<compile_context>
chip_gen: v7x
topology: tpu7x:2x2x1
jax: 0.10.0
libtpu: 0.0.40
codegen_flags: <defaults>
</compile_context>

<pallas_src>
import jax
import jax.numpy as jnp
from jax.experimental import pallas as pl
from jax.experimental.pallas import tpu as pltpu

DIM_FEAT = 64      # encoder output / sm embedding width
DIM_COND = 128     # concat([encode, atac]) width
DIM_HIDDEN = 1024  # ConditionalNet hidden width
N_BLOCKS = 4
ENC_HIDDEN = 512


def _detect_vmem_limit():
    # 96 MiB scoped limit on 128-MiB parts (v5e/v6e); 48 MiB on 64-MiB parts (v7x).
    try:
        cap = pltpu.get_tpu_info().vmem_capacity_bytes
    except Exception:
        cap = 64 * 1024 * 1024
    if cap >= 128 * 1024 * 1024:
        return 96 * 1024 * 1024
    return 48 * 1024 * 1024


VMEM_LIMIT = _detect_vmem_limit()

# Tile-size candidates derived from the VMEM budget (weight tiles are double-buffered).
if VMEM_LIMIT >= 96 * 1024 * 1024:
    GENE_K_CANDS = (8192, 4096, 2048, 1024, 512, 256, 128)   # K1 contraction tile
    HEAD_N_CANDS = (8192, 4096, 2048, 1024, 512, 256, 128)   # K3 output tile
else:  # v7x: 64 MiB physical per TensorCore — keep 2x-buffered tiles small
    GENE_K_CANDS = (4096, 2048, 1024, 512, 256, 128)
    HEAD_N_CANDS = (4096, 2048, 1024, 512, 256, 128)
ATAC_K_CANDS = (2048, 1024, 512, 256, 128)


def _round_up(x, m):
    return ((x + m - 1) // m) * m


def _pick_tile(dim, candidates):
    # Largest candidate that evenly divides `dim`. Dims are asserted to be multiples
    # of 128 by callers, so the fallback (full dim) never produces an oversized block
    # for the shapes used here.
    for c in candidates:
        if dim % c == 0:
            return c
    return dim


# ---------------------------------------------------------------------------
# Kernel 1: fused dual encoder + ConditionalNet block 0
#   encoder : x       -> Linear(gene_num,512) -> BN(eval) -> ReLU -> Linear(512,64)
#   atac_enc: atac_in -> Linear(atac_dim,512) -> BN(eval) -> ReLU -> Linear(512,64)
#   cond    = concat([encode, atac], axis=1)                     [B, 128] lane-dense
#   h1      = ReLU((sm @ W0 + b0) * (1 + ReLU(cond) @ Wc0 + bc0)) [B, 1024]
# Grid: gene_num contraction tiles ("arbitrary"); the atac contraction is tiled over
# the same axis (its tile count n_a <= n_k); both accumulators live in VMEM scratch.
# The two 512->64 second-layer weights are zero-padded into disjoint 128-wide halves
# so the concat is a sum of two lane-dense matmuls (bit-exact).
# ---------------------------------------------------------------------------
def fused_encoders(x, atac_in, sm, enc_p, atac_p, b2_cat, blk0_p):
    B, gene_num = x.shape
    atac_dim = atac_in.shape[1]
    assert gene_num % 128 == 0, "pad gene_num to a multiple of 128 in the wrapper"
    assert atac_dim % 128 == 0, "pad atac_dim to a multiple of 128 in the wrapper"
    w1e, b1e, se, she, w2e = enc_p
    w1a, b1a, sa, sha, w2a = atac_p
    w0, b0, wc0, bc0 = blk0_p

    tk = _pick_tile(gene_num, GENE_K_CANDS)
    ta = _pick_tile(atac_dim, ATAC_K_CANDS)
    n_k = gene_num // tk
    n_a = atac_dim // ta
    # TODO(synk): generalize to n_a > n_k (only possible if atac_dim > gene_num).
    assert n_a <= n_k, "atac_dim contraction has more tiles than gene_num"

    def _enc_kernel(x_ref, w1e_ref, b1e_ref, se_ref, she_ref, w2e_ref,
                    atac_ref, w1a_ref, b1a_ref, sa_ref, sha_ref, w2a_ref,
                    b2_ref, sm_ref, w0_ref, b0_ref, wc0_ref, bc0_ref,
                    cond_ref, h1_ref, acc_e, acc_a):
        k = pl.program_id(0)

        @pl.when(k == 0)
        def _():
            acc_e[...] = jnp.zeros_like(acc_e)
            acc_a[...] = jnp.zeros_like(acc_a)

        # Streamed K-tile of the big gene_num matmul (bf16 MXU, f32 accumulate).
        acc_e[...] += jnp.dot(x_ref[...].astype(jnp.bfloat16), w1e_ref[...],
                              preferred_element_type=jnp.float32)

        # atac contraction shares the grid axis; only its first n_a steps contribute.
        @pl.when(k < n_a)
        def _():
            acc_a[...] += jnp.dot(atac_ref[...].astype(jnp.bfloat16), w1a_ref[...],
                                  preferred_element_type=jnp.float32)

        @pl.when(k == n_k - 1)
        def _():
            # Epilogue: bias -> folded BatchNorm affine -> ReLU for both encoders.
            he = jnp.maximum((acc_e[...] + b1e_ref[...]) * se_ref[...] + she_ref[...], 0.0)
            ha = jnp.maximum((acc_a[...] + b1a_ref[...]) * sa_ref[...] + sha_ref[...], 0.0)
            # w2e/w2a are zero-padded to disjoint halves of 128 output columns, so
            # the sum below is exactly concat([he@W2e+b2e, ha@W2a+b2a], axis=1).
            cond = (jnp.dot(he.astype(jnp.bfloat16), w2e_ref[...],
                            preferred_element_type=jnp.float32)
                    + jnp.dot(ha.astype(jnp.bfloat16), w2a_ref[...],
                              preferred_element_type=jnp.float32)
                    + b2_ref[...])
            cond_ref[...] = cond
            # ConditionalMLP block 0 (real [64,1024] weight; no padded streaming):
            #   h1 = ReLU((sm @ W0 + b0) * (1 + ReLU(cond) @ Wc0 + bc0))
            crelu = jnp.maximum(cond, 0.0)
            c0 = jnp.dot(crelu.astype(jnp.bfloat16), wc0_ref[...],
                         preferred_element_type=jnp.float32) + bc0_ref[...]
            h0 = jnp.dot(sm_ref[...].astype(jnp.bfloat16), w0_ref[...],
                         preferred_element_type=jnp.float32) + b0_ref[...]
            h1_ref[...] = jnp.maximum(h0 * (1.0 + c0), 0.0)

    c0map = lambda k: (0, 0)
    amap = lambda k: (0, jnp.minimum(k, n_a - 1))
    wamap = lambda k: (jnp.minimum(k, n_a - 1), 0)

    return pl.pallas_call(
        _enc_kernel,
        out_shape=(jax.ShapeDtypeStruct((B, DIM_COND), jnp.float32),
                   jax.ShapeDtypeStruct((B, DIM_HIDDEN), jnp.float32)),
        grid_spec=pltpu.PrefetchScalarGridSpec(
            num_scalar_prefetch=0,
            grid=(n_k,),
            in_specs=[
                pl.BlockSpec((B, tk), lambda k: (0, k)),            # x tile
                pl.BlockSpec((tk, ENC_HIDDEN), lambda k: (k, 0)),   # W1 (encoder) tile
                pl.BlockSpec((1, ENC_HIDDEN), c0map),               # b1
                pl.BlockSpec((1, ENC_HIDDEN), c0map),               # bn scale
                pl.BlockSpec((1, ENC_HIDDEN), c0map),               # bn shift
                pl.BlockSpec((ENC_HIDDEN, DIM_COND), c0map),        # W2 (padded to 128)
                pl.BlockSpec((B, ta), amap),                        # atac_in tile
                pl.BlockSpec((ta, ENC_HIDDEN), wamap),              # W1 (atac) tile
                pl.BlockSpec((1, ENC_HIDDEN), c0map),               # b1 (atac)
                pl.BlockSpec((1, ENC_HIDDEN), c0map),               # bn scale (atac)
                pl.BlockSpec((1, ENC_HIDDEN), c0map),               # bn shift (atac)
                pl.BlockSpec((ENC_HIDDEN, DIM_COND), c0map),        # W2 (atac, padded)
                pl.BlockSpec((1, DIM_COND), c0map),                 # b2 (concat)
                pl.BlockSpec((B, DIM_FEAT), c0map),                 # sm embedding
                pl.BlockSpec((DIM_FEAT, DIM_HIDDEN), c0map),        # block-0 W
                pl.BlockSpec((1, DIM_HIDDEN), c0map),               # block-0 b
                pl.BlockSpec((DIM_COND, DIM_HIDDEN), c0map),        # block-0 Wc
                pl.BlockSpec((1, DIM_HIDDEN), c0map),               # block-0 bc
            ],
            out_specs=[pl.BlockSpec((B, DIM_COND), c0map),
                       pl.BlockSpec((B, DIM_HIDDEN), c0map)],
            scratch_shapes=[pltpu.VMEM((B, ENC_HIDDEN), jnp.float32),
                            pltpu.VMEM((B, ENC_HIDDEN), jnp.float32)],
        ),
        compiler_params=pltpu.CompilerParams(
            dimension_semantics=("arbitrary",),
            vmem_limit_bytes=VMEM_LIMIT),
    )(x, w1e, b1e, se, she, w2e, atac_in, w1a, b1a, sa, sha, w2a,
      b2_cat, sm, w0, b0, wc0, bc0)


# ---------------------------------------------------------------------------
# Kernel 2: fused ConditionalNet blocks 1..3 (eval mode)
#   per block:  h = ReLU((h @ W_k + b_k) * (1 + ReLU(cond) @ Wc_k + bc_k))
# Grid: block index ("arbitrary"); h resident in VMEM scratch across steps; stacked
# per-block weights are streamed (default double-buffering); ReLU(cond) hoisted.
# ---------------------------------------------------------------------------
def _blocks_kernel(h1_ref, cond_ref, w_ref, b_ref, wc_ref, bc_ref,
                   h_out_ref, h_scr, crelu_scr):
    k = pl.program_id(0)

    @pl.when(k == 0)
    def _():
        h_scr[...] = h1_ref[...]                       # output of block 0 (from K1)
        crelu_scr[...] = jnp.maximum(cond_ref[...], 0.0)

    # cond_layers = Sequential(ReLU, Linear(dim_cond, dim_hidden))
    c = jnp.dot(crelu_scr[...].astype(jnp.bfloat16), wc_ref[0],
                preferred_element_type=jnp.float32) + bc_ref[0]
    # Linear (F.dropout(p=0.5) is identity in eval mode)
    h = jnp.dot(h_scr[...].astype(jnp.bfloat16), w_ref[0],
                preferred_element_type=jnp.float32) + b_ref[0]
    # x * (cond_bias + cond), cond_bias = 1.0, then ReLU
    h_scr[...] = jnp.maximum(h * (1.0 + c), 0.0)

    @pl.when(k == pl.num_programs(0) - 1)
    def _():
        h_out_ref[...] = h_scr[...]


def fused_blocks(h1, cond, w_stk, b_stk, wc_stk, bc_stk):
    B = h1.shape[0]
    nb = w_stk.shape[0]          # N_BLOCKS - 1
    c0 = lambda k: (0, 0)
    return pl.pallas_call(
        _blocks_kernel,
        out_shape=jax.ShapeDtypeStruct((B, DIM_HIDDEN), jnp.float32),
        grid_spec=pltpu.PrefetchScalarGridSpec(
            num_scalar_prefetch=0,
            grid=(nb,),
            in_specs=[
                pl.BlockSpec((B, DIM_HIDDEN), c0),                                # h1
                pl.BlockSpec((B, DIM_COND), c0),                                  # cond
                pl.BlockSpec((1, DIM_HIDDEN, DIM_HIDDEN), lambda k: (k, 0, 0)),   # W_k
                pl.BlockSpec((1, 1, DIM_HIDDEN), lambda k: (k, 0, 0)),            # b_k
                pl.BlockSpec((1, DIM_COND, DIM_HIDDEN), lambda k: (k, 0, 0)),     # Wc_k
                pl.BlockSpec((1, 1, DIM_HIDDEN), lambda k: (k, 0, 0)),            # bc_k
            ],
            out_specs=pl.BlockSpec((B, DIM_HIDDEN), c0),
            scratch_shapes=[pltpu.VMEM((B, DIM_HIDDEN), jnp.float32),
                            pltpu.VMEM((B, DIM_COND), jnp.float32)],
        ),
        compiler_params=pltpu.CompilerParams(
            dimension_semantics=("arbitrary",),
            vmem_limit_bytes=VMEM_LIMIT),
    )(h1, cond, w_stk, b_stk, wc_stk, bc_stk)


# ---------------------------------------------------------------------------
# Kernel 3: decoder head Linear(1024 -> gene_num), tiled over gene_num ("parallel",
# so it shards across the two TensorCores on v7x). Lane-dense output stores.
# ---------------------------------------------------------------------------
def _head_kernel(h_ref, w_ref, b_ref, o_ref):
    o_ref[...] = (jnp.dot(h_ref[...].astype(jnp.bfloat16), w_ref[...],
                          preferred_element_type=jnp.float32) + b_ref[...])


def dec_head(h, w, b):
    B = h.shape[0]
    gene_num = w.shape[1]
    assert gene_num % 128 == 0, "pad gene_num to a multiple of 128 in the wrapper"
    tn = _pick_tile(gene_num, HEAD_N_CANDS)
    return pl.pallas_call(
        _head_kernel,
        out_shape=jax.ShapeDtypeStruct((B, gene_num), jnp.float32),
        grid_spec=pltpu.PrefetchScalarGridSpec(
            num_scalar_prefetch=0,
            grid=(gene_num // tn,),
            in_specs=[
                pl.BlockSpec((B, DIM_HIDDEN), lambda j: (0, 0)),
                pl.BlockSpec((DIM_HIDDEN, tn), lambda j: (0, j)),
                pl.BlockSpec((1, tn), lambda j: (0, j)),
            ],
            out_specs=pl.BlockSpec((B, tn), lambda j: (0, j)),
        ),
        compiler_params=pltpu.CompilerParams(
            dimension_semantics=("parallel",),
            vmem_limit_bytes=VMEM_LIMIT),
    )(h, w, b)


# ---------------------------------------------------------------------------
# Parameter initialization (deterministic, synthetic), laid out for the kernels:
# weights bf16, biases / BN affines f32, block-1..3 weights stacked, block-0 params
# kept separate (consumed in K1's epilogue), encoder second-layer weights zero-padded
# to disjoint halves of a 128-wide output.
# ---------------------------------------------------------------------------
def init_params(key, gene_num, atac_dim, n_types,
                dim_feat=DIM_FEAT, dim_hidden=DIM_HIDDEN, n_blocks=N_BLOCKS):
    assert n_blocks >= 2
    state = {"key": key}

    def nxt():
        state["key"], sub = jax.random.split(state["key"])
        return sub

    def dense(din, dout, scale=0.02):
        w = (scale * jax.random.normal(nxt(), (din, dout), jnp.float32)
             ).astype(jnp.bfloat16)
        b = 0.01 * jax.random.normal(nxt(), (1, dout), jnp.float32)
        return w, b

    def bn_affine(d):
        gamma = 1.0 + 0.1 * jax.random.normal(nxt(), (1, d), jnp.float32)
        beta = 0.01 * jax.random.normal(nxt(), (1, d), jnp.float32)
        mean = 0.1 * jax.random.normal(nxt(), (1, d), jnp.float32)
        var = 1.0 + 0.1 * jax.random.uniform(nxt(), (1, d), jnp.float32)
        scale = gamma / jnp.sqrt(var + 1e-5)
        shift = beta - mean * scale
        return scale, shift

    def two_layer_enc(din, half):
        w1, b1 = dense(din, ENC_HIDDEN)
        s, sh = bn_affine(ENC_HIDDEN)
        w2, b2 = dense(ENC_HIDDEN, dim_feat)              # [512, 64]
        zero = jnp.zeros((ENC_HIDDEN, dim_feat), jnp.bfloat16)
        # Pad 512x64 head into 512x128 with the other half zero, so the fused
        # encoder kernel emits the concat as a sum of lane-dense matmuls.
        w2p = (jnp.concatenate([w2, zero], axis=1) if half == "left"
               else jnp.concatenate([zero, w2], axis=1))
        return (w1, b1, s, sh, w2p), b2

    enc_p, b2e = two_layer_enc(gene_num, "left")
    atac_p, b2a = two_layer_enc(atac_dim, "right")

    params = {
        # sm_feature is None -> nn.Embedding(gene_num, 64) lookup table
        "sm_emb": 0.1 * jax.random.normal(nxt(), (gene_num, dim_feat), jnp.float32),
        # fixed type_atac feature table (constructor argument)
        "type_atac": jax.random.normal(nxt(), (n_types, atac_dim), jnp.float32),
        "encoder": enc_p,
        "atac_enc": atac_p,
        "enc_b2": jnp.concatenate([b2e, b2a], axis=1),     # [1, 128]
    }

    # ConditionalNet block 0: real [64,1024] weight, consumed in K1's epilogue.
    w0, b0 = dense(dim_feat, dim_hidden)
    wc0, bc0 = dense(DIM_COND, dim_hidden)
    params["block0"] = (w0, b0, wc0, bc0)

    # ConditionalNet blocks 1..3 (skip_layers=()), stacked for weight streaming.
    w_list, b_list, wc_list, bc_list = [], [], [], []
    for _ in range(1, n_blocks):
        w, b = dense(dim_hidden, dim_hidden)
        wc, bc = dense(DIM_COND, dim_hidden)
        w_list.append(w); b_list.append(b); wc_list.append(wc); bc_list.append(bc)
    params["blocks_w"] = jnp.stack(w_list)      # [3, 1024, 1024] bf16
    params["blocks_b"] = jnp.stack(b_list)      # [3, 1, 1024]    f32
    params["blocks_wc"] = jnp.stack(wc_list)    # [3, 128, 1024]  bf16
    params["blocks_bc"] = jnp.stack(bc_list)    # [3, 1, 1024]    f32

    params["dec_head"] = dense(dim_hidden, gene_num)       # [1024, gene_num] bf16
    return params, state["key"]


# ---------------------------------------------------------------------------
# Net.forward (eval mode)
# ---------------------------------------------------------------------------
def net_forward(params, x, type_idx, sm_name):
    # Pad batch to a multiple of 16 (bf16 sublane packing); weight stream is
    # identical, so the extra rows are free; output is sliced back.
    B0 = x.shape[0]
    B = _round_up(max(B0, 16), 16)
    if B != B0:
        x = jnp.pad(x, ((0, B - B0), (0, 0)))
        type_idx = jnp.concatenate(
            [type_idx, jnp.zeros((B - B0,), type_idx.dtype)])
        sm_name = jnp.concatenate(
            [sm_name, jnp.zeros((B - B0,), sm_name.dtype)])

    # Embedding / table gathers are glue (plain JAX).
    sm = params["sm_emb"][sm_name]               # [B, 64]
    atac_in = params["type_atac"][type_idx]      # [B, atac_dim]

    # K1: cond = concat([encoder(x), atac_enc(...)]) and h1 = block0(sm, cond)
    cond, h1 = fused_encoders(x, atac_in, sm, params["encoder"],
                              params["atac_enc"], params["enc_b2"],
                              params["block0"])

    # K2: ConditionalMLP blocks 1..3 -> [B, 1024]
    h = fused_blocks(h1, cond, params["blocks_w"], params["blocks_b"],
                     params["blocks_wc"], params["blocks_bc"])

    # K3: decoder head -> [B, gene_num]
    w_out, b_out = params["dec_head"]
    pred = dec_head(h, w_out, b_out)
    return pred[:B0]


if __name__ == "__main__":
    GENE_NUM = 256     # small stand-in for the real gene count (multiple of 128)
    ATAC_DIM = 128     # type_atac feature dimension (multiple of 128)
    N_TYPES = 4
    BATCH = 8

    key = jax.random.PRNGKey(0)
    params, key = init_params(key, GENE_NUM, ATAC_DIM, N_TYPES)

    kx, kt, ks = jax.random.split(key, 3)
    x = jax.random.normal(kx, (BATCH, GENE_NUM), jnp.float32)
    type_idx = jax.random.randint(kt, (BATCH,), 0, N_TYPES)
    sm_name = jax.random.randint(ks, (BATCH,), 0, GENE_NUM)

    pred = jax.jit(net_forward)(params, x, type_idx, sm_name)
    pred = jax.block_until_ready(pred)
    assert pred.shape == (BATCH, GENE_NUM) and pred.dtype == jnp.float32
    print("KERNEL_OK")
</pallas_src>

<mosaic_0001>
module attributes {stable_mosaic.version = 11 : i64} {
  func.func @_enc_kernel(%arg0: i32, %arg1: memref<16x256xf32, #tpu.memory_space<vmem>>, %arg2: memref<256x512xbf16, #tpu.memory_space<vmem>>, %arg3: memref<1x512xf32, #tpu.memory_space<vmem>>, %arg4: memref<1x512xf32, #tpu.memory_space<vmem>>, %arg5: memref<1x512xf32, #tpu.memory_space<vmem>>, %arg6: memref<512x128xbf16, #tpu.memory_space<vmem>>, %arg7: memref<16x128xf32, #tpu.memory_space<vmem>>, %arg8: memref<128x512xbf16, #tpu.memory_space<vmem>>, %arg9: memref<1x512xf32, #tpu.memory_space<vmem>>, %arg10: memref<1x512xf32, #tpu.memory_space<vmem>>, %arg11: memref<1x512xf32, #tpu.memory_space<vmem>>, %arg12: memref<512x128xbf16, #tpu.memory_space<vmem>>, %arg13: memref<1x128xf32, #tpu.memory_space<vmem>>, %arg14: memref<16x64xf32, #tpu.memory_space<vmem>>, %arg15: memref<64x1024xbf16, #tpu.memory_space<vmem>>, %arg16: memref<1x1024xf32, #tpu.memory_space<vmem>>, %arg17: memref<128x1024xbf16, #tpu.memory_space<vmem>>, %arg18: memref<1x1024xf32, #tpu.memory_space<vmem>>, %arg19: memref<16x128xf32, #tpu.memory_space<vmem>>, %arg20: memref<16x1024xf32, #tpu.memory_space<vmem>>, %arg21: memref<16x512xf32, #tpu.memory_space<vmem>>, %arg22: memref<16x512xf32, #tpu.memory_space<vmem>>) attributes {dimension_semantics = [#tpu.dimension_semantics<arbitrary>], iteration_bounds = array<i64: 1>, scalar_prefetch = 0 : i64, scratch_operands = 2 : i64, tpu.core_type = #tpu.core_type<tc>, window_params = [{transform_indices = @transform_0, window_bounds = array<i64: 16, 256>}, {transform_indices = @transform_1, window_bounds = array<i64: 256, 512>}, {pipeline_mode = #tpu.pipeline_mode<synchronous>, transform_indices = @transform_2, window_bounds = array<i64: 1, 512>}, {pipeline_mode = #tpu.pipeline_mode<synchronous>, transform_indices = @transform_3, window_bounds = array<i64: 1, 512>}, {pipeline_mode = #tpu.pipeline_mode<synchronous>, transform_indices = @transform_4, window_bounds = array<i64: 1, 512>}, {pipeline_mode = #tpu.pipeline_mode<synchronous>, transform_indices = @transform_5, window_bounds = array<i64: 512, 128>}, {transform_indices = @transform_6, window_bounds = array<i64: 16, 128>}, {transform_indices = @transform_7, window_bounds = array<i64: 128, 512>}, {pipeline_mode = #tpu.pipeline_mode<synchronous>, transform_indices = @transform_8, window_bounds = array<i64: 1, 512>}, {pipeline_mode = #tpu.pipeline_mode<synchronous>, transform_indices = @transform_9, window_bounds = array<i64: 1, 512>}, {pipeline_mode = #tpu.pipeline_mode<synchronous>, transform_indices = @transform_10, window_bounds = array<i64: 1, 512>}, {pipeline_mode = #tpu.pipeline_mode<synchronous>, transform_indices = @transform_11, window_bounds = array<i64: 512, 128>}, {pipeline_mode = #tpu.pipeline_mode<synchronous>, transform_indices = @transform_12, window_bounds = array<i64: 1, 128>}, {pipeline_mode = #tpu.pipeline_mode<synchronous>, transform_indices = @transform_13, window_bounds = array<i64: 16, 64>}, {pipeline_mode = #tpu.pipeline_mode<synchronous>, transform_indices = @transform_14, window_bounds = array<i64: 64, 1024>}, {pipeline_mode = #tpu.pipeline_mode<synchronous>, transform_indices = @transform_15, window_bounds = array<i64: 1, 1024>}, {pipeline_mode = #tpu.pipeline_mode<synchronous>, transform_indices = @transform_16, window_bounds = array<i64: 128, 1024>}, {pipeline_mode = #tpu.pipeline_mode<synchronous>, transform_indices = @transform_17, window_bounds = array<i64: 1, 1024>}, {pipeline_mode = #tpu.pipeline_mode<synchronous>, transform_indices = @transform_18, window_bounds = array<i64: 16, 128>}, {pipeline_mode = #tpu.pipeline_mode<synchronous>, transform_indices = @transform_19, window_bounds = array<i64: 16, 1024>}]} {
    %c0_i32 = arith.constant 0 : i32
    %0 = arith.cmpi eq, %arg0, %c0_i32 : i32
    %1 = arith.extui %0 : i1 to i32
    %c0_i32_0 = arith.constant 0 : i32
    %2 = arith.cmpi ne, %1, %c0_i32_0 : i32
    scf.if %2 {
      %cst_11 = arith.constant 0.000000e+00 : f32
      %16 = vector.broadcast %cst_11 : f32 to vector<16x512xf32>
      %c0_12 = arith.constant 0 : index
      %c0_13 = arith.constant 0 : index
      %17 = vector.load %arg21[%c0_12, %c0_13] : memref<16x512xf32, #tpu.memory_space<vmem>>, vector<16x512xf32>
      tpu.vector_store %arg21[%c0_12, %c0_13], %16 {strides = array<i32>} : memref<16x512xf32, #tpu.memory_space<vmem>>, vector<16x512xf32>,
      %cst_14 = arith.constant 0.000000e+00 : f32
      %18 = vector.broadcast %cst_14 : f32 to vector<16x512xf32>
      %c0_15 = arith.constant 0 : index
      %c0_16 = arith.constant 0 : index
      %19 = vector.load %arg22[%c0_15, %c0_16] : memref<16x512xf32, #tpu.memory_space<vmem>>, vector<16x512xf32>
      tpu.vector_store %arg22[%c0_15, %c0_16], %18 {strides = array<i32>} : memref<16x512xf32, #tpu.memory_space<vmem>>, vector<16x512xf32>,
    } else {
    }
    %c0 = arith.constant 0 : index
    %c0_1 = arith.constant 0 : index
    %3 = vector.load %arg21[%c0, %c0_1] : memref<16x512xf32, #tpu.memory_space<vmem>>, vector<16x512xf32>
    %c0_2 = arith.constant 0 : index
    %c0_3 = arith.constant 0 : index
    %4 = vector.load %arg1[%c0_2, %c0_3] : memref<16x256xf32, #tpu.memory_space<vmem>>, vector<16x256xf32>
    %5 = arith.truncf %4 : vector<16x256xf32> to vector<16x256xbf16>
    %c0_4 = arith.constant 0 : index
    %c0_5 = arith.constant 0 : index
    %6 = vector.load %arg2[%c0_4, %c0_5] : memref<256x512xbf16, #tpu.memory_space<vmem>>, vector<256x512xbf16>
    %cst = arith.constant dense<0.000000e+00> : vector<16x512xf32>
    %7 = tpu.matmul %5, %6, %cst {dimension_numbers = #tpu.dot_dimension_numbers<[1], [0], [0], [1], [0, 0, 1, 1], [], []>} : vector<16x256xbf16>, vector<256x512xbf16>, vector<16x512xf32> -> vector<16x512xf32>
    %8 = arith.addf %3, %7 : vector<16x512xf32>
    %c0_6 = arith.constant 0 : index
    %c0_7 = arith.constant 0 : index
    %9 = vector.load %arg21[%c0_6, %c0_7] : memref<16x512xf32, #tpu.memory_space<vmem>>, vector<16x512xf32>
    tpu.vector_store %arg21[%c0_6, %c0_7], %8 {strides = array<i32>} : memref<16x512xf32, #tpu.memory_space<vmem>>, vector<16x512xf32>,
    %c1_i32 = arith.constant 1 : i32
    %10 = arith.cmpi slt, %arg0, %c1_i32 : i32
    %11 = arith.extui %10 : i1 to i32
    %c0_i32_8 = arith.constant 0 : i32
    %12 = arith.cmpi ne, %11, %c0_i32_8 : i32
    scf.if %12 {
      %c0_11 = arith.constant 0 : index
      %c0_12 = arith.constant 0 : index
      %16 = vector.load %arg22[%c0_11, %c0_12] : memref<16x512xf32, #tpu.memory_space<vmem>>, vector<16x512xf32>
      %c0_13 = arith.constant 0 : index
      %c0_14 = arith.constant 0 : index
      %17 = vector.load %arg7[%c0_13, %c0_14] : memref<16x128xf32, #tpu.memory_space<vmem>>, vector<16x128xf32>
      %18 = arith.truncf %17 : vector<16x128xf32> to vector<16x128xbf16>
      %c0_15 = arith.constant 0 : index
      %c0_16 = arith.constant 0 : index
      %19 = vector.load %arg8[%c0_15, %c0_16] : memref<128x512xbf16, #tpu.memory_space<vmem>>, vector<128x512xbf16>
      %cst_17 = arith.constant dense<0.000000e+00> : vector<16x512xf32>
      %20 = tpu.matmul %18, %19, %cst_17 {dimension_numbers = #tpu.dot_dimension_numbers<[1], [0], [0], [1], [0, 0, 1, 1], [], []>} : vector<16x128xbf16>, vector<128x512xbf16>, vector<16x512xf32> -> vector<16x512xf32>
      %21 = arith.addf %16, %20 : vector<16x512xf32>
      %c0_18 = arith.constant 0 : index
      %c0_19 = arith.constant 0 : index
      %22 = vector.load %arg22[%c0_18, %c0_19] : memref<16x512xf32, #tpu.memory_space<vmem>>, vector<16x512xf32>
      tpu.vector_store %arg22[%c0_18, %c0_19], %21 {strides = array<i32>} : memref<16x512xf32, #tpu.memory_space<vmem>>, vector<16x512xf32>,
    } else {
    }
    %c0_i32_9 = arith.constant 0 : i32
    %13 = arith.cmpi eq, %arg0, %c0_i32_9 : i32
    %14 = arith.extui %13 : i1 to i32
    %c0_i32_10 = arith.constant 0 : i32
    %15 = arith.cmpi ne, %14, %c0_i32_10 : i32
    scf.if %15 {
      %c0_11 = arith.constant 0 : index
      %c0_12 = arith.constant 0 : index
      %16 = vector.load %arg21[%c0_11, %c0_12] : memref<16x512xf32, #tpu.memory_space<vmem>>, vector<16x512xf32>
      %c0_13 = arith.constant 0 : index
      %c0_14 = arith.constant 0 : index
      %17 = vector.load %arg3[%c0_13, %c0_14] : memref<1x512xf32, #tpu.memory_space<vmem>>, vector<1x512xf32>
      %18 = vector.broadcast %17 : vector<1x512xf32> to vector<16x512xf32>
      %19 = arith.addf %16, %18 : vector<16x512xf32>
      %c0_15 = arith.constant 0 : index
      %c0_16 = arith.constant 0 : index
      %20 = vector.load %arg4[%c0_15, %c0_16] : memref<1x512xf32, #tpu.memory_space<vmem>>, vector<1x512xf32>
      %21 = vector.broadcast %20 : vector<1x512xf32> to vector<16x512xf32>
      %22 = arith.mulf %19, %21 : vector<16x512xf32>
      %c0_17 = arith.constant 0 : index
      %c0_18 = arith.constant 0 : index
      %23 = vector.load %arg5[%c0_17, %c0_18] : memref<1x512xf32, #tpu.memory_space<vmem>>, vector<1x512xf32>
      %24 = vector.broadcast %23 : vector<1x512xf32> to vector<16x512xf32>
      %25 = arith.addf %22, %24 : vector<16x512xf32>
      %cst_19 = arith.constant 0.000000e+00 : f32
      %26 = vector.broadcast %cst_19 : f32 to vector<16x512xf32>
      %27 = arith.maximumf %25, %26 : vector<16x512xf32>
      %c0_20 = arith.constant 0 : index
      %c0_21 = arith.constant 0 : index
      %28 = vector.load %arg22[%c0_20, %c0_21] : memref<16x512xf32, #tpu.memory_space<vmem>>, vector<16x512xf32>
      %c0_22 = arith.constant 0 : index
      %c0_23 = arith.constant 0 : index
      %29 = vector.load %arg9[%c0_22, %c0_23] : memref<1x512xf32, #tpu.memory_space<vmem>>, vector<1x512xf32>
      %30 = vector.broadcast %29 : vector<1x512xf32> to vector<16x512xf32>
      %31 = arith.addf %28, %30 : vector<16x512xf32>
      %c0_24 = arith.constant 0 : index
      %c0_25 = arith.constant 0 : index
      %32 = vector.load %arg10[%c0_24, %c0_25] : memref<1x512xf32, #tpu.memory_space<vmem>>, vector<1x512xf32>
      %33 = vector.broadcast %32 : vector<1x512xf32> to vector<16x512xf32>
      %34 = arith.mulf %31, %33 : vector<16x512xf32>
      %c0_26 = arith.constant 0 : index
      %c0_27 = arith.constant 0 : index
      %35 = vector.load %arg11[%c0_26, %c0_27] : memref<1x512xf32, #tpu.memory_space<vmem>>, vector<1x512xf32>
      %36 = vector.broadcast %35 : vector<1x512xf32> to vector<16x512xf32>
      %37 = arith.addf %34, %36 : vector<16x512xf32>
      %cst_28 = arith.constant 0.000000e+00 : f32
      %38 = vector.broadcast %cst_28 : f32 to vector<16x512xf32>
      %39 = arith.maximumf %37, %38 : vector<16x512xf32>
      %40 = arith.truncf %27 : vector<16x512xf32> to vector<16x512xbf16>
      %c0_29 = arith.constant 0 : index
      %c0_30 = arith.constant 0 : index
      %41 = vector.load %arg6[%c0_29, %c0_30] : memref<512x128xbf16, #tpu.memory_space<vmem>>, vector<512x128xbf16>
      %cst_31 = arith.constant dense<0.000000e+00> : vector<16x128xf32>
      %42 = tpu.matmul %40, %41, %cst_31 {dimension_numbers = #tpu.dot_dimension_numbers<[1], [0], [0], [1], [0, 0, 1, 1], [], []>} : vector<16x512xbf16>, vector<512x128xbf16>, vector<16x128xf32> -> vector<16x128xf32>
      %43 = arith.truncf %39 : vector<16x512xf32> to vector<16x512xbf16>
      %c0_32 = arith.constant 0 : index
      %c0_33 = arith.constant 0 : index
      %44 = vector.load %arg12[%c0_32, %c0_33] : memref<512x128xbf16, #tpu.memory_space<vmem>>, vector<512x128xbf16>
      %cst_34 = arith.constant dense<0.000000e+00> : vector<16x128xf32>
      %45 = tpu.matmul %43, %44, %cst_34 {dimension_numbers = #tpu.dot_dimension_numbers<[1], [0], [0], [1], [0, 0, 1, 1], [], []>} : vector<16x512xbf16>, vector<512x128xbf16>, vector<16x128xf32> -> vector<16x128xf32>
      %46 = arith.addf %42, %45 : vector<16x128xf32>
      %c0_35 = arith.constant 0 : index
      %c0_36 = arith.constant 0 : index
      %47 = vector.load %arg13[%c0_35, %c0_36] : memref<1x128xf32, #tpu.memory_space<vmem>>, vector<1x128xf32>
      %48 = vector.broadcast %47 : vector<1x128xf32> to vector<16x128xf32>
      %49 = arith.addf %46, %48 : vector<16x128xf32>
      %c0_37 = arith.constant 0 : index
      %c0_38 = arith.constant 0 : index
      %50 = vector.load %arg19[%c0_37, %c0_38] : memref<16x128xf32, #tpu.memory_space<vmem>>, vector<16x128xf32>
      tpu.vector_store %arg19[%c0_37, %c0_38], %49 {strides = array<i32>} : memref<16x128xf32, #tpu.memory_space<vmem>>, vector<16x128xf32>,
      %cst_39 = arith.constant 0.000000e+00 : f32
      %51 = vector.broadcast %cst_39 : f32 to vector<16x128xf32>
      %52 = arith.maximumf %49, %51 : vector<16x128xf32>
      %53 = arith.truncf %52 : vector<16x128xf32> to vector<16x128xbf16>
      %c0_40 = arith.constant 0 : index
      %c0_41 = arith.constant 0 : index
      %54 = vector.load %arg17[%c0_40, %c0_41] : memref<128x1024xbf16, #tpu.memory_space<vmem>>, vector<128x1024xbf16>
      %cst_42 = arith.constant dense<0.000000e+00> : vector<16x1024xf32>
      %55 = tpu.matmul %53, %54, %cst_42 {dimension_numbers = #tpu.dot_dimension_numbers<[1], [0], [0], [1], [0, 0, 1, 1], [], []>} : vector<16x128xbf16>, vector<128x1024xbf16>, vector<16x1024xf32> -> vector<16x1024xf32>
      %c0_43 = arith.constant 0 : index
      %c0_44 = arith.constant 0 : index
      %56 = vector.load %arg18[%c0_43, %c0_44] : memref<1x1024xf32, #tpu.memory_space<vmem>>, vector<1x1024xf32>
      %57 = vector.broadcast %56 : vector<1x1024xf32> to vector<16x1024xf32>
      %58 = arith.addf %55, %57 : vector<16x1024xf32>
      %c0_45 = arith.constant 0 : index
      %c0_46 = arith.constant 0 : index
      %59 = vector.load %arg14[%c0_45, %c0_46] : memref<16x64xf32, #tpu.memory_space<vmem>>, vector<16x64xf32>
      %60 = arith.truncf %59 : vector<16x64xf32> to vector<16x64xbf16>
      %c0_47 = arith.constant 0 : index
      %c0_48 = arith.constant 0 : index
      %61 = vector.load %arg15[%c0_47, %c0_48] : memref<64x1024xbf16, #tpu.memory_space<vmem>>, vector<64x1024xbf16>
      %cst_49 = arith.constant dense<0.000000e+00> : vector<16x1024xf32>
      %62 = tpu.matmul %60, %61, %cst_49 {dimension_numbers = #tpu.dot_dimension_numbers<[1], [0], [0], [1], [0, 0, 1, 1], [], []>} : vector<16x64xbf16>, vector<64x1024xbf16>, vector<16x1024xf32> -> vector<16x1024xf32>
      %c0_50 = arith.constant 0 : index
      %c0_51 = arith.constant 0 : index
      %63 = vector.load %arg16[%c0_50, %c0_51] : memref<1x1024xf32, #tpu.memory_space<vmem>>, vector<1x1024xf32>
      %64 = vector.broadcast %63 : vector<1x1024xf32> to vector<16x1024xf32>
      %65 = arith.addf %62, %64 : vector<16x1024xf32>
      %cst_52 = arith.constant 1.000000e+00 : f32
      %66 = vector.broadcast %cst_52 : f32 to vector<16x1024xf32>
      %67 = arith.addf %66, %58 : vector<16x1024xf32>
      %68 = arith.mulf %65, %67 : vector<16x1024xf32>
      %cst_53 = arith.constant 0.000000e+00 : f32
      %69 = vector.broadcast %cst_53 : f32 to vector<16x1024xf32>
      %70 = arith.maximumf %68, %69 : vector<16x1024xf32>
      %c0_54 = arith.constant 0 : index
      %c0_55 = arith.constant 0 : index
      %71 = vector.load %arg20[%c0_54, %c0_55] : memref<16x1024xf32, #tpu.memory_space<vmem>>, vector<16x1024xf32>
      tpu.vector_store %arg20[%c0_54, %c0_55], %70 {strides = array<i32>} : memref<16x1024xf32, #tpu.memory_space<vmem>>, vector<16x1024xf32>,
    } else {
    }
    return
  }
  func.func @transform_0(%arg0: i32) -> (i32, i32) {
    %c0_i32 = arith.constant 0 : i32
    %c0_i32_0 = arith.constant 0 : i32
    return %c0_i32, %arg0 : i32, i32
  }
  func.func @transform_1(%arg0: i32) -> (i32, i32) {
    %c0_i32 = arith.constant 0 : i32
    %c0_i32_0 = arith.constant 0 : i32
    return %arg0, %c0_i32 : i32, i32
  }
  func.func @transform_2(%arg0: i32) -> (i32, i32) {
    %c0_i32 = arith.constant 0 : i32
    %c0_i32_0 = arith.constant 0 : i32
    %c0_i32_1 = arith.constant 0 : i32
    return %c0_i32, %c0_i32_0 : i32, i32
  }
  func.func @transform_3(%arg0: i32) -> (i32, i32) {
    %c0_i32 = arith.constant 0 : i32
    %c0_i32_0 = arith.constant 0 : i32
    %c0_i32_1 = arith.constant 0 : i32
    return %c0_i32, %c0_i32_0 : i32, i32
  }
  func.func @transform_4(%arg0: i32) -> (i32, i32) {
    %c0_i32 = arith.constant 0 : i32
    %c0_i32_0 = arith.constant 0 : i32
    %c0_i32_1 = arith.constant 0 : i32
    return %c0_i32, %c0_i32_0 : i32, i32
  }
  func.func @transform_5(%arg0: i32) -> (i32, i32) {
    %c0_i32 = arith.constant 0 : i32
    %c0_i32_0 = arith.constant 0 : i32
    %c0_i32_1 = arith.constant 0 : i32
    return %c0_i32, %c0_i32_0 : i32, i32
  }
  func.func @transform_6(%arg0: i32) -> (i32, i32) {
    %c0_i32 = arith.constant 0 : i32
    %0 = arith.minsi %arg0, %c0_i32 : i32
    %c0_i32_0 = arith.constant 0 : i32
    %c0_i32_1 = arith.constant 0 : i32
    return %c0_i32_0, %0 : i32, i32
  }
  func.func @transform_7(%arg0: i32) -> (i32, i32) {
    %c0_i32 = arith.constant 0 : i32
    %0 = arith.minsi %arg0, %c0_i32 : i32
    %c0_i32_0 = arith.constant 0 : i32
    %c0_i32_1 = arith.constant 0 : i32
    return %0, %c0_i32_0 : i32, i32
  }
  func.func @transform_8(%arg0: i32) -> (i32, i32) {
    %c0_i32 = arith.constant 0 : i32
    %c0_i32_0 = arith.constant 0 : i32
    %c0_i32_1 = arith.constant 0 : i32
    return %c0_i32, %c0_i32_0 : i32, i32
  }
  func.func @transform_9(%arg0: i32) -> (i32, i32) {
    %c0_i32 = arith.constant 0 : i32
    %c0_i32_0 = arith.constant 0 : i32
    %c0_i32_1 = arith.constant 0 : i32
    return %c0_i32, %c0_i32_0 : i32, i32
  }
  func.func @transform_10(%arg0: i32) -> (i32, i32) {
    %c0_i32 = arith.constant 0 : i32
    %c0_i32_0 = arith.constant 0 : i32
    %c0_i32_1 = arith.constant 0 : i32
    return %c0_i32, %c0_i32_0 : i32, i32
  }
  func.func @transform_11(%arg0: i32) -> (i32, i32) {
    %c0_i32 = arith.constant 0 : i32
    %c0_i32_0 = arith.constant 0 : i32
    %c0_i32_1 = arith.constant 0 : i32
    return %c0_i32, %c0_i32_0 : i32, i32
  }
  func.func @transform_12(%arg0: i32) -> (i32, i32) {
    %c0_i32 = arith.constant 0 : i32
    %c0_i32_0 = arith.constant 0 : i32
    %c0_i32_1 = arith.constant 0 : i32
    return %c0_i32, %c0_i32_0 : i32, i32
  }
  func.func @transform_13(%arg0: i32) -> (i32, i32) {
    %c0_i32 = arith.constant 0 : i32
    %c0_i32_0 = arith.constant 0 : i32
    %c0_i32_1 = arith.constant 0 : i32
    return %c0_i32, %c0_i32_0 : i32, i32
  }
  func.func @transform_14(%arg0: i32) -> (i32, i32) {
    %c0_i32 = arith.constant 0 : i32
    %c0_i32_0 = arith.constant 0 : i32
    %c0_i32_1 = arith.constant 0 : i32
    return %c0_i32, %c0_i32_0 : i32, i32
  }
  func.func @transform_15(%arg0: i32) -> (i32, i32) {
    %c0_i32 = arith.constant 0 : i32
    %c0_i32_0 = arith.constant 0 : i32
    %c0_i32_1 = arith.constant 0 : i32
    return %c0_i32, %c0_i32_0 : i32, i32
  }
  func.func @transform_16(%arg0: i32) -> (i32, i32) {
    %c0_i32 = arith.constant 0 : i32
    %c0_i32_0 = arith.constant 0 : i32
    %c0_i32_1 = arith.constant 0 : i32
    return %c0_i32, %c0_i32_0 : i32, i32
  }
  func.func @transform_17(%arg0: i32) -> (i32, i32) {
    %c0_i32 = arith.constant 0 : i32
    %c0_i32_0 = arith.constant 0 : i32
    %c0_i32_1 = arith.constant 0 : i32
    return %c0_i32, %c0_i32_0 : i32, i32
  }
  func.func @transform_18(%arg0: i32) -> (i32, i32) {
    %c0_i32 = arith.constant 0 : i32
    %c0_i32_0 = arith.constant 0 : i32
    %c0_i32_1 = arith.constant 0 : i32
    return %c0_i32, %c0_i32_0 : i32, i32
  }
  func.func @transform_19(%arg0: i32) -> (i32, i32) {
    %c0_i32 = arith.constant 0 : i32
    %c0_i32_0 = arith.constant 0 : i32
    %c0_i32_1 = arith.constant 0 : i32
    return %c0_i32, %c0_i32_0 : i32, i32
  }
}

module attributes {stable_mosaic.version = 11 : i64} {
  func.func @_head_kernel(%arg0: i32, %arg1: memref<16x1024xf32, #tpu.memory_space<vmem>>, %arg2: memref<1024x256xbf16, #tpu.memory_space<vmem>>, %arg3: memref<1x256xf32, #tpu.memory_space<vmem>>, %arg4: memref<16x256xf32, #tpu.memory_space<vmem>>) attributes {dimension_semantics = [#tpu.dimension_semantics<parallel>], iteration_bounds = array<i64: 1>, scalar_prefetch = 0 : i64, scratch_operands = 0 : i64, tpu.core_type = #tpu.core_type<tc>, window_params = [{pipeline_mode = #tpu.pipeline_mode<synchronous>, transform_indices = @transform_0, window_bounds = array<i64: 16, 1024>}, {transform_indices = @transform_1, window_bounds = array<i64: 1024, 256>}, {transform_indices = @transform_2, window_bounds = array<i64: 1, 256>}, {transform_indices = @transform_3, window_bounds = array<i64: 16, 256>}]} {
    %c0 = arith.constant 0 : index
    %c0_0 = arith.constant 0 : index
    %0 = vector.load %arg1[%c0, %c0_0] : memref<16x1024xf32, #tpu.memory_space<vmem>>, vector<16x1024xf32>
    %1 = arith.truncf %0 : vector<16x1024xf32> to vector<16x1024xbf16>
    %c0_1 = arith.constant 0 : index
    %c0_2 = arith.constant 0 : index
    %2 = vector.load %arg2[%c0_1, %c0_2] : memref<1024x256xbf16, #tpu.memory_space<vmem>>, vector<1024x256xbf16>
    %cst = arith.constant dense<0.000000e+00> : vector<16x256xf32>
    %3 = tpu.matmul %1, %2, %cst {dimension_numbers = #tpu.dot_dimension_numbers<[1], [0], [0], [1], [0, 0, 1, 1], [], []>} : vector<16x1024xbf16>, vector<1024x256xbf16>, vector<16x256xf32> -> vector<16x256xf32>
    %c0_3 = arith.constant 0 : index
    %c0_4 = arith.constant 0 : index
    %4 = vector.load %arg3[%c0_3, %c0_4] : memref<1x256xf32, #tpu.memory_space<vmem>>, vector<1x256xf32>
    %5 = vector.broadcast %4 : vector<1x256xf32> to vector<16x256xf32>
    %6 = arith.addf %3, %5 : vector<16x256xf32>
    %c0_5 = arith.constant 0 : index
    %c0_6 = arith.constant 0 : index
    %7 = vector.load %arg4[%c0_5, %c0_6] : memref<16x256xf32, #tpu.memory_space<vmem>>, vector<16x256xf32>
    tpu.vector_store %arg4[%c0_5, %c0_6], %6 {strides = array<i32>} : memref<16x256xf32, #tpu.memory_space<vmem>>, vector<16x256xf32>,
    return
  }
  func.func @transform_0(%arg0: i32) -> (i32, i32) {
    %c0_i32 = arith.constant 0 : i32
    %c0_i32_0 = arith.constant 0 : i32
    %c0_i32_1 = arith.constant 0 : i32
    return %c0_i32, %c0_i32_0 : i32, i32
  }
  func.func @transform_1(%arg0: i32) -> (i32, i32) {
    %c0_i32 = arith.constant 0 : i32
    %c0_i32_0 = arith.constant 0 : i32
    return %c0_i32, %arg0 : i32, i32
  }
  func.func @transform_2(%arg0: i32) -> (i32, i32) {
    %c0_i32 = arith.constant 0 : i32
    %c0_i32_0 = arith.constant 0 : i32
    return %c0_i32, %arg0 : i32, i32
  }
  func.func @transform_3(%arg0: i32) -> (i32, i32) {
    %c0_i32 = arith.constant 0 : i32
    %c0_i32_0 = arith.constant 0 : i32
    return %c0_i32, %arg0 : i32, i32
  }
}

module attributes {stable_mosaic.version = 11 : i64} {
  func.func @_blocks_kernel(%arg0: i32, %arg1: memref<16x1024xf32, #tpu.memory_space<vmem>>, %arg2: memref<16x128xf32, #tpu.memory_space<vmem>>, %arg3: memref<1x1024x1024xbf16, #tpu.memory_space<vmem>>, %arg4: memref<1x1x1024xf32, #tpu.memory_space<vmem>>, %arg5: memref<1x128x1024xbf16, #tpu.memory_space<vmem>>, %arg6: memref<1x1x1024xf32, #tpu.memory_space<vmem>>, %arg7: memref<16x1024xf32, #tpu.memory_space<vmem>>, %arg8: memref<16x1024xf32, #tpu.memory_space<vmem>>, %arg9: memref<16x128xf32, #tpu.memory_space<vmem>>) attributes {dimension_semantics = [#tpu.dimension_semantics<arbitrary>], iteration_bounds = array<i64: 3>, scalar_prefetch = 0 : i64, scratch_operands = 2 : i64, tpu.core_type = #tpu.core_type<tc>, window_params = [{pipeline_mode = #tpu.pipeline_mode<synchronous>, transform_indices = @transform_0, window_bounds = array<i64: 16, 1024>}, {pipeline_mode = #tpu.pipeline_mode<synchronous>, transform_indices = @transform_1, window_bounds = array<i64: 16, 128>}, {transform_indices = @transform_2, window_bounds = array<i64: 1, 1024, 1024>}, {transform_indices = @transform_3, window_bounds = array<i64: 1, 1, 1024>}, {transform_indices = @transform_4, window_bounds = array<i64: 1, 128, 1024>}, {transform_indices = @transform_5, window_bounds = array<i64: 1, 1, 1024>}, {pipeline_mode = #tpu.pipeline_mode<synchronous>, transform_indices = @transform_6, window_bounds = array<i64: 16, 1024>}]} {
    %c0_i32 = arith.constant 0 : i32
    %0 = arith.cmpi eq, %arg0, %c0_i32 : i32
    %1 = arith.extui %0 : i1 to i32
    %c0_i32_0 = arith.constant 0 : i32
    %2 = arith.cmpi ne, %1, %c0_i32_0 : i32
    scf.if %2 {
      %c0_22 = arith.constant 0 : index
      %c0_23 = arith.constant 0 : index
      %30 = vector.load %arg1[%c0_22, %c0_23] : memref<16x1024xf32, #tpu.memory_space<vmem>>, vector<16x1024xf32>
      %c0_24 = arith.constant 0 : index
      %c0_25 = arith.constant 0 : index
      %31 = vector.load %arg8[%c0_24, %c0_25] : memref<16x1024xf32, #tpu.memory_space<vmem>>, vector<16x1024xf32>
      tpu.vector_store %arg8[%c0_24, %c0_25], %30 {strides = array<i32>} : memref<16x1024xf32, #tpu.memory_space<vmem>>, vector<16x1024xf32>,
      %c0_26 = arith.constant 0 : index
      %c0_27 = arith.constant 0 : index
      %32 = vector.load %arg2[%c0_26, %c0_27] : memref<16x128xf32, #tpu.memory_space<vmem>>, vector<16x128xf32>
      %cst_28 = arith.constant 0.000000e+00 : f32
      %33 = vector.broadcast %cst_28 : f32 to vector<16x128xf32>
      %34 = arith.maximumf %32, %33 : vector<16x128xf32>
      %c0_29 = arith.constant 0 : index
      %c0_30 = arith.constant 0 : index
      %35 = vector.load %arg9[%c0_29, %c0_30] : memref<16x128xf32, #tpu.memory_space<vmem>>, vector<16x128xf32>
      tpu.vector_store %arg9[%c0_29, %c0_30], %34 {strides = array<i32>} : memref<16x128xf32, #tpu.memory_space<vmem>>, vector<16x128xf32>,
    } else {
    }
    %c0 = arith.constant 0 : index
    %c0_1 = arith.constant 0 : index
    %3 = vector.load %arg9[%c0, %c0_1] : memref<16x128xf32, #tpu.memory_space<vmem>>, vector<16x128xf32>
    %4 = arith.truncf %3 : vector<16x128xf32> to vector<16x128xbf16>
    %c0_2 = arith.constant 0 : index
    %c0_3 = arith.constant 0 : index
    %c0_4 = arith.constant 0 : index
    %5 = vector.load %arg5[%c0_2, %c0_3, %c0_4] : memref<1x128x1024xbf16, #tpu.memory_space<vmem>>, vector<1x128x1024xbf16>
    %6 = vector.shape_cast %5 : vector<1x128x1024xbf16> to vector<128x1024xbf16>
    %cst = arith.constant dense<0.000000e+00> : vector<16x1024xf32>
    %7 = tpu.matmul %4, %6, %cst {dimension_numbers = #tpu.dot_dimension_numbers<[1], [0], [0], [1], [0, 0, 1, 1], [], []>} : vector<16x128xbf16>, vector<128x1024xbf16>, vector<16x1024xf32> -> vector<16x1024xf32>
    %c0_5 = arith.constant 0 : index
    %c0_6 = arith.constant 0 : index
    %c0_7 = arith.constant 0 : index
    %8 = vector.load %arg6[%c0_5, %c0_6, %c0_7] : memref<1x1x1024xf32, #tpu.memory_space<vmem>>, vector<1x1x1024xf32>
    %9 = vector.shape_cast %8 : vector<1x1x1024xf32> to vector<1x1024xf32>
    %10 = vector.broadcast %9 : vector<1x1024xf32> to vector<16x1024xf32>
    %11 = arith.addf %7, %10 : vector<16x1024xf32>
    %c0_8 = arith.constant 0 : index
    %c0_9 = arith.constant 0 : index
    %12 = vector.load %arg8[%c0_8, %c0_9] : memref<16x1024xf32, #tpu.memory_space<vmem>>, vector<16x1024xf32>
    %13 = arith.truncf %12 : vector<16x1024xf32> to vector<16x1024xbf16>
    %c0_10 = arith.constant 0 : index
    %c0_11 = arith.constant 0 : index
    %c0_12 = arith.constant 0 : index
    %14 = vector.load %arg3[%c0_10, %c0_11, %c0_12] : memref<1x1024x1024xbf16, #tpu.memory_space<vmem>>, vector<1x1024x1024xbf16>
    %15 = vector.shape_cast %14 : vector<1x1024x1024xbf16> to vector<1024x1024xbf16>
    %cst_13 = arith.constant dense<0.000000e+00> : vector<16x1024xf32>
    %16 = tpu.matmul %13, %15, %cst_13 {dimension_numbers = #tpu.dot_dimension_numbers<[1], [0], [0], [1], [0, 0, 1, 1], [], []>} : vector<16x1024xbf16>, vector<1024x1024xbf16>, vector<16x1024xf32> -> vector<16x1024xf32>
    %c0_14 = arith.constant 0 : index
    %c0_15 = arith.constant 0 : index
    %c0_16 = arith.constant 0 : index
    %17 = vector.load %arg4[%c0_14, %c0_15, %c0_16] : memref<1x1x1024xf32, #tpu.memory_space<vmem>>, vector<1x1x1024xf32>
    %18 = vector.shape_cast %17 : vector<1x1x1024xf32> to vector<1x1024xf32>
    %19 = vector.broadcast %18 : vector<1x1024xf32> to vector<16x1024xf32>
    %20 = arith.addf %16, %19 : vector<16x1024xf32>
    %cst_17 = arith.constant 1.000000e+00 : f32
    %21 = vector.broadcast %cst_17 : f32 to vector<16x1024xf32>
    %22 = arith.addf %21, %11 : vector<16x1024xf32>
    %23 = arith.mulf %20, %22 : vector<16x1024xf32>
    %cst_18 = arith.constant 0.000000e+00 : f32
    %24 = vector.broadcast %cst_18 : f32 to vector<16x1024xf32>
    %25 = arith.maximumf %23, %24 : vector<16x1024xf32>
    %c0_19 = arith.constant 0 : index
    %c0_20 = arith.constant 0 : index
    %26 = vector.load %arg8[%c0_19, %c0_20] : memref<16x1024xf32, #tpu.memory_space<vmem>>, vector<16x1024xf32>
    tpu.vector_store %arg8[%c0_19, %c0_20], %25 {strides = array<i32>} : memref<16x1024xf32, #tpu.memory_space<vmem>>, vector<16x1024xf32>,
    %c2_i32 = arith.constant 2 : i32
    %27 = arith.cmpi eq, %arg0, %c2_i32 : i32
    %28 = arith.extui %27 : i1 to i32
    %c0_i32_21 = arith.constant 0 : i32
    %29 = arith.cmpi ne, %28, %c0_i32_21 : i32
    scf.if %29 {
      %c0_22 = arith.constant 0 : index
      %c0_23 = arith.constant 0 : index
      %30 = vector.load %arg8[%c0_22, %c0_23] : memref<16x1024xf32, #tpu.memory_space<vmem>>, vector<16x1024xf32>
      %c0_24 = arith.constant 0 : index
      %c0_25 = arith.constant 0 : index
      %31 = vector.load %arg7[%c0_24, %c0_25] : memref<16x1024xf32, #tpu.memory_space<vmem>>, vector<16x1024xf32>
      tpu.vector_store %arg7[%c0_24, %c0_25], %30 {strides = array<i32>} : memref<16x1024xf32, #tpu.memory_space<vmem>>, vector<16x1024xf32>,
    } else {
    }
    return
  }
  func.func @transform_0(%arg0: i32) -> (i32, i32) {
    %c0_i32 = arith.constant 0 : i32
    %c0_i32_0 = arith.constant 0 : i32
    %c0_i32_1 = arith.constant 0 : i32
    return %c0_i32, %c0_i32_0 : i32, i32
  }
  func.func @transform_1(%arg0: i32) -> (i32, i32) {
    %c0_i32 = arith.constant 0 : i32
    %c0_i32_0 = arith.constant 0 : i32
    %c0_i32_1 = arith.constant 0 : i32
    return %c0_i32, %c0_i32_0 : i32, i32
  }
  func.func @transform_2(%arg0: i32) -> (i32, i32, i32) {
    %c0_i32 = arith.constant 0 : i32
    %c0_i32_0 = arith.constant 0 : i32
    %c0_i32_1 = arith.constant 0 : i32
    return %arg0, %c0_i32, %c0_i32_0 : i32, i32, i32
  }
  func.func @transform_3(%arg0: i32) -> (i32, i32, i32) {
    %c0_i32 = arith.constant 0 : i32
    %c0_i32_0 = arith.constant 0 : i32
    %c0_i32_1 = arith.constant 0 : i32
    return %arg0, %c0_i32, %c0_i32_0 : i32, i32, i32
  }
  func.func @transform_4(%arg0: i32) -> (i32, i32, i32) {
    %c0_i32 = arith.constant 0 : i32
    %c0_i32_0 = arith.constant 0 : i32
    %c0_i32_1 = arith.constant 0 : i32
    return %arg0, %c0_i32, %c0_i32_0 : i32, i32, i32
  }
  func.func @transform_5(%arg0: i32) -> (i32, i32, i32) {
    %c0_i32 = arith.constant 0 : i32
    %c0_i32_0 = arith.constant 0 : i32
    %c0_i32_1 = arith.constant 0 : i32
    return %arg0, %c0_i32, %c0_i32_0 : i32, i32, i32
  }
  func.func @transform_6(%arg0: i32) -> (i32, i32) {
    %c0_i32 = arith.constant 0 : i32
    %c0_i32_0 = arith.constant 0 : i32
    %c0_i32_1 = arith.constant 0 : i32
    return %c0_i32, %c0_i32_0 : i32, i32
  }
}

</mosaic_0001>

<bundles_post_ra>
// kernel: net_forward.5
= control target key start
LH: loop header
LB: loop body
LE: loop exit
PB: predicated region body
PF: predicated region fallthrough
CT: control target
= control target key end

     0   :  { %s1801_s1 = inlined_call_operand.vmem [shape: bf16[1024,256], index: 1, kind: input, shape index: {}]   ;;  %s1802_s0 = inlined_call_operand.vmem [shape: f32[16,1024], index: 0, kind: input, shape index: {}]   ;;  %s1803_s2 = inlined_call_operand.vmem [shape: f32[1,256], index: 2, kind: input, shape index: {}]   ;;  %s1804_s3 = inlined_call_operand.vmem [shape: f32[16,256], index: 3, kind: output, shape index: {}]  }
   0x1   :  { %v1142_v0 = vld [vmem:[%s1801_s1 + $0x4] ss:$8 sps:$4 sm:$0xff]   ;;  %v1146_v2 = vld [vmem:[%s1801_s1] ss:$8 sps:$4 sm:$0xff]   ;;  %v1148_v4 = vld [vmem:[%s1801_s1 + $0x14] ss:$8 sps:$4 sm:$0xff]  }
   0x2   :  { %v1144_v1 = vld [vmem:[%s1801_s1 + $0x204] ss:$8 sps:$4 sm:$0xff]   ;;  %818 = vmatprep.subr.bf16.mxu1 %v1142_v0  ;;  %v1147_v3 = vld [vmem:[%s1801_s1 + $0x200] ss:$8 sps:$4 sm:$0xff]   ;;  %v1150_v5 = vld [vmem:[%s1801_s1 + $0x214] ss:$8 sps:$4 sm:$0xff]  }
   0x3   :  { %904 = vmatprep.subr.bf16.mxu0 %v1144_v1  ;;  %819 = vmatpush1.bf16.msra.mxu1 %v1146_v2  ;;  %v1152_v6 = vld [vmem:[%s1801_s1 + $0x10] ss:$8 sps:$4 sm:$0xff]   ;;  %v1154_v8 = vld [vmem:[%s1801_s1 + $0x24] ss:$8 sps:$4 sm:$0xff]   ;;  %v1158_v10 = vld [vmem:[%s1801_s1 + $0x20] ss:$8 sps:$4 sm:$0xff]  }
   0x4   :  { %905 = vmatpush1.bf16.msra.mxu0 %v1147_v3  ;;  %820 = vmatprep.subr.bf16.mxu1 %v1148_v4  ;;  %v1153_v7 = vld [vmem:[%s1801_s1 + $0x210] ss:$8 sps:$4 sm:$0xff]   ;;  %v1156_v9 = vld [vmem:[%s1801_s1 + $0x224] ss:$8 sps:$4 sm:$0xff]   ;;  %v1159_v11 = vld [vmem:[%s1801_s1 + $0x220] ss:$8 sps:$4 sm:$0xff]  }
   0x5   :  { %906 = vmatprep.subr.bf16.mxu0 %v1150_v5  ;;  %v1160_v12 = vld [vmem:[%s1801_s1 + $0x34] ss:$8 sps:$4 sm:$0xff]   ;;  %v1164_v14 = vld [vmem:[%s1801_s1 + $0x30] ss:$8 sps:$4 sm:$0xff]   ;;  %v1166_v16 = vld [vmem:[%s1801_s1 + $0x44] ss:$8 sps:$4 sm:$0xff]  }
   0x6   :  { %v1162_v13 = vld [vmem:[%s1801_s1 + $0x234] ss:$8 sps:$4 sm:$0xff]   ;;  %v1165_v15 = vld [vmem:[%s1801_s1 + $0x230] ss:$8 sps:$4 sm:$0xff]   ;;  %v1168_v17 = vld [vmem:[%s1801_s1 + $0x244] ss:$8 sps:$4 sm:$0xff]  }
   0x7   :  { %821 = vmatpush1.bf16.msra.mxu1 %v1152_v6  ;;  %v1170_v18 = vld [vmem:[%s1801_s1 + $0x40] ss:$8 sps:$4 sm:$0xff]   ;;  %v1172_v20 = vld [vmem:[%s1801_s1 + $0x54] ss:$8 sps:$4 sm:$0xff]   ;;  %v1176_v22 = vld [vmem:[%s1801_s1 + $0x50] ss:$8 sps:$4 sm:$0xff]  }
   0x8   :  { %907 = vmatpush1.bf16.msra.mxu0 %v1153_v7  ;;  %822 = vmatprep.subr.bf16.mxu1 %v1154_v8  ;;  %v1171_v19 = vld [vmem:[%s1801_s1 + $0x240] ss:$8 sps:$4 sm:$0xff]   ;;  %v1174_v21 = vld [vmem:[%s1801_s1 + $0x254] ss:$8 sps:$4 sm:$0xff]   ;;  %v1177_v23 = vld [vmem:[%s1801_s1 + $0x250] ss:$8 sps:$4 sm:$0xff]  }
   0x9   :  { %908 = vmatprep.subr.bf16.mxu0 %v1156_v9  ;;  %v1178_v24 = vld [vmem:[%s1801_s1 + $0x64] ss:$8 sps:$4 sm:$0xff]   ;;  %v1182_v26 = vld [vmem:[%s1801_s1 + $0x60] ss:$8 sps:$4 sm:$0xff]   ;;  %v1184_v28 = vld [vmem:[%s1801_s1 + $0x74] ss:$8 sps:$4 sm:$0xff]  }
   0xa   :  { %v1180_v25 = vld [vmem:[%s1801_s1 + $0x264] ss:$8 sps:$4 sm:$0xff]   ;;  %v1183_v27 = vld [vmem:[%s1801_s1 + $0x260] ss:$8 sps:$4 sm:$0xff]   ;;  %v1186_v29 = vld [vmem:[%s1801_s1 + $0x274] ss:$8 sps:$4 sm:$0xff]  }
   0xb   :  { %823 = vmatpush1.bf16.msra.mxu1 %v1158_v10  ;;  %v1188_v30 = vld [vmem:[%s1801_s1 + $0x70] ss:$8 sps:$4 sm:$0xff]   ;;  %v1190_v32 = vld [vmem:[%s1801_s1 + $0x84] ss:$8 sps:$4 sm:$0xff]   ;;  %v1194_v34 = vld [vmem:[%s1801_s1 + $0x80] ss:$8 sps:$4 sm:$0xff]  }
   0xc   :  { %909 = vmatpush1.bf16.msra.mxu0 %v1159_v11  ;;  %824 = vmatprep.subr.bf16.mxu1 %v1160_v12  ;;  %v1189_v31 = vld [vmem:[%s1801_s1 + $0x270] ss:$8 sps:$4 sm:$0xff]   ;;  %v1192_v33 = vld [vmem:[%s1801_s1 + $0x284] ss:$8 sps:$4 sm:$0xff]   ;;  %v1195_v35 = vld [vmem:[%s1801_s1 + $0x280] ss:$8 sps:$4 sm:$0xff]  }
   0xd   :  { %910 = vmatprep.subr.bf16.mxu0 %v1162_v13  ;;  %v1196_v36 = vld [vmem:[%s1801_s1 + $0x94] ss:$8 sps:$4 sm:$0xff]   ;;  %v1200_v38 = vld [vmem:[%s1801_s1 + $0x90] ss:$8 sps:$4 sm:$0xff]   ;;  %v1202_v40 = vld [vmem:[%s1801_s1 + $0xa4] ss:$8 sps:$4 sm:$0xff]  }
   0xe   :  { %v1198_v37 = vld [vmem:[%s1801_s1 + $0x294] ss:$8 sps:$4 sm:$0xff]   ;;  %v1201_v39 = vld [vmem:[%s1801_s1 + $0x290] ss:$8 sps:$4 sm:$0xff]   ;;  %v1204_v41 = vld [vmem:[%s1801_s1 + $0x2a4] ss:$8 sps:$4 sm:$0xff]  }
   0xf   :  { %825 = vmatpush1.bf16.msra.mxu1 %v1164_v14  ;;  %v1206_v42 = vld [vmem:[%s1801_s1 + $0xa0] ss:$8 sps:$4 sm:$0xff]   ;;  %v1208_v44 = vld [vmem:[%s1801_s1 + $0xb4] ss:$8 sps:$4 sm:$0xff]   ;;  %v1212_v46 = vld [vmem:[%s1801_s1 + $0xb0] ss:$8 sps:$4 sm:$0xff]  }
  0x10   :  { %911 = vmatpush1.bf16.msra.mxu0 %v1165_v15  ;;  %826 = vmatprep.subr.bf16.mxu1 %v1166_v16  ;;  %v1207_v43 = vld [vmem:[%s1801_s1 + $0x2a0] ss:$8 sps:$4 sm:$0xff]   ;;  %v1210_v45 = vld [vmem:[%s1801_s1 + $0x2b4] ss:$8 sps:$4 sm:$0xff]   ;;  %v1213_v47 = vld [vmem:[%s1801_s1 + $0x2b0] ss:$8 sps:$4 sm:$0xff]  }
  0x11   :  { %912 = vmatprep.subr.bf16.mxu0 %v1168_v17  ;;  %v15_v48 = vld [vmem:[%s1802_s0 + $0x8] sm:$0xff]  ;;  %v1220_v58 = vld [vmem:[%s1801_s1 + $0xd4] ss:$8 sps:$4 sm:$0xff]   ;;  %v1224_v60 = vld [vmem:[%s1801_s1 + $0xd0] ss:$8 sps:$4 sm:$0xff]  }
  0x12   :  { %v23_v49 = vld [vmem:[%s1802_s0 + $0x48] sm:$0xff]  ;;  %v1222_v59 = vld [vmem:[%s1801_s1 + $0x2d4] ss:$8 sps:$4 sm:$0xff]   ;;  %v1225_v61 = vld [vmem:[%s1801_s1 + $0x2d0] ss:$8 sps:$4 sm:$0xff]  }
  0x13   :  { %827 = vmatpush1.bf16.msra.mxu1 %v1170_v18  ;;  %v1214_v50 = vld [vmem:[%s1801_s1 + $0xc4] ss:$8 sps:$4 sm:$0xff]   ;;  %v31_v52 = vpack.c.bf16 %v23_v49, %v15_v48  ;;  %v1218_v56 = vld [vmem:[%s1801_s1 + $0xc0] ss:$8 sps:$4 sm:$0xff]   ;;  %v1232_v2 = vld [vmem:[%s1801_s1 + $0xf4] ss:$8 sps:$4 sm:$0xff]  }
  0x14   :  { %913 = vmatpush1.bf16.msra.mxu0 %v1171_v19  ;;  %828 = vmatprep.subr.bf16.mxu1 %v1172_v20  ;;  %v1216_v51 = vld [vmem:[%s1801_s1 + $0x2c4] ss:$8 sps:$4 sm:$0xff]   ;;  %v1219_v57 = vld [vmem:[%s1801_s1 + $0x2c0] ss:$8 sps:$4 sm:$0xff]   ;;  %v1234_v3 = vld [vmem:[%s1801_s1 + $0x2f4] ss:$8 sps:$4 sm:$0xff]  }
  0x15   :  { %914 = vmatprep.subr.bf16.mxu0 %v1174_v21  ;;  %v19_v53 = vld [vmem:[%s1802_s0 + $0x28] sm:$0xff]  ;;  %850 = vmatprep.mubr.bf16.mxu1 %v31_v52  ;;  %v1236_v4 = vld [vmem:[%s1801_s1 + $0xf0] ss:$8 sps:$4 sm:$0xff]   ;;  %v14_v6 = vld [vmem:[%s1802_s0] sm:$0xff] }
  0x16   :  { %v27_v54 = vld [vmem:[%s1802_s0 + $0x68] sm:$0xff]  ;;  %v1237_v5 = vld [vmem:[%s1801_s1 + $0x2f0] ss:$8 sps:$4 sm:$0xff]   ;;  %v22_v8 = vld [vmem:[%s1802_s0 + $0x40] sm:$0xff] }
  0x17   :  { %829 = vmatpush1.bf16.msra.mxu1 %v1176_v22  ;;  %v35_v55 = vpack.c.bf16 %v27_v54, %v19_v53  ;;  %v1226_v62 = vld [vmem:[%s1801_s1 + $0xe4] ss:$8 sps:$4 sm:$0xff]   ;;  %v1230_v0 = vld [vmem:[%s1801_s1 + $0xe0] ss:$8 sps:$4 sm:$0xff]   ;;  %v30_v14 = vpack.c.bf16 %v22_v8, %v14_v6  ;;  %v1246_v16 = vld [vmem:[%s1801_s1 + $0x114] ss:$8 sps:$4 sm:$0xff]  }
  0x18   :  { %915 = vmatpush1.bf16.msra.mxu0 %v1177_v23  ;;  %830 = vmatprep.subr.bf16.mxu1 %v1178_v24  ;;  %v1228_v63 = vld [vmem:[%s1801_s1 + $0x2e4] ss:$8 sps:$4 sm:$0xff]   ;;  %v1231_v1 = vld [vmem:[%s1801_s1 + $0x2e0] ss:$8 sps:$4 sm:$0xff]   ;;  %v1249_v17 = vld [vmem:[%s1801_s1 + $0x314] ss:$8 sps:$4 sm:$0xff]  }
  0x19   :  { %916 = vmatprep.subr.bf16.mxu0 %v1180_v25  ;;  %936 = vmatprep.mubr.bf16.mxu0 %v35_v55  ;;  %v1240_v7 = vld [vmem:[%s1801_s1 + $0x104] ss:$8 sps:$4 sm:$0xff]   ;;  %v1238_v12 = vld [vmem:[%s1801_s1 + $0x100] ss:$8 sps:$4 sm:$0xff]   ;;  %v1244_v18 = vld [vmem:[%s1801_s1 + $0x110] ss:$8 sps:$4 sm:$0xff]  }
  0x1a   :  { %v18_v9 = vld [vmem:[%s1802_s0 + $0x20] sm:$0xff]  ;;  %v1247_v19 = vld [vmem:[%s1801_s1 + $0x310] ss:$8 sps:$4 sm:$0xff]   ;;  %v1258_v24 = vld [vmem:[%s1801_s1 + $0x134] ss:$8 sps:$4 sm:$0xff]  }
  0x1b   :  { %831 = vmatpush1.bf16.msra.mxu1 %v1182_v26  ;;  %v26_v10 = vld [vmem:[%s1802_s0 + $0x60] sm:$0xff]  ;;  %v1261_v25 = vld [vmem:[%s1801_s1 + $0x334] ss:$8 sps:$4 sm:$0xff]   ;;  %v1256_v26 = vld [vmem:[%s1801_s1 + $0x130] ss:$8 sps:$4 sm:$0xff]  }
  0x1c   :  { %917 = vmatpush1.bf16.msra.mxu0 %v1183_v27  ;;  %832 = vmatprep.subr.bf16.mxu1 %v1184_v28  ;;  %v1243_v11 = vld [vmem:[%s1801_s1 + $0x304] ss:$8 sps:$4 sm:$0xff]   ;;  %v1241_v13 = vld [vmem:[%s1801_s1 + $0x300] ss:$8 sps:$4 sm:$0xff]   ;;  %v34_v15 = vpack.c.bf16 %v26_v10, %v18_v9  ;;  %v1259_v27 = vld [vmem:[%s1801_s1 + $0x330] ss:$8 sps:$4 sm:$0xff]  }
  0x1d   :  { %918 = vmatprep.subr.bf16.mxu0 %v1186_v29  ;;  %v1252_v20 = vld [vmem:[%s1801_s1 + $0x124] ss:$8 sps:$4 sm:$0xff]   ;;  %v1250_v22 = vld [vmem:[%s1801_s1 + $0x120] ss:$8 sps:$4 sm:$0xff]   ;;  %v1280_v48 = vld [vmem:[%s1801_s1 + $0x170] ss:$8 sps:$4 sm:$0xff]  }
  0x1e   :  { %v1255_v21 = vld [vmem:[%s1801_s1 + $0x324] ss:$8 sps:$4 sm:$0xff]   ;;  %v1253_v23 = vld [vmem:[%s1801_s1 + $0x320] ss:$8 sps:$4 sm:$0xff]   ;;  %v1283_v49 = vld [vmem:[%s1801_s1 + $0x370] ss:$8 sps:$4 sm:$0xff]  }
  0x1f   :  { %833 = vmatpush1.bf16.msra.mxu1 %v1188_v30  ;;  %v1264_v28 = vld [vmem:[%s1801_s1 + $0x144] ss:$8 sps:$4 sm:$0xff]   ;;  %v1262_v30 = vld [vmem:[%s1801_s1 + $0x140] ss:$8 sps:$4 sm:$0xff]   ;;  %v1294_v54 = vld [vmem:[%s1801_s1 + $0x194] ss:$8 sps:$4 sm:$0xff]  }
  0x20   :  { %919 = vmatpush1.bf16.msra.mxu0 %v1189_v31  ;;  %834 = vmatprep.subr.bf16.mxu1 %v1190_v32  ;;  %v1267_v29 = vld [vmem:[%s1801_s1 + $0x344] ss:$8 sps:$4 sm:$0xff]   ;;  %v1265_v31 = vld [vmem:[%s1801_s1 + $0x340] ss:$8 sps:$4 sm:$0xff]   ;;  %v1270_v32 = vld [vmem:[%s1801_s1 + $0x154] ss:$8 sps:$4 sm:$0xff]  }
  0x21   :  { %920 = vmatprep.subr.bf16.mxu0 %v1192_v33  ;;  %v1273_v33 = vld [vmem:[%s1801_s1 + $0x354] ss:$8 sps:$4 sm:$0xff]   ;;  %v1286_v52 = vld [vmem:[%s1801_s1 + $0x180] ss:$8 sps:$4 sm:$0xff]   ;;  %v1316_v8 = vld [vmem:[%s1801_s1 + $0x1d0] ss:$8 sps:$4 sm:$0xff]  }
  0x22   :  { %v1289_v53 = vld [vmem:[%s1801_s1 + $0x380] ss:$8 sps:$4 sm:$0xff]   ;;  %v1297_v55 = vld [vmem:[%s1801_s1 + $0x394] ss:$8 sps:$4 sm:$0xff]   ;;  %v1319_v9 = vld [vmem:[%s1801_s1 + $0x3d0] ss:$8 sps:$4 sm:$0xff]  }
  0x23   :  { %835 = vmatpush1.bf16.msra.mxu1 %v1194_v34  ;;  %v1268_v34 = vld [vmem:[%s1801_s1 + $0x150] ss:$8 sps:$4 sm:$0xff]   ;;  %v1318_v6 = vld [vmem:[%s1801_s1 + $0x1d4] ss:$8 sps:$4 sm:$0xff]   ;;  %v1324_v10 = vld [vmem:[%s1801_s1 + $0x1e4] ss:$8 sps:$4 sm:$0xff]  }
  0x24   :  { %921 = vmatpush1.bf16.msra.mxu0 %v1195_v35  ;;  %836 = vmatprep.subr.bf16.mxu1 %v1196_v36  ;;  %v1271_v35 = vld [vmem:[%s1801_s1 + $0x350] ss:$8 sps:$4 sm:$0xff]   ;;  %v1276_v36 = vld [vmem:[%s1801_s1 + $0x164] ss:$8 sps:$4 sm:$0xff]  }
  0x25   :  { %922 = vmatprep.subr.bf16.mxu0 %v1198_v37  ;;  %v1279_v37 = vld [vmem:[%s1801_s1 + $0x364] ss:$8 sps:$4 sm:$0xff]  }
  0x27   :  { %837 = vmatpush1.bf16.msra.mxu1 %v1200_v38  ;;  %v1274_v38 = vld [vmem:[%s1801_s1 + $0x160] ss:$8 sps:$4 sm:$0xff]  }
  0x28   :  { %923 = vmatpush1.bf16.msra.mxu0 %v1201_v39  ;;  %838 = vmatprep.subr.bf16.mxu1 %v1202_v40  ;;  %v1277_v39 = vld [vmem:[%s1801_s1 + $0x360] ss:$8 sps:$4 sm:$0xff]   ;;  %v17_v40 = vld [vmem:[%s1802_s0 + $0x18] sm:$0xff] }
  0x29   :  { %924 = vmatprep.subr.bf16.mxu0 %v1204_v41  ;;  %v25_v41 = vld [vmem:[%s1802_s0 + $0x58] sm:$0xff] }
  0x2b   :  { %839 = vmatpush1.bf16.msra.mxu1 %v1206_v42  ;;  %v21_v42 = vld [vmem:[%s1802_s0 + $0x38] sm:$0xff] }
  0x2c   :  { %925 = vmatpush1.bf16.msra.mxu0 %v1207_v43  ;;  %840 = vmatprep.subr.bf16.mxu1 %v1208_v44  ;;  %v1282_v43 = vld [vmem:[%s1801_s1 + $0x174] ss:$8 sps:$4 sm:$0xff]  }
  0x2d   :  { %926 = vmatprep.subr.bf16.mxu0 %v1210_v45  ;;  %v1285_v44 = vld [vmem:[%s1801_s1 + $0x374] ss:$8 sps:$4 sm:$0xff]   ;;  %v33_v45 = vpack.c.bf16 %v25_v41, %v17_v40 }
  0x2f   :  { %841 = vmatpush1.bf16.msra.mxu1 %v1212_v46  ;;  %v29_v46 = vld [vmem:[%s1802_s0 + $0x78] sm:$0xff] }
  0x30   :  { %927 = vmatpush1.bf16.msra.mxu0 %v1213_v47  ;;  %842 = vmatprep.subr.bf16.mxu1 %v1214_v50  ;;  %v37_v47 = vpack.c.bf16 %v29_v46, %v21_v42  ;;  %v1288_v50 = vld [vmem:[%s1801_s1 + $0x184] ss:$8 sps:$4 sm:$0xff]  }
  0x31   :  { %928 = vmatprep.subr.bf16.mxu0 %v1216_v51  ;;  %v1291_v51 = vld [vmem:[%s1801_s1 + $0x384] ss:$8 sps:$4 sm:$0xff]  }
  0x33   :  { %843 = vmatpush1.bf16.msra.mxu1 %v1218_v56  ;;  %v1292_v56 = vld [vmem:[%s1801_s1 + $0x190] ss:$8 sps:$4 sm:$0xff]  }
  0x34   :  { %929 = vmatpush1.bf16.msra.mxu0 %v1219_v57  ;;  %844 = vmatprep.subr.bf16.mxu1 %v1220_v58  ;;  %v1295_v57 = vld [vmem:[%s1801_s1 + $0x390] ss:$8 sps:$4 sm:$0xff]   ;;  %v1300_v58 = vld [vmem:[%s1801_s1 + $0x1a4] ss:$8 sps:$4 sm:$0xff]  }
  0x35   :  { %930 = vmatprep.subr.bf16.mxu0 %v1222_v59  ;;  %v1303_v59 = vld [vmem:[%s1801_s1 + $0x3a4] ss:$8 sps:$4 sm:$0xff]  }
  0x37   :  { %845 = vmatpush1.bf16.msra.mxu1 %v1224_v60  ;;  %v1298_v60 = vld [vmem:[%s1801_s1 + $0x1a0] ss:$8 sps:$4 sm:$0xff]  }
  0x38   :  { %931 = vmatpush1.bf16.msra.mxu0 %v1225_v61  ;;  %846 = vmatprep.subr.bf16.mxu1 %v1226_v62  ;;  %v1301_v61 = vld [vmem:[%s1801_s1 + $0x3a0] ss:$8 sps:$4 sm:$0xff]   ;;  %v1306_v62 = vld [vmem:[%s1801_s1 + $0x1b4] ss:$8 sps:$4 sm:$0xff]  }
  0x39   :  { %932 = vmatprep.subr.bf16.mxu0 %v1228_v63  ;;  %v1309_v63 = vld [vmem:[%s1801_s1 + $0x3b4] ss:$8 sps:$4 sm:$0xff]  }
  0x3b   :  { %847 = vmatpush1.bf16.msra.mxu1 %v1230_v0  ;;  %v1304_v0 = vld [vmem:[%s1801_s1 + $0x1b0] ss:$8 sps:$4 sm:$0xff]  }
  0x3c   :  { %933 = vmatpush1.bf16.msra.mxu0 %v1231_v1  ;;  %848 = vmatprep.subr.bf16.mxu1 %v1232_v2  ;;  %v1307_v1 = vld [vmem:[%s1801_s1 + $0x3b0] ss:$8 sps:$4 sm:$0xff]   ;;  %v1312_v2 = vld [vmem:[%s1801_s1 + $0x1c4] ss:$8 sps:$4 sm:$0xff]  }
  0x3d   :  { %934 = vmatprep.subr.bf16.mxu0 %v1234_v3  ;;  %v1315_v3 = vld [vmem:[%s1801_s1 + $0x3c4] ss:$8 sps:$4 sm:$0xff]  }
  0x3f   :  { %849 = vmatpush1.bf16.msra.mxu1 %v1236_v4  ;;  %v1310_v4 = vld [vmem:[%s1801_s1 + $0x1c0] ss:$8 sps:$4 sm:$0xff]  }
  0x40   :  { %935 = vmatpush1.bf16.msra.mxu0 %v1237_v5  ;;  %861 = vmatprep.subr.bf16.mxu1 %v1240_v7  ;;  %v1313_v5 = vld [vmem:[%s1801_s1 + $0x3c0] ss:$8 sps:$4 sm:$0xff]   ;;  %v1321_v7 = vld [vmem:[%s1801_s1 + $0x3d4] ss:$8 sps:$4 sm:$0xff]  }
  0x41   :  { %947 = vmatprep.subr.bf16.mxu0 %v1243_v11  ;;  %v1327_v11 = vld [vmem:[%s1801_s1 + $0x3e4] ss:$8 sps:$4 sm:$0xff]  }
  0x42   :  { %851 = vmatmul.mubr.bf16.vlgmr.msra.gmra.mrb[0].mxu1 %v30_v14  ;;  %v1330_v14 = vld [vmem:[%s1801_s1 + $0x1f4] ss:$8 sps:$4 sm:$0xff]  }
  0x43   :  { %937 = vmatmul.mubr.bf16.vlgmr.msra.gmra.mrb[0].mxu0 %v34_v15  ;;  %862 = vmatpush1.bf16.msra.mxu1 %v1238_v12  ;;  %v1322_v12 = vld [vmem:[%s1801_s1 + $0x1e0] ss:$8 sps:$4 sm:$0xff]   ;;  %v1333_v15 = vld [vmem:[%s1801_s1 + $0x3f4] ss:$8 sps:$4 sm:$0xff]  }
  0x44   :  { %948 = vmatpush1.bf16.msra.mxu0 %v1241_v13  ;;  %863 = vmatprep.subr.bf16.mxu1 %v1246_v16  ;;  %v1325_v13 = vld [vmem:[%s1801_s1 + $0x3e0] ss:$8 sps:$4 sm:$0xff]   ;;  %v1328_v16 = vld [vmem:[%s1801_s1 + $0x1f0] ss:$8 sps:$4 sm:$0xff]  }
  0x45   :  { %949 = vmatprep.subr.bf16.mxu0 %v1249_v17  ;;  %893 = vmatprep.mubr.bf16.mxu1 %v33_v45  ;;  %v1331_v17 = vld [vmem:[%s1801_s1 + $0x3f0] ss:$8 sps:$4 sm:$0xff]  }
  0x46   :  { %979 = vmatprep.mubr.bf16.mxu0 %v37_v47 }
  0x47   :  { %864 = vmatpush1.bf16.msra.mxu1 %v1244_v18  ;;  %v16_v18 = vld [vmem:[%s1802_s0 + $0x10] sm:$0xff] }
  0x48   :  { %950 = vmatpush1.bf16.msra.mxu0 %v1247_v19  ;;  %865 = vmatprep.subr.bf16.mxu1 %v1252_v20  ;;  %v24_v19 = vld [vmem:[%s1802_s0 + $0x50] sm:$0xff] }
  0x49   :  { %951 = vmatprep.subr.bf16.mxu0 %v1255_v21  ;;  %v20_v20 = vld [vmem:[%s1802_s0 + $0x30] sm:$0xff] }
  0x4a   :  { %v28_v21 = vld [vmem:[%s1802_s0 + $0x70] sm:$0xff] }
  0x4b   :  { %866 = vmatpush1.bf16.msra.mxu1 %v1250_v22  ;;  %v32_v22 = vpack.c.bf16 %v24_v19, %v16_v18 }
  0x4c   :  { %952 = vmatpush1.bf16.msra.mxu0 %v1253_v23  ;;  %867 = vmatprep.subr.bf16.mxu1 %v1258_v24  ;;  %v36_v23 = vpack.c.bf16 %v28_v21, %v20_v20  ;;  %v168_v24 = vlaneseq }
  0x4d   :  { %953 = vmatprep.subr.bf16.mxu0 %v1261_v25 }
  0x4e   :  { %v169_v25 = vshrl.u32 %v168_v24, 7 }
  0x4f   :  { %868 = vmatpush1.bf16.msra.mxu1 %v1256_v26 }
  0x50   :  { %954 = vmatpush1.bf16.msra.mxu0 %v1259_v27  ;;  %869 = vmatprep.subr.bf16.mxu1 %v1264_v28  ;;  %v170_v26 = vsub.s32 0, %v169_v25  ;;  %v166_v27 = vld [vmem:[%s1803_s2] sm:$0x3]  ;;  %v174_v28 = vsub.s32 1, %v169_v25 }
  0x51   :  { %955 = vmatprep.subr.bf16.mxu0 %v1267_v29 }
  0x52   :  { %v171_v29 = vrot.slane %v166_v27, %v170_v26 }
  0x53   :  { %870 = vmatpush1.bf16.msra.mxu1 %v1262_v30  ;;  %v175_v30 = vrot.slane %v166_v27, %v174_v28 }
  0x54   :  { %956 = vmatpush1.bf16.msra.mxu0 %v1265_v31  ;;  %871 = vmatprep.subr.bf16.mxu1 %v1270_v32 }
  0x55   :  { %957 = vmatprep.subr.bf16.mxu0 %v1273_v33 }
  0x57   :  { %872 = vmatpush1.bf16.msra.mxu1 %v1268_v34 }
  0x58   :  { %958 = vmatpush1.bf16.msra.mxu0 %v1271_v35  ;;  %873 = vmatprep.subr.bf16.mxu1 %v1276_v36 }
  0x59   :  { %959 = vmatprep.subr.bf16.mxu0 %v1279_v37 }
  0x5b   :  { %874 = vmatpush1.bf16.msra.mxu1 %v1274_v38 }
  0x5c   :  { %960 = vmatpush1.bf16.msra.mxu0 %v1277_v39  ;;  %875 = vmatprep.subr.bf16.mxu1 %v1282_v43 }
  0x5d   :  { %961 = vmatprep.subr.bf16.mxu0 %v1285_v44 }
  0x5f   :  { %876 = vmatpush1.bf16.msra.mxu1 %v1280_v48 }
  0x60   :  { %962 = vmatpush1.bf16.msra.mxu0 %v1283_v49  ;;  %877 = vmatprep.subr.bf16.mxu1 %v1288_v50 }
  0x61   :  { %963 = vmatprep.subr.bf16.mxu0 %v1291_v51 }
  0x63   :  { %878 = vmatpush1.bf16.msra.mxu1 %v1286_v52 }
  0x64   :  { %964 = vmatpush1.bf16.msra.mxu0 %v1289_v53  ;;  %879 = vmatprep.subr.bf16.mxu1 %v1294_v54 }
  0x65   :  { %965 = vmatprep.subr.bf16.mxu0 %v1297_v55 }
  0x67   :  { %880 = vmatpush1.bf16.msra.mxu1 %v1292_v56 }
  0x68   :  { %966 = vmatpush1.bf16.msra.mxu0 %v1295_v57  ;;  %881 = vmatprep.subr.bf16.mxu1 %v1300_v58 }
  0x69   :  { %967 = vmatprep.subr.bf16.mxu0 %v1303_v59 }
  0x6b   :  { %882 = vmatpush1.bf16.msra.mxu1 %v1298_v60 }
  0x6c   :  { %968 = vmatpush1.bf16.msra.mxu0 %v1301_v61  ;;  %883 = vmatprep.subr.bf16.mxu1 %v1306_v62 }
  0x6d   :  { %969 = vmatprep.subr.bf16.mxu0 %v1309_v63 }
  0x6f   :  { %884 = vmatpush1.bf16.msra.mxu1 %v1304_v0 }
  0x70   :  { %970 = vmatpush1.bf16.msra.mxu0 %v1307_v1  ;;  %885 = vmatprep.subr.bf16.mxu1 %v1312_v2 }
  0x71   :  { %971 = vmatprep.subr.bf16.mxu0 %v1315_v3 }
  0x73   :  { %886 = vmatpush1.bf16.msra.mxu1 %v1310_v4 }
  0x74   :  { %972 = vmatpush1.bf16.msra.mxu0 %v1313_v5  ;;  %887 = vmatprep.subr.bf16.mxu1 %v1318_v6 }
  0x75   :  { %973 = vmatprep.subr.bf16.mxu0 %v1321_v7 }
  0x77   :  { %888 = vmatpush1.bf16.msra.mxu1 %v1316_v8 }
  0x78   :  { %974 = vmatpush1.bf16.msra.mxu0 %v1319_v9  ;;  %889 = vmatprep.subr.bf16.mxu1 %v1324_v10 }
  0x79   :  { %975 = vmatprep.subr.bf16.mxu0 %v1327_v11 }
  0x7b   :  { %890 = vmatpush1.bf16.msra.mxu1 %v1322_v12 }
  0x7c   :  { %976 = vmatpush1.bf16.msra.mxu0 %v1325_v13  ;;  %891 = vmatprep.subr.bf16.mxu1 %v1330_v14 }
  0x7d   :  { %977 = vmatprep.subr.bf16.mxu0 %v1333_v15 }
  0x7f   :  { %892 = vmatpush1.bf16.msra.mxu1 %v1328_v16 }
  0x80   :  { %978 = vmatpush1.bf16.msra.mxu0 %v1331_v17 }
  0x82   :  { %894 = vmatmul.mubr.bf16.vlgmr.msra.gmra.mrb[0].mxu1 %v32_v22 }
  0x83   :  { %980 = vmatmul.mubr.bf16.vlgmr.msra.gmra.mrb[0].mxu0 %v36_v23 }
 0x155   :  { %v895_v31 = vpop.f32.mrb[0].mxu1 }
 0x156   :  { %v981_v32 = vpop.f32.mrb[0].mxu0  ;;  %v1126_v33 = vadd.f32 %v895_v31, %v171_v29  ;;  %v897_v34 = vpop.f32.mrb[1].mxu1 }
 0x157   :  { %v983_v35 = vpop.f32.mrb[1].mxu0  ;;  %v1128_v36 = vadd.f32 %v897_v34, %v175_v30  ;;  %v899_v37 = vpop.f32.mrb[2].mxu1 }
 0x158   :  { %v985_v38 = vpop.f32.mrb[2].mxu0  ;;  %v1127_v39 = vadd.f32 %v1126_v33, %v981_v32  ;;  %v1130_v40 = vadd.f32 %v899_v37, %v171_v29  ;;  %v901_v41 = vpop.f32.mrb[3].mxu1 }
 0x159   :  { %v987_v42 = vpop.f32.mrb[3].mxu0  ;;  %v1129_v43 = vadd.f32 %v1128_v36, %v983_v35  ;;  %v1132_v44 = vadd.f32 %v901_v41, %v175_v30 }
 0x15a   :  { %990 = vst [vmem:[%s1804_s3] sm:$0xff] %v1127_v39  ;;  %v1131_v45 = vadd.f32 %v1130_v40, %v985_v38 }
 0x15b   :  { %991 = vst [vmem:[%s1804_s3 + $0x8] sm:$0xff] %v1129_v43  ;;  %v1133_v46 = vadd.f32 %v1132_v44, %v987_v42 }
 0x15c   :  { %992 = vst [vmem:[%s1804_s3 + $0x10] sm:$0xff] %v1131_v45 }
 0x15d   :  { %993 = vst [vmem:[%s1804_s3 + $0x18] sm:$0xff] %v1133_v46 }

// kernel: net_forward.3
= control target key start
LH: loop header
LB: loop body
LE: loop exit
PB: predicated region body
PF: predicated region fallthrough
CT: control target
= control target key end

     0   :  { %s4552_s0 = inlined_call_operand.vmem [shape: f32[16,256], index: 0, kind: input, shape index: {}]   ;;  %s4553_s1 = inlined_call_operand.hbm [shape: bf16[256,512], index: 1, kind: input, shape index: {}]   ;;  %s4554_s2 = inlined_call_operand.hbm [shape: f32[1,512], index: 2, kind: input, shape index: {}]   ;;  %s4555_s3 = inlined_call_operand.hbm [shape: f32[1,512], index: 3, kind: input, shape index: {}]   ;;  %s4556_s4 = inlined_call_operand.hbm [shape: f32[1,512], index: 4, kind: input, shape index: {}]   ;;  %s4557_s5 = inlined_call_operand.hbm [shape: bf16[512,128], index: 5, kind: input, shape index: {}]   ;;  %s4558_s6 = inlined_call_operand.vmem [shape: f32[16,128], index: 6, kind: input, shape index: {}]   ;;  %s4559_s7 = inlined_call_operand.hbm [shape: bf16[128,512], index: 7, kind: input, shape index: {}]   ;;  %s4560_s8 = inlined_call_operand.hbm [shape: f32[1,512], index: 8, kind: input, shape index: {}]   ;;  %s4561_s9 = inlined_call_operand.hbm [shape: f32[1,512], index: 9, kind: input, shape index: {}]   ;;  %s4562_s10 = inlined_call_operand.hbm [shape: f32[1,512], index: 10, kind: input, shape index: {}]   ;;  %s4563_s11 = inlined_call_operand.hbm [shape: bf16[512,128], index: 11, kind: input, shape index: {}]   ;;  %s4564_s12 = inlined_call_operand.hbm [shape: f32[1,128], index: 12, kind: input, shape index: {}]   ;;  %s4565_s13 = inlined_call_operand.vmem [shape: f32[16,64], index: 13, kind: input, shape index: {}]   ;;  %s4566_s14 = inlined_call_operand.hbm [shape: bf16[64,1024], index: 14, kind: input, shape index: {}]   ;;  %s4567_s15 = inlined_call_operand.hbm [shape: f32[1,1024], index: 15, kind: input, shape index: {}]   ;;  %s4568_s16 = inlined_call_operand.hbm [shape: bf16[128,1024], index: 16, kind: input, shape index: {}]   ;;  %s4569_s17 = inlined_call_operand.hbm [shape: f32[1,1024], index: 17, kind: input, shape index: {}]   ;;  %s4570_s18 = inlined_call_operand.vmem [shape: f32[16,128], index: 18, kind: output, shape index: {0}]   ;;  %s4571_s19 = inlined_call_operand.vmem [shape: f32[16,1024], index: 19, kind: output, shape index: {1}]  }
   0x1   :  { %4577 = sst [smem:[#allocation35_spill]] %s4552_s0 }
   0x2   :  { %4578 = sst [smem:[#allocation36_spill]] %s4553_s1 }
   0x3   :  { %4579 = sst [smem:[#allocation37_spill]] %s4554_s2 }
   0x4   :  { %4580 = sst [smem:[#allocation38_spill]] %s4555_s3 }
   0x5   :  { %25 = vsyncpa [#allocation5], 0 }
   0x6   :  { %26 = vsyncpa [#allocation7], 0 }
   0x7   :  { %27 = vsyncpa [#allocation10], 0 }
   0x8   :  { %28 = vsyncpa [#allocation13], 0 }
   0x9   :  { %29 = vsyncpa [#allocation16], 0 }
   0xa   :  { %30 = vsyncpa [#allocation19], 0 }
   0xb   :  { %31 = vsyncpa [#allocation22], 0 }
   0xc   :  { %32 = vsyncpa [#allocation25], 0  ;;  %s4005_s0 = smov [#allocation6]   ;;  %s4006_s20 = smov [#allocation9]  }
   0xd   :  { %s53_s30 = sshll.u32 %s4005_s0, 4  ;;  %s73_s21 = sshll.u32 %s4006_s20, 4  ;;  %s54_s30 = int_to_ptr.vmem [resolvable:$true] %s53_s30  ;;  %s74_s21 = int_to_ptr.vmem [resolvable:$true] %s73_s21 }
   0xe   :  { %s4581_s2 = sld [smem:[#allocation37_spill]] }
  0x14   :  { %s3659_s23 = scalar_lea.hbm %s4581_s2, 64 }
  0x15   :  { %p3660_p0 = scmp.ne.s32.totalorder %s4581_s2, %s3659_s23  ;;  %p3663_p1 = scmp.lt.u32.totalorder %s3659_s23, %s4581_s2 }
  0x17   :  { %p3665_p2 = pnand %p3663_p1, %p3660_p0 }
  0x19   :  { %3668 = shalt.err (!%p3665_p2)
}
  0x1a   :  { %s3669_s27 = scalar_lea.vmem %s54_s30, 64  ;;  %p3674_p4 = scmp.lt.s32.totalorder %s54_s30, %s54_s30 }
  0x1b   :  { %p3670_p3 = scmp.ne.s32.totalorder %s54_s30, %s3669_s27  ;;  %p3675_p5 = scmp.lt.s32.totalorder %s3669_s27, %s3669_s27 }
  0x1d   :  { %p3676_p6 = por %p3675_p5, %p3674_p4 }
  0x1f   :  { %p3677_p7 = pnand %p3676_p6, %p3670_p3 }
  0x21   :  { %3680 = shalt.err (!%p3677_p7)
}
  0x22   :  { %56 = dma.hbm_to_vmem [thread:$0]  %s4581_s2, 64, %s54_s30, [#allocation7]  }
  0x23   :  { %s3681_s1 = scalar_lea.hbm %s4556_s4, 64 }
  0x24   :  { %p3682_p8 = scmp.ne.s32.totalorder %s4556_s4, %s3681_s1  ;;  %p3685_p9 = scmp.lt.u32.totalorder %s3681_s1, %s4556_s4 }
  0x26   :  { %p3687_p10 = pnand %p3685_p9, %p3682_p8 }
  0x28   :  { %3690 = shalt.err (!%p3687_p10)
}
  0x29   :  { %s3691_s3 = scalar_lea.vmem %s74_s21, 64  ;;  %p3696_p12 = scmp.lt.s32.totalorder %s74_s21, %s74_s21 }
  0x2a   :  { %p3692_p11 = scmp.ne.s32.totalorder %s74_s21, %s3691_s3  ;;  %p3697_p13 = scmp.lt.s32.totalorder %s3691_s3, %s3691_s3 }
  0x2c   :  { %p3698_p0 = por %p3697_p13, %p3696_p12 }
  0x2e   :  { %p3699_p1 = pnand %p3698_p0, %p3692_p11 }
  0x30   :  { %3702 = shalt.err (!%p3699_p1)
}
  0x31   :  { %76 = dma.hbm_to_vmem [thread:$0]  %s4556_s4, 64, %s74_s21, [#allocation10]  }
  0x32   :  { %s4007_s26 = smov [#allocation12]   ;;  %s4008_s28 = smov [#allocation15]  }
  0x33   :  { %s96_s27 = sshll.u32 %s4007_s26, 4  ;;  %s119_s29 = sshll.u32 %s4008_s28, 4  ;;  %s97_s27 = int_to_ptr.vmem [resolvable:$true] %s96_s27  ;;  %s120_s29 = int_to_ptr.vmem [resolvable:$true] %s119_s29 }
  0x34   :  { %s3703_s1 = scalar_lea.hbm %s4559_s7, 4096 }
  0x35   :  { %p3704_p2 = scmp.ne.s32.totalorder %s4559_s7, %s3703_s1  ;;  %p3707_p3 = scmp.lt.u32.totalorder %s3703_s1, %s4559_s7 }
  0x37   :  { %p3709_p4 = pnand %p3707_p3, %p3704_p2 }
  0x39   :  { %3712 = shalt.err (!%p3709_p4)
}
  0x3a   :  { %s3713_s4 = scalar_lea.vmem %s97_s27, 4096  ;;  %p3718_p6 = scmp.lt.s32.totalorder %s97_s27, %s97_s27 }
  0x3b   :  { %p3714_p5 = scmp.ne.s32.totalorder %s97_s27, %s3713_s4  ;;  %p3719_p7 = scmp.lt.s32.totalorder %s3713_s4, %s3713_s4 }
  0x3d   :  { %p3720_p8 = por %p3719_p7, %p3718_p6 }
  0x3f   :  { %p3721_p9 = pnand %p3720_p8, %p3714_p5 }
  0x41   :  { %3724 = shalt.err (!%p3721_p9)
}
  0x42   :  { %s4009_s21 = smov 256   ;;  %s4010_s3 = smov 16  }
  0x43   :  { %102 = dma.hbm_to_vmem [thread:$0]  %s4559_s7, 4096, %s97_s27, [#allocation13], %s4009_s21, %s4009_s21, %s4010_s3  }
  0x44   :  { %s3725_s0 = scalar_lea.hbm %s4561_s9, 64 }
  0x45   :  { %p3726_p10 = scmp.ne.s32.totalorder %s4561_s9, %s3725_s0  ;;  %p3729_p11 = scmp.lt.u32.totalorder %s3725_s0, %s4561_s9 }
  0x47   :  { %p3731_p12 = pnand %p3729_p11, %p3726_p10 }
  0x49   :  { %3734 = shalt.err (!%p3731_p12)
}
  0x4a   :  { %s3735_s23 = scalar_lea.vmem %s120_s29, 64  ;;  %p3740_p0 = scmp.lt.s32.totalorder %s120_s29, %s120_s29 }
  0x4b   :  { %p3736_p13 = scmp.ne.s32.totalorder %s120_s29, %s3735_s23  ;;  %p3741_p1 = scmp.lt.s32.totalorder %s3735_s23, %s3735_s23 }
  0x4d   :  { %p3742_p2 = por %p3741_p1, %p3740_p0 }
  0x4f   :  { %p3743_p3 = pnand %p3742_p2, %p3736_p13 }
  0x51   :  { %3746 = shalt.err (!%p3743_p3)
}
  0x52   :  { %122 = dma.hbm_to_vmem [thread:$0]  %s4561_s9, 64, %s120_s29, [#allocation16]  }
  0x53   :  { %s4011_s25 = smov [#allocation18]   ;;  %s4012_s30 = smov [#allocation21]  }
  0x54   :  { %s138_s4 = sshll.u32 %s4011_s25, 4  ;;  %s162_s2 = sshll.u32 %s4012_s30, 4  ;;  %s139_s4 = int_to_ptr.vmem [resolvable:$true] %s138_s4  ;;  %s4178_s2 = int_to_ptr.vmem [resolvable:$true] %s162_s2 }
  0x55   :  { %s3747_s0 = scalar_lea.hbm %s4563_s11, 4096 }
  0x56   :  { %p3748_p4 = scmp.ne.s32.totalorder %s4563_s11, %s3747_s0  ;;  %p3751_p5 = scmp.lt.u32.totalorder %s3747_s0, %s4563_s11 }
  0x58   :  { %p3753_p6 = pnand %p3751_p5, %p3748_p4 }
  0x5a   :  { %3756 = shalt.err (!%p3753_p6)
}
  0x5b   :  { %s3757_s9 = scalar_lea.vmem %s139_s4, 4096  ;;  %p3762_p8 = scmp.lt.s32.totalorder %s139_s4, %s139_s4 }
  0x5c   :  { %p3758_p7 = scmp.ne.s32.totalorder %s139_s4, %s3757_s9  ;;  %p3763_p9 = scmp.lt.s32.totalorder %s3757_s9, %s3757_s9 }
  0x5e   :  { %p3764_p10 = por %p3763_p9, %p3762_p8 }
  0x60   :  { %p3765_p11 = pnand %p3764_p10, %p3758_p7 }
  0x62   :  { %3768 = shalt.err (!%p3765_p11)
}
  0x63   :  { %s4576_s29 = smov 64   ;;  %s4014_s23 = smov 4  }
  0x64   :  { %144 = dma.hbm_to_vmem [thread:$0]  %s4563_s11, 4096, %s139_s4, [#allocation19], %s4576_s29, %s4576_s29, %s4014_s23  }
  0x65   :  { %s3769_s26 = scalar_lea.hbm %s4566_s14, 4096 }
  0x66   :  { %p3770_p12 = scmp.ne.s32.totalorder %s4566_s14, %s3769_s26  ;;  %p3773_p13 = scmp.lt.u32.totalorder %s3769_s26, %s4566_s14 }
  0x68   :  { %p3775_p0 = pnand %p3773_p13, %p3770_p12 }
  0x6a   :  { %3778 = shalt.err (!%p3775_p0)
}
  0x6b   :  { %s3779_s22 = scalar_lea.vmem %s4178_s2, 4096  ;;  %p3784_p2 = scmp.lt.s32.totalorder %s4178_s2, %s4178_s2 }
  0x6c   :  { %p3780_p1 = scmp.ne.s32.totalorder %s4178_s2, %s3779_s22  ;;  %p3785_p3 = scmp.lt.s32.totalorder %s3779_s22, %s3779_s22 }
  0x6e   :  { %p3786_p4 = por %p3785_p3, %p3784_p2 }
  0x70   :  { %p3787_p5 = pnand %p3786_p4, %p3780_p1 }
  0x72   :  { %3790 = shalt.err (!%p3787_p5)
}
  0x73   :  { %s4015_s11 = smov 512   ;;  %s4016_s4 = smov 32  }
  0x74   :  { %168 = dma.hbm_to_vmem [thread:$0]  %s4566_s14, 4096, %s4178_s2, [#allocation22], %s4015_s11, %s4015_s11, %s4016_s4  }
  0x75   :  { %s4017_s7 = smov [#allocation24]   ;;  %s4018_s25 = smov [#allocation4]  }
  0x76   :  { %s184_s27 = sshll.u32 %s4017_s7, 4  ;;  %s40_s30 = sshll.u32 %s4018_s25, 4  ;;  %s185_s27 = int_to_ptr.vmem [resolvable:$true] %s184_s27  ;;  %s4212_s30 = int_to_ptr.vmem [resolvable:$true] %s40_s30 }
  0x77   :  { %s3791_s0 = scalar_lea.hbm %s4568_s16, 8192 }
  0x78   :  { %p3792_p6 = scmp.ne.s32.totalorder %s4568_s16, %s3791_s0  ;;  %p3795_p7 = scmp.lt.u32.totalorder %s3791_s0, %s4568_s16 }
  0x7a   :  { %p3797_p8 = pnand %p3795_p7, %p3792_p6 }
  0x7c   :  { %3800 = shalt.err (!%p3797_p8)
}
  0x7d   :  { %s3801_s14 = scalar_lea.vmem %s185_s27, 8192  ;;  %p3806_p10 = scmp.lt.s32.totalorder %s185_s27, %s185_s27 }
  0x7e   :  { %p3802_p9 = scmp.ne.s32.totalorder %s185_s27, %s3801_s14  ;;  %p3807_p11 = scmp.lt.s32.totalorder %s3801_s14, %s3801_s14 }
  0x80   :  { %p3808_p12 = por %p3807_p11, %p3806_p10 }
  0x82   :  { %p3809_p13 = pnand %p3808_p12, %p3802_p9 }
  0x84   :  { %3812 = shalt.err (!%p3809_p13)
}
  0x85   :  { %190 = dma.hbm_to_vmem [thread:$0]  %s4568_s16, 8192, %s185_s27, [#allocation25], %s4015_s11, %s4015_s11, %s4016_s4  }
  0x86   :  { %s4582_s25 = sld [smem:[#allocation36_spill]] }
  0x8c   :  { %s3813_s26 = scalar_lea.hbm %s4582_s25, 8192 }
  0x8d   :  { %p3814_p0 = scmp.ne.s32.totalorder %s4582_s25, %s3813_s26  ;;  %p3817_p1 = scmp.lt.u32.totalorder %s3813_s26, %s4582_s25 }
  0x8f   :  { %p3819_p2 = pnand %p3817_p1, %p3814_p0 }
  0x91   :  { %3822 = shalt.err (!%p3819_p2)
}
  0x92   :  { %s3823_s1 = scalar_lea.vmem %s4212_s30, 8192  ;;  %p3828_p4 = scmp.lt.s32.totalorder %s4212_s30, %s4212_s30 }
  0x93   :  { %p3824_p3 = scmp.ne.s32.totalorder %s4212_s30, %s3823_s1  ;;  %p3829_p5 = scmp.lt.s32.totalorder %s3823_s1, %s3823_s1 }
  0x95   :  { %p3830_p6 = por %p3829_p5, %p3828_p4 }
  0x97   :  { %p3831_p7 = pnand %p3830_p6, %p3824_p3 }
  0x99   :  { %3834 = shalt.err (!%p3831_p7)
}
  0x9a   :  { %46 = dma.hbm_to_vmem [thread:$0]  %s4582_s25, 8192, %s4212_s30, [#allocation5], %s4009_s21, %s4009_s21, %s4010_s3  }
  0x9b   :  { %s4019_s4 = smov [#allocation8]   ;;  %s4020_s22 = smov [#allocation11]  }
  0x9c   :  { %s63_s27 = sshll.u32 %s4019_s4, 4  ;;  %s82_s14 = sshll.u32 %s4020_s22, 4  ;;  %s64_s27 = int_to_ptr.vmem [resolvable:$true] %s63_s27  ;;  %s4246_s14 = int_to_ptr.vmem [resolvable:$true] %s82_s14 }
  0x9d   :  { %s4583_s9 = sld [smem:[#allocation38_spill]] }
  0xa3   :  { %s3835_s7 = scalar_lea.hbm %s4583_s9, 64 }
  0xa4   :  { %p3836_p8 = scmp.ne.s32.totalorder %s4583_s9, %s3835_s7  ;;  %p3839_p9 = scmp.lt.u32.totalorder %s3835_s7, %s4583_s9 }
  0xa6   :  { %p3841_p10 = pnand %p3839_p9, %p3836_p8 }
  0xa8   :  { %3844 = shalt.err (!%p3841_p10)
}
  0xa9   :  { %s3845_s21 = scalar_lea.vmem %s64_s27, 64  ;;  %p3850_p12 = scmp.lt.s32.totalorder %s64_s27, %s64_s27 }
  0xaa   :  { %p3846_p11 = scmp.ne.s32.totalorder %s64_s27, %s3845_s21  ;;  %p3851_p13 = scmp.lt.s32.totalorder %s3845_s21, %s3845_s21 }
  0xac   :  { %p3852_p0 = por %p3851_p13, %p3850_p12 }
  0xae   :  { %p3853_p1 = pnand %p3852_p0, %p3846_p11 }
  0xb0   :  { %3856 = shalt.err (!%p3853_p1)
}
  0xb1   :  { %66 = dma.hbm_to_vmem [thread:$0]  %s4583_s9, 64, %s64_s27, [#allocation7]  }
  0xb2   :  { %s3857_s1 = scalar_lea.hbm %s4557_s5, 4096 }
  0xb3   :  { %p3858_p2 = scmp.ne.s32.totalorder %s4557_s5, %s3857_s1  ;;  %p3861_p3 = scmp.lt.u32.totalorder %s3857_s1, %s4557_s5 }
  0xb5   :  { %p3863_p4 = pnand %p3861_p3, %p3858_p2 }
  0xb7   :  { %3866 = shalt.err (!%p3863_p4)
}
  0xb8   :  { %s3867_s2 = scalar_lea.vmem %s4246_s14, 4096  ;;  %p3872_p6 = scmp.lt.s32.totalorder %s4246_s14, %s4246_s14 }
  0xb9   :  { %p3868_p5 = scmp.ne.s32.totalorder %s4246_s14, %s3867_s2  ;;  %p3873_p7 = scmp.lt.s32.totalorder %s3867_s2, %s3867_s2 }
  0xbb   :  { %p3874_p8 = por %p3873_p7, %p3872_p6 }
  0xbd   :  { %p3875_p9 = pnand %p3874_p8, %p3868_p5 }
  0xbf   :  { %3878 = shalt.err (!%p3875_p9)
}
  0xc0   :  { %s4584_s27 = smov 64   ;;  %s4021_s7 = smov [#allocation14]  }
  0xc1   :  { %88 = dma.hbm_to_vmem [thread:$0]  %s4557_s5, 4096, %s4246_s14, [#allocation10], %s4584_s27, %s4584_s27, %s4014_s23  }
  0xc2   :  { %s109_s26 = sshll.u32 %s4021_s7, 4  ;;  %s4022_s28 = smov [#allocation17]   ;;  %s110_s26 = int_to_ptr.vmem [resolvable:$true] %s109_s26 }
  0xc3   :  { %s129_s29 = sshll.u32 %s4022_s28, 4  ;;  %s3879_s3 = scalar_lea.hbm %s4560_s8, 64  ;;  %s130_s29 = int_to_ptr.vmem [resolvable:$true] %s129_s29 }
  0xc4   :  { %p3880_p10 = scmp.ne.s32.totalorder %s4560_s8, %s3879_s3  ;;  %p3883_p11 = scmp.lt.u32.totalorder %s3879_s3, %s4560_s8 }
  0xc6   :  { %p3885_p12 = pnand %p3883_p11, %p3880_p10 }
  0xc8   :  { %3888 = shalt.err (!%p3885_p12)
}
  0xc9   :  { %s3889_s5 = scalar_lea.vmem %s110_s26, 64  ;;  %p3894_p0 = scmp.lt.s32.totalorder %s110_s26, %s110_s26 }
  0xca   :  { %p3890_p13 = scmp.ne.s32.totalorder %s110_s26, %s3889_s5  ;;  %p3895_p1 = scmp.lt.s32.totalorder %s3889_s5, %s3889_s5 }
  0xcc   :  { %p3896_p2 = por %p3895_p1, %p3894_p0 }
  0xce   :  { %p3897_p3 = pnand %p3896_p2, %p3890_p13 }
  0xd0   :  { %3900 = shalt.err (!%p3897_p3)
}
  0xd1   :  { %112 = dma.hbm_to_vmem [thread:$0]  %s4560_s8, 64, %s110_s26, [#allocation13]  }
  0xd2   :  { %s3901_s4 = scalar_lea.hbm %s4562_s10, 64 }
  0xd3   :  { %p3902_p4 = scmp.ne.s32.totalorder %s4562_s10, %s3901_s4  ;;  %p3905_p5 = scmp.lt.u32.totalorder %s3901_s4, %s4562_s10 }
  0xd5   :  { %p3907_p6 = pnand %p3905_p5, %p3902_p4 }
  0xd7   :  { %3910 = shalt.err (!%p3907_p6)
}
  0xd8   :  { %s3911_s9 = scalar_lea.vmem %s130_s29, 64  ;;  %p3916_p8 = scmp.lt.s32.totalorder %s130_s29, %s130_s29 }
  0xd9   :  { %p3912_p7 = scmp.ne.s32.totalorder %s130_s29, %s3911_s9  ;;  %p3917_p9 = scmp.lt.s32.totalorder %s3911_s9, %s3911_s9 }
  0xdb   :  { %p3918_p10 = por %p3917_p9, %p3916_p8 }
  0xdd   :  { %p3919_p11 = pnand %p3918_p10, %p3912_p7 }
  0xdf   :  { %3922 = shalt.err (!%p3919_p11)
}
  0xe0   :  { %132 = dma.hbm_to_vmem [thread:$0]  %s4562_s10, 64, %s130_s29, [#allocation16]  }
  0xe1   :  { %s4023_s26 = smov [#allocation20]   ;;  %s4024_s0 = smov [#allocation23]  }
  0xe2   :  { %s151_s28 = sshll.u32 %s4023_s26, 4  ;;  %s175_s21 = sshll.u32 %s4024_s0, 4  ;;  %s152_s28 = int_to_ptr.vmem [resolvable:$true] %s151_s28  ;;  %s176_s21 = int_to_ptr.vmem [resolvable:$true] %s175_s21 }
  0xe3   :  { %s3923_s25 = scalar_lea.hbm %s4564_s12, 16 }
  0xe4   :  { %p3924_p12 = scmp.ne.s32.totalorder %s4564_s12, %s3923_s25  ;;  %p3927_p13 = scmp.lt.u32.totalorder %s3923_s25, %s4564_s12 }
  0xe6   :  { %p3929_p0 = pnand %p3927_p13, %p3924_p12 }
  0xe8   :  { %3932 = shalt.err (!%p3929_p0)
}
  0xe9   :  { %s3933_s10 = scalar_lea.vmem %s152_s28, 16  ;;  %s3937_s29 = scalar_lea.vmem %s152_s28, 32 }
  0xea   :  { %p3934_p1 = scmp.ne.s32.totalorder %s152_s28, %s3933_s10  ;;  %p3938_p2 = scmp.lt.s32.totalorder %s152_s28, %s152_s28 }
  0xeb   :  { %p3939_p3 = scmp.lt.s32.totalorder %s3937_s29, %s3933_s10 }
  0xed   :  { %p3940_p4 = por %p3939_p3, %p3938_p2 }
  0xef   :  { %p3941_p5 = pnand %p3940_p4, %p3934_p1 }
  0xf1   :  { %3944 = shalt.err (!%p3941_p5)
}
  0xf2   :  { %154 = dma.hbm_to_vmem [thread:$0]  %s4564_s12, 16, %s152_s28, [#allocation19]  }
  0xf3   :  { %s3945_s22 = scalar_lea.hbm %s4567_s15, 128 }
  0xf4   :  { %p3946_p6 = scmp.ne.s32.totalorder %s4567_s15, %s3945_s22  ;;  %p3949_p7 = scmp.lt.u32.totalorder %s3945_s22, %s4567_s15 }
  0xf6   :  { %p3951_p8 = pnand %p3949_p7, %p3946_p6 }
  0xf8   :  { %3954 = shalt.err (!%p3951_p8)
}
  0xf9   :  { %s3955_s8 = scalar_lea.vmem %s176_s21, 128  ;;  %p3960_p10 = scmp.lt.s32.totalorder %s176_s21, %s176_s21 }
  0xfa   :  { %p3956_p9 = scmp.ne.s32.totalorder %s176_s21, %s3955_s8  ;;  %p3961_p11 = scmp.lt.s32.totalorder %s3955_s8, %s3955_s8 }
  0xfc   :  { %p3962_p12 = por %p3961_p11, %p3960_p10 }
  0xfe   :  { %p3963_p13 = pnand %p3962_p12, %p3956_p9 }
 0x100   :  { %3966 = shalt.err (!%p3963_p13)
}
 0x101   :  { %178 = dma.hbm_to_vmem [thread:$0]  %s4567_s15, 128, %s176_s21, [#allocation22]  }
 0x102   :  { %s4025_s26 = smov [#allocation26]   ;;  %s3967_s30 = scalar_lea.hbm %s4569_s17, 128 }
 0x103   :  { %s197_s28 = sshll.u32 %s4025_s26, 4  ;;  %p3968_p0 = scmp.ne.s32.totalorder %s4569_s17, %s3967_s30  ;;  %s198_s28 = int_to_ptr.vmem [resolvable:$true] %s197_s28 }
 0x104   :  { %p3971_p1 = scmp.lt.u32.totalorder %s3967_s30, %s4569_s17 }
 0x106   :  { %p3973_p2 = pnand %p3971_p1, %p3968_p0 }
 0x108   :  { %3976 = shalt.err (!%p3973_p2)
}
 0x109   :  { %s3977_s23 = scalar_lea.vmem %s198_s28, 128  ;;  %p3982_p4 = scmp.lt.s32.totalorder %s198_s28, %s198_s28 }
 0x10a   :  { %p3978_p3 = scmp.ne.s32.totalorder %s198_s28, %s3977_s23  ;;  %p3983_p5 = scmp.lt.s32.totalorder %s3977_s23, %s3977_s23 }
 0x10c   :  { %p3984_p6 = por %p3983_p5, %p3982_p4 }
 0x10e   :  { %p3985_p7 = pnand %p3984_p6, %p3978_p3 }
 0x110   :  { %3988 = shalt.err (!%p3985_p7)
}
 0x111   :  { %200 = dma.hbm_to_vmem [thread:$0]  %s4569_s17, 128, %s198_s28, [#allocation25]  }
 0x112   :  { %3989 = dma.done.wait [#allocation5], 8192  }
 0x113   :  { %3990 = vsyncadd [#allocation5], 4294959104 }
 0x114   :  { %3991 = dma.done.wait [#allocation7], 128  }
 0x115   :  { %3992 = vsyncadd [#allocation7], 4294967168 }
 0x116   :  { %3993 = dma.done.wait [#allocation10], 4160  }
 0x117   :  { %3994 = vsyncadd [#allocation10], 4294963136 }
 0x118   :  { %3995 = dma.done.wait [#allocation13], 4160  }
 0x119   :  { %3996 = vsyncadd [#allocation13], 4294963136 }
 0x11a   :  { %3997 = dma.done.wait [#allocation16], 128  }
 0x11b   :  { %3998 = vsyncadd [#allocation16], 4294967168 }
 0x11c   :  { %3999 = dma.done.wait [#allocation19], 4112  }
 0x11d   :  { %4000 = vsyncadd [#allocation19], 4294963184 }
 0x11e   :  { %4001 = dma.done.wait [#allocation22], 4224  }
 0x11f   :  { %4002 = vsyncadd [#allocation22], 4294963072 }
 0x120   :  { %4003 = dma.done.wait [#allocation25], 8320  }
 0x121   :  { %4004 = vsyncadd [#allocation25], 4294958976  ;;  %v3451_v0 = vld [vmem:[#allocation4 + $0x4] ss:$16 sps:$4 sm:$0xff]   ;;  %v3453_v1 = vld [vmem:[#allocation4 + $0xc] ss:$16 sps:$4 sm:$0xff]  }
 0x122   :  { %665 = vmatprep.subr.bf16.mxu0 %v3451_v0  ;;  %v3455_v2 = vld [vmem:[#allocation4] ss:$16 sps:$4 sm:$0xff]   ;;  %v3456_v3 = vld [vmem:[#allocation4 + $0x8] ss:$16 sps:$4 sm:$0xff]   ;;  %708 = vmatprep.subr.bf16.mxu1 %v3453_v1  ;;  %v3457_v4 = vld [vmem:[#allocation4 + $0x24] ss:$16 sps:$4 sm:$0xff]  }
 0x123   :  { %666 = vmatpush1.bf16.msra.mxu0 %v3455_v2  ;;  %709 = vmatpush1.bf16.msra.mxu1 %v3456_v3  ;;  %v3459_v5 = vld [vmem:[#allocation4 + $0x2c] ss:$16 sps:$4 sm:$0xff]   ;;  %v3461_v6 = vld [vmem:[#allocation4 + $0x20] ss:$16 sps:$4 sm:$0xff]   ;;  %v3462_v7 = vld [vmem:[#allocation4 + $0x28] ss:$16 sps:$4 sm:$0xff]  }
 0x124   :  { %667 = vmatprep.subr.bf16.mxu0 %v3457_v4  ;;  %710 = vmatprep.subr.bf16.mxu1 %v3459_v5  ;;  %v3463_v8 = vld [vmem:[#allocation4 + $0x44] ss:$16 sps:$4 sm:$0xff]   ;;  %v3465_v9 = vld [vmem:[#allocation4 + $0x4c] ss:$16 sps:$4 sm:$0xff]   ;;  %v3467_v10 = vld [vmem:[#allocation4 + $0x40] ss:$16 sps:$4 sm:$0xff]  }
 0x125   :  { %v3468_v11 = vld [vmem:[#allocation4 + $0x48] ss:$16 sps:$4 sm:$0xff]   ;;  %v3469_v12 = vld [vmem:[#allocation4 + $0x64] ss:$16 sps:$4 sm:$0xff]   ;;  %v3471_v13 = vld [vmem:[#allocation4 + $0x6c] ss:$16 sps:$4 sm:$0xff]  }
 0x126   :  { %v3473_v14 = vld [vmem:[#allocation4 + $0x60] ss:$16 sps:$4 sm:$0xff]   ;;  %v3474_v15 = vld [vmem:[#allocation4 + $0x68] ss:$16 sps:$4 sm:$0xff]   ;;  %v3475_v16 = vld [vmem:[#allocation4 + $0x84] ss:$16 sps:$4 sm:$0xff]  }
 0x127   :  { %668 = vmatpush1.bf16.msra.mxu0 %v3461_v6  ;;  %711 = vmatpush1.bf16.msra.mxu1 %v3462_v7  ;;  %v3477_v17 = vld [vmem:[#allocation4 + $0x8c] ss:$16 sps:$4 sm:$0xff]   ;;  %v3479_v18 = vld [vmem:[#allocation4 + $0x80] ss:$16 sps:$4 sm:$0xff]   ;;  %v3480_v19 = vld [vmem:[#allocation4 + $0x88] ss:$16 sps:$4 sm:$0xff]  }
 0x128   :  { %669 = vmatprep.subr.bf16.mxu0 %v3463_v8  ;;  %712 = vmatprep.subr.bf16.mxu1 %v3465_v9  ;;  %v3481_v20 = vld [vmem:[#allocation4 + $0xa4] ss:$16 sps:$4 sm:$0xff]   ;;  %v3483_v21 = vld [vmem:[#allocation4 + $0xac] ss:$16 sps:$4 sm:$0xff]   ;;  %v3485_v22 = vld [vmem:[#allocation4 + $0xa0] ss:$16 sps:$4 sm:$0xff]  }
 0x129   :  { %v3486_v23 = vld [vmem:[#allocation4 + $0xa8] ss:$16 sps:$4 sm:$0xff]   ;;  %v3487_v24 = vld [vmem:[#allocation4 + $0xc4] ss:$16 sps:$4 sm:$0xff]   ;;  %v3489_v25 = vld [vmem:[#allocation4 + $0xcc] ss:$16 sps:$4 sm:$0xff]  }
 0x12a   :  { %v3491_v26 = vld [vmem:[#allocation4 + $0xc0] ss:$16 sps:$4 sm:$0xff]   ;;  %v3492_v27 = vld [vmem:[#allocation4 + $0xc8] ss:$16 sps:$4 sm:$0xff]   ;;  %v3493_v28 = vld [vmem:[#allocation4 + $0xe4] ss:$16 sps:$4 sm:$0xff]  }
 0x12b   :  { %670 = vmatpush1.bf16.msra.mxu0 %v3467_v10  ;;  %713 = vmatpush1.bf16.msra.mxu1 %v3468_v11  ;;  %v3495_v29 = vld [vmem:[#allocation4 + $0xec] ss:$16 sps:$4 sm:$0xff]   ;;  %v3497_v30 = vld [vmem:[#allocation4 + $0xe0] ss:$16 sps:$4 sm:$0xff]   ;;  %v3498_v31 = vld [vmem:[#allocation4 + $0xe8] ss:$16 sps:$4 sm:$0xff]  }
 0x12c   :  { %671 = vmatprep.subr.bf16.mxu0 %v3469_v12  ;;  %714 = vmatprep.subr.bf16.mxu1 %v3471_v13  ;;  %v3499_v32 = vld [vmem:[#allocation4 + $0x104] ss:$16 sps:$4 sm:$0xff]   ;;  %v3501_v33 = vld [vmem:[#allocation4 + $0x10c] ss:$16 sps:$4 sm:$0xff]   ;;  %v3503_v34 = vld [vmem:[#allocation4 + $0x100] ss:$16 sps:$4 sm:$0xff]  }
 0x12d   :  { %v3504_v35 = vld [vmem:[#allocation4 + $0x108] ss:$16 sps:$4 sm:$0xff]   ;;  %v3505_v36 = vld [vmem:[#allocation4 + $0x124] ss:$16 sps:$4 sm:$0xff]   ;;  %v3507_v37 = vld [vmem:[#allocation4 + $0x12c] ss:$16 sps:$4 sm:$0xff]  }
 0x12e   :  { %v3509_v38 = vld [vmem:[#allocation4 + $0x120] ss:$16 sps:$4 sm:$0xff]   ;;  %v3510_v39 = vld [vmem:[#allocation4 + $0x128] ss:$16 sps:$4 sm:$0xff]   ;;  %v3511_v40 = vld [vmem:[#allocation4 + $0x144] ss:$16 sps:$4 sm:$0xff]  }
 0x12f   :  { %672 = vmatpush1.bf16.msra.mxu0 %v3473_v14  ;;  %715 = vmatpush1.bf16.msra.mxu1 %v3474_v15  ;;  %v3513_v41 = vld [vmem:[#allocation4 + $0x14c] ss:$16 sps:$4 sm:$0xff]   ;;  %v3515_v42 = vld [vmem:[#allocation4 + $0x140] ss:$16 sps:$4 sm:$0xff]   ;;  %v3516_v43 = vld [vmem:[#allocation4 + $0x148] ss:$16 sps:$4 sm:$0xff]  }
 0x130   :  { %673 = vmatprep.subr.bf16.mxu0 %v3475_v16  ;;  %716 = vmatprep.subr.bf16.mxu1 %v3477_v17  ;;  %v3517_v44 = vld [vmem:[#allocation4 + $0x164] ss:$16 sps:$4 sm:$0xff]   ;;  %v3519_v45 = vld [vmem:[#allocation4 + $0x16c] ss:$16 sps:$4 sm:$0xff]   ;;  %s4585_s29 = sld [smem:[#allocation35_spill]]  ;;  %vm2824_vm0 = vcmask 523264  }
 0x131   :  { %v3521_v47 = vld [vmem:[#allocation4 + $0x160] ss:$16 sps:$4 sm:$0xff]   ;;  %v3522_v48 = vld [vmem:[#allocation4 + $0x168] ss:$16 sps:$4 sm:$0xff]   ;;  %v3523_v50 = vld [vmem:[#allocation4 + $0x184] ss:$16 sps:$4 sm:$0xff]  }
 0x132   :  { %v3525_v52 = vld [vmem:[#allocation4 + $0x18c] ss:$16 sps:$4 sm:$0xff]   ;;  %v3527_v53 = vld [vmem:[#allocation4 + $0x180] ss:$16 sps:$4 sm:$0xff]   ;;  %v3528_v54 = vld [vmem:[#allocation4 + $0x188] ss:$16 sps:$4 sm:$0xff]  }
 0x133   :  { %674 = vmatpush1.bf16.msra.mxu0 %v3479_v18  ;;  %717 = vmatpush1.bf16.msra.mxu1 %v3480_v19  ;;  %v3529_v55 = vld [vmem:[#allocation4 + $0x1a4] ss:$16 sps:$4 sm:$0xff]   ;;  %v3531_v56 = vld [vmem:[#allocation4 + $0x1ac] ss:$16 sps:$4 sm:$0xff]   ;;  %v3533_v57 = vld [vmem:[#allocation4 + $0x1a0] ss:$16 sps:$4 sm:$0xff]  }
 0x134   :  { %675 = vmatprep.subr.bf16.mxu0 %v3481_v20  ;;  %718 = vmatprep.subr.bf16.mxu1 %v3483_v21  ;;  %v3534_v58 = vld [vmem:[#allocation4 + $0x1a8] ss:$16 sps:$4 sm:$0xff]   ;;  %v3535_v59 = vld [vmem:[#allocation4 + $0x1c4] ss:$16 sps:$4 sm:$0xff]   ;;  %v3537_v60 = vld [vmem:[#allocation4 + $0x1cc] ss:$16 sps:$4 sm:$0xff]  }
 0x135   :  { %v3539_v61 = vld [vmem:[#allocation4 + $0x1c0] ss:$16 sps:$4 sm:$0xff]   ;;  %v3540_v62 = vld [vmem:[#allocation4 + $0x1c8] ss:$16 sps:$4 sm:$0xff]   ;;  %v3541_v63 = vld [vmem:[#allocation4 + $0x1e4] ss:$16 sps:$4 sm:$0xff]  }
 0x136   :  { %v276_v46 = vld [vmem:[%s4585_s29 + $0x8] sm:$0xff]  ;;  %v278_v49 = vld [vmem:[%s4585_s29 + $0x18] sm:$0xff]  ;;  %v3545_v1 = vld [vmem:[#allocation4 + $0x1e0] ss:$16 sps:$4 sm:$0xff]   ;;  %v4026_v18 = vmov 0  }
 0x137   :  { %676 = vmatpush1.bf16.msra.mxu0 %v3485_v22  ;;  %719 = vmatpush1.bf16.msra.mxu1 %v3486_v23  ;;  %v280_v51 = vpack.c.bf16 %v278_v49, %v276_v46  ;;  %v3543_v0 = vld [vmem:[#allocation4 + $0x1ec] ss:$16 sps:$4 sm:$0xff]   ;;  %v3546_v2 = vld [vmem:[#allocation4 + $0x1e8] ss:$16 sps:$4 sm:$0xff]   ;;  %v275_v3 = vld [vmem:[%s4585_s29] sm:$0xff] }
 0x138   :  { %677 = vmatprep.subr.bf16.mxu0 %v3487_v24  ;;  %720 = vmatprep.subr.bf16.mxu1 %v3489_v25  ;;  %v277_v4 = vld [vmem:[%s4585_s29 + $0x10] sm:$0xff]  ;;  %v3552_v6 = vld [vmem:[#allocation12 + $0xc] ss:$16 sps:$4 sm:$0xff]   ;;  %v3547_v8 = vld [vmem:[#allocation12] ss:$16 sps:$4 sm:$0xff]  }
 0x139   :  { %697 = vmatprep.mubr.bf16.mxu0 %v280_v51  ;;  %740 = vmatprep.mubr.bf16.mxu1 %v280_v51  ;;  %v3549_v5 = vld [vmem:[#allocation12 + $0x4] ss:$16 sps:$4 sm:$0xff]   ;;  %v279_v7 = vpack.c.bf16 %v277_v4, %v275_v3  ;;  %v3550_v9 = vld [vmem:[#allocation12 + $0x8] ss:$16 sps:$4 sm:$0xff]   ;;  %v3558_v11 = vld [vmem:[#allocation12 + $0x2c] ss:$16 sps:$4 sm:$0xff]  }
 0x13a   :  { %v3555_v10 = vld [vmem:[#allocation12 + $0x24] ss:$16 sps:$4 sm:$0xff]   ;;  %v3553_v12 = vld [vmem:[#allocation12 + $0x20] ss:$16 sps:$4 sm:$0xff]   ;;  %v3556_v13 = vld [vmem:[#allocation12 + $0x28] ss:$16 sps:$4 sm:$0xff]  }
 0x13b   :  { %678 = vmatpush1.bf16.msra.mxu0 %v3491_v26  ;;  %721 = vmatpush1.bf16.msra.mxu1 %v3492_v27  ;;  %v3561_v14 = vld [vmem:[#allocation12 + $0x44] ss:$16 sps:$4 sm:$0xff]   ;;  %v3564_v15 = vld [vmem:[#allocation12 + $0x4c] ss:$16 sps:$4 sm:$0xff]   ;;  %v3559_v16 = vld [vmem:[#allocation12 + $0x40] ss:$16 sps:$4 sm:$0xff]  }
 0x13c   :  { %679 = vmatprep.subr.bf16.mxu0 %v3493_v28  ;;  %722 = vmatprep.subr.bf16.mxu1 %v3495_v29  ;;  %v3562_v17 = vld [vmem:[#allocation12 + $0x48] ss:$16 sps:$4 sm:$0xff]   ;;  %v3567_v19 = vld [vmem:[#allocation12 + $0x64] ss:$16 sps:$4 sm:$0xff]   ;;  %v3570_v20 = vld [vmem:[#allocation12 + $0x6c] ss:$16 sps:$4 sm:$0xff]  }
 0x13d   :  { %v3565_v21 = vld [vmem:[#allocation12 + $0x60] ss:$16 sps:$4 sm:$0xff]   ;;  %v3568_v22 = vld [vmem:[#allocation12 + $0x68] ss:$16 sps:$4 sm:$0xff]   ;;  %v3573_v23 = vld [vmem:[#allocation12 + $0x84] ss:$16 sps:$4 sm:$0xff]  }
 0x13e   :  { %v3576_v24 = vld [vmem:[#allocation12 + $0x8c] ss:$16 sps:$4 sm:$0xff]   ;;  %v3571_v25 = vld [vmem:[#allocation12 + $0x80] ss:$16 sps:$4 sm:$0xff]   ;;  %v3574_v26 = vld [vmem:[#allocation12 + $0x88] ss:$16 sps:$4 sm:$0xff]  }
 0x13f   :  { %680 = vmatpush1.bf16.msra.mxu0 %v3497_v30  ;;  %723 = vmatpush1.bf16.msra.mxu1 %v3498_v31  ;;  %v3579_v27 = vld [vmem:[#allocation12 + $0xa4] ss:$16 sps:$4 sm:$0xff]   ;;  %v3582_v28 = vld [vmem:[#allocation12 + $0xac] ss:$16 sps:$4 sm:$0xff]   ;;  %v3577_v29 = vld [vmem:[#allocation12 + $0xa0] ss:$16 sps:$4 sm:$0xff]  }
 0x140   :  { %681 = vmatprep.subr.bf16.mxu0 %v3499_v32  ;;  %724 = vmatprep.subr.bf16.mxu1 %v3501_v33  ;;  %v3580_v30 = vld [vmem:[#allocation12 + $0xa8] ss:$16 sps:$4 sm:$0xff]   ;;  %v3585_v31 = vld [vmem:[#allocation12 + $0xc4] ss:$16 sps:$4 sm:$0xff]   ;;  %v3588_v32 = vld [vmem:[#allocation12 + $0xcc] ss:$16 sps:$4 sm:$0xff]  }
 0x141   :  { %v3583_v33 = vld [vmem:[#allocation12 + $0xc0] ss:$16 sps:$4 sm:$0xff]   ;;  %v3599_v46 = vld [vmem:[#allocation18 + $0x48] sm:$0xff]  }
 0x142   :  { %v3602_v49 = vld [vmem:[#allocation18 + $0x88] sm:$0xff]   ;;  %v3604_v51 = vld [vmem:[#allocation18 + $0xd0] sm:$0xff]  }
 0x143   :  { %682 = vmatpush1.bf16.msra.mxu0 %v3503_v34  ;;  %725 = vmatpush1.bf16.msra.mxu1 %v3504_v35  ;;  %v3586_v34 = vld [vmem:[#allocation12 + $0xc8] ss:$16 sps:$4 sm:$0xff]   ;;  %v3591_v35 = vld [vmem:[#allocation12 + $0xe4] ss:$16 sps:$4 sm:$0xff]   ;;  %v3620_v3 = vld [vmem:[#allocation18 + $0xf0] sm:$0xff]  }
 0x144   :  { %683 = vmatprep.subr.bf16.mxu0 %v3505_v36  ;;  %726 = vmatprep.subr.bf16.mxu1 %v3507_v37  ;;  %v3594_v36 = vld [vmem:[#allocation12 + $0xec] ss:$16 sps:$4 sm:$0xff]   ;;  %v3589_v37 = vld [vmem:[#allocation12 + $0xe0] ss:$16 sps:$4 sm:$0xff]  }
 0x145   :  { %v3621_v4 = vld [vmem:[#allocation18 + $0x30] sm:$0xff]  }
 0x147   :  { %684 = vmatpush1.bf16.msra.mxu0 %v3509_v38  ;;  %727 = vmatpush1.bf16.msra.mxu1 %v3510_v39  ;;  %v3592_v38 = vld [vmem:[#allocation12 + $0xe8] ss:$16 sps:$4 sm:$0xff]  }
 0x148   :  { %685 = vmatprep.subr.bf16.mxu0 %v3511_v40  ;;  %728 = vmatprep.subr.bf16.mxu1 %v3513_v41  ;;  %v779_v39 = vld [vmem:[%s4558_s6] sm:$0xff]  ;;  %v780_v40 = vld [vmem:[%s4558_s6 + $0x8] sm:$0xff] }
 0x149   :  { %v781_v41 = vpack.c.bf16 %v780_v40, %v779_v39 }
 0x14b   :  { %686 = vmatpush1.bf16.msra.mxu0 %v3515_v42  ;;  %729 = vmatpush1.bf16.msra.mxu1 %v3516_v43  ;;  %v3595_v42 = vld [vmem:[#allocation18 + $0x40] sm:$0xff]  }
 0x14c   :  { %687 = vmatprep.subr.bf16.mxu0 %v3517_v44  ;;  %730 = vmatprep.subr.bf16.mxu1 %v3519_v45  ;;  %v3596_v43 = vld [vmem:[#allocation18 + $0xc0] sm:$0xff]  }
 0x14d   :  { %v3597_v44 = vld [vmem:[#allocation18] sm:$0xff]  }
 0x14e   :  { %v3598_v45 = vld [vmem:[#allocation18 + $0x80] sm:$0xff]  }
 0x14f   :  { %688 = vmatpush1.bf16.msra.mxu0 %v3521_v47  ;;  %731 = vmatpush1.bf16.msra.mxu1 %v3522_v48  ;;  %v3600_v47 = vld [vmem:[#allocation18 + $0xc8] sm:$0xff]  }
 0x150   :  { %689 = vmatprep.subr.bf16.mxu0 %v3523_v50  ;;  %732 = vmatprep.subr.bf16.mxu1 %v3525_v52  ;;  %v3601_v48 = vld [vmem:[#allocation18 + $0x8] sm:$0xff]   ;;  %v3603_v50 = vld [vmem:[#allocation18 + $0x50] sm:$0xff]  }
 0x151   :  { %v3605_v52 = vld [vmem:[#allocation18 + $0x10] sm:$0xff]  }
 0x153   :  { %690 = vmatpush1.bf16.msra.mxu0 %v3527_v53  ;;  %733 = vmatpush1.bf16.msra.mxu1 %v3528_v54  ;;  %v3606_v53 = vld [vmem:[#allocation18 + $0x90] sm:$0xff]   ;;  %v3607_v54 = vld [vmem:[#allocation18 + $0x58] sm:$0xff]  }
 0x154   :  { %691 = vmatprep.subr.bf16.mxu0 %v3529_v55  ;;  %734 = vmatprep.subr.bf16.mxu1 %v3531_v56  ;;  %v3608_v55 = vld [vmem:[#allocation18 + $0xd8] sm:$0xff]  }
 0x155   :  { %v3609_v56 = vld [vmem:[#allocation18 + $0x18] sm:$0xff]  }
 0x157   :  { %692 = vmatpush1.bf16.msra.mxu0 %v3533_v57  ;;  %735 = vmatpush1.bf16.msra.mxu1 %v3534_v58  ;;  %v3610_v57 = vld [vmem:[#allocation18 + $0x98] sm:$0xff]   ;;  %v3611_v58 = vld [vmem:[#allocation18 + $0x60] sm:$0xff]  }
 0x158   :  { %693 = vmatprep.subr.bf16.mxu0 %v3535_v59  ;;  %736 = vmatprep.subr.bf16.mxu1 %v3537_v60  ;;  %v3612_v59 = vld [vmem:[#allocation18 + $0xe0] sm:$0xff]  }
 0x159   :  { %v3613_v60 = vld [vmem:[#allocation18 + $0x20] sm:$0xff]  }
 0x15b   :  { %694 = vmatpush1.bf16.msra.mxu0 %v3539_v61  ;;  %737 = vmatpush1.bf16.msra.mxu1 %v3540_v62  ;;  %v3614_v61 = vld [vmem:[#allocation18 + $0xa0] sm:$0xff]   ;;  %v3615_v62 = vld [vmem:[#allocation18 + $0x68] sm:$0xff]  }
 0x15c   :  { %695 = vmatprep.subr.bf16.mxu0 %v3541_v63  ;;  %738 = vmatprep.subr.bf16.mxu1 %v3543_v0  ;;  %v3616_v63 = vld [vmem:[#allocation18 + $0xe8] sm:$0xff]  }
 0x15d   :  { %v3617_v0 = vld [vmem:[#allocation18 + $0x28] sm:$0xff]  }
 0x15f   :  { %696 = vmatpush1.bf16.msra.mxu0 %v3545_v1  ;;  %739 = vmatpush1.bf16.msra.mxu1 %v3546_v2  ;;  %v3618_v1 = vld [vmem:[#allocation18 + $0xa8] sm:$0xff]   ;;  %v3619_v2 = vld [vmem:[#allocation18 + $0x70] sm:$0xff]  }
 0x160   :  { %974 = vmatprep.subr.bf16.mxu0 %v3549_v5  ;;  %1017 = vmatprep.subr.bf16.mxu1 %v3552_v6  ;;  %v3622_v5 = vld [vmem:[#allocation18 + $0xb0] sm:$0xff]   ;;  %v3623_v6 = vld [vmem:[#allocation18 + $0x78] sm:$0xff]  }
 0x162   :  { %698 = vmatmul.mubr.bf16.vlgmr.msra.gmra.mrb[0].mxu0 %v279_v7  ;;  %741 = vmatmul.mubr.bf16.vlgmr.msra.gmra.mrb[0].mxu1 %v279_v7  ;;  %v3624_v7 = vld [vmem:[#allocation18 + $0xf8] sm:$0xff]  }
 0x163   :  { %975 = vmatpush1.bf16.msra.mxu0 %v3547_v8  ;;  %1018 = vmatpush1.bf16.msra.mxu1 %v3550_v9  ;;  %v3625_v8 = vld [vmem:[#allocation18 + $0x38] sm:$0xff]  }
 0x164   :  { %976 = vmatprep.subr.bf16.mxu0 %v3555_v10  ;;  %1019 = vmatprep.subr.bf16.mxu1 %v3558_v11  ;;  %v3626_v9 = vld [vmem:[#allocation18 + $0xb8] sm:$0xff]  }
 0x165   :  { %1006 = vmatprep.mubr.bf16.mxu0 %v4026_v18  ;;  %1049 = vmatprep.mubr.bf16.mxu1 %v4026_v18  ;;  %v3627_v10 = vld [vmem:[#allocation11 + $0x40] sm:$0xff]  }
 0x166   :  { %v3628_v11 = vld [vmem:[#allocation11 + $0xc0] sm:$0xff]  }
 0x167   :  { %977 = vmatpush1.bf16.msra.mxu0 %v3553_v12  ;;  %1020 = vmatpush1.bf16.msra.mxu1 %v3556_v13  ;;  %v1089_v12 = vlaneseq }
 0x168   :  { %978 = vmatprep.subr.bf16.mxu0 %v3561_v14  ;;  %1021 = vmatprep.subr.bf16.mxu1 %v3564_v15 }
 0x169   :  { %v4360_v13 = vshrl.u32 %v1089_v12, 7 }
 0x16b   :  { %979 = vmatpush1.bf16.msra.mxu0 %v3559_v16  ;;  %1022 = vmatpush1.bf16.msra.mxu1 %v3562_v17  ;;  %v4363_v14 = vsub.s32 0, %v4360_v13  ;;  %v4366_v15 = vsub.s32 2, %v4360_v13  ;;  %v1087_v16 = vld [vmem:[#allocation6] sm:$0xf]  ;;  %v4369_v17 = vsub.s32 1, %v4360_v13 }
 0x16c   :  { %980 = vmatprep.subr.bf16.mxu0 %v3567_v19  ;;  %1023 = vmatprep.subr.bf16.mxu1 %v3570_v20  ;;  %v4372_v19 = vsub.s32 3, %v4360_v13  ;;  %v1117_v20 = vld [vmem:[#allocation8] sm:$0xf] }
 0x16f   :  { %981 = vmatpush1.bf16.msra.mxu0 %v3565_v21  ;;  %1024 = vmatpush1.bf16.msra.mxu1 %v3568_v22  ;;  %v1092_v21 = vrot.slane %v1087_v16, %v4363_v14  ;;  %v1100_v22 = vrot.slane %v1087_v16, %v4366_v15 }
 0x170   :  { %982 = vmatprep.subr.bf16.mxu0 %v3573_v23  ;;  %1025 = vmatprep.subr.bf16.mxu1 %v3576_v24  ;;  %v1147_v23 = vld [vmem:[#allocation9] sm:$0xf]  ;;  %v1096_v24 = vrot.slane %v1087_v16, %v4369_v17 }
 0x171   :  { %v1156_v39 = vrot.slane %v1147_v23, %v4369_v17 }
 0x173   :  { %983 = vmatpush1.bf16.msra.mxu0 %v3571_v25  ;;  %1026 = vmatpush1.bf16.msra.mxu1 %v3574_v26  ;;  %v1104_v25 = vrot.slane %v1087_v16, %v4372_v19  ;;  %v1122_v26 = vrot.slane %v1117_v20, %v4363_v14 }
 0x174   :  { %984 = vmatprep.subr.bf16.mxu0 %v3579_v27  ;;  %1027 = vmatprep.subr.bf16.mxu1 %v3582_v28  ;;  %v1130_v27 = vrot.slane %v1117_v20, %v4366_v15 }
 0x177   :  { %985 = vmatpush1.bf16.msra.mxu0 %v3577_v29  ;;  %1028 = vmatpush1.bf16.msra.mxu1 %v3580_v30  ;;  %v1126_v30 = vrot.slane %v1117_v20, %v4369_v17 }
 0x178   :  { %986 = vmatprep.subr.bf16.mxu0 %v3585_v31  ;;  %1029 = vmatprep.subr.bf16.mxu1 %v3588_v32  ;;  %v1134_v31 = vrot.slane %v1117_v20, %v4372_v19  ;;  %v1193_v20 = vld [vmem:[#allocation14] sm:$0xf] }
 0x17b   :  { %987 = vmatpush1.bf16.msra.mxu0 %v3583_v33  ;;  %1030 = vmatpush1.bf16.msra.mxu1 %v3586_v34  ;;  %v1152_v33 = vrot.slane %v1147_v23, %v4363_v14 }
 0x17c   :  { %988 = vmatprep.subr.bf16.mxu0 %v3591_v35  ;;  %1031 = vmatprep.subr.bf16.mxu1 %v3594_v36  ;;  %v1160_v35 = vrot.slane %v1147_v23, %v4366_v15 }
 0x17f   :  { %989 = vmatpush1.bf16.msra.mxu0 %v3589_v37  ;;  %1032 = vmatpush1.bf16.msra.mxu1 %v3592_v38 }
 0x180   :  { %3341 = vmatprep.subr.bf16.mxu0 %v3595_v42  ;;  %3363 = vmatprep.subr.bf16.mxu1 %v3596_v43 }
 0x182   :  { %1007 = vmatmul.mubr.bf16.vlgmr.msra.gmra.mrb[4].mxu0 %v781_v41  ;;  %1050 = vmatmul.mubr.bf16.vlgmr.msra.gmra.mrb[4].mxu1 %v781_v41  ;;  %v1164_v41 = vrot.slane %v1147_v23, %v4372_v19  ;;  %v1206_v23 = vrot.slane %v1193_v20, %v4366_v15 }
 0x183   :  { %3342 = vmatpush3.bf16.msra.mxu0 %v3597_v44  ;;  %3364 = vmatpush3.bf16.msra.mxu1 %v3598_v45 }
 0x184   :  { %3343 = vmatprep.subr.bf16.mxu0 %v3599_v46  ;;  %3365 = vmatprep.subr.bf16.mxu1 %v3600_v47 }
 0x187   :  { %3344 = vmatpush3.bf16.msra.mxu0 %v3601_v48  ;;  %3366 = vmatpush3.bf16.msra.mxu1 %v3602_v49 }
 0x188   :  { %3345 = vmatprep.subr.bf16.mxu0 %v3603_v50  ;;  %3367 = vmatprep.subr.bf16.mxu1 %v3604_v51 }
 0x18b   :  { %3346 = vmatpush3.bf16.msra.mxu0 %v3605_v52  ;;  %3368 = vmatpush3.bf16.msra.mxu1 %v3606_v53 }
 0x18c   :  { %3347 = vmatprep.subr.bf16.mxu0 %v3607_v54  ;;  %3369 = vmatprep.subr.bf16.mxu1 %v3608_v55 }
 0x18f   :  { %3348 = vmatpush3.bf16.msra.mxu0 %v3609_v56  ;;  %3370 = vmatpush3.bf16.msra.mxu1 %v3610_v57 }
 0x190   :  { %3349 = vmatprep.subr.bf16.mxu0 %v3611_v58  ;;  %3371 = vmatprep.subr.bf16.mxu1 %v3612_v59 }
 0x193   :  { %3350 = vmatpush3.bf16.msra.mxu0 %v3613_v60  ;;  %3372 = vmatpush3.bf16.msra.mxu1 %v3614_v61 }
 0x194   :  { %3351 = vmatprep.subr.bf16.mxu0 %v3615_v62  ;;  %3373 = vmatprep.subr.bf16.mxu1 %v3616_v63 }
 0x197   :  { %3352 = vmatpush3.bf16.msra.mxu0 %v3617_v0  ;;  %3374 = vmatpush3.bf16.msra.mxu1 %v3618_v1 }
 0x198   :  { %3353 = vmatprep.subr.bf16.mxu0 %v3619_v2  ;;  %3375 = vmatprep.subr.bf16.mxu1 %v3620_v3 }
 0x19b   :  { %3354 = vmatpush3.bf16.msra.mxu0 %v3621_v4  ;;  %3376 = vmatpush3.bf16.msra.mxu1 %v3622_v5 }
 0x19c   :  { %3355 = vmatprep.subr.bf16.mxu0 %v3623_v6  ;;  %3377 = vmatprep.subr.bf16.mxu1 %v3624_v7 }
 0x19f   :  { %3356 = vmatpush3.bf16.msra.mxu0 %v3625_v8  ;;  %3378 = vmatpush3.bf16.msra.mxu1 %v3626_v9 }
 0x1a0   :  { %3385 = vmatprep.subr.bf16.mxu0 %v3627_v10  ;;  %3407 = vmatprep.subr.bf16.mxu1 %v3628_v11 }
 0x235   :  { %v699_v28 = vpop.f32.mrb[0].mxu0  ;;  %v742_v29 = vpop.f32.mrb[0].mxu1 }
 0x236   :  { %v1109_v32 = vadd.f32 %v1092_v21, %v699_v28  ;;  %v1111_v34 = vadd.f32 %v1100_v22, %v742_v29  ;;  %v701_v36 = vpop.f32.mrb[1].mxu0  ;;  %v744_v37 = vpop.f32.mrb[1].mxu1 }
 0x237   :  { %v1110_v38 = vadd.f32 %v1096_v24, %v701_v36  ;;  %v1112_v40 = vadd.f32 %v1104_v25, %v744_v37  ;;  %v703_v42 = vpop.f32.mrb[2].mxu0  ;;  %v746_v43 = vpop.f32.mrb[2].mxu1 }
 0x238   :  { %v1139_v44 = vmul.f32 %v1122_v26, %v1109_v32  ;;  %v1141_v45 = vmul.f32 %v1130_v27, %v1111_v34  ;;  %v1113_v46 = vadd.f32 %v1092_v21, %v703_v42  ;;  %v1115_v47 = vadd.f32 %v1100_v22, %v746_v43  ;;  %v705_v48 = vpop.f32.mrb[3].mxu0  ;;  %v748_v49 = vpop.f32.mrb[3].mxu1  ;;  %v1223_v21 = vld [vmem:[#allocation15] sm:$0xf] }
 0x239   :  { %v1140_v50 = vmul.f32 %v1126_v30, %v1110_v38  ;;  %v1142_v51 = vmul.f32 %v1134_v31, %v1112_v40  ;;  %v1114_v52 = vadd.f32 %v1096_v24, %v705_v48  ;;  %v1116_v53 = vadd.f32 %v1104_v25, %v748_v49  ;;  %v1253_v24 = vld [vmem:[#allocation17] sm:$0xf] }
 0x23a   :  { %v1169_v54 = vadd.f32 %v1152_v33, %v1139_v44  ;;  %v1171_v55 = vadd.f32 %v1160_v35, %v1141_v45  ;;  %v1143_v56 = vmul.f32 %v1122_v26, %v1113_v46  ;;  %v1145_v57 = vmul.f32 %v1130_v27, %v1115_v47 }
 0x23b   :  { %v1170_v58 = vadd.f32 %v1156_v39, %v1140_v50  ;;  %v1172_v59 = vadd.f32 %v1164_v41, %v1142_v51  ;;  %v1144_v60 = vmul.f32 %v1126_v30, %v1114_v52  ;;  %v1146_v61 = vmul.f32 %v1134_v31, %v1116_v53 }
 0x23c   :  { %v1177_v62 = vmax.f32 %v1169_v54, 0.0  ;;  %v1179_v63 = vmax.f32 %v1171_v55, 0.0  ;;  %v1173_v0 = vadd.f32 %v1152_v33, %v1143_v56  ;;  %v1175_v1 = vadd.f32 %v1160_v35, %v1145_v57 }
 0x23d   :  { %v1180_v2 = vmax.f32 %v1172_v59, 0.0  ;;  %v1174_v3 = vadd.f32 %v1156_v39, %v1144_v60  ;;  %v1176_v4 = vadd.f32 %v1164_v41, %v1146_v61  ;;  %v1178_v7 = vmax.f32 %v1170_v58, 0.0 }
 0x23e   :  { %v1181_v5 = vmax.f32 %v1173_v0, 0.0  ;;  %v1183_v6 = vmax.f32 %v1175_v1, 0.0  ;;  %v1198_v22 = vrot.slane %v1193_v20, %v4363_v14  ;;  %v1202_v25 = vrot.slane %v1193_v20, %v4369_v17 }
 0x23f   :  { %v1182_v8 = vmax.f32 %v1174_v3, 0.0  ;;  %v1184_v9 = vmax.f32 %v1176_v4, 0.0  ;;  %v1210_v26 = vrot.slane %v1193_v20, %v4372_v19  ;;  %v1228_v27 = vrot.slane %v1223_v21, %v4363_v14 }
 0x240   :  { %v4386_v10 = vpack.c.bf16 %v1181_v5, %v1177_v62  ;;  %v4388_v11 = vpack.c.bf16 %v1183_v6, %v1179_v63  ;;  %v1236_v28 = vrot.slane %v1223_v21, %v4366_v15  ;;  %v1232_v31 = vrot.slane %v1223_v21, %v4369_v17 }
 0x241   :  { %v4390_v12 = vpack.c.bf16 %v1182_v8, %v1178_v7  ;;  %v4392_v16 = vpack.c.bf16 %v1184_v9, %v1180_v2  ;;  %v1240_v32 = vrot.slane %v1223_v21, %v4372_v19  ;;  %v1258_v34 = vrot.slane %v1253_v24, %v4363_v14 }
 0x242   :  { %v1266_v36 = vrot.slane %v1253_v24, %v4366_v15  ;;  %v1262_v40 = vrot.slane %v1253_v24, %v4369_v17  ;;  %v1270_v42 = vrot.slane %v1253_v24, %v4372_v19 }
 0x255   :  { %v1008_v29 = vpop.f32.mrb[4].mxu0  ;;  %v1051_v30 = vpop.f32.mrb[4].mxu1 }
 0x256   :  { %v1215_v33 = vadd.f32 %v1198_v22, %v1008_v29  ;;  %v1217_v35 = vadd.f32 %v1206_v23, %v1051_v30  ;;  %v1010_v37 = vpop.f32.mrb[5].mxu0  ;;  %v1053_v38 = vpop.f32.mrb[5].mxu1  ;;  %v3633_v29 = vld [vmem:[#allocation11 + $0x8] sm:$0xff]  }
 0x257   :  { %v1216_v39 = vadd.f32 %v1202_v25, %v1010_v37  ;;  %v1218_v41 = vadd.f32 %v1210_v26, %v1053_v38  ;;  %v1012_v43 = vpop.f32.mrb[6].mxu0  ;;  %v1055_v44 = vpop.f32.mrb[6].mxu1  ;;  %v3634_v30 = vld [vmem:[#allocation11 + $0x88] sm:$0xff]   ;;  %v3641_v37 = vld [vmem:[#allocation11 + $0x18] sm:$0xff]  }
 0x258   :  { %v1245_v45 = vmul.f32 %v1228_v27, %v1215_v33  ;;  %v1247_v46 = vmul.f32 %v1236_v28, %v1217_v35  ;;  %v1219_v47 = vadd.f32 %v1198_v22, %v1012_v43  ;;  %v1221_v48 = vadd.f32 %v1206_v23, %v1055_v44  ;;  %v1014_v49 = vpop.f32.mrb[7].mxu0  ;;  %v1057_v50 = vpop.f32.mrb[7].mxu1  ;;  %v3637_v33 = vld [vmem:[#allocation11 + $0x10] sm:$0xff]   ;;  %v3639_v35 = vld [vmem:[#allocation11 + $0x58] sm:$0xff]   ;;  %v3649_v43 = vld [vmem:[#allocation11 + $0x28] sm:$0xff]  }
 0x259   :  { %v1246_v51 = vmul.f32 %v1232_v31, %v1216_v39  ;;  %v1248_v52 = vmul.f32 %v1240_v32, %v1218_v41  ;;  %v1220_v53 = vadd.f32 %v1202_v25, %v1014_v49  ;;  %v1222_v54 = vadd.f32 %v1210_v26, %v1057_v50  ;;  %v3629_v25 = vld [vmem:[#allocation11] sm:$0xff]   ;;  %v3642_v38 = vld [vmem:[#allocation11 + $0x98] sm:$0xff]   ;;  %v3647_v41 = vld [vmem:[#allocation11 + $0x68] sm:$0xff]  }
 0x25a   :  { %v1275_v55 = vadd.f32 %v1258_v34, %v1245_v45  ;;  %v1277_v56 = vadd.f32 %v1266_v36, %v1247_v46  ;;  %v1249_v57 = vmul.f32 %v1228_v27, %v1219_v47  ;;  %v1251_v58 = vmul.f32 %v1236_v28, %v1221_v48  ;;  %v3630_v26 = vld [vmem:[#allocation11 + $0x80] sm:$0xff]   ;;  %v3631_v27 = vld [vmem:[#allocation11 + $0x48] sm:$0xff]   ;;  %v3651_v45 = vld [vmem:[#allocation11 + $0x70] sm:$0xff]  }
 0x25b   :  { %v1276_v59 = vadd.f32 %v1262_v40, %v1246_v51  ;;  %v1278_v60 = vadd.f32 %v1270_v42, %v1248_v52  ;;  %v1250_v61 = vmul.f32 %v1232_v31, %v1220_v53  ;;  %v1252_v62 = vmul.f32 %v1240_v32, %v1222_v54  ;;  %v3632_v28 = vld [vmem:[#allocation11 + $0xc8] sm:$0xff]   ;;  %v3635_v31 = vld [vmem:[#allocation11 + $0x50] sm:$0xff]   ;;  %v3645_v39 = vld [vmem:[#allocation11 + $0x20] sm:$0xff]  }
 0x25c   :  { %v1285_v63 = vmax.f32 %v1277_v56, 0.0  ;;  %v1279_v0 = vadd.f32 %v1258_v34, %v1249_v57  ;;  %v1281_v1 = vadd.f32 %v1266_v36, %v1251_v58  ;;  %v1283_v5 = vmax.f32 %v1275_v55, 0.0  ;;  %v3636_v32 = vld [vmem:[#allocation11 + $0xd0] sm:$0xff]   ;;  %v3640_v36 = vld [vmem:[#allocation11 + $0xd8] sm:$0xff]   ;;  %v3650_v44 = vld [vmem:[#allocation11 + $0xa8] sm:$0xff]  }
 0x25d   :  { %v1286_v2 = vmax.f32 %v1278_v60, 0.0  ;;  %v1280_v3 = vadd.f32 %v1262_v40, %v1250_v61  ;;  %v1282_v4 = vadd.f32 %v1270_v42, %v1252_v62  ;;  %v1284_v8 = vmax.f32 %v1276_v59, 0.0  ;;  %v3638_v34 = vld [vmem:[#allocation11 + $0x90] sm:$0xff]   ;;  %v3646_v40 = vld [vmem:[#allocation11 + $0xa0] sm:$0xff]   ;;  %v3648_v42 = vld [vmem:[#allocation11 + $0xe8] sm:$0xff]  }
 0x25e   :  { %v1287_v6 = vmax.f32 %v1279_v0, 0.0  ;;  %v1289_v7 = vmax.f32 %v1281_v1, 0.0  ;;  %v3652_v46 = vld [vmem:[#allocation11 + $0xf0] sm:$0xff]   ;;  %v3655_v49 = vld [vmem:[#allocation11 + $0x78] sm:$0xff]  }
 0x25f   :  { %v1288_v9 = vmax.f32 %v1280_v3, 0.0  ;;  %v1290_v20 = vmax.f32 %v1282_v4, 0.0  ;;  %v3653_v47 = vld [vmem:[#allocation11 + $0x30] sm:$0xff]   ;;  %v3656_v50 = vld [vmem:[#allocation11 + $0xf8] sm:$0xff]  }
 0x260   :  { %v1359_v21 = vpack.c.bf16 %v1287_v6, %v1283_v5  ;;  %v1361_v22 = vpack.c.bf16 %v1289_v7, %v1285_v63  ;;  %v3654_v48 = vld [vmem:[#allocation11 + $0xb0] sm:$0xff]   ;;  %v3657_v51 = vld [vmem:[#allocation11 + $0x38] sm:$0xff]  }
 0x261   :  { %v1360_v23 = vpack.c.bf16 %v1288_v9, %v1284_v8  ;;  %v1362_v24 = vpack.c.bf16 %v1290_v20, %v1286_v2  ;;  %v3658_v52 = vld [vmem:[#allocation11 + $0xb8] sm:$0xff]  }
 0x262   :  { %v1989_v53 = vld [vmem:[#allocation24] sm:$0xff]  ;;  %v1990_v55 = vld [vmem:[#allocation24 + $0x8] sm:$0xff] }
 0x263   :  { %1651 = vmatprep.mubr.bf16.mxu0 %v1360_v23  ;;  %1692 = vmatprep.mubr.bf16.mxu1 %v1362_v24  ;;  %v1993_v54 = vld [vmem:[#allocation24 + $0x20] sm:$0xff]  ;;  %v1994_v58 = vld [vmem:[#allocation24 + $0x28] sm:$0xff] }
 0x264   :  { %1652 = vmatmul.mubr.bf16.vlgmr.msra.gmra.mrb[8].mxu0 %v1359_v21  ;;  %1693 = vmatmul.mubr.bf16.vlgmr.msra.gmra.mrb[8].mxu1 %v1361_v22  ;;  %v3241_v56 = vcombine.low %v1989_v53, %v1993_v54  ;;  %v3242_v57 = vcombine.high %v1989_v53, %v1993_v54  ;;  %v1997_v59 = vld [vmem:[#allocation24 + $0x40] sm:$0xff]  ;;  %v3243_v61 = vcombine.low %v1990_v55, %v1994_v58  ;;  %v1998_v0 = vld [vmem:[#allocation24 + $0x48] sm:$0xff] }
 0x265   :  { %3386 = vmatpush3.bf16.msra.mxu0 %v3629_v25  ;;  %3408 = vmatpush3.bf16.msra.mxu1 %v3630_v26  ;;  %v2001_v60 = vld [vmem:[#allocation24 + $0x60] sm:$0xff]  ;;  %v3244_v62 = vcombine.high %v1990_v55, %v1994_v58  ;;  %v2002_v1 = vld [vmem:[#allocation24 + $0x68] sm:$0xff] }
 0x266   :  { %1925 = vmatprep.mubr.bf16.mxu0 %v4390_v12  ;;  %1966 = vmatprep.mubr.bf16.mxu1 %v4392_v16  ;;  %v3643_v12 = vld [vmem:[#allocation11 + $0x60] sm:$0xff]   ;;  %v3250_v63 = vcombine.high %v1997_v59, %v2001_v60  ;;  %v2009_v2 = vld [vmem:[#allocation24 + $0xa0] sm:$0xff]  ;;  %v3249_v5 = vcombine.low %v1997_v59, %v2001_v60  ;;  %v3251_v6 = vcombine.low %v1998_v0, %v2002_v1 }
 0x267   :  { %3387 = vmatprep.subr.bf16.mxu0 %v3631_v27  ;;  %3409 = vmatprep.subr.bf16.mxu1 %v3632_v28  ;;  %v3644_v16 = vld [vmem:[#allocation11 + $0xe0] sm:$0xff]   ;;  %v2013_v9 = vld [vmem:[#allocation24 + $0xc0] sm:$0xff] }
 0x268   :  { %v2006_v3 = vld [vmem:[#allocation24 + $0x88] sm:$0xff]  ;;  %v2017_v20 = vld [vmem:[#allocation24 + $0xe0] sm:$0xff]  ;;  %v1991_v59 = vld [vmem:[#allocation24 + $0x10] sm:$0xff] }
 0x269   :  { %3388 = vmatpush3.bf16.msra.mxu0 %v3633_v29  ;;  %3410 = vmatpush3.bf16.msra.mxu1 %v3634_v30  ;;  %v2010_v4 = vld [vmem:[#allocation24 + $0xa8] sm:$0xff]  ;;  %v3266_v25 = vcombine.high %v2013_v9, %v2017_v20  ;;  %v2021_v27 = vld [vmem:[#allocation24 + $0x100] sm:$0xff]  ;;  %v1995_v60 = vld [vmem:[#allocation24 + $0x30] sm:$0xff] }
 0x26a   :  { %3389 = vmatprep.subr.bf16.mxu0 %v3635_v31  ;;  %3411 = vmatprep.subr.bf16.mxu1 %v3636_v32  ;;  %v3260_v8 = vcombine.high %v2006_v3, %v2010_v4  ;;  %v2014_v21 = vld [vmem:[#allocation24 + $0xc8] sm:$0xff]  ;;  %v3259_v24 = vcombine.low %v2006_v3, %v2010_v4  ;;  %v2025_v28 = vld [vmem:[#allocation24 + $0x120] sm:$0xff]  ;;  %v3265_v31 = vcombine.low %v2013_v9, %v2017_v20 }
 0x26b   :  { %v2018_v22 = vld [vmem:[#allocation24 + $0xe8] sm:$0xff] }
 0x26c   :  { %v3268_v26 = vcombine.high %v2014_v21, %v2018_v22  ;;  %v2022_v29 = vld [vmem:[#allocation24 + $0x108] sm:$0xff]  ;;  %v3267_v32 = vcombine.low %v2014_v21, %v2018_v22 }
 0x26d   :  { %3390 = vmatpush3.bf16.msra.mxu0 %v3637_v33  ;;  %3412 = vmatpush3.bf16.msra.mxu1 %v3638_v34  ;;  %v2026_v30 = vld [vmem:[#allocation24 + $0x128] sm:$0xff]  ;;  %v3274_v33 = vcombine.high %v2021_v27, %v2025_v28 }
 0x26e   :  { %3391 = vmatprep.subr.bf16.mxu0 %v3639_v35  ;;  %3413 = vmatprep.subr.bf16.mxu1 %v3640_v36  ;;  %v3276_v34 = vcombine.high %v2022_v29, %v2026_v30  ;;  %v3273_v35 = vcombine.low %v2021_v27, %v2025_v28  ;;  %v3275_v36 = vcombine.low %v2022_v29, %v2026_v30  ;;  %v2046_v53 = vld [vmem:[#allocation24 + $0x1c8] sm:$0xff] }
 0x26f   :  { %v2050_v55 = vld [vmem:[#allocation24 + $0x1e8] sm:$0xff] }
 0x270   :  { %v3300_v58 = vcombine.high %v2046_v53, %v2050_v55 }
 0x271   :  { %3392 = vmatpush3.bf16.msra.mxu0 %v3641_v37  ;;  %3414 = vmatpush3.bf16.msra.mxu1 %v3642_v38  ;;  %v2029_v37 = vld [vmem:[#allocation24 + $0x140] sm:$0xff] }
 0x272   :  { %3393 = vmatprep.subr.bf16.mxu0 %v3643_v12  ;;  %3415 = vmatprep.subr.bf16.mxu1 %v3644_v16  ;;  %v2033_v38 = vld [vmem:[#allocation24 + $0x160] sm:$0xff]  ;;  %v2030_v12 = vld [vmem:[#allocation24 + $0x148] sm:$0xff] }
 0x273   :  { %v3282_v16 = vcombine.high %v2029_v37, %v2033_v38 }
 0x275   :  { %3394 = vmatpush3.bf16.msra.mxu0 %v3645_v39  ;;  %3416 = vmatpush3.bf16.msra.mxu1 %v3646_v40  ;;  %v2034_v39 = vld [vmem:[#allocation24 + $0x168] sm:$0xff]  ;;  %v3281_v40 = vcombine.low %v2029_v37, %v2033_v38  ;;  %v3240_v38 = vld [vmem:[#allocation20] ss:$0 sm:$0xff] }
 0x276   :  { %3395 = vmatprep.subr.bf16.mxu0 %v3647_v41  ;;  %3417 = vmatprep.subr.bf16.mxu1 %v3648_v42  ;;  %v3283_v41 = vcombine.low %v2030_v12, %v2034_v39  ;;  %v3284_v42 = vcombine.high %v2030_v12, %v2034_v39 }
 0x279   :  { %3396 = vmatpush3.bf16.msra.mxu0 %v3649_v43  ;;  %3418 = vmatpush3.bf16.msra.mxu1 %v3650_v44  ;;  %v2037_v43 = vld [vmem:[#allocation24 + $0x180] sm:$0xff] }
 0x27a   :  { %3397 = vmatprep.subr.bf16.mxu0 %v3651_v45  ;;  %3419 = vmatprep.subr.bf16.mxu1 %v3652_v46  ;;  %v2041_v44 = vld [vmem:[#allocation24 + $0x1a0] sm:$0xff]  ;;  %v2038_v45 = vld [vmem:[#allocation24 + $0x188] sm:$0xff] }
 0x27b   :  { %v3290_v46 = vcombine.high %v2037_v43, %v2041_v44 }
 0x27d   :  { %3398 = vmatpush3.bf16.msra.mxu0 %v3653_v47  ;;  %3420 = vmatpush3.bf16.msra.mxu1 %v3654_v48  ;;  %v2042_v47 = vld [vmem:[#allocation24 + $0x1a8] sm:$0xff]  ;;  %v3289_v48 = vcombine.low %v2037_v43, %v2041_v44  ;;  %v2003_v43 = vld [vmem:[#allocation24 + $0x70] sm:$0xff]  ;;  %v2000_v44 = vld [vmem:[#allocation24 + $0x58] sm:$0xff] }
 0x27e   :  { %3399 = vmatprep.subr.bf16.mxu0 %v3655_v49  ;;  %3421 = vmatprep.subr.bf16.mxu1 %v3656_v50  ;;  %v3291_v49 = vcombine.low %v2038_v45, %v2042_v47  ;;  %v3292_v50 = vcombine.high %v2038_v45, %v2042_v47  ;;  %v2004_v45 = vld [vmem:[#allocation24 + $0x78] sm:$0xff] }
 0x281   :  { %3400 = vmatpush3.bf16.msra.mxu0 %v3657_v51  ;;  %3422 = vmatpush3.bf16.msra.mxu1 %v3658_v52  ;;  %v2045_v51 = vld [vmem:[#allocation24 + $0x1c0] sm:$0xff] }
 0x282   :  { %2415 = vmatprep.subr.bf16.mxu0 %v3242_v57  ;;  %2458 = vmatprep.subr.bf16.mxu1 %v3244_v62  ;;  %v2049_v52 = vld [vmem:[#allocation24 + $0x1e0] sm:$0xff]  ;;  %v3299_v57 = vcombine.low %v2046_v53, %v2050_v55  ;;  %v3245_v62 = vcombine.low %v1991_v59, %v1995_v60  ;;  %v2008_v53 = vld [vmem:[#allocation24 + $0x98] sm:$0xff] }
 0x283   :  { %v3298_v54 = vcombine.high %v2045_v51, %v2049_v52 }
 0x284   :  { %1926 = vmatmul.mubr.bf16.vlgmr.msra.gmra.mrb[12].mxu0 %v4386_v10  ;;  %1967 = vmatmul.mubr.bf16.vlgmr.msra.gmra.mrb[12].mxu1 %v4388_v11  ;;  %v2005_v10 = vld [vmem:[#allocation24 + $0x80] sm:$0xff]  ;;  %v3252_v11 = vcombine.high %v1998_v0, %v2002_v1  ;;  %v1996_v0 = vld [vmem:[#allocation24 + $0x38] sm:$0xff] }
 0x285   :  { %2447 = vmatprep.mubr.bf16.mxu0 %v4026_v18  ;;  %2490 = vmatprep.mubr.bf16.mxu1 %v4026_v18  ;;  %v3258_v7 = vcombine.high %v2005_v10, %v2009_v2  ;;  %v3257_v23 = vcombine.low %v2005_v10, %v2009_v2 }
 0x286   :  { %2416 = vmatpush1.bf16.msra.mxu0 %v3241_v56  ;;  %2459 = vmatpush1.bf16.msra.mxu1 %v3243_v61  ;;  %v3297_v56 = vcombine.low %v2045_v51, %v2049_v52  ;;  %v1992_v61 = vld [vmem:[#allocation24 + $0x18] sm:$0xff]  ;;  %v2007_v51 = vld [vmem:[#allocation24 + $0x90] sm:$0xff] }
 0x287   :  { %2417 = vmatprep.subr.bf16.mxu0 %v3250_v63  ;;  %2460 = vmatprep.subr.bf16.mxu1 %v3252_v11  ;;  %v3246_v63 = vcombine.high %v1991_v59, %v1995_v60  ;;  %v3247_v1 = vcombine.low %v1992_v61, %v1996_v0  ;;  %v3248_v10 = vcombine.high %v1992_v61, %v1996_v0  ;;  %v2011_v52 = vld [vmem:[#allocation24 + $0xb0] sm:$0xff]  ;;  %v2016_v61 = vld [vmem:[#allocation24 + $0xd8] sm:$0xff] }
 0x288   :  { %v2015_v59 = vld [vmem:[#allocation24 + $0xd0] sm:$0xff]  ;;  %v3261_v0 = vcombine.low %v2007_v51, %v2011_v52 }
 0x289   :  { %v2019_v60 = vld [vmem:[#allocation24 + $0xf0] sm:$0xff] }
 0x28a   :  { %2418 = vmatpush1.bf16.msra.mxu0 %v3249_v5  ;;  %2461 = vmatpush1.bf16.msra.mxu1 %v3251_v6 }
 0x28b   :  { %2419 = vmatprep.subr.bf16.mxu0 %v3258_v7  ;;  %2462 = vmatprep.subr.bf16.mxu1 %v3260_v8 }
 0x28e   :  { %2420 = vmatpush1.bf16.msra.mxu0 %v3257_v23  ;;  %2463 = vmatpush1.bf16.msra.mxu1 %v3259_v24 }
 0x28f   :  { %2421 = vmatprep.subr.bf16.mxu0 %v3266_v25  ;;  %2464 = vmatprep.subr.bf16.mxu1 %v3268_v26 }
 0x292   :  { %2422 = vmatpush1.bf16.msra.mxu0 %v3265_v31  ;;  %2465 = vmatpush1.bf16.msra.mxu1 %v3267_v32 }
 0x293   :  { %2423 = vmatprep.subr.bf16.mxu0 %v3274_v33  ;;  %2466 = vmatprep.subr.bf16.mxu1 %v3276_v34 }
 0x296   :  { %2424 = vmatpush1.bf16.msra.mxu0 %v3273_v35  ;;  %2467 = vmatpush1.bf16.msra.mxu1 %v3275_v36 }
 0x297   :  { %2425 = vmatprep.subr.bf16.mxu0 %v3282_v16  ;;  %2468 = vmatprep.subr.bf16.mxu1 %v3284_v42  ;;  %v1999_v42 = vld [vmem:[#allocation24 + $0x50] sm:$0xff] }
 0x298   :  { %v3253_v55 = vcombine.low %v1999_v42, %v2003_v43 }
 0x29a   :  { %2426 = vmatpush1.bf16.msra.mxu0 %v3281_v40  ;;  %2469 = vmatpush1.bf16.msra.mxu1 %v3283_v41 }
 0x29b   :  { %2427 = vmatprep.subr.bf16.mxu0 %v3290_v46  ;;  %2470 = vmatprep.subr.bf16.mxu1 %v3292_v50  ;;  %v3256_v50 = vcombine.high %v2000_v44, %v2004_v45 }
 0x29e   :  { %2428 = vmatpush1.bf16.msra.mxu0 %v3289_v48  ;;  %2471 = vmatpush1.bf16.msra.mxu1 %v3291_v49  ;;  %v3254_v49 = vcombine.high %v1999_v42, %v2003_v43  ;;  %v2594_v42 = vld [vmem:[#allocation21 + $0x20] sm:$0xff]  ;;  %v2591_v43 = vld [vmem:[#allocation21 + $0x8] sm:$0xff] }
 0x29f   :  { %2429 = vmatprep.subr.bf16.mxu0 %v3298_v54  ;;  %2472 = vmatprep.subr.bf16.mxu1 %v3300_v58  ;;  %v2012_v54 = vld [vmem:[#allocation24 + $0xb8] sm:$0xff] }
 0x2a0   :  { %v3264_v58 = vcombine.high %v2008_v53, %v2012_v54 }
 0x2a2   :  { %2430 = vmatpush1.bf16.msra.mxu0 %v3297_v56  ;;  %2473 = vmatpush1.bf16.msra.mxu1 %v3299_v57  ;;  %v3255_v56 = vcombine.low %v2000_v44, %v2004_v45  ;;  %v3262_v57 = vcombine.high %v2007_v51, %v2011_v52  ;;  %v2595_v44 = vld [vmem:[#allocation21 + $0x28] sm:$0xff]  ;;  %v2602_v51 = vld [vmem:[#allocation21 + $0x60] sm:$0xff] }
 0x2a3   :  { %2501 = vmatprep.subr.bf16.mxu0 %v3246_v63  ;;  %2544 = vmatprep.subr.bf16.mxu1 %v3248_v10  ;;  %v2020_v63 = vld [vmem:[#allocation24 + $0xf8] sm:$0xff]  ;;  %v3263_v10 = vcombine.low %v2008_v53, %v2012_v54  ;;  %v2599_v52 = vld [vmem:[#allocation21 + $0x48] sm:$0xff] }
 0x2a4   :  { %v2603_v53 = vld [vmem:[#allocation21 + $0x68] sm:$0xff] }
 0x337   :  { %v3357_v11 = vpop.f32.mrb[8].mxu0  ;;  %v3379_v2 = vpop.f32.mrb[8].mxu1 }
 0x338   :  { %v3358_v3 = vpop.f32.mrb[9].mxu0  ;;  %v3380_v4 = vpop.f32.mrb[9].mxu1 }
 0x339   :  { %v3359_v5 = vadd.f32 %v3358_v3, %v3357_v11  ;;  %v3381_v6 = vadd.f32 %v3380_v4, %v3379_v2  ;;  %v3360_v7 = vpop.f32.mrb[10].mxu0  ;;  %v3382_v8 = vpop.f32.mrb[10].mxu1  ;;  %v2023_v11 = vld [vmem:[#allocation24 + $0x110] sm:$0xff]  ;;  %v2024_v3 = vld [vmem:[#allocation24 + $0x118] sm:$0xff] }
 0x33a   :  { %v3361_v9 = vpop.f32.mrb[11].mxu0  ;;  %v3383_v20 = vpop.f32.mrb[11].mxu1  ;;  %v2027_v2 = vld [vmem:[#allocation24 + $0x130] sm:$0xff]  ;;  %v2028_v4 = vld [vmem:[#allocation24 + $0x138] sm:$0xff] }
 0x33b   :  { %v1695_v21 = vadd.f32 %v3381_v6, %v3359_v5  ;;  %v3362_v22 = vadd.f32 %v3361_v9, %v3360_v7  ;;  %v3384_v23 = vadd.f32 %v3383_v20, %v3382_v8  ;;  %v3269_v5 = vcombine.low %v2015_v59, %v2019_v60  ;;  %v2031_v9 = vld [vmem:[#allocation24 + $0x150] sm:$0xff] }
 0x33c   :  { %v3271_v6 = vcombine.low %v2016_v61, %v2020_v63  ;;  %v3278_v7 = vcombine.high %v2023_v11, %v2027_v2  ;;  %v3280_v8 = vcombine.high %v2024_v3, %v2028_v4  ;;  %v2035_v20 = vld [vmem:[#allocation24 + $0x170] sm:$0xff] }
 0x33d   :  { %v1698_v24 = vadd.f32 %v3384_v23, %v3362_v22  ;;  %v2036_v22 = vld [vmem:[#allocation24 + $0x178] sm:$0xff]  ;;  %v3277_v23 = vcombine.low %v2023_v11, %v2027_v2  ;;  %v2615_v2 = vld [vmem:[#allocation21 + $0xc8] sm:$0xff] }
 0x33e   :  { %v2618_v11 = vld [vmem:[#allocation21 + $0xe0] sm:$0xff] }
 0x357   :  { %v3401_v25 = vpop.f32.mrb[12].mxu0  ;;  %v3423_v26 = vpop.f32.mrb[12].mxu1 }
 0x358   :  { %v3402_v27 = vpop.f32.mrb[13].mxu0  ;;  %v3424_v28 = vpop.f32.mrb[13].mxu1 }
 0x359   :  { %v3403_v29 = vadd.f32 %v3402_v27, %v3401_v25  ;;  %v3425_v30 = vadd.f32 %v3424_v28, %v3423_v26  ;;  %v3404_v31 = vpop.f32.mrb[14].mxu0  ;;  %v3426_v32 = vpop.f32.mrb[14].mxu1  ;;  %v3286_v25 = vcombine.high %v2031_v9, %v2035_v20  ;;  %v2039_v27 = vld [vmem:[#allocation24 + $0x190] sm:$0xff] }
 0x35a   :  { %v3405_v33 = vpop.f32.mrb[15].mxu0  ;;  %v3427_v34 = vpop.f32.mrb[15].mxu1  ;;  %v2043_v28 = vld [vmem:[#allocation24 + $0x1b0] sm:$0xff] }
 0x35b   :  { %v1928_v35 = vadd.f32 %v3403_v29, %v1695_v21  ;;  %v3406_v36 = vadd.f32 %v3405_v33, %v3404_v31  ;;  %v3428_v37 = vadd.f32 %v3427_v34, %v3426_v32  ;;  %v2032_v21 = vld [vmem:[#allocation24 + $0x158] sm:$0xff]  ;;  %v3285_v31 = vcombine.low %v2031_v9, %v2035_v20  ;;  %v2593_v9 = vld [vmem:[#allocation21 + $0x18] sm:$0xff] }
 0x35c   :  { %v3288_v26 = vcombine.high %v2032_v21, %v2036_v22  ;;  %v2040_v29 = vld [vmem:[#allocation24 + $0x198] sm:$0xff]  ;;  %v3287_v32 = vcombine.low %v2032_v21, %v2036_v22  ;;  %v3294_v33 = vcombine.high %v2039_v27, %v2043_v28  ;;  %v2597_v20 = vld [vmem:[#allocation21 + $0x38] sm:$0xff] }
 0x35d   :  { %v1969_v12 = vadd.f32 %v3425_v30, %v1928_v35  ;;  %v1931_v16 = vadd.f32 %v3406_v36, %v1698_v24  ;;  %v3279_v24 = vcombine.low %v2024_v3, %v2028_v4  ;;  %v2044_v30 = vld [vmem:[#allocation24 + $0x1b8] sm:$0xff]  ;;  %v2047_v35 = vld [vmem:[#allocation24 + $0x1d0] sm:$0xff]  ;;  %v2619_v3 = vld [vmem:[#allocation21 + $0xe8] sm:$0xff] }
 0x35e   :  { %v3296_v34 = vcombine.high %v2040_v29, %v2044_v30  ;;  %v2051_v36 = vld [vmem:[#allocation24 + $0x1f0] sm:$0xff]  ;;  %v3331_v22 = vcombine.low %v2615_v2, %v2619_v3 }
 0x35f   :  { %v1982_v39 = vadd.f32 %v3240_v38, %v1969_v12  ;;  %v1972_v40 = vadd.f32 %v3428_v37, %v1931_v16  ;;  %v2048_v37 = vld [vmem:[#allocation24 + $0x1d8] sm:$0xff]  ;;  %v3293_v12 = vcombine.low %v2039_v27, %v2043_v28  ;;  %v3295_v16 = vcombine.low %v2040_v29, %v2044_v30  ;;  %v2600_v27 = vld [vmem:[#allocation21 + $0x50] sm:$0xff]  ;;  %v2601_v29 = vld [vmem:[#allocation21 + $0x58] sm:$0xff] }
 0x360   :  { %v3301_v45 = vcombine.low %v2047_v35, %v2051_v36  ;;  %v2604_v28 = vld [vmem:[#allocation21 + $0x70] sm:$0xff]  ;;  %v2605_v30 = vld [vmem:[#allocation21 + $0x78] sm:$0xff] }
 0x361   :  { %1984 = vst [vmem:[%s4570_s18] sm:$0xff] %v1982_v39  ;;  %v1983_v41 = vadd.f32 %v3240_v38, %v1972_v40  ;;  %v1986_v46 = vmax.f32 %v1982_v39, 0.0  ;;  %v2052_v38 = vld [vmem:[#allocation24 + $0x1f8] sm:$0xff]  ;;  %v3302_v39 = vcombine.high %v2047_v35, %v2051_v36  ;;  %v3320_v35 = vcombine.high %v2601_v29, %v2605_v30  ;;  %v2608_v36 = vld [vmem:[#allocation21 + $0x90] sm:$0xff] }
 0x362   :  { %v3304_v40 = vcombine.high %v2048_v37, %v2052_v38 }
 0x363   :  { %1985 = vst [vmem:[%s4570_s18 + $0x8] sm:$0xff] %v1983_v41  ;;  %v1987_v47 = vmax.f32 %v1983_v41, 0.0  ;;  %v2590_v41 = vld [vmem:[#allocation21] sm:$0xff] }
 0x364   :  { %v3305_v54 = vcombine.low %v2590_v41, %v2594_v42 }
 0x365   :  { %v4418_v48 = vpack.c.bf16 %v1987_v47, %v1986_v46  ;;  %v3303_v46 = vcombine.low %v2048_v37, %v2052_v38  ;;  %v3306_v47 = vcombine.high %v2590_v41, %v2594_v42  ;;  %v2612_v37 = vld [vmem:[#allocation21 + $0xb0] sm:$0xff]  ;;  %v2609_v38 = vld [vmem:[#allocation21 + $0x98] sm:$0xff] }
 0x366   :  { %v2616_v42 = vld [vmem:[#allocation21 + $0xd0] sm:$0xff] }
 0x367   :  { %2448 = vmatmul.mubr.bf16.vlgmr.msra.gmra.mrb[16].mxu0 %v4418_v48  ;;  %2491 = vmatmul.mubr.bf16.vlgmr.msra.gmra.mrb[16].mxu1 %v4418_v48 }
 0x368   :  { %2502 = vmatpush1.bf16.msra.mxu0 %v3245_v62  ;;  %2545 = vmatpush1.bf16.msra.mxu1 %v3247_v1  ;;  %v3270_v62 = vcombine.high %v2015_v59, %v2019_v60  ;;  %v3272_v1 = vcombine.high %v2016_v61, %v2020_v63  ;;  %v2610_v59 = vld [vmem:[#allocation21 + $0xa0] sm:$0xff]  ;;  %v2607_v60 = vld [vmem:[#allocation21 + $0x88] sm:$0xff] }
 0x369   :  { %2503 = vmatprep.subr.bf16.mxu0 %v3254_v49  ;;  %2546 = vmatprep.subr.bf16.mxu1 %v3256_v50  ;;  %v3308_v49 = vcombine.high %v2591_v43, %v2595_v44  ;;  %v2598_v50 = vld [vmem:[#allocation21 + $0x40] sm:$0xff]  ;;  %v2611_v61 = vld [vmem:[#allocation21 + $0xa8] sm:$0xff] }
 0x36a   :  { %2533 = vmatprep.mubr.bf16.mxu0 %v4026_v18  ;;  %2576 = vmatprep.mubr.bf16.mxu1 %v4026_v18  ;;  %v3313_v63 = vcombine.low %v2598_v50, %v2602_v51 }
 0x36c   :  { %2504 = vmatpush1.bf16.msra.mxu0 %v3253_v55  ;;  %2547 = vmatpush1.bf16.msra.mxu1 %v3255_v56  ;;  %v3307_v55 = vcombine.low %v2591_v43, %v2595_v44  ;;  %v3314_v56 = vcombine.high %v2598_v50, %v2602_v51  ;;  %v2620_v43 = vld [vmem:[#allocation21 + $0xf0] sm:$0xff]  ;;  %v2617_v44 = vld [vmem:[#allocation21 + $0xd8] sm:$0xff] }
 0x36d   :  { %2505 = vmatprep.subr.bf16.mxu0 %v3262_v57  ;;  %2548 = vmatprep.subr.bf16.mxu1 %v3264_v58  ;;  %v3316_v57 = vcombine.high %v2599_v52, %v2603_v53  ;;  %v2606_v58 = vld [vmem:[#allocation21 + $0x80] sm:$0xff]  ;;  %v3333_v51 = vcombine.low %v2616_v42, %v2620_v43 }
 0x36e   :  { %v3321_v4 = vcombine.low %v2606_v58, %v2610_v59 }
 0x370   :  { %2506 = vmatpush1.bf16.msra.mxu0 %v3261_v0  ;;  %2549 = vmatpush1.bf16.msra.mxu1 %v3263_v10  ;;  %v3315_v0 = vcombine.low %v2599_v52, %v2603_v53  ;;  %v3322_v10 = vcombine.high %v2606_v58, %v2610_v59 }
 0x371   :  { %2507 = vmatprep.subr.bf16.mxu0 %v3270_v62  ;;  %2550 = vmatprep.subr.bf16.mxu1 %v3272_v1  ;;  %v3324_v62 = vcombine.high %v2607_v60, %v2611_v61  ;;  %v2614_v1 = vld [vmem:[#allocation21 + $0xc0] sm:$0xff] }
 0x372   :  { %v3329_v21 = vcombine.low %v2614_v1, %v2618_v11 }
 0x374   :  { %2508 = vmatpush1.bf16.msra.mxu0 %v3269_v5  ;;  %2551 = vmatpush1.bf16.msra.mxu1 %v3271_v6  ;;  %v3330_v5 = vcombine.high %v2614_v1, %v2618_v11  ;;  %v3332_v6 = vcombine.high %v2615_v2, %v2619_v3  ;;  %v4456_v2 = vld [vmem:[#allocation26] sm:$0xff] }
 0x375   :  { %2509 = vmatprep.subr.bf16.mxu0 %v3278_v7  ;;  %2552 = vmatprep.subr.bf16.mxu1 %v3280_v8  ;;  %v2592_v7 = vld [vmem:[#allocation21 + $0x10] sm:$0xff]  ;;  %v2058_v3 = vrot.slane %v4456_v2, %v4363_v14 }
 0x376   :  { %v2596_v8 = vld [vmem:[#allocation21 + $0x30] sm:$0xff] }
 0x378   :  { %2510 = vmatpush1.bf16.msra.mxu0 %v3277_v23  ;;  %2553 = vmatpush1.bf16.msra.mxu1 %v3279_v24  ;;  %v2587_v23 = vld [vmem:[%s4565_s13] sm:$0xff]  ;;  %v2588_v24 = vld [vmem:[%s4565_s13 + $0x8] sm:$0xff] }
 0x379   :  { %2511 = vmatprep.subr.bf16.mxu0 %v3286_v25  ;;  %2554 = vmatprep.subr.bf16.mxu1 %v3288_v26  ;;  %v3310_v25 = vcombine.high %v2592_v7, %v2596_v8  ;;  %v3312_v26 = vcombine.high %v2593_v9, %v2597_v20 }
 0x37c   :  { %2512 = vmatpush1.bf16.msra.mxu0 %v3285_v31  ;;  %2555 = vmatpush1.bf16.msra.mxu1 %v3287_v32  ;;  %v2589_v31 = vpack.c.bf16 %v2588_v24, %v2587_v23  ;;  %v3309_v32 = vcombine.low %v2592_v7, %v2596_v8 }
 0x37d   :  { %2513 = vmatprep.subr.bf16.mxu0 %v3294_v33  ;;  %2556 = vmatprep.subr.bf16.mxu1 %v3296_v34  ;;  %v3311_v33 = vcombine.low %v2593_v9, %v2597_v20  ;;  %v3318_v34 = vcombine.high %v2600_v27, %v2604_v28 }
 0x380   :  { %2514 = vmatpush1.bf16.msra.mxu0 %v3293_v12  ;;  %2557 = vmatpush1.bf16.msra.mxu1 %v3295_v16  ;;  %v2613_v12 = vld [vmem:[#allocation21 + $0xb8] sm:$0xff]  ;;  %v3317_v16 = vcombine.low %v2600_v27, %v2604_v28 }
 0x381   :  { %2515 = vmatprep.subr.bf16.mxu0 %v3302_v39  ;;  %2558 = vmatprep.subr.bf16.mxu1 %v3304_v40  ;;  %v3319_v39 = vcombine.low %v2601_v29, %v2605_v30  ;;  %v3326_v40 = vcombine.high %v2608_v36, %v2612_v37  ;;  %v3328_v41 = vcombine.high %v2609_v38, %v2613_v12  ;;  %v2073_v29 = vsub.s32 4, %v4360_v13 }
 0x382   :  { %v2081_v30 = vsub.s32 6, %v4360_v13 }
 0x384   :  { %2516 = vmatpush1.bf16.msra.mxu0 %v3301_v45  ;;  %2559 = vmatpush1.bf16.msra.mxu1 %v3303_v46  ;;  %v2621_v45 = vld [vmem:[#allocation21 + $0xf8] sm:$0xff]  ;;  %v3325_v46 = vcombine.low %v2608_v36, %v2612_v37 }
 0x385   :  { %2828 = vmatprep.subr.bf16.mxu0 %v3306_v47  ;;  %2871 = vmatprep.subr.bf16.mxu1 %v3308_v49  ;;  %v3327_v47 = vcombine.low %v2609_v38, %v2613_v12  ;;  %v3334_v49 = vcombine.high %v2616_v42, %v2620_v43  ;;  %v3336_v50 = vcombine.high %v2617_v44, %v2621_v45 }
 0x386   :  { %v3335_v52 = vcombine.low %v2617_v44, %v2621_v45 }
 0x387   :  { %2534 = vmatmul.mubr.bf16.vlgmr.msra.gmra.mrb[20].mxu0 %v4418_v48  ;;  %2577 = vmatmul.mubr.bf16.vlgmr.msra.gmra.mrb[20].mxu1 %v4418_v48  ;;  %v3323_v48 = vcombine.low %v2607_v60, %v2611_v61 }
 0x388   :  { %2829 = vmatpush1.bf16.msra.mxu0 %v3305_v54  ;;  %2872 = vmatpush1.bf16.msra.mxu1 %v3307_v55 }
 0x389   :  { %2830 = vmatprep.subr.bf16.mxu0 %v3314_v56  ;;  %2873 = vmatprep.subr.bf16.mxu1 %v3316_v57 }
 0x38a   :  { %2860 = vmatprep.mubr.bf16.mxu0 %v4026_v18  ;;  %2903 = vmatprep.mubr.bf16.mxu1 %v4026_v18 }
 0x38c   :  { %2831 = vmatpush1.bf16.msra.mxu0 %v3313_v63  ;;  %2874 = vmatpush1.bf16.msra.mxu1 %v3315_v0 }
 0x38d   :  { %2832 = vmatprep.subr.bf16.mxu0 %v3322_v10  ;;  %2875 = vmatprep.subr.bf16.mxu1 %v3324_v62 }
 0x390   :  { %2833 = vmatpush1.bf16.msra.mxu0 %v3321_v4  ;;  %2876 = vmatpush1.bf16.msra.mxu1 %v3323_v48  ;;  %v2066_v4 = vrot.slane %v4456_v2, %v4366_v15  ;;  %v2062_v48 = vrot.slane %v4456_v2, %v4369_v17 }
 0x391   :  { %2834 = vmatprep.subr.bf16.mxu0 %v3330_v5  ;;  %2877 = vmatprep.subr.bf16.mxu1 %v3332_v6  ;;  %v2070_v5 = vrot.slane %v4456_v2, %v4372_v19  ;;  %v4466_v6 = vld [vmem:[#allocation23] sm:$0xff] }
 0x392   :  { %v2627_v23 = vrot.slane %v4466_v6, %v4363_v14  ;;  %v2635_v24 = vrot.slane %v4466_v6, %v4366_v15  ;;  %v2631_v27 = vrot.slane %v4466_v6, %v4369_v17  ;;  %v2639_v28 = vrot.slane %v4466_v6, %v4372_v19 }
 0x394   :  { %2835 = vmatpush1.bf16.msra.mxu0 %v3329_v21  ;;  %2878 = vmatpush1.bf16.msra.mxu1 %v3331_v22 }
 0x395   :  { %2914 = vmatprep.subr.bf16.mxu0 %v3310_v25  ;;  %2957 = vmatprep.subr.bf16.mxu1 %v3312_v26 }
 0x397   :  { %3337 = vmatmul.mubr.msk.bf16.vlgmr.msra.gmra.mrb[24].mxu0 %vm2824_vm0, %v2589_v31  ;;  %3338 = vmatmul.mubr.msk.bf16.vlgmr.msra.gmra.mrb[24].mxu1 %vm2824_vm0, %v2589_v31 }
 0x398   :  { %2915 = vmatpush1.bf16.msra.mxu0 %v3309_v32  ;;  %2958 = vmatpush1.bf16.msra.mxu1 %v3311_v33  ;;  %v2085_v32 = vsub.s32 7, %v4360_v13 }
 0x399   :  { %2916 = vmatprep.subr.bf16.mxu0 %v3318_v34  ;;  %2959 = vmatprep.subr.bf16.mxu1 %v3320_v35 }
 0x39a   :  { %2946 = vmatprep.mubr.bf16.mxu0 %v4026_v18  ;;  %2989 = vmatprep.mubr.bf16.mxu1 %v4026_v18 }
 0x39c   :  { %2917 = vmatpush1.bf16.msra.mxu0 %v3317_v16  ;;  %2960 = vmatpush1.bf16.msra.mxu1 %v3319_v39 }
 0x39d   :  { %2918 = vmatprep.subr.bf16.mxu0 %v3326_v40  ;;  %2961 = vmatprep.subr.bf16.mxu1 %v3328_v41 }
 0x3a0   :  { %2919 = vmatpush1.bf16.msra.mxu0 %v3325_v46  ;;  %2962 = vmatpush1.bf16.msra.mxu1 %v3327_v47 }
 0x3a1   :  { %2920 = vmatprep.subr.bf16.mxu0 %v3334_v49  ;;  %2963 = vmatprep.subr.bf16.mxu1 %v3336_v50 }
 0x3a4   :  { %2921 = vmatpush1.bf16.msra.mxu0 %v3333_v51  ;;  %2964 = vmatpush1.bf16.msra.mxu1 %v3335_v52 }
 0x3a7   :  { %3339 = vmatmul.mubr.msk.bf16.vlgmr.msra.gmra.mrb[28].mxu0 %vm2824_vm0, %v2589_v31  ;;  %3340 = vmatmul.mubr.msk.bf16.vlgmr.msra.gmra.mrb[28].mxu1 %vm2824_vm0, %v2589_v31  ;;  %v2077_v31 = vsub.s32 5, %v4360_v13 }
 0x43a   :  { %v2449_v18 = vpop.f32.mrb[16].mxu0  ;;  %v2492_v53 = vpop.f32.mrb[16].mxu1 }
 0x43b   :  { %v2451_v54 = vpop.f32.mrb[17].mxu0  ;;  %v2494_v55 = vpop.f32.mrb[17].mxu1  ;;  %v2450_v7 = vadd.f32 %v2449_v18, %v2058_v3  ;;  %v2493_v8 = vadd.f32 %v2492_v53, %v2066_v4 }
 0x43c   :  { %v2453_v56 = vpop.f32.mrb[18].mxu0  ;;  %v2496_v57 = vpop.f32.mrb[18].mxu1  ;;  %v2452_v9 = vadd.f32 %v2451_v54, %v2062_v48  ;;  %v2495_v20 = vadd.f32 %v2494_v55, %v2070_v5 }
 0x43d   :  { %v2455_v58 = vpop.f32.mrb[19].mxu0  ;;  %v2498_v59 = vpop.f32.mrb[19].mxu1  ;;  %v2454_v21 = vadd.f32 %v2453_v56, %v2058_v3  ;;  %v2497_v22 = vadd.f32 %v2496_v57, %v2066_v4  ;;  %v3000_v14 = vadd.f32 1.0, %v2450_v7  ;;  %v3002_v33 = vadd.f32 1.0, %v2493_v8 }
 0x43e   :  { %v2456_v25 = vadd.f32 %v2455_v58, %v2062_v48  ;;  %v2499_v26 = vadd.f32 %v2498_v59, %v2070_v5  ;;  %v3001_v34 = vadd.f32 1.0, %v2452_v9  ;;  %v3003_v15 = vadd.f32 1.0, %v2495_v20 }
 0x43f   :  { %v3008_v37 = vadd.f32 1.0, %v2454_v21  ;;  %v3010_v38 = vadd.f32 1.0, %v2497_v22  ;;  %v2074_v5 = vrot.slane %v4456_v2, %v2073_v29  ;;  %v2082_v7 = vrot.slane %v4456_v2, %v2081_v30 }
 0x440   :  { %v3009_v39 = vadd.f32 1.0, %v2456_v25  ;;  %v3011_v40 = vadd.f32 1.0, %v2499_v26  ;;  %v2078_v20 = vrot.slane %v4456_v2, %v2077_v31  ;;  %v2086_v21 = vrot.slane %v4456_v2, %v2085_v32 }
 0x45a   :  { %v4440_v60 = vpop.f32.mrb[20].mxu0  ;;  %v4442_v61 = vpop.f32.mrb[20].mxu1 }
 0x45b   :  { %v4444_v63 = vpop.f32.mrb[21].mxu0  ;;  %v4446_v0 = vpop.f32.mrb[21].mxu1  ;;  %v2536_v2 = vadd.f32 %v4440_v60, %v2074_v5  ;;  %v2647_v60 = vrot.slane %v4466_v6, %v2077_v31 }
 0x45c   :  { %v4448_v10 = vpop.f32.mrb[22].mxu0  ;;  %v4450_v62 = vpop.f32.mrb[22].mxu1  ;;  %v2538_v25 = vadd.f32 %v4444_v63, %v2078_v20  ;;  %v2581_v26 = vadd.f32 %v4446_v0, %v2086_v21 }
 0x45d   :  { %v4452_v1 = vpop.f32.mrb[23].mxu0  ;;  %v4454_v11 = vpop.f32.mrb[23].mxu1  ;;  %v3004_v63 = vadd.f32 1.0, %v2536_v2 }
 0x46a   :  { %v2862_v35 = vpop.f32.mrb[24].mxu0  ;;  %v2905_v36 = vpop.f32.mrb[24].mxu1 }
 0x46b   :  { %v2863_v17 = vadd.f32 %v2862_v35, %v2627_v23  ;;  %v2906_v12 = vadd.f32 %v2905_v36, %v2635_v24  ;;  %v2864_v16 = vpop.f32.mrb[25].mxu0  ;;  %v2907_v19 = vpop.f32.mrb[25].mxu1 }
 0x46c   :  { %v2865_v41 = vadd.f32 %v2864_v16, %v2631_v27  ;;  %v2908_v42 = vadd.f32 %v2907_v19, %v2639_v28  ;;  %v2866_v43 = vpop.f32.mrb[26].mxu0  ;;  %v2909_v44 = vpop.f32.mrb[26].mxu1 }
 0x46d   :  { %v3016_v45 = vmul.f32 %v3000_v14, %v2863_v17  ;;  %v3018_v46 = vmul.f32 %v3002_v33, %v2906_v12  ;;  %v2867_v47 = vadd.f32 %v2866_v43, %v2627_v23  ;;  %v2910_v49 = vadd.f32 %v2909_v44, %v2635_v24  ;;  %v2868_v50 = vpop.f32.mrb[27].mxu0  ;;  %v2911_v51 = vpop.f32.mrb[27].mxu1 }
 0x46e   :  { %v3017_v52 = vmul.f32 %v3001_v34, %v2865_v41  ;;  %v3019_v18 = vmul.f32 %v3003_v15, %v2908_v42  ;;  %v2869_v53 = vadd.f32 %v2868_v50, %v2631_v27  ;;  %v2912_v54 = vadd.f32 %v2911_v51, %v2639_v28 }
 0x46f   :  { %v3032_v55 = vmax.f32 %v3016_v45, 0.0  ;;  %v3034_v56 = vmax.f32 %v3018_v46, 0.0  ;;  %v3024_v57 = vmul.f32 %v3008_v37, %v2867_v47  ;;  %v3026_v58 = vmul.f32 %v3010_v38, %v2910_v49 }
 0x470   :  { %v3033_v59 = vmax.f32 %v3017_v52, 0.0  ;;  %v3035_v3 = vmax.f32 %v3019_v18, 0.0  ;;  %v3025_v4 = vmul.f32 %v3009_v39, %v2869_v53  ;;  %v3027_v48 = vmul.f32 %v3011_v40, %v2912_v54 }
 0x471   :  { %3048 = vst [vmem:[%s4571_s19] sm:$0xff] %v3032_v55  ;;  %3050 = vst [vmem:[%s4571_s19 + $0x10] sm:$0xff] %v3034_v56  ;;  %v3040_v8 = vmax.f32 %v3024_v57, 0.0  ;;  %v3042_v9 = vmax.f32 %v3026_v58, 0.0  ;;  %v2579_v24 = vadd.f32 %v4442_v61, %v2082_v7  ;;  %v2540_v27 = vadd.f32 %v4448_v10, %v2074_v5 }
 0x472   :  { %3049 = vst [vmem:[%s4571_s19 + $0x8] sm:$0xff] %v3033_v59  ;;  %3051 = vst [vmem:[%s4571_s19 + $0x18] sm:$0xff] %v3035_v3  ;;  %v3041_v22 = vmax.f32 %v3025_v4, 0.0  ;;  %v3043_v23 = vmax.f32 %v3027_v48, 0.0  ;;  %v2583_v28 = vadd.f32 %v4450_v62, %v2082_v7  ;;  %v2643_v14 = vrot.slane %v4466_v6, %v2073_v29 }
 0x473   :  { %3056 = vst [vmem:[%s4571_s19 + $0x40] sm:$0xff] %v3040_v8  ;;  %3058 = vst [vmem:[%s4571_s19 + $0x50] sm:$0xff] %v3042_v9  ;;  %v2651_v33 = vrot.slane %v4466_v6, %v2081_v30  ;;  %v2542_v34 = vadd.f32 %v4452_v1, %v2078_v20  ;;  %v2585_v15 = vadd.f32 %v4454_v11, %v2086_v21  ;;  %v3006_v0 = vadd.f32 1.0, %v2579_v24 }
 0x474   :  { %3057 = vst [vmem:[%s4571_s19 + $0x48] sm:$0xff] %v3041_v22  ;;  %3059 = vst [vmem:[%s4571_s19 + $0x58] sm:$0xff] %v3043_v23  ;;  %v2655_v61 = vrot.slane %v4466_v6, %v2085_v32  ;;  %v3005_v10 = vadd.f32 1.0, %v2538_v25  ;;  %v3007_v62 = vadd.f32 1.0, %v2581_v26  ;;  %v3012_v36 = vadd.f32 1.0, %v2540_v27 }
 0x475   :  { %v3014_v30 = vadd.f32 1.0, %v2583_v28  ;;  %v3013_v17 = vadd.f32 1.0, %v2542_v34  ;;  %v3015_v12 = vadd.f32 1.0, %v2585_v15 }
 0x47a   :  { %v2948_v35 = vpop.f32.mrb[28].mxu0  ;;  %v2991_v29 = vpop.f32.mrb[28].mxu1 }
 0x47b   :  { %v2949_v37 = vadd.f32 %v2948_v35, %v2643_v14  ;;  %v2992_v1 = vadd.f32 %v2991_v29, %v2651_v33  ;;  %v2950_v38 = vpop.f32.mrb[29].mxu0  ;;  %v2993_v11 = vpop.f32.mrb[29].mxu1 }
 0x47c   :  { %v2951_v16 = vadd.f32 %v2950_v38, %v2647_v60  ;;  %v2994_v31 = vadd.f32 %v2993_v11, %v2655_v61  ;;  %v2952_v19 = vpop.f32.mrb[30].mxu0  ;;  %v2995_v13 = vpop.f32.mrb[30].mxu1 }
 0x47d   :  { %v3020_v39 = vmul.f32 %v3004_v63, %v2949_v37  ;;  %v3022_v6 = vmul.f32 %v3006_v0, %v2992_v1  ;;  %v2953_v32 = vadd.f32 %v2952_v19, %v2643_v14  ;;  %v2996_v40 = vadd.f32 %v2995_v13, %v2651_v33  ;;  %v2954_v41 = vpop.f32.mrb[31].mxu0  ;;  %v2997_v42 = vpop.f32.mrb[31].mxu1 }
 0x47e   :  { %v3021_v43 = vmul.f32 %v3005_v10, %v2951_v16  ;;  %v3023_v44 = vmul.f32 %v3007_v62, %v2994_v31  ;;  %v2955_v45 = vadd.f32 %v2954_v41, %v2647_v60  ;;  %v2998_v46 = vadd.f32 %v2997_v42, %v2655_v61 }
 0x47f   :  { %v3036_v47 = vmax.f32 %v3020_v39, 0.0  ;;  %v3038_v49 = vmax.f32 %v3022_v6, 0.0  ;;  %v3028_v50 = vmul.f32 %v3012_v36, %v2953_v32  ;;  %v3030_v51 = vmul.f32 %v3014_v30, %v2996_v40 }
 0x480   :  { %v3037_v52 = vmax.f32 %v3021_v43, 0.0  ;;  %v3039_v18 = vmax.f32 %v3023_v44, 0.0  ;;  %v3029_v53 = vmul.f32 %v3013_v17, %v2955_v45  ;;  %v3031_v54 = vmul.f32 %v3015_v12, %v2998_v46 }
 0x481   :  { %3052 = vst [vmem:[%s4571_s19 + $0x20] sm:$0xff] %v3036_v47  ;;  %3054 = vst [vmem:[%s4571_s19 + $0x30] sm:$0xff] %v3038_v49  ;;  %v3044_v55 = vmax.f32 %v3028_v50, 0.0  ;;  %v3046_v56 = vmax.f32 %v3030_v51, 0.0 }
 0x482   :  { %3053 = vst [vmem:[%s4571_s19 + $0x28] sm:$0xff] %v3037_v52  ;;  %3055 = vst [vmem:[%s4571_s19 + $0x38] sm:$0xff] %v3039_v18  ;;  %v3045_v57 = vmax.f32 %v3029_v53, 0.0  ;;  %v3047_v58 = vmax.f32 %v3031_v54, 0.0 }
 0x483   :  { %3060 = vst [vmem:[%s4571_s19 + $0x60] sm:$0xff] %v3044_v55  ;;  %3062 = vst [vmem:[%s4571_s19 + $0x70] sm:$0xff] %v3046_v56 }
 0x484   :  { %3061 = vst [vmem:[%s4571_s19 + $0x68] sm:$0xff] %v3045_v57  ;;  %3063 = vst [vmem:[%s4571_s19 + $0x78] sm:$0xff] %v3047_v58 }
 0x485   :  { %3072 = vsyncpa [#allocation5], 1 }
 0x486   :  { %3073 = vsyncpa [#allocation7], 1 }
 0x487   :  { %3074 = vsyncpa [#allocation10], 1 }
 0x488   :  { %3075 = vsyncpa [#allocation13], 1 }
 0x489   :  { %3076 = vsyncpa [#allocation16], 1 }
 0x48a   :  { %3077 = vsyncpa [#allocation19], 1 }
 0x48b   :  { %3078 = vsyncpa [#allocation22], 1 }
 0x48c   :  { %3079 = vsyncpa [#allocation25], 1 }

// kernel: net_forward.4
= control target key start
LH: loop header
LB: loop body
LE: loop exit
PB: predicated region body
PF: predicated region fallthrough
CT: control target
= control target key end

     0   :  { %s7089_s0 = inlined_call_operand.vmem [shape: f32[16,1024], index: 0, kind: input, shape index: {}]   ;;  %s7090_s1 = inlined_call_operand.vmem [shape: f32[16,128], index: 1, kind: input, shape index: {}]   ;;  %s7091_s2 = inlined_call_operand.hbm [shape: bf16[3,1024,1024], index: 2, kind: input, shape index: {}]   ;;  %s7092_s3 = inlined_call_operand.hbm [shape: f32[3,1,1024], index: 3, kind: input, shape index: {}]   ;;  %s7093_s4 = inlined_call_operand.hbm [shape: bf16[3,128,1024], index: 4, kind: input, shape index: {}]   ;;  %s7094_s5 = inlined_call_operand.hbm [shape: f32[3,1,1024], index: 5, kind: input, shape index: {}]   ;;  %s7095_s6 = inlined_call_operand.vmem [shape: f32[16,1024], index: 6, kind: output, shape index: {}]  }
   0x1   :  { %7100 = sst [smem:[#allocation14_spill]] %s7091_s2 }
   0x2   :  { %11 = vsyncpa [#allocation5], 0 }
   0x3   :  { %13 = vsyncpa [#allocation5 + $0x1], 0 }
   0x4   :  { %14 = vsyncpa [#allocation7], 0 }
   0x5   :  { %16 = vsyncpa [#allocation7 + $0x1], 0 }
   0x6   :  { %17 = vsyncpa [#allocation10], 0 }
   0x7   :  { %19 = vsyncpa [#allocation10 + $0x1], 0  ;;  %s5977_s21 = smov 0   ;;  %s5979_s22 = smov 0  }
   0x8   :  { %s5981_s23 = smov 0   ;;  %s5983_s24 = smov 0  }
   0x9 LB: > { %s5996_s25 = sadd.s32 4294967295, %s5933_s24   ;;  %s5999_s26 = sadd.s32 1, %s5933_s24   ;;  %s5933_s24 = sphi %s5983_s24, %s7114_s24   ;;  %s5929_s23 = sphi %s5981_s23, %s7113_s23   ;;  %s5925_s22 = sphi %s5979_s22, %s7112_s22   ;;  %s5921_s21 = sphi %s5977_s21, %s7111_s21  }
   0xa   : > { %s71_s27 = ssub.s32 %s5933_s24, %s5999_s26  ;;  %s74_s28 = sadd.s32 1, %s5929_s23 }
   0xb   : > { %p72_p0 = scmp.eq.s32.totalorder %s71_s27, 0  ;;  %p81_p1 = scmp.ne.s32.totalorder %s5929_s23, %s5925_s22 }
   0xc   : > { %p82_p2 = scmp.eq.s32.totalorder %s5933_s24, 0  ;;  %p87_p3 = scmp.ne.s32.totalorder %s5925_s22, %s5921_s21 }
   0xd   : > { %s6009_s29 = scalar_select %p72_p0, %s5929_s23, %s74_s28  }
   0xe   : > { %p83_p4 = por %p82_p2, %p81_p1  ;;  %p88_p5 = scmp.eq.s32.totalorder %s5996_s25, 0 }
   0xf   : > { %p5734_p6 = scmp.lt.s32.totalorder %s5933_s24, 3  ;;  %s6018_s7 = sand.u32 1, %s5929_s23  }
  0x10   : > { %p6013_p7 = por %p88_p5, %p87_p3  ;;  %s237_s9 = sand.u32 1, %s5933_s24  }
  0x11   : > { %p6020_p8 = pnand %p5734_p6, %p83_p4  ;;  %s7097_s10 = sshll.u32 %s6018_s7, 3 }
  0x12   : > { %s7101_s30 = scalar_select %p6013_p7, 1, 0 }
  0x13   : > { %s7102_s8 = scalar_select %p6020_p8, 1, 0 }
  0x14   : > { %s7098_s11 = sshll.u32 %s5933_s24, 7  ;;  %s241_s12 = scalar_lea.vmem [#allocation6], %s7097_s10 }
  0x15   : > { %s249_s13 = sshll.u32 %s241_s12, 4  ;;  %s6034_s16 = scalar_lea.hbm %s7092_s3, %s7098_s11  ;;  %s6036_s13 = int_to_ptr.vmem [resolvable:$true] %s249_s13 }
  0x16   : > { %s6038_s17 = scalar_lea.sflag [#allocation7], %s237_s9  ;;  %s5771_s18 = scalar_lea.hbm %s6034_s16, 128 }
  0x17   : > { %p5772_p9 = scmp.ne.s32.totalorder %s6034_s16, %s5771_s18  ;;  %p6044_p10 = pneg %p6020_p8 }
  0x18   : > { %s5776_s27 = scalar_lea.hbm %s7092_s3, 384  ;;  %p5777_p13 = scmp.lt.u32.totalorder %s6034_s16, %s7092_s3 }
  0x19   : > { %p5774_p11 = pnand %p6044_p10, %p5772_p9  ;;  %p5778_p0 = scmp.lt.u32.totalorder %s5776_s27, %s5771_s18 }
  0x1a   : > { %p5780_p2 = scmp.lt.u32.totalorder %s5771_s18, %s6034_s16 }
  0x1b   : > { %p5775_p12 = pneg %p5774_p11  ;;  %p5779_p1 = por %p5778_p0, %p5777_p13 }
  0x1d   : > { %p5781_p3 = por %p5780_p2, %p5779_p1 }
  0x1f   : > { %p5782_p4 = pnand %p5781_p3, %p5775_p12 }
  0x21   : > { %5785 = shalt.err (!%p5782_p4)
}
  0x22   : > { %s5786_s9 = scalar_lea.vmem %s6036_s13, 128  ;;  %s5935_s14 = smov [#allocation6]  }
  0x23   : > { %p5787_p5 = scmp.ne.s32.totalorder %s6036_s13, %s5786_s9  ;;  %s5791_s15 = sshll.u32 %s5935_s14, 4  ;;  %s5792_s15 = int_to_ptr.vmem [resolvable:$false] %s5791_s15 }
  0x24   : > { %s5793_s20 = scalar_lea.vmem %s5792_s15, 256  ;;  %p5794_p11 = scmp.lt.s32.totalorder %s6036_s13, %s5792_s15 }
  0x25   : > { %p5789_p6 = pnand %p5787_p5, %p6044_p10  ;;  %p5795_p7 = scmp.lt.s32.totalorder %s5793_s20, %s5786_s9 }
  0x27   : > { %p5790_p9 = pneg %p5789_p6  ;;  %p5796_p13 = por %p5795_p7, %p5794_p11 }
  0x29   : > { %p5797_p0 = pnand %p5796_p13, %p5790_p9 }
  0x2b   : > { %5800 = shalt.err (!%p5797_p0)
}
  0x2c   : > { %5727 = dma.hbm_to_vmem [thread:$0]  (!%p6020_p8), %s6034_s16, 128, %s6036_s13, %s6038_s17  }
  0x2d   : > { %p5060_p12 = scmp.ge.s32.totalorder %s5933_s24, 1  ;;  %p294_p1 = scmp.lt.s32.totalorder %s5933_s24, 4 }
  0x2e   : > { %s5048_s18 = sshll.u32 %s6018_s7, 12  ;;  %s5645_s27 = sshll.u32 %s5933_s24, 16 }
  0x2f   : > { %p6071_p2 = pnand %p5060_p12, %p294_p1  ;;  %s220_s28 = scalar_lea.vmem [#allocation4], %s5048_s18 }
  0x30   : > { %s227_s12 = sshll.u32 %s220_s28, 4  ;;  %s7105_s2 = sld [smem:[#allocation14_spill]]  ;;  %s6081_s12 = int_to_ptr.vmem [resolvable:$true] %s227_s12 }
  0x31   : > { %s7104_s21 = scalar_select %p6071_p2, 1, 0 }
  0x32   : > { %s217_s13 = scalar_lea.sflag [#allocation5], %s6018_s7 }
  0x36   : > { %s6079_s15 = scalar_lea.hbm %s7105_s2, %s5645_s27  ;;  %s5806_s28 = scalar_lea.hbm %s7105_s2, 196608 }
  0x37   : > { %s5801_s16 = scalar_lea.hbm %s6079_s15, 65536  ;;  %p5807_p5 = scmp.lt.u32.totalorder %s6079_s15, %s7105_s2 }
  0x38   : > { %p5802_p7 = scmp.ne.s32.totalorder %s6079_s15, %s5801_s16  ;;  %p5808_p6 = scmp.lt.u32.totalorder %s5806_s28, %s5801_s16 }
  0x39   : > { %p5810_p11 = scmp.lt.u32.totalorder %s5801_s16, %s6079_s15 }
  0x3a   : > { %p5804_p3 = pnand %p5802_p7, %p6044_p10  ;;  %p5809_p9 = por %p5808_p6, %p5807_p5 }
  0x3c   : > { %p5805_p4 = pneg %p5804_p3  ;;  %p5811_p13 = por %p5810_p11, %p5809_p9 }
  0x3e   : > { %p5812_p0 = pnand %p5811_p13, %p5805_p4 }
  0x40   : > { %5815 = shalt.err (!%p5812_p0)
}
  0x41   : > { %s5816_s27 = scalar_lea.vmem %s6081_s12, 65536  ;;  %s5936_s14 = smov [#allocation4]  }
  0x42   : > { %p5817_p12 = scmp.ne.s32.totalorder %s6081_s12, %s5816_s27  ;;  %s5821_s20 = sshll.u32 %s5936_s14, 4  ;;  %s5822_s20 = int_to_ptr.vmem [resolvable:$false] %s5821_s20 }
  0x43   : > { %s5823_s10 = scalar_lea.vmem %s5822_s20, 131072  ;;  %p5824_p3 = scmp.lt.s32.totalorder %s6081_s12, %s5822_s20 }
  0x44   : > { %p5819_p1 = pnand %p5817_p12, %p6044_p10  ;;  %p5825_p2 = scmp.lt.s32.totalorder %s5823_s10, %s5816_s27 }
  0x46   : > { %p5820_p7 = pneg %p5819_p1  ;;  %p5826_p5 = por %p5825_p2, %p5824_p3 }
  0x48   : > { %p5827_p6 = pnand %p5826_p5, %p5820_p7 }
  0x4a   : > { %5830 = shalt.err (!%p5827_p6)
}
  0x4b   : > { %s5937_s16 = smov 512   ;;  %s5938_s18 = smov 32  }
  0x4c   : > { %5724 = dma.hbm_to_vmem [thread:$0]  (!%p6020_p8), %s6079_s15, 65536, %s6081_s12, %s217_s13, %s5937_s16, %s5937_s16, %s5938_s18  }
  0x4d   : > { %s5054_s28 = sshll.u32 %s6018_s7, 9  ;;  %s5647_s9 = sshll.u32 %s5933_s24, 13 }
  0x4e   : > { %s6115_s20 = scalar_lea.hbm %s7093_s4, %s5647_s9  ;;  %s260_s10 = scalar_lea.vmem [#allocation8], %s5054_s28 }
  0x4f   : > { %s267_s11 = sshll.u32 %s260_s10, 4  ;;  %s5831_s2 = scalar_lea.hbm %s6115_s20, 8192  ;;  %s6117_s11 = int_to_ptr.vmem [resolvable:$true] %s267_s11 }
  0x50   : > { %p5832_p2 = scmp.ne.s32.totalorder %s6115_s20, %s5831_s2  ;;  %s5836_s13 = scalar_lea.hbm %s7093_s4, 24576 }
  0x51   : > { %p5837_p11 = scmp.lt.u32.totalorder %s6115_s20, %s7093_s4  ;;  %p5838_p13 = scmp.lt.u32.totalorder %s5836_s13, %s5831_s2 }
  0x52   : > { %p5834_p4 = pnand %p5832_p2, %p6044_p10  ;;  %p5840_p12 = scmp.lt.u32.totalorder %s5831_s2, %s6115_s20 }
  0x53   : > { %p5839_p0 = por %p5838_p13, %p5837_p11 }
  0x54   : > { %p5835_p9 = pneg %p5834_p4 }
  0x55   : > { %p5841_p1 = por %p5840_p12, %p5839_p0 }
  0x57   : > { %p5842_p7 = pnand %p5841_p1, %p5835_p9 }
  0x59   : > { %5845 = shalt.err (!%p5842_p7)
}
  0x5a   : > { %s5846_s28 = scalar_lea.vmem %s6117_s11, 8192  ;;  %s5939_s14 = smov [#allocation8]  }
  0x5b   : > { %p5847_p3 = scmp.ne.s32.totalorder %s6117_s11, %s5846_s28  ;;  %s5851_s10 = sshll.u32 %s5939_s14, 4  ;;  %s5852_s10 = int_to_ptr.vmem [resolvable:$false] %s5851_s10 }
  0x5c   : > { %s5853_s12 = scalar_lea.vmem %s5852_s10, 16384  ;;  %p5854_p2 = scmp.lt.s32.totalorder %s6117_s11, %s5852_s10 }
  0x5d   : > { %p5849_p5 = pnand %p5847_p3, %p6044_p10  ;;  %p5855_p4 = scmp.lt.s32.totalorder %s5853_s12, %s5846_s28 }
  0x5f   : > { %p5850_p6 = pneg %p5849_p5  ;;  %p5856_p11 = por %p5855_p4, %p5854_p2 }
  0x61   : > { %p5857_p13 = pnand %p5856_p11, %p5850_p6 }
  0x63   : > { %5860 = shalt.err (!%p5857_p13)
}
  0x64   : > { %5730 = dma.hbm_to_vmem [thread:$0]  (!%p6020_p8), %s6115_s20, 8192, %s6117_s11, %s6038_s17, %s5937_s16, %s5937_s16, %s5938_s18  }
  0x65   : > { %s7106_s2 = sshll.u32 %s5933_s24, 7  ;;  %s7107_s9 = sshll.u32 %s6018_s7, 3 }
  0x66   : > { %s6149_s27 = scalar_lea.hbm %s7094_s5, %s7106_s2  ;;  %s281_s28 = scalar_lea.vmem [#allocation9], %s7107_s9 }
  0x67   : > { %s289_s14 = sshll.u32 %s281_s28, 4  ;;  %s278_s10 = scalar_lea.sflag [#allocation10], %s6018_s7  ;;  %s290_s14 = int_to_ptr.vmem [resolvable:$true] %s289_s14 }
  0x68   : > { %s5861_s12 = scalar_lea.hbm %s6149_s27, 128  ;;  %s5866_s17 = scalar_lea.hbm %s7094_s5, 384 }
  0x69   : > { %p5862_p9 = scmp.ne.s32.totalorder %s6149_s27, %s5861_s12  ;;  %p5867_p1 = scmp.lt.u32.totalorder %s6149_s27, %s7094_s5 }
  0x6a   : > { %p5868_p7 = scmp.lt.u32.totalorder %s5866_s17, %s5861_s12  ;;  %p5870_p5 = scmp.lt.u32.totalorder %s5861_s12, %s6149_s27 }
  0x6b   : > { %p5864_p0 = pnand %p5862_p9, %p6044_p10 }
  0x6c   : > { %p5869_p3 = por %p5868_p7, %p5867_p1 }
  0x6d   : > { %p5865_p12 = pneg %p5864_p0 }
  0x6e   : > { %p5871_p6 = por %p5870_p5, %p5869_p3 }
  0x70   : > { %p5872_p2 = pnand %p5871_p6, %p5865_p12 }
  0x72   : > { %5875 = shalt.err (!%p5872_p2)
}
  0x73   : > { %s5876_s7 = scalar_lea.vmem %s290_s14, 128  ;;  %s5940_s20 = smov [#allocation9]  }
  0x74   : > { %p5877_p4 = scmp.ne.s32.totalorder %s290_s14, %s5876_s7  ;;  %s5881_s2 = sshll.u32 %s5940_s20, 4  ;;  %s5882_s2 = int_to_ptr.vmem [resolvable:$false] %s5881_s2 }
  0x75   : > { %s5883_s15 = scalar_lea.vmem %s5882_s2, 256  ;;  %p5884_p9 = scmp.lt.s32.totalorder %s290_s14, %s5882_s2 }
  0x76   : > { %p5879_p11 = pnand %p5877_p4, %p6044_p10  ;;  %p5885_p0 = scmp.lt.s32.totalorder %s5883_s15, %s5876_s7 }
  0x78   : > { %p5880_p13 = pneg %p5879_p11  ;;  %p5886_p8 = por %p5885_p0, %p5884_p9 }
  0x7a   : > { %p5887_p1 = pnand %p5886_p8, %p5880_p13 }
  0x7c   : > { %5890 = shalt.err (!%p5887_p1)
}
  0x7d   : > { %p7108_p7 = scmp.ne.s32.totalorder %s7102_s8, 0  ;;  %p7109_p12 = scmp.ne.s32.totalorder %s7104_s21, 0 }
  0x7e   : > { %s300_s19 = sand.u32 (!%p7109_p12), 1, %s5925_s22   ;;  %p7110_p10 = scmp.ne.s32.totalorder (!%p7109_p12), %s7101_s30, 0 }
  0x7f   : > { %5733 = dma.hbm_to_vmem [thread:$0]  (!%p7108_p7), %s6149_s27, 128, %s290_s14, %s278_s10  }
  0x80   : > { %298 = sbr.rel (%p7109_p12) target bundleno = 965 (0x3c5), region = 44  ;;  %s5061_s13 = sshll.u32 (!%p7109_p12), %s300_s19, 12 }
  0x81   : > { %s301_s9 = scalar_lea.sflag (!%p7109_p12), [#allocation5], %s300_s19  ;;  %s6174_s28 = scalar_lea.vmem (!%p7109_p12), [#allocation4], %s5061_s13 }
  0x87   : > { %5908 = dma.done.wait (%p7110_p10), %s301_s9, 65536  }
  0x88   : > { %5910 = vsyncadd (%p7110_p10), %s301_s9, 4294901760  ;;  %s309_s8 = sand.u32 1, %s5996_s25   ;;  %s5062_s12 = sshll.u32 %s300_s19, 3 }
  0x89   : > { %s310_s27 = scalar_lea.sflag [#allocation7], %s309_s8  ;;  %s6181_s14 = scalar_lea.vmem [#allocation6], %s5062_s12 }
  0x8a   : > { %5912 = dma.done.wait (%p7110_p10), %s310_s27, 8320  }
  0x8b   : > { %5914 = vsyncadd (%p7110_p10), %s310_s27, 4294958976  ;;  %s5063_s21 = sshll.u32 %s300_s19, 9  ;;  %s328_s24 = scalar_lea.sflag [#allocation10], %s300_s19 }
  0x8c   : > { %s6187_s10 = scalar_lea.vmem [#allocation8], %s5063_s21  ;;  %s6189_s11 = scalar_lea.vmem [#allocation9], %s5062_s12 }
  0x8d   : > { %5916 = dma.done.wait (%p7110_p10), %s328_s24, 128  }
  0x8e   : > { %5918 = vsyncadd (%p7110_p10), %s328_s24, 4294967168  ;;  %p5065_p8 = scmp.ne.s32.totalorder %s5996_s25, 0 }
  0x8f   : > { %v375_v0 = vld [vmem:[%s7089_s0] sm:$0xff] (!%p5065_p8)  ;;  %v376_v1 = vld [vmem:[%s7089_s0 + $0x8] sm:$0xff] (!%p5065_p8)  ;;  %v377_v2 = vld [vmem:[%s7089_s0 + $0x10] sm:$0xff] (!%p5065_p8) }
  0x90   : > { %374 = sbr.rel (%p5065_p8) target bundleno = 155 (0x9b), region = 64  ;;  %391 = vst [vmem:[#allocation2] sm:$0xff] (!%p5065_p8), %v375_v0  ;;  %392 = vst [vmem:[#allocation2 + $0x8] sm:$0xff] (!%p5065_p8), %v376_v1  ;;  %v378_v3 = vld [vmem:[%s7089_s0 + $0x18] sm:$0xff] (!%p5065_p8)  ;;  %v379_v4 = vld [vmem:[%s7089_s0 + $0x20] sm:$0xff] (!%p5065_p8) }
  0x91   : > { %393 = vst [vmem:[#allocation2 + $0x10] sm:$0xff] (!%p5065_p8), %v377_v2  ;;  %v380_v5 = vld [vmem:[%s7089_s0 + $0x28] sm:$0xff] (!%p5065_p8)  ;;  %394 = vst [vmem:[#allocation2 + $0x18] sm:$0xff] (!%p5065_p8), %v378_v3  ;;  %v381_v6 = vld [vmem:[%s7089_s0 + $0x30] sm:$0xff] (!%p5065_p8) }
  0x92   : > { %395 = vst [vmem:[#allocation2 + $0x20] sm:$0xff] (!%p5065_p8), %v379_v4  ;;  %396 = vst [vmem:[#allocation2 + $0x28] sm:$0xff] (!%p5065_p8), %v380_v5  ;;  %v382_v7 = vld [vmem:[%s7089_s0 + $0x38] sm:$0xff] (!%p5065_p8)  ;;  %v383_v8 = vld [vmem:[%s7089_s0 + $0x40] sm:$0xff] (!%p5065_p8) }
  0x93   : > { %397 = vst [vmem:[#allocation2 + $0x30] sm:$0xff] (!%p5065_p8), %v381_v6  ;;  %398 = vst [vmem:[#allocation2 + $0x38] sm:$0xff] (!%p5065_p8), %v382_v7  ;;  %v384_v9 = vld [vmem:[%s7089_s0 + $0x48] sm:$0xff] (!%p5065_p8)  ;;  %v385_v10 = vld [vmem:[%s7089_s0 + $0x50] sm:$0xff] (!%p5065_p8) }
  0x94   : > { %399 = vst [vmem:[#allocation2 + $0x40] sm:$0xff] (!%p5065_p8), %v383_v8  ;;  %v386_v11 = vld [vmem:[%s7089_s0 + $0x58] sm:$0xff] (!%p5065_p8)  ;;  %400 = vst [vmem:[#allocation2 + $0x48] sm:$0xff] (!%p5065_p8), %v384_v9  ;;  %v387_v12 = vld [vmem:[%s7089_s0 + $0x60] sm:$0xff] (!%p5065_p8) }
  0x95   : > { %401 = vst [vmem:[#allocation2 + $0x50] sm:$0xff] (!%p5065_p8), %v385_v10  ;;  %402 = vst [vmem:[#allocation2 + $0x58] sm:$0xff] (!%p5065_p8), %v386_v11  ;;  %v388_v13 = vld [vmem:[%s7089_s0 + $0x68] sm:$0xff] (!%p5065_p8)  ;;  %v389_v14 = vld [vmem:[%s7089_s0 + $0x70] sm:$0xff] (!%p5065_p8) }
  0x96   : > { %403 = vst [vmem:[#allocation2 + $0x60] sm:$0xff] (!%p5065_p8), %v387_v12  ;;  %404 = vst [vmem:[#allocation2 + $0x68] sm:$0xff] (!%p5065_p8), %v388_v13  ;;  %v390_v15 = vld [vmem:[%s7089_s0 + $0x78] sm:$0xff] (!%p5065_p8)  ;;  %v407_v16 = vld [vmem:[%s7090_s1] sm:$0xff] (!%p5065_p8) }
  0x97   : > { %405 = vst [vmem:[#allocation2 + $0x70] sm:$0xff] %v389_v14  ;;  %v408_v17 = vld [vmem:[%s7090_s1 + $0x8] sm:$0xff]  ;;  %406 = vst [vmem:[#allocation2 + $0x78] sm:$0xff] %v390_v15  ;;  %v409_v18 = vmax.f32 %v407_v16, 0.0 }
  0x98   : > { %v410_v19 = vmax.f32 %v408_v17, 0.0 }
  0x99   : > { %411 = vst [vmem:[#allocation3] sm:$0xff] %v409_v18 }
  0x9a   : > { %412 = vst [vmem:[#allocation3 + $0x8] sm:$0xff] %v410_v19 }
  0x9b PF: > { %v416_v20 = vld [vmem:[%s6187_s10] sm:$0xff]  ;;  %v417_v22 = vld [vmem:[%s6187_s10 + $0x8] sm:$0xff]  ;;  %v5941_v28 = vmov 0   ;;  %v418_v19 = vld [vmem:[%s6187_s10 + $0x10] sm:$0xff]  ;;  %p5642_p3 = scmp.ne.s32.totalorder %s5996_s25, 2 }
  0x9c   : > { %v420_v21 = vld [vmem:[%s6187_s10 + $0x20] sm:$0xff]  ;;  %v421_v24 = vld [vmem:[%s6187_s10 + $0x28] sm:$0xff]  ;;  %874 = vmatprep.mubr.bf16.mxu0 %v5941_v28  ;;  %917 = vmatprep.mubr.bf16.mxu1 %v5941_v28 }
  0x9d   : > { %v5067_v23 = vcombine.high %v416_v20, %v420_v21  ;;  %v5066_v25 = vcombine.low %v416_v20, %v420_v21  ;;  %v424_v26 = vld [vmem:[%s6187_s10 + $0x40] sm:$0xff]  ;;  %v5069_v29 = vcombine.high %v417_v22, %v421_v24  ;;  %v5068_v30 = vcombine.low %v417_v22, %v421_v24  ;;  %v425_v32 = vld [vmem:[%s6187_s10 + $0x48] sm:$0xff]  ;;  %v422_v20 = vld [vmem:[%s6187_s10 + $0x30] sm:$0xff] }
  0x9e   : > { %v428_v27 = vld [vmem:[%s6187_s10 + $0x60] sm:$0xff]  ;;  %v429_v33 = vld [vmem:[%s6187_s10 + $0x68] sm:$0xff]  ;;  %v419_v21 = vld [vmem:[%s6187_s10 + $0x18] sm:$0xff] }
  0x9f   : > { %v5075_v31 = vcombine.high %v424_v26, %v428_v27  ;;  %v432_v34 = vld [vmem:[%s6187_s10 + $0x80] sm:$0xff]  ;;  %842 = vmatprep.subr.bf16.mxu0 %v5067_v23  ;;  %v5077_v35 = vcombine.high %v425_v32, %v429_v33  ;;  %v433_v37 = vld [vmem:[%s6187_s10 + $0x88] sm:$0xff]  ;;  %885 = vmatprep.subr.bf16.mxu1 %v5069_v29  ;;  %v5074_v39 = vcombine.low %v424_v26, %v428_v27  ;;  %v423_v22 = vld [vmem:[%s6187_s10 + $0x38] sm:$0xff] }
  0xa0   : > { %v436_v36 = vld [vmem:[%s6187_s10 + $0xa0] sm:$0xff]  ;;  %v437_v38 = vld [vmem:[%s6187_s10 + $0xa8] sm:$0xff]  ;;  %843 = vmatpush1.bf16.msra.mxu0 %v5066_v25  ;;  %886 = vmatpush1.bf16.msra.mxu1 %v5068_v30  ;;  %v5076_v40 = vcombine.low %v425_v32, %v429_v33  ;;  %v5071_v27 = vcombine.high %v418_v19, %v422_v20  ;;  %v5073_v29 = vcombine.high %v419_v21, %v423_v22  ;;  %v426_v30 = vld [vmem:[%s6187_s10 + $0x50] sm:$0xff] }
  0xa1   : > { %844 = vmatprep.subr.bf16.mxu0 %v5075_v31  ;;  %v5083_v41 = vcombine.high %v432_v34, %v436_v36  ;;  %887 = vmatprep.subr.bf16.mxu1 %v5077_v35  ;;  %v5085_v42 = vcombine.high %v433_v37, %v437_v38  ;;  %v440_v43 = vld [vmem:[%s6187_s10 + $0xc0] sm:$0xff]  ;;  %v441_v45 = vld [vmem:[%s6187_s10 + $0xc8] sm:$0xff]  ;;  %v5082_v47 = vcombine.low %v432_v34, %v436_v36  ;;  %v430_v31 = vld [vmem:[%s6187_s10 + $0x70] sm:$0xff] }
  0xa2   : > { %v444_v44 = vld [vmem:[%s6187_s10 + $0xe0] sm:$0xff]  ;;  %v445_v46 = vld [vmem:[%s6187_s10 + $0xe8] sm:$0xff]  ;;  %v5084_v48 = vcombine.low %v433_v37, %v437_v38  ;;  %v427_v33 = vld [vmem:[%s6187_s10 + $0x58] sm:$0xff]  ;;  %v5070_v35 = vcombine.low %v418_v19, %v422_v20  ;;  %v5072_v36 = vcombine.low %v419_v21, %v423_v22  ;;  %v5079_v37 = vcombine.high %v426_v30, %v430_v31 }
  0xa3   : > { %v5091_v49 = vcombine.high %v440_v43, %v444_v44  ;;  %v5093_v50 = vcombine.high %v441_v45, %v445_v46  ;;  %v448_v51 = vld [vmem:[%s6187_s10 + $0x100] sm:$0xff]  ;;  %v449_v53 = vld [vmem:[%s6187_s10 + $0x108] sm:$0xff]  ;;  %v5090_v55 = vcombine.low %v440_v43, %v444_v44  ;;  %v5092_v56 = vcombine.low %v441_v45, %v445_v46  ;;  %v431_v34 = vld [vmem:[%s6187_s10 + $0x78] sm:$0xff] }
  0xa4   : > { %845 = vmatpush1.bf16.msra.mxu0 %v5074_v39  ;;  %888 = vmatpush1.bf16.msra.mxu1 %v5076_v40  ;;  %v452_v52 = vld [vmem:[%s6187_s10 + $0x120] sm:$0xff]  ;;  %v453_v54 = vld [vmem:[%s6187_s10 + $0x128] sm:$0xff]  ;;  %v5081_v38 = vcombine.high %v427_v33, %v431_v34  ;;  %v434_v39 = vld [vmem:[%s6187_s10 + $0x90] sm:$0xff]  ;;  %v5078_v43 = vcombine.low %v426_v30, %v430_v31  ;;  %v5080_v44 = vcombine.low %v427_v33, %v431_v34 }
  0xa5   : > { %846 = vmatprep.subr.bf16.mxu0 %v5083_v41  ;;  %889 = vmatprep.subr.bf16.mxu1 %v5085_v42  ;;  %v5099_v57 = vcombine.high %v448_v51, %v452_v52  ;;  %v5101_v58 = vcombine.high %v449_v53, %v453_v54  ;;  %v456_v59 = vld [vmem:[%s6187_s10 + $0x140] sm:$0xff]  ;;  %v457_v61 = vld [vmem:[%s6187_s10 + $0x148] sm:$0xff]  ;;  %v5098_v63 = vcombine.low %v448_v51, %v452_v52  ;;  %v438_v40 = vld [vmem:[%s6187_s10 + $0xb0] sm:$0xff] }
  0xa6   : > { %v460_v60 = vld [vmem:[%s6187_s10 + $0x160] sm:$0xff]  ;;  %v461_v62 = vld [vmem:[%s6187_s10 + $0x168] sm:$0xff]  ;;  %v5100_v0 = vcombine.low %v449_v53, %v453_v54  ;;  %v435_v41 = vld [vmem:[%s6187_s10 + $0x98] sm:$0xff]  ;;  %v5087_v45 = vcombine.high %v434_v39, %v438_v40  ;;  %v5086_v51 = vcombine.low %v434_v39, %v438_v40 }
  0xa7   : > { %v5107_v1 = vcombine.high %v456_v59, %v460_v60  ;;  %v5109_v2 = vcombine.high %v457_v61, %v461_v62  ;;  %v464_v3 = vld [vmem:[%s6187_s10 + $0x180] sm:$0xff]  ;;  %v465_v5 = vld [vmem:[%s6187_s10 + $0x188] sm:$0xff]  ;;  %v5106_v7 = vcombine.low %v456_v59, %v460_v60  ;;  %v5108_v8 = vcombine.low %v457_v61, %v461_v62  ;;  %v439_v42 = vld [vmem:[%s6187_s10 + $0xb8] sm:$0xff] }
  0xa8   : > { %847 = vmatpush1.bf16.msra.mxu0 %v5082_v47  ;;  %890 = vmatpush1.bf16.msra.mxu1 %v5084_v48  ;;  %v468_v4 = vld [vmem:[%s6187_s10 + $0x1a0] sm:$0xff]  ;;  %v469_v6 = vld [vmem:[%s6187_s10 + $0x1a8] sm:$0xff]  ;;  %v5089_v46 = vcombine.high %v435_v41, %v439_v42  ;;  %v442_v47 = vld [vmem:[%s6187_s10 + $0xd0] sm:$0xff]  ;;  %v5088_v52 = vcombine.low %v435_v41, %v439_v42 }
  0xa9   : > { %848 = vmatprep.subr.bf16.mxu0 %v5091_v49  ;;  %891 = vmatprep.subr.bf16.mxu1 %v5093_v50  ;;  %v5115_v9 = vcombine.high %v464_v3, %v468_v4  ;;  %v5117_v10 = vcombine.high %v465_v5, %v469_v6  ;;  %v472_v11 = vld [vmem:[%s6187_s10 + $0x1c0] sm:$0xff]  ;;  %v473_v13 = vld [vmem:[%s6187_s10 + $0x1c8] sm:$0xff]  ;;  %v5114_v15 = vcombine.low %v464_v3, %v468_v4  ;;  %v446_v48 = vld [vmem:[%s6187_s10 + $0xf0] sm:$0xff] }
  0xaa   : > { %v476_v12 = vld [vmem:[%s6187_s10 + $0x1e0] sm:$0xff]  ;;  %v477_v14 = vld [vmem:[%s6187_s10 + $0x1e8] sm:$0xff]  ;;  %v5116_v16 = vcombine.low %v465_v5, %v469_v6  ;;  %v443_v49 = vld [vmem:[%s6187_s10 + $0xd8] sm:$0xff]  ;;  %v5095_v53 = vcombine.high %v442_v47, %v446_v48  ;;  %v5094_v59 = vcombine.low %v442_v47, %v446_v48 }
  0xab   : > { %v5123_v17 = vcombine.high %v472_v11, %v476_v12  ;;  %v5125_v18 = vcombine.high %v473_v13, %v477_v14  ;;  %v5122_v23 = vcombine.low %v472_v11, %v476_v12  ;;  %v413_v24 = vld [vmem:[#allocation3] sm:$0xff]  ;;  %v414_v25 = vld [vmem:[#allocation3 + $0x8] sm:$0xff]  ;;  %v5124_v26 = vcombine.low %v473_v13, %v477_v14  ;;  %v447_v50 = vld [vmem:[%s6187_s10 + $0xf8] sm:$0xff] }
  0xac   : > { %849 = vmatpush1.bf16.msra.mxu0 %v5090_v55  ;;  %892 = vmatpush1.bf16.msra.mxu1 %v5092_v56  ;;  %v6290_v32 = vpack.c.bf16 %v414_v25, %v413_v24  ;;  %v5097_v54 = vcombine.high %v443_v49, %v447_v50  ;;  %v450_v55 = vld [vmem:[%s6187_s10 + $0x110] sm:$0xff]  ;;  %v1039_v24 = vld [vmem:[%s6174_s28 + $0x8] sm:$0xff] }
  0xad   : > { %850 = vmatprep.subr.bf16.mxu0 %v5099_v57  ;;  %893 = vmatprep.subr.bf16.mxu1 %v5101_v58  ;;  %v454_v56 = vld [vmem:[%s6187_s10 + $0x130] sm:$0xff]  ;;  %v451_v57 = vld [vmem:[%s6187_s10 + $0x118] sm:$0xff] }
  0xae   : > { %v455_v58 = vld [vmem:[%s6187_s10 + $0x138] sm:$0xff]  ;;  %v5103_v60 = vcombine.high %v450_v55, %v454_v56  ;;  %v458_v62 = vld [vmem:[%s6187_s10 + $0x150] sm:$0xff] }
  0xaf   : > { %v5105_v61 = vcombine.high %v451_v57, %v455_v58  ;;  %v5104_v3 = vcombine.low %v451_v57, %v455_v58  ;;  %v466_v6 = vld [vmem:[%s6187_s10 + $0x190] sm:$0xff]  ;;  %v1043_v25 = vld [vmem:[%s6174_s28 + $0x28] sm:$0xff] }
  0xb0   : > { %851 = vmatpush1.bf16.msra.mxu0 %v5098_v63  ;;  %894 = vmatpush1.bf16.msra.mxu1 %v5100_v0  ;;  %v462_v63 = vld [vmem:[%s6187_s10 + $0x170] sm:$0xff]  ;;  %v459_v0 = vld [vmem:[%s6187_s10 + $0x158] sm:$0xff]  ;;  %v5133_v30 = vcombine.high %v1039_v24, %v1043_v25  ;;  %v5132_v39 = vcombine.low %v1039_v24, %v1043_v25 }
  0xb1   : > { %852 = vmatprep.subr.bf16.mxu0 %v5107_v1  ;;  %895 = vmatprep.subr.bf16.mxu1 %v5109_v2  ;;  %v463_v1 = vld [vmem:[%s6187_s10 + $0x178] sm:$0xff]  ;;  %v5102_v2 = vcombine.low %v450_v55, %v454_v56  ;;  %v5111_v4 = vcombine.high %v458_v62, %v462_v63  ;;  %v474_v14 = vld [vmem:[%s6187_s10 + $0x1d0] sm:$0xff] }
  0xb2   : > { %v5113_v5 = vcombine.high %v459_v0, %v463_v1  ;;  %v5112_v11 = vcombine.low %v459_v0, %v463_v1  ;;  %v1038_v22 = vld [vmem:[%s6174_s28] sm:$0xff]  ;;  %v1047_v34 = vld [vmem:[%s6174_s28 + $0x48] sm:$0xff] }
  0xb3   : > { %v1046_v31 = vld [vmem:[%s6174_s28 + $0x40] sm:$0xff] }
  0xb4   : > { %853 = vmatpush1.bf16.msra.mxu0 %v5106_v7  ;;  %896 = vmatpush1.bf16.msra.mxu1 %v5108_v8  ;;  %v470_v7 = vld [vmem:[%s6187_s10 + $0x1b0] sm:$0xff]  ;;  %v467_v8 = vld [vmem:[%s6187_s10 + $0x198] sm:$0xff] }
  0xb5   : > { %854 = vmatprep.subr.bf16.mxu0 %v5115_v9  ;;  %897 = vmatprep.subr.bf16.mxu1 %v5117_v10  ;;  %v471_v9 = vld [vmem:[%s6187_s10 + $0x1b8] sm:$0xff]  ;;  %v5110_v10 = vcombine.low %v458_v62, %v462_v63  ;;  %v5119_v12 = vcombine.high %v466_v6, %v470_v7  ;;  %v1050_v33 = vld [vmem:[%s6174_s28 + $0x60] sm:$0xff] }
  0xb6   : > { %v5121_v13 = vcombine.high %v467_v8, %v471_v9  ;;  %v5120_v19 = vcombine.low %v467_v8, %v471_v9  ;;  %v5139_v40 = vcombine.high %v1046_v31, %v1050_v33  ;;  %v1054_v42 = vld [vmem:[%s6174_s28 + $0x80] sm:$0xff]  ;;  %v5138_v47 = vcombine.low %v1046_v31, %v1050_v33 }
  0xb7   : > { %v1070_v58 = vld [vmem:[%s6174_s28 + $0x100] sm:$0xff] }
  0xb8   : > { %855 = vmatpush1.bf16.msra.mxu0 %v5114_v15  ;;  %898 = vmatpush1.bf16.msra.mxu1 %v5116_v16  ;;  %v478_v15 = vld [vmem:[%s6187_s10 + $0x1f0] sm:$0xff]  ;;  %v475_v16 = vld [vmem:[%s6187_s10 + $0x1d8] sm:$0xff] }
  0xb9   : > { %856 = vmatprep.subr.bf16.mxu0 %v5123_v17  ;;  %899 = vmatprep.subr.bf16.mxu1 %v5125_v18  ;;  %v479_v17 = vld [vmem:[%s6187_s10 + $0x1f8] sm:$0xff]  ;;  %v5118_v18 = vcombine.low %v466_v6, %v470_v7  ;;  %v5127_v20 = vcombine.high %v474_v14, %v478_v15  ;;  %v1078_v1 = vld [vmem:[%s6174_s28 + $0x140] sm:$0xff] }
  0xba   : > { %v5129_v21 = vcombine.high %v475_v16, %v479_v17  ;;  %v1086_v9 = vld [vmem:[%s6174_s28 + $0x180] sm:$0xff] }
  0xbb   : > { %v1102_v25 = vld [vmem:[%s6174_s28 + $0x200] sm:$0xff] }
  0xbc   : > { %857 = vmatpush1.bf16.msra.mxu0 %v5122_v23  ;;  %900 = vmatpush1.bf16.msra.mxu1 %v5124_v26  ;;  %v1042_v23 = vld [vmem:[%s6174_s28 + $0x20] sm:$0xff]  ;;  %v5126_v26 = vcombine.low %v474_v14, %v478_v15 }
  0xbd   : > { %928 = vmatprep.subr.bf16.mxu0 %v5071_v27  ;;  %971 = vmatprep.subr.bf16.mxu1 %v5073_v29  ;;  %v5128_v27 = vcombine.low %v475_v16, %v479_v17  ;;  %v5131_v29 = vcombine.high %v1038_v22, %v1042_v23  ;;  %v1094_v17 = vld [vmem:[%s6174_s28 + $0x1c0] sm:$0xff] }
  0xbf   : > { %875 = vmatmul.mubr.bf16.vlgmr.msra.gmra.mrb[0].mxu0 %v6290_v32  ;;  %918 = vmatmul.mubr.bf16.vlgmr.msra.gmra.mrb[0].mxu1 %v6290_v32 }
  0xc0   : > { %929 = vmatpush1.bf16.msra.mxu0 %v5070_v35  ;;  %972 = vmatpush1.bf16.msra.mxu1 %v5072_v36  ;;  %v1051_v35 = vld [vmem:[%s6174_s28 + $0x68] sm:$0xff]  ;;  %v1015_v36 = vld [vmem:[#allocation2 + $0x8] sm:$0xff] }
  0xc1   : > { %930 = vmatprep.subr.bf16.mxu0 %v5079_v37  ;;  %973 = vmatprep.subr.bf16.mxu1 %v5081_v38  ;;  %v1023_v37 = vld [vmem:[#allocation2 + $0x48] sm:$0xff]  ;;  %v5130_v38 = vcombine.low %v1038_v22, %v1042_v23  ;;  %v5141_v41 = vcombine.high %v1047_v34, %v1051_v35  ;;  %v5140_v48 = vcombine.low %v1047_v34, %v1051_v35  ;;  %v1110_v35 = vld [vmem:[%s6174_s28 + $0x240] sm:$0xff] }
  0xc2   : > { %960 = vmatprep.mubr.bf16.mxu0 %v5941_v28  ;;  %1003 = vmatprep.mubr.bf16.mxu1 %v5941_v28  ;;  %v5096_v28 = vcombine.low %v443_v49, %v447_v50 }
  0xc4   : > { %931 = vmatpush1.bf16.msra.mxu0 %v5078_v43  ;;  %974 = vmatpush1.bf16.msra.mxu1 %v5080_v44  ;;  %v1058_v43 = vld [vmem:[%s6174_s28 + $0xa0] sm:$0xff]  ;;  %v6332_v44 = vpack.c.bf16 %v1023_v37, %v1015_v36  ;;  %v1111_v37 = vld [vmem:[%s6174_s28 + $0x248] sm:$0xff] }
  0xc5   : > { %932 = vmatprep.subr.bf16.mxu0 %v5087_v45  ;;  %975 = vmatprep.subr.bf16.mxu1 %v5089_v46  ;;  %v1055_v45 = vld [vmem:[%s6174_s28 + $0x88] sm:$0xff]  ;;  %v5147_v49 = vcombine.high %v1054_v42, %v1058_v43  ;;  %v1114_v36 = vld [vmem:[%s6174_s28 + $0x260] sm:$0xff] }
  0xc6   : > { %v1059_v46 = vld [vmem:[%s6174_s28 + $0xa8] sm:$0xff] }
  0xc7   : > { %v5149_v50 = vcombine.high %v1055_v45, %v1059_v46  ;;  %v5148_v55 = vcombine.low %v1055_v45, %v1059_v46  ;;  %v1122_v45 = vld [vmem:[%s6174_s28 + $0x2a0] sm:$0xff]  ;;  %v1119_v46 = vld [vmem:[%s6174_s28 + $0x288] sm:$0xff] }
  0xc8   : > { %933 = vmatpush1.bf16.msra.mxu0 %v5086_v51  ;;  %976 = vmatpush1.bf16.msra.mxu1 %v5088_v52  ;;  %v1062_v51 = vld [vmem:[%s6174_s28 + $0xc0] sm:$0xff] }
  0xc9   : > { %934 = vmatprep.subr.bf16.mxu0 %v5095_v53  ;;  %977 = vmatprep.subr.bf16.mxu1 %v5097_v54  ;;  %v1066_v52 = vld [vmem:[%s6174_s28 + $0xe0] sm:$0xff]  ;;  %v1063_v53 = vld [vmem:[%s6174_s28 + $0xc8] sm:$0xff] }
  0xca   : > { %v1067_v54 = vld [vmem:[%s6174_s28 + $0xe8] sm:$0xff]  ;;  %v5155_v56 = vcombine.high %v1062_v51, %v1066_v52 }
  0xcb   : > { %v5157_v57 = vcombine.high %v1063_v53, %v1067_v54  ;;  %v5156_v62 = vcombine.low %v1063_v53, %v1067_v54  ;;  %v1130_v53 = vld [vmem:[%s6174_s28 + $0x2e0] sm:$0xff]  ;;  %v1127_v54 = vld [vmem:[%s6174_s28 + $0x2c8] sm:$0xff] }
  0xcc   : > { %935 = vmatpush1.bf16.msra.mxu0 %v5094_v59  ;;  %978 = vmatpush1.bf16.msra.mxu1 %v5096_v28  ;;  %v1074_v59 = vld [vmem:[%s6174_s28 + $0x120] sm:$0xff]  ;;  %v1071_v28 = vld [vmem:[%s6174_s28 + $0x108] sm:$0xff] }
  0xcd   : > { %936 = vmatprep.subr.bf16.mxu0 %v5103_v60  ;;  %979 = vmatprep.subr.bf16.mxu1 %v5105_v61  ;;  %v1075_v60 = vld [vmem:[%s6174_s28 + $0x128] sm:$0xff]  ;;  %v5154_v61 = vcombine.low %v1062_v51, %v1066_v52  ;;  %v5163_v63 = vcombine.high %v1070_v58, %v1074_v59  ;;  %v1126_v52 = vld [vmem:[%s6174_s28 + $0x2c0] sm:$0xff] }
  0xce   : > { %v5165_v0 = vcombine.high %v1071_v28, %v1075_v60  ;;  %v5164_v6 = vcombine.low %v1071_v28, %v1075_v60  ;;  %v1138_v28 = vld [vmem:[%s6174_s28 + $0x320] sm:$0xff]  ;;  %v1135_v60 = vld [vmem:[%s6174_s28 + $0x308] sm:$0xff] }
  0xd0   : > { %937 = vmatpush1.bf16.msra.mxu0 %v5102_v2  ;;  %980 = vmatpush1.bf16.msra.mxu1 %v5104_v3  ;;  %v1082_v2 = vld [vmem:[%s6174_s28 + $0x160] sm:$0xff]  ;;  %v1079_v3 = vld [vmem:[%s6174_s28 + $0x148] sm:$0xff] }
  0xd1   : > { %938 = vmatprep.subr.bf16.mxu0 %v5111_v4  ;;  %981 = vmatprep.subr.bf16.mxu1 %v5113_v5  ;;  %v1083_v4 = vld [vmem:[%s6174_s28 + $0x168] sm:$0xff]  ;;  %v5162_v5 = vcombine.low %v1070_v58, %v1074_v59  ;;  %v5171_v7 = vcombine.high %v1078_v1, %v1082_v2  ;;  %v1134_v59 = vld [vmem:[%s6174_s28 + $0x300] sm:$0xff] }
  0xd2   : > { %v5173_v8 = vcombine.high %v1079_v3, %v1083_v4  ;;  %v5172_v14 = vcombine.low %v1079_v3, %v1083_v4  ;;  %v1146_v3 = vld [vmem:[%s6174_s28 + $0x360] sm:$0xff]  ;;  %v1143_v4 = vld [vmem:[%s6174_s28 + $0x348] sm:$0xff] }
  0xd4   : > { %939 = vmatpush1.bf16.msra.mxu0 %v5110_v10  ;;  %982 = vmatpush1.bf16.msra.mxu1 %v5112_v11  ;;  %v1090_v10 = vld [vmem:[%s6174_s28 + $0x1a0] sm:$0xff]  ;;  %v1087_v11 = vld [vmem:[%s6174_s28 + $0x188] sm:$0xff] }
  0xd5   : > { %940 = vmatprep.subr.bf16.mxu0 %v5119_v12  ;;  %983 = vmatprep.subr.bf16.mxu1 %v5121_v13  ;;  %v1091_v12 = vld [vmem:[%s6174_s28 + $0x1a8] sm:$0xff]  ;;  %v5170_v13 = vcombine.low %v1078_v1, %v1082_v2  ;;  %v5179_v15 = vcombine.high %v1086_v9, %v1090_v10  ;;  %v1142_v2 = vld [vmem:[%s6174_s28 + $0x340] sm:$0xff] }
  0xd6   : > { %v5181_v16 = vcombine.high %v1087_v11, %v1091_v12  ;;  %v5180_v22 = vcombine.low %v1087_v11, %v1091_v12  ;;  %v1154_v11 = vld [vmem:[%s6174_s28 + $0x3a0] sm:$0xff]  ;;  %v1151_v12 = vld [vmem:[%s6174_s28 + $0x388] sm:$0xff] }
  0xd8   : > { %941 = vmatpush1.bf16.msra.mxu0 %v5118_v18  ;;  %984 = vmatpush1.bf16.msra.mxu1 %v5120_v19  ;;  %v1098_v18 = vld [vmem:[%s6174_s28 + $0x1e0] sm:$0xff]  ;;  %v1095_v19 = vld [vmem:[%s6174_s28 + $0x1c8] sm:$0xff] }
  0xd9   : > { %942 = vmatprep.subr.bf16.mxu0 %v5127_v20  ;;  %985 = vmatprep.subr.bf16.mxu1 %v5129_v21  ;;  %v1099_v20 = vld [vmem:[%s6174_s28 + $0x1e8] sm:$0xff]  ;;  %v5178_v21 = vcombine.low %v1086_v9, %v1090_v10  ;;  %v5187_v23 = vcombine.high %v1094_v17, %v1098_v18  ;;  %v1150_v10 = vld [vmem:[%s6174_s28 + $0x380] sm:$0xff] }
  0xda   : > { %v5189_v24 = vcombine.high %v1095_v19, %v1099_v20  ;;  %v5188_v31 = vcombine.low %v1095_v19, %v1099_v20  ;;  %v1162_v19 = vld [vmem:[%s6174_s28 + $0x3e0] sm:$0xff]  ;;  %v1159_v20 = vld [vmem:[%s6174_s28 + $0x3c8] sm:$0xff] }
  0xdc   : > { %943 = vmatpush1.bf16.msra.mxu0 %v5126_v26  ;;  %986 = vmatpush1.bf16.msra.mxu1 %v5128_v27  ;;  %v1106_v26 = vld [vmem:[%s6174_s28 + $0x220] sm:$0xff]  ;;  %v1103_v27 = vld [vmem:[%s6174_s28 + $0x208] sm:$0xff] }
  0xdd   : > { %4152 = vmatprep.subr.bf16.mxu0 %v5131_v29  ;;  %4324 = vmatprep.subr.bf16.mxu1 %v5133_v30  ;;  %v1107_v29 = vld [vmem:[%s6174_s28 + $0x228] sm:$0xff]  ;;  %v5186_v30 = vcombine.low %v1094_v17, %v1098_v18  ;;  %v5195_v33 = vcombine.high %v1102_v25, %v1106_v26  ;;  %v1158_v18 = vld [vmem:[%s6174_s28 + $0x3c0] sm:$0xff] }
  0xde   : > { %v5197_v34 = vcombine.high %v1103_v27, %v1107_v29 }
  0xdf   : > { %961 = vmatmul.mubr.bf16.vlgmr.msra.gmra.mrb[4].mxu0 %v6290_v32  ;;  %1004 = vmatmul.mubr.bf16.vlgmr.msra.gmra.mrb[4].mxu1 %v6290_v32  ;;  %v5146_v32 = vcombine.low %v1054_v42, %v1058_v43  ;;  %v1118_v43 = vld [vmem:[%s6174_s28 + $0x280] sm:$0xff] }
  0xe0   : > { %4153 = vmatpush1.bf16.msra.mxu0 %v5130_v38  ;;  %4325 = vmatpush1.bf16.msra.mxu1 %v5132_v39  ;;  %v1115_v38 = vld [vmem:[%s6174_s28 + $0x268] sm:$0xff]  ;;  %v5194_v39 = vcombine.low %v1102_v25, %v1106_v26  ;;  %v1166_v26 = vld [vmem:[%s6174_s28 + $0x400] sm:$0xff] }
  0xe1   : > { %4154 = vmatprep.subr.bf16.mxu0 %v5139_v40  ;;  %4326 = vmatprep.subr.bf16.mxu1 %v5141_v41  ;;  %v5196_v40 = vcombine.low %v1103_v27, %v1107_v29  ;;  %v5203_v41 = vcombine.high %v1110_v35, %v1114_v36  ;;  %v5205_v42 = vcombine.high %v1111_v37, %v1115_v38  ;;  %v1170_v27 = vld [vmem:[%s6174_s28 + $0x420] sm:$0xff]  ;;  %v1167_v29 = vld [vmem:[%s6174_s28 + $0x408] sm:$0xff] }
  0xe2   : > { %4184 = vmatprep.mubr.bf16.mxu0 %v6332_v44  ;;  %4356 = vmatprep.mubr.bf16.mxu1 %v6332_v44 }
  0xe4   : > { %4155 = vmatpush1.bf16.msra.mxu0 %v5138_v47  ;;  %4327 = vmatpush1.bf16.msra.mxu1 %v5140_v48  ;;  %v1123_v47 = vld [vmem:[%s6174_s28 + $0x2a8] sm:$0xff]  ;;  %v5202_v48 = vcombine.low %v1110_v35, %v1114_v36  ;;  %v5259_v36 = vcombine.high %v1166_v26, %v1170_v27 }
  0xe5   : > { %4156 = vmatprep.subr.bf16.mxu0 %v5147_v49  ;;  %4328 = vmatprep.subr.bf16.mxu1 %v5149_v50  ;;  %v5204_v49 = vcombine.low %v1111_v37, %v1115_v38  ;;  %v5211_v50 = vcombine.high %v1118_v43, %v1122_v45  ;;  %v5213_v51 = vcombine.high %v1119_v46, %v1123_v47  ;;  %v1174_v38 = vld [vmem:[%s6174_s28 + $0x440] sm:$0xff] }
  0xe8   : > { %4157 = vmatpush1.bf16.msra.mxu0 %v5146_v32  ;;  %4329 = vmatpush1.bf16.msra.mxu1 %v5148_v55  ;;  %v1131_v32 = vld [vmem:[%s6174_s28 + $0x2e8] sm:$0xff]  ;;  %v5210_v55 = vcombine.low %v1118_v43, %v1122_v45 }
  0xe9   : > { %4158 = vmatprep.subr.bf16.mxu0 %v5155_v56  ;;  %4330 = vmatprep.subr.bf16.mxu1 %v5157_v57  ;;  %v5212_v56 = vcombine.low %v1119_v46, %v1123_v47  ;;  %v5219_v57 = vcombine.high %v1126_v52, %v1130_v53  ;;  %v5221_v58 = vcombine.high %v1127_v54, %v1131_v32  ;;  %v1017_v43 = vld [vmem:[#allocation2 + $0x18] sm:$0xff] }
  0xea   : > { %v1025_v45 = vld [vmem:[#allocation2 + $0x58] sm:$0xff]  ;;  %v5258_v46 = vcombine.low %v1166_v26, %v1170_v27 }
  0xec   : > { %4159 = vmatpush1.bf16.msra.mxu0 %v5154_v61  ;;  %4331 = vmatpush1.bf16.msra.mxu1 %v5156_v62  ;;  %v1139_v61 = vld [vmem:[%s6174_s28 + $0x328] sm:$0xff]  ;;  %v5218_v62 = vcombine.low %v1126_v52, %v1130_v53  ;;  %v6404_v52 = vpack.c.bf16 %v1025_v45, %v1017_v43 }
  0xed   : > { %4160 = vmatprep.subr.bf16.mxu0 %v5163_v63  ;;  %4332 = vmatprep.subr.bf16.mxu1 %v5165_v0  ;;  %v5220_v63 = vcombine.low %v1127_v54, %v1131_v32  ;;  %v5227_v0 = vcombine.high %v1134_v59, %v1138_v28  ;;  %v5229_v1 = vcombine.high %v1135_v60, %v1139_v61  ;;  %v1183_v53 = vld [vmem:[%s6174_s28 + $0x488] sm:$0xff] }
  0xee   : > { %v1187_v54 = vld [vmem:[%s6174_s28 + $0x4a8] sm:$0xff] }
  0xf0   : > { %4161 = vmatpush1.bf16.msra.mxu0 %v5162_v5  ;;  %4333 = vmatpush1.bf16.msra.mxu1 %v5164_v6  ;;  %v1147_v5 = vld [vmem:[%s6174_s28 + $0x368] sm:$0xff]  ;;  %v5226_v6 = vcombine.low %v1134_v59, %v1138_v28  ;;  %v1194_v59 = vld [vmem:[%s6174_s28 + $0x4e0] sm:$0xff] }
  0xf1   : > { %4162 = vmatprep.subr.bf16.mxu0 %v5171_v7  ;;  %4334 = vmatprep.subr.bf16.mxu1 %v5173_v8  ;;  %v5228_v7 = vcombine.low %v1135_v60, %v1139_v61  ;;  %v5235_v8 = vcombine.high %v1142_v2, %v1146_v3  ;;  %v5237_v9 = vcombine.high %v1143_v4, %v1147_v5  ;;  %v1191_v28 = vld [vmem:[%s6174_s28 + $0x4c8] sm:$0xff] }
  0xf2   : > { %v1195_v60 = vld [vmem:[%s6174_s28 + $0x4e8] sm:$0xff] }
  0xf4   : > { %4163 = vmatpush1.bf16.msra.mxu0 %v5170_v13  ;;  %4335 = vmatpush1.bf16.msra.mxu1 %v5172_v14  ;;  %v1155_v13 = vld [vmem:[%s6174_s28 + $0x3a8] sm:$0xff]  ;;  %v5234_v14 = vcombine.low %v1142_v2, %v1146_v3  ;;  %v1202_v2 = vld [vmem:[%s6174_s28 + $0x520] sm:$0xff] }
  0xf5   : > { %4164 = vmatprep.subr.bf16.mxu0 %v5179_v15  ;;  %4336 = vmatprep.subr.bf16.mxu1 %v5181_v16  ;;  %v5236_v15 = vcombine.low %v1143_v4, %v1147_v5  ;;  %v5243_v16 = vcombine.high %v1150_v10, %v1154_v11  ;;  %v5245_v17 = vcombine.high %v1151_v12, %v1155_v13  ;;  %v1199_v3 = vld [vmem:[%s6174_s28 + $0x508] sm:$0xff] }
  0xf6   : > { %v1203_v4 = vld [vmem:[%s6174_s28 + $0x528] sm:$0xff] }
  0xf8   : > { %4165 = vmatpush1.bf16.msra.mxu0 %v5178_v21  ;;  %4337 = vmatpush1.bf16.msra.mxu1 %v5180_v22  ;;  %v1163_v21 = vld [vmem:[%s6174_s28 + $0x3e8] sm:$0xff]  ;;  %v5242_v22 = vcombine.low %v1150_v10, %v1154_v11  ;;  %v1210_v10 = vld [vmem:[%s6174_s28 + $0x560] sm:$0xff] }
  0xf9   : > { %4166 = vmatprep.subr.bf16.mxu0 %v5187_v23  ;;  %4338 = vmatprep.subr.bf16.mxu1 %v5189_v24  ;;  %v5244_v23 = vcombine.low %v1151_v12, %v1155_v13  ;;  %v5251_v24 = vcombine.high %v1158_v18, %v1162_v19  ;;  %v5253_v25 = vcombine.high %v1159_v20, %v1163_v21  ;;  %v1207_v11 = vld [vmem:[%s6174_s28 + $0x548] sm:$0xff]  ;;  %v482_v13 = vlaneseq }
  0xfa   : > { %v5252_v35 = vcombine.low %v1159_v20, %v1163_v21  ;;  %v1211_v12 = vld [vmem:[%s6174_s28 + $0x568] sm:$0xff] }
  0xfb   : > { %v1215_v20 = vld [vmem:[%s6174_s28 + $0x588] sm:$0xff] }
  0xfc   : > { %4167 = vmatpush1.bf16.msra.mxu0 %v5186_v30  ;;  %4339 = vmatpush1.bf16.msra.mxu1 %v5188_v31  ;;  %v1171_v30 = vld [vmem:[%s6174_s28 + $0x428] sm:$0xff]  ;;  %v5250_v31 = vcombine.low %v1158_v18, %v1162_v19  ;;  %v1218_v18 = vld [vmem:[%s6174_s28 + $0x5a0] sm:$0xff]  ;;  %v5301_v19 = vcombine.high %v1207_v11, %v1211_v12 }
  0xfd   : > { %4168 = vmatprep.subr.bf16.mxu0 %v5195_v33  ;;  %4340 = vmatprep.subr.bf16.mxu1 %v5197_v34  ;;  %v1014_v33 = vld [vmem:[#allocation2] sm:$0xff]  ;;  %v5261_v37 = vcombine.high %v1167_v29, %v1171_v30  ;;  %v5260_v47 = vcombine.low %v1167_v29, %v1171_v30  ;;  %v1219_v21 = vld [vmem:[%s6174_s28 + $0x5a8] sm:$0xff] }
  0xfe   : > { %v1022_v34 = vld [vmem:[#allocation2 + $0x40] sm:$0xff]  ;;  %v5308_v45 = vcombine.low %v1215_v20, %v1219_v21 }
 0x100   : > { %4169 = vmatpush1.bf16.msra.mxu0 %v5194_v39  ;;  %4341 = vmatpush1.bf16.msra.mxu1 %v5196_v40  ;;  %v1178_v39 = vld [vmem:[%s6174_s28 + $0x460] sm:$0xff]  ;;  %v1175_v40 = vld [vmem:[%s6174_s28 + $0x448] sm:$0xff] }
 0x101   : > { %4170 = vmatprep.subr.bf16.mxu0 %v5203_v41  ;;  %4342 = vmatprep.subr.bf16.mxu1 %v5205_v42  ;;  %v6399_v41 = vpack.c.bf16 %v1022_v34, %v1014_v33  ;;  %v1179_v42 = vld [vmem:[%s6174_s28 + $0x468] sm:$0xff]  ;;  %v5266_v32 = vcombine.low %v1174_v38, %v1178_v39  ;;  %v1222_v33 = vld [vmem:[%s6174_s28 + $0x5c0] sm:$0xff] }
 0x102   : > { %v1226_v34 = vld [vmem:[%s6174_s28 + $0x5e0] sm:$0xff] }
 0x104   : > { %4171 = vmatpush1.bf16.msra.mxu0 %v5202_v48  ;;  %4343 = vmatpush1.bf16.msra.mxu1 %v5204_v49  ;;  %v5267_v48 = vcombine.high %v1174_v38, %v1178_v39  ;;  %v5269_v49 = vcombine.high %v1175_v40, %v1179_v42 }
 0x105   : > { %4172 = vmatprep.subr.bf16.mxu0 %v5211_v50  ;;  %4344 = vmatprep.subr.bf16.mxu1 %v5213_v51  ;;  %v1182_v50 = vld [vmem:[%s6174_s28 + $0x480] sm:$0xff] }
 0x106   : > { %v1186_v51 = vld [vmem:[%s6174_s28 + $0x4a0] sm:$0xff] }
 0x107   : > { %v5274_v61 = vcombine.low %v1182_v50, %v1186_v51 }
 0x108   : > { %4173 = vmatpush1.bf16.msra.mxu0 %v5210_v55  ;;  %4345 = vmatpush1.bf16.msra.mxu1 %v5212_v56  ;;  %v5268_v55 = vcombine.low %v1175_v40, %v1179_v42  ;;  %v5275_v56 = vcombine.high %v1182_v50, %v1186_v51  ;;  %v1231_v50 = vld [vmem:[%s6174_s28 + $0x608] sm:$0xff] }
 0x109   : > { %4174 = vmatprep.subr.bf16.mxu0 %v5219_v57  ;;  %4346 = vmatprep.subr.bf16.mxu1 %v5221_v58  ;;  %v5277_v57 = vcombine.high %v1183_v53, %v1187_v54  ;;  %v1190_v58 = vld [vmem:[%s6174_s28 + $0x4c0] sm:$0xff]  ;;  %v1235_v51 = vld [vmem:[%s6174_s28 + $0x628] sm:$0xff] }
 0x10a   : > { %v5282_v5 = vcombine.low %v1190_v58, %v1194_v59 }
 0x10c   : > { %4175 = vmatpush1.bf16.msra.mxu0 %v5218_v62  ;;  %4347 = vmatpush1.bf16.msra.mxu1 %v5220_v63  ;;  %v5276_v62 = vcombine.low %v1183_v53, %v1187_v54  ;;  %v5283_v63 = vcombine.high %v1190_v58, %v1194_v59  ;;  %v5314_v53 = vcombine.low %v1222_v33, %v1226_v34  ;;  %v1239_v58 = vld [vmem:[%s6174_s28 + $0x648] sm:$0xff] }
 0x10d   : > { %4176 = vmatprep.subr.bf16.mxu0 %v5227_v0  ;;  %4348 = vmatprep.subr.bf16.mxu1 %v5229_v1  ;;  %v5285_v0 = vcombine.high %v1191_v28, %v1195_v60  ;;  %v1198_v1 = vld [vmem:[%s6174_s28 + $0x500] sm:$0xff]  ;;  %v1243_v59 = vld [vmem:[%s6174_s28 + $0x668] sm:$0xff] }
 0x110   : > { %4177 = vmatpush1.bf16.msra.mxu0 %v5226_v6  ;;  %4349 = vmatpush1.bf16.msra.mxu1 %v5228_v7  ;;  %v5284_v6 = vcombine.low %v1191_v28, %v1195_v60  ;;  %v5291_v7 = vcombine.high %v1198_v1, %v1202_v2  ;;  %v5324_v60 = vcombine.low %v1231_v50, %v1235_v51 }
 0x111   : > { %4178 = vmatprep.subr.bf16.mxu0 %v5235_v8  ;;  %4350 = vmatprep.subr.bf16.mxu1 %v5237_v9  ;;  %v5293_v8 = vcombine.high %v1199_v3, %v1203_v4  ;;  %v1206_v9 = vld [vmem:[%s6174_s28 + $0x540] sm:$0xff] }
 0x114   : > { %4179 = vmatpush1.bf16.msra.mxu0 %v5234_v14  ;;  %4351 = vmatpush1.bf16.msra.mxu1 %v5236_v15  ;;  %v5290_v14 = vcombine.low %v1198_v1, %v1202_v2  ;;  %v5292_v15 = vcombine.low %v1199_v3, %v1203_v4  ;;  %v1247_v1 = vld [vmem:[%s6174_s28 + $0x688] sm:$0xff]  ;;  %v5332_v4 = vcombine.low %v1239_v58, %v1243_v59 }
 0x115   : > { %4180 = vmatprep.subr.bf16.mxu0 %v5243_v16  ;;  %4352 = vmatprep.subr.bf16.mxu1 %v5245_v17  ;;  %v5299_v16 = vcombine.high %v1206_v9, %v1210_v10  ;;  %v1214_v17 = vld [vmem:[%s6174_s28 + $0x580] sm:$0xff]  ;;  %v1251_v2 = vld [vmem:[%s6174_s28 + $0x6a8] sm:$0xff] }
 0x116   : > { %v5306_v43 = vcombine.low %v1214_v17, %v1218_v18 }
 0x118   : > { %4181 = vmatpush1.bf16.msra.mxu0 %v5242_v22  ;;  %4353 = vmatpush1.bf16.msra.mxu1 %v5244_v23  ;;  %v6428_v22 = vshrl.u32 %v482_v13, 7  ;;  %v5298_v23 = vcombine.low %v1206_v9, %v1210_v10  ;;  %v1255_v9 = vld [vmem:[%s6174_s28 + $0x6c8] sm:$0xff] }
 0x119   : > { %4182 = vmatprep.subr.bf16.mxu0 %v5251_v24  ;;  %4354 = vmatprep.subr.bf16.mxu1 %v5253_v25  ;;  %v5300_v24 = vcombine.low %v1207_v11, %v1211_v12  ;;  %v5307_v25 = vcombine.high %v1214_v17, %v1218_v18  ;;  %v1259_v10 = vld [vmem:[%s6174_s28 + $0x6e8] sm:$0xff]  ;;  %v5340_v12 = vcombine.low %v1247_v1, %v1251_v2 }
 0x11a   : > { %v500_v26 = vsub.s32 4, %v6428_v22  ;;  %v508_v27 = vsub.s32 6, %v6428_v22  ;;  %v504_v29 = vsub.s32 5, %v6428_v22  ;;  %v512_v30 = vsub.s32 7, %v6428_v22  ;;  %v1263_v17 = vld [vmem:[%s6174_s28 + $0x708] sm:$0xff] }
 0x11b   : > { %v1267_v18 = vld [vmem:[%s6174_s28 + $0x728] sm:$0xff] }
 0x11c   : > { %4183 = vmatpush1.bf16.msra.mxu0 %v5250_v31  ;;  %4355 = vmatpush1.bf16.msra.mxu1 %v5252_v35  ;;  %v5309_v31 = vcombine.high %v1215_v20, %v1219_v21  ;;  %v480_v35 = vld [vmem:[%s6189_s11] sm:$0xff]  ;;  %v5348_v20 = vcombine.low %v1255_v9, %v1259_v10 }
 0x11d   : > { %4195 = vmatprep.subr.bf16.mxu0 %v5259_v36  ;;  %4367 = vmatprep.subr.bf16.mxu1 %v5261_v37  ;;  %v1223_v36 = vld [vmem:[%s6174_s28 + $0x5c8] sm:$0xff]  ;;  %v6441_v38 = vrot.slane %v480_v35, %v500_v26  ;;  %v6445_v39 = vrot.slane %v480_v35, %v508_v27  ;;  %v6449_v40 = vrot.slane %v480_v35, %v504_v29 }
 0x11e   : > { %v1227_v37 = vld [vmem:[%s6174_s28 + $0x5e8] sm:$0xff]  ;;  %v6453_v42 = vrot.slane %v480_v35, %v512_v30  ;;  %v5356_v35 = vcombine.low %v1263_v17, %v1267_v18 }
 0x11f   : > { %4185 = vmatmul.mubr.bf16.vlgmr.msra.gmra.mrb[8].mxu0 %v6399_v41  ;;  %4357 = vmatmul.mubr.bf16.vlgmr.msra.gmra.mrb[8].mxu1 %v6399_v41  ;;  %v5316_v54 = vcombine.low %v1223_v36, %v1227_v37 }
 0x120   : > { %4196 = vmatpush1.bf16.msra.mxu0 %v5258_v46  ;;  %4368 = vmatpush1.bf16.msra.mxu1 %v5260_v47  ;;  %v5315_v46 = vcombine.high %v1222_v33, %v1226_v34  ;;  %v5317_v47 = vcombine.high %v1223_v36, %v1227_v37  ;;  %v1275_v33 = vld [vmem:[%s6174_s28 + $0x768] sm:$0xff] }
 0x121   : > { %4197 = vmatprep.subr.bf16.mxu0 %v5267_v48  ;;  %4369 = vmatprep.subr.bf16.mxu1 %v5269_v49  ;;  %v1230_v48 = vld [vmem:[%s6174_s28 + $0x600] sm:$0xff] }
 0x122   : > { %4227 = vmatprep.mubr.bf16.mxu0 %v6404_v52  ;;  %4399 = vmatprep.mubr.bf16.mxu1 %v6404_v52  ;;  %v1234_v49 = vld [vmem:[%s6174_s28 + $0x620] sm:$0xff] }
 0x123   : > { %v5322_v28 = vcombine.low %v1230_v48, %v1234_v49 }
 0x124   : > { %4198 = vmatpush1.bf16.msra.mxu0 %v5266_v32  ;;  %4370 = vmatpush1.bf16.msra.mxu1 %v5268_v55  ;;  %v5323_v32 = vcombine.high %v1230_v48, %v1234_v49  ;;  %v5325_v55 = vcombine.high %v1231_v50, %v1235_v51 }
 0x125   : > { %4199 = vmatprep.subr.bf16.mxu0 %v5275_v56  ;;  %4371 = vmatprep.subr.bf16.mxu1 %v5277_v57  ;;  %v1238_v56 = vld [vmem:[%s6174_s28 + $0x640] sm:$0xff] }
 0x126   : > { %v1242_v57 = vld [vmem:[%s6174_s28 + $0x660] sm:$0xff] }
 0x127   : > { %v5330_v3 = vcombine.low %v1238_v56, %v1242_v57 }
 0x128   : > { %4200 = vmatpush1.bf16.msra.mxu0 %v5274_v61  ;;  %4372 = vmatpush1.bf16.msra.mxu1 %v5276_v62  ;;  %v5331_v61 = vcombine.high %v1238_v56, %v1242_v57  ;;  %v5333_v62 = vcombine.high %v1239_v58, %v1243_v59 }
 0x129   : > { %4201 = vmatprep.subr.bf16.mxu0 %v5283_v63  ;;  %4373 = vmatprep.subr.bf16.mxu1 %v5285_v0  ;;  %v1246_v63 = vld [vmem:[%s6174_s28 + $0x680] sm:$0xff] }
 0x12a   : > { %v1250_v0 = vld [vmem:[%s6174_s28 + $0x6a0] sm:$0xff] }
 0x12b   : > { %v5338_v11 = vcombine.low %v1246_v63, %v1250_v0 }
 0x12c   : > { %4202 = vmatpush1.bf16.msra.mxu0 %v5282_v5  ;;  %4374 = vmatpush1.bf16.msra.mxu1 %v5284_v6  ;;  %v5339_v5 = vcombine.high %v1246_v63, %v1250_v0  ;;  %v5341_v6 = vcombine.high %v1247_v1, %v1251_v2  ;;  %v1016_v0 = vld [vmem:[#allocation2 + $0x10] sm:$0xff] }
 0x12d   : > { %4203 = vmatprep.subr.bf16.mxu0 %v5291_v7  ;;  %4375 = vmatprep.subr.bf16.mxu1 %v5293_v8  ;;  %v1254_v7 = vld [vmem:[%s6174_s28 + $0x6c0] sm:$0xff] }
 0x12e   : > { %v1258_v8 = vld [vmem:[%s6174_s28 + $0x6e0] sm:$0xff] }
 0x12f   : > { %v5347_v13 = vcombine.high %v1254_v7, %v1258_v8  ;;  %v1024_v1 = vld [vmem:[#allocation2 + $0x50] sm:$0xff] }
 0x130   : > { %4204 = vmatpush1.bf16.msra.mxu0 %v5290_v14  ;;  %4376 = vmatpush1.bf16.msra.mxu1 %v5292_v15  ;;  %v5349_v14 = vcombine.high %v1255_v9, %v1259_v10  ;;  %v1262_v15 = vld [vmem:[%s6174_s28 + $0x700] sm:$0xff]  ;;  %v1307_v9 = vld [vmem:[%s6174_s28 + $0x868] sm:$0xff]  ;;  %v1019_v10 = vld [vmem:[#allocation2 + $0x28] sm:$0xff] }
 0x131   : > { %4205 = vmatprep.subr.bf16.mxu0 %v5299_v16  ;;  %4377 = vmatprep.subr.bf16.mxu1 %v5301_v19  ;;  %v1266_v16 = vld [vmem:[%s6174_s28 + $0x720] sm:$0xff]  ;;  %v5346_v19 = vcombine.low %v1254_v7, %v1258_v8  ;;  %v1303_v7 = vld [vmem:[%s6174_s28 + $0x848] sm:$0xff]  ;;  %v6494_v8 = vpack.c.bf16 %v1024_v1, %v1016_v0 }
 0x132   : > { %v5355_v21 = vcombine.high %v1262_v15, %v1266_v16  ;;  %v5354_v34 = vcombine.low %v1262_v15, %v1266_v16  ;;  %v5397_v15 = vcombine.high %v1303_v7, %v1307_v9  ;;  %v1310_v16 = vld [vmem:[%s6174_s28 + $0x880] sm:$0xff]  ;;  %v1347_v0 = vld [vmem:[%s6174_s28 + $0x9a8] sm:$0xff] }
 0x134   : > { %4206 = vmatpush1.bf16.msra.mxu0 %v5298_v23  ;;  %4378 = vmatpush1.bf16.msra.mxu1 %v5300_v24  ;;  %v5357_v23 = vcombine.high %v1263_v17, %v1267_v18  ;;  %v1270_v24 = vld [vmem:[%s6174_s28 + $0x740] sm:$0xff] }
 0x135   : > { %4207 = vmatprep.subr.bf16.mxu0 %v5307_v25  ;;  %4379 = vmatprep.subr.bf16.mxu1 %v5309_v31  ;;  %v1274_v25 = vld [vmem:[%s6174_s28 + $0x760] sm:$0xff]  ;;  %v1271_v31 = vld [vmem:[%s6174_s28 + $0x748] sm:$0xff] }
 0x136   : > { %v5363_v36 = vcombine.high %v1270_v24, %v1274_v25  ;;  %v5365_v37 = vcombine.high %v1271_v31, %v1275_v33  ;;  %v5362_v48 = vcombine.low %v1270_v24, %v1274_v25  ;;  %v5364_v49 = vcombine.low %v1271_v31, %v1275_v33  ;;  %v1314_v17 = vld [vmem:[%s6174_s28 + $0x8a0] sm:$0xff] }
 0x137   : > { %v5403_v24 = vcombine.high %v1310_v16, %v1314_v17  ;;  %v1318_v31 = vld [vmem:[%s6174_s28 + $0x8c0] sm:$0xff] }
 0x138   : > { %4208 = vmatpush1.bf16.msra.mxu0 %v5306_v43  ;;  %4380 = vmatpush1.bf16.msra.mxu1 %v5308_v45  ;;  %v1278_v43 = vld [vmem:[%s6174_s28 + $0x780] sm:$0xff] }
 0x139   : > { %4209 = vmatprep.subr.bf16.mxu0 %v5315_v46  ;;  %4381 = vmatprep.subr.bf16.mxu1 %v5317_v47  ;;  %v1282_v45 = vld [vmem:[%s6174_s28 + $0x7a0] sm:$0xff]  ;;  %v1279_v46 = vld [vmem:[%s6174_s28 + $0x788] sm:$0xff] }
 0x13a   : > { %v1283_v47 = vld [vmem:[%s6174_s28 + $0x7a8] sm:$0xff]  ;;  %v5371_v50 = vcombine.high %v1278_v43, %v1282_v45  ;;  %v5370_v56 = vcombine.low %v1278_v43, %v1282_v45  ;;  %v1322_v33 = vld [vmem:[%s6174_s28 + $0x8e0] sm:$0xff] }
 0x13b   : > { %v5373_v51 = vcombine.high %v1279_v46, %v1283_v47  ;;  %v5372_v57 = vcombine.low %v1279_v46, %v1283_v47  ;;  %v5411_v43 = vcombine.high %v1318_v31, %v1322_v33  ;;  %v1326_v46 = vld [vmem:[%s6174_s28 + $0x900] sm:$0xff] }
 0x13c   : > { %4210 = vmatpush1.bf16.msra.mxu0 %v5314_v53  ;;  %4382 = vmatpush1.bf16.msra.mxu1 %v5316_v54  ;;  %v1286_v53 = vld [vmem:[%s6174_s28 + $0x7c0] sm:$0xff] }
 0x13d   : > { %4211 = vmatprep.subr.bf16.mxu0 %v5323_v32  ;;  %4383 = vmatprep.subr.bf16.mxu1 %v5325_v55  ;;  %v1290_v54 = vld [vmem:[%s6174_s28 + $0x7e0] sm:$0xff]  ;;  %v1287_v32 = vld [vmem:[%s6174_s28 + $0x7c8] sm:$0xff] }
 0x13e   : > { %v1291_v55 = vld [vmem:[%s6174_s28 + $0x7e8] sm:$0xff]  ;;  %v5379_v58 = vcombine.high %v1286_v53, %v1290_v54  ;;  %v5378_v63 = vcombine.low %v1286_v53, %v1290_v54  ;;  %v1330_v47 = vld [vmem:[%s6174_s28 + $0x920] sm:$0xff] }
 0x13f   : > { %v5381_v59 = vcombine.high %v1287_v32, %v1291_v55  ;;  %v5380_v2 = vcombine.low %v1287_v32, %v1291_v55  ;;  %v5419_v53 = vcombine.high %v1326_v46, %v1330_v47  ;;  %v1334_v32 = vld [vmem:[%s6174_s28 + $0x940] sm:$0xff] }
 0x140   : > { %4212 = vmatpush1.bf16.msra.mxu0 %v5322_v28  ;;  %4384 = vmatpush1.bf16.msra.mxu1 %v5324_v60  ;;  %v1294_v28 = vld [vmem:[%s6174_s28 + $0x800] sm:$0xff] }
 0x141   : > { %4213 = vmatprep.subr.bf16.mxu0 %v5331_v61  ;;  %4385 = vmatprep.subr.bf16.mxu1 %v5333_v62  ;;  %v1298_v60 = vld [vmem:[%s6174_s28 + $0x820] sm:$0xff]  ;;  %v1295_v61 = vld [vmem:[%s6174_s28 + $0x808] sm:$0xff] }
 0x142   : > { %v1299_v62 = vld [vmem:[%s6174_s28 + $0x828] sm:$0xff]  ;;  %v1338_v55 = vld [vmem:[%s6174_s28 + $0x960] sm:$0xff] }
 0x143   : > { %v5426_v1 = vcombine.low %v1334_v32, %v1338_v55 }
 0x144   : > { %4214 = vmatpush1.bf16.msra.mxu0 %v5330_v3  ;;  %4386 = vmatpush1.bf16.msra.mxu1 %v5332_v4  ;;  %v5387_v3 = vcombine.high %v1294_v28, %v1298_v60  ;;  %v5389_v4 = vcombine.high %v1295_v61, %v1299_v62 }
 0x145   : > { %4215 = vmatprep.subr.bf16.mxu0 %v5339_v5  ;;  %4387 = vmatprep.subr.bf16.mxu1 %v5341_v6  ;;  %v1302_v5 = vld [vmem:[%s6174_s28 + $0x840] sm:$0xff] }
 0x146   : > { %v1306_v6 = vld [vmem:[%s6174_s28 + $0x860] sm:$0xff] }
 0x148   : > { %4216 = vmatpush1.bf16.msra.mxu0 %v5338_v11  ;;  %4388 = vmatpush1.bf16.msra.mxu1 %v5340_v12  ;;  %v1027_v11 = vld [vmem:[#allocation2 + $0x68] sm:$0xff]  ;;  %v5386_v12 = vcombine.low %v1294_v28, %v1298_v60  ;;  %v5427_v28 = vcombine.high %v1334_v32, %v1338_v55  ;;  %v1383_v32 = vld [vmem:[%s6174_s28 + $0xac8] sm:$0xff] }
 0x149   : > { %4217 = vmatprep.subr.bf16.mxu0 %v5347_v13  ;;  %4389 = vmatprep.subr.bf16.mxu1 %v5349_v14  ;;  %v5388_v13 = vcombine.low %v1295_v61, %v1299_v62  ;;  %v5395_v14 = vcombine.high %v1302_v5, %v1306_v6  ;;  %v6499_v18 = vpack.c.bf16 %v1027_v11, %v1019_v10  ;;  %v1342_v61 = vld [vmem:[%s6174_s28 + $0x980] sm:$0xff]  ;;  %v1387_v55 = vld [vmem:[%s6174_s28 + $0xae8] sm:$0xff] }
 0x14a   : > { %v1346_v62 = vld [vmem:[%s6174_s28 + $0x9a0] sm:$0xff] }
 0x14b   : > { %v5434_v10 = vcombine.low %v1342_v61, %v1346_v62 }
 0x14c   : > { %4218 = vmatpush1.bf16.msra.mxu0 %v5346_v19  ;;  %4390 = vmatpush1.bf16.msra.mxu1 %v5348_v20  ;;  %v1311_v19 = vld [vmem:[%s6174_s28 + $0x888] sm:$0xff] }
 0x14d   : > { %4219 = vmatprep.subr.bf16.mxu0 %v5355_v21  ;;  %4391 = vmatprep.subr.bf16.mxu1 %v5357_v23  ;;  %v1315_v20 = vld [vmem:[%s6174_s28 + $0x8a8] sm:$0xff]  ;;  %v5394_v21 = vcombine.low %v1302_v5, %v1306_v6  ;;  %v5396_v23 = vcombine.low %v1303_v7, %v1307_v9  ;;  %v1350_v5 = vld [vmem:[%s6174_s28 + $0x9c0] sm:$0xff] }
 0x14e   : > { %v5405_v25 = vcombine.high %v1311_v19, %v1315_v20  ;;  %v1354_v6 = vld [vmem:[%s6174_s28 + $0x9e0] sm:$0xff]  ;;  %v1351_v7 = vld [vmem:[%s6174_s28 + $0x9c8] sm:$0xff] }
 0x14f   : > { %v1355_v9 = vld [vmem:[%s6174_s28 + $0x9e8] sm:$0xff] }
 0x150   : > { %4220 = vmatpush1.bf16.msra.mxu0 %v5354_v34  ;;  %4392 = vmatpush1.bf16.msra.mxu1 %v5356_v35  ;;  %v1319_v34 = vld [vmem:[%s6174_s28 + $0x8c8] sm:$0xff] }
 0x151   : > { %4221 = vmatprep.subr.bf16.mxu0 %v5363_v36  ;;  %4393 = vmatprep.subr.bf16.mxu1 %v5365_v37  ;;  %v1323_v35 = vld [vmem:[%s6174_s28 + $0x8e8] sm:$0xff]  ;;  %v5402_v36 = vcombine.low %v1310_v16, %v1314_v17  ;;  %v5404_v37 = vcombine.low %v1311_v19, %v1315_v20  ;;  %v5442_v19 = vcombine.low %v1350_v5, %v1354_v6 }
 0x152   : > { %v5413_v45 = vcombine.high %v1319_v34, %v1323_v35  ;;  %v1359_v16 = vld [vmem:[%s6174_s28 + $0xa08] sm:$0xff]  ;;  %v5444_v20 = vcombine.low %v1351_v7, %v1355_v9 }
 0x153   : > { %v1363_v17 = vld [vmem:[%s6174_s28 + $0xa28] sm:$0xff] }
 0x154   : > { %4222 = vmatpush1.bf16.msra.mxu0 %v5362_v48  ;;  %4394 = vmatpush1.bf16.msra.mxu1 %v5364_v49  ;;  %v1327_v48 = vld [vmem:[%s6174_s28 + $0x908] sm:$0xff] }
 0x155   : > { %4223 = vmatprep.subr.bf16.mxu0 %v5371_v50  ;;  %4395 = vmatprep.subr.bf16.mxu1 %v5373_v51  ;;  %v1331_v49 = vld [vmem:[%s6174_s28 + $0x928] sm:$0xff]  ;;  %v5410_v50 = vcombine.low %v1318_v31, %v1322_v33  ;;  %v5412_v51 = vcombine.low %v1319_v34, %v1323_v35  ;;  %v5452_v35 = vcombine.low %v1359_v16, %v1363_v17 }
 0x156   : > { %v5421_v54 = vcombine.high %v1327_v48, %v1331_v49  ;;  %v1367_v31 = vld [vmem:[%s6174_s28 + $0xa48] sm:$0xff] }
 0x157   : > { %v1371_v33 = vld [vmem:[%s6174_s28 + $0xa68] sm:$0xff] }
 0x158   : > { %4224 = vmatpush1.bf16.msra.mxu0 %v5370_v56  ;;  %4396 = vmatpush1.bf16.msra.mxu1 %v5372_v57  ;;  %v1335_v56 = vld [vmem:[%s6174_s28 + $0x948] sm:$0xff] }
 0x159   : > { %4225 = vmatprep.subr.bf16.mxu0 %v5379_v58  ;;  %4397 = vmatprep.subr.bf16.mxu1 %v5381_v59  ;;  %v1339_v57 = vld [vmem:[%s6174_s28 + $0x968] sm:$0xff]  ;;  %v5418_v58 = vcombine.low %v1326_v46, %v1330_v47  ;;  %v5420_v59 = vcombine.low %v1327_v48, %v1331_v49  ;;  %v5460_v49 = vcombine.low %v1367_v31, %v1371_v33 }
 0x15a   : > { %v5429_v60 = vcombine.high %v1335_v56, %v1339_v57  ;;  %v1375_v46 = vld [vmem:[%s6174_s28 + $0xa88] sm:$0xff] }
 0x15b   : > { %v1379_v47 = vld [vmem:[%s6174_s28 + $0xaa8] sm:$0xff] }
 0x15c   : > { %4226 = vmatpush1.bf16.msra.mxu0 %v5378_v63  ;;  %4398 = vmatpush1.bf16.msra.mxu1 %v5380_v2  ;;  %v1343_v63 = vld [vmem:[%s6174_s28 + $0x988] sm:$0xff]  ;;  %v5428_v2 = vcombine.low %v1335_v56, %v1339_v57  ;;  %v5468_v57 = vcombine.low %v1375_v46, %v1379_v47 }
 0x15d   : > { %4238 = vmatprep.subr.bf16.mxu0 %v5387_v3  ;;  %4410 = vmatprep.subr.bf16.mxu1 %v5389_v4  ;;  %v5435_v3 = vcombine.high %v1342_v61, %v1346_v62  ;;  %v5437_v4 = vcombine.high %v1343_v63, %v1347_v0  ;;  %v5436_v11 = vcombine.low %v1343_v63, %v1347_v0  ;;  %v1391_v61 = vld [vmem:[%s6174_s28 + $0xb08] sm:$0xff] }
 0x15e   : > { %v1395_v62 = vld [vmem:[%s6174_s28 + $0xb28] sm:$0xff]  ;;  %v5476_v0 = vcombine.low %v1383_v32, %v1387_v55 }
 0x15f   : > { %4228 = vmatmul.mubr.bf16.vlgmr.msra.gmra.mrb[8].mxu0 %v6494_v8  ;;  %4400 = vmatmul.mubr.bf16.vlgmr.msra.gmra.mrb[8].mxu1 %v6494_v8 }
 0x160   : > { %4239 = vmatpush1.bf16.msra.mxu0 %v5386_v12  ;;  %4411 = vmatpush1.bf16.msra.mxu1 %v5388_v13  ;;  %v5443_v12 = vcombine.high %v1350_v5, %v1354_v6  ;;  %v5445_v13 = vcombine.high %v1351_v7, %v1355_v9  ;;  %v1399_v5 = vld [vmem:[%s6174_s28 + $0xb48] sm:$0xff]  ;;  %v5484_v9 = vcombine.low %v1391_v61, %v1395_v62 }
 0x161   : > { %4240 = vmatprep.subr.bf16.mxu0 %v5395_v14  ;;  %4412 = vmatprep.subr.bf16.mxu1 %v5397_v15  ;;  %v1358_v14 = vld [vmem:[%s6174_s28 + $0xa00] sm:$0xff]  ;;  %v1403_v6 = vld [vmem:[%s6174_s28 + $0xb68] sm:$0xff] }
 0x162   : > { %4270 = vmatprep.mubr.bf16.mxu0 %v6499_v18  ;;  %4442 = vmatprep.mubr.bf16.mxu1 %v6499_v18  ;;  %v1362_v15 = vld [vmem:[%s6174_s28 + $0xa20] sm:$0xff] }
 0x163   : > { %v5450_v34 = vcombine.low %v1358_v14, %v1362_v15 }
 0x164   : > { %4241 = vmatpush1.bf16.msra.mxu0 %v5394_v21  ;;  %4413 = vmatpush1.bf16.msra.mxu1 %v5396_v23  ;;  %v5451_v21 = vcombine.high %v1358_v14, %v1362_v15  ;;  %v5453_v23 = vcombine.high %v1359_v16, %v1363_v17  ;;  %v1407_v14 = vld [vmem:[%s6174_s28 + $0xb88] sm:$0xff]  ;;  %v5492_v17 = vcombine.low %v1399_v5, %v1403_v6 }
 0x165   : > { %4242 = vmatprep.subr.bf16.mxu0 %v5403_v24  ;;  %4414 = vmatprep.subr.bf16.mxu1 %v5405_v25  ;;  %v1366_v24 = vld [vmem:[%s6174_s28 + $0xa40] sm:$0xff]  ;;  %v1411_v15 = vld [vmem:[%s6174_s28 + $0xba8] sm:$0xff] }
 0x166   : > { %v1370_v25 = vld [vmem:[%s6174_s28 + $0xa60] sm:$0xff] }
 0x167   : > { %v5458_v48 = vcombine.low %v1366_v24, %v1370_v25 }
 0x168   : > { %4243 = vmatpush1.bf16.msra.mxu0 %v5402_v36  ;;  %4415 = vmatpush1.bf16.msra.mxu1 %v5404_v37  ;;  %v5459_v36 = vcombine.high %v1366_v24, %v1370_v25  ;;  %v5461_v37 = vcombine.high %v1367_v31, %v1371_v33  ;;  %v1418_v24 = vld [vmem:[%s6174_s28 + $0xbe0] sm:$0xff]  ;;  %v1415_v33 = vld [vmem:[%s6174_s28 + $0xbc8] sm:$0xff] }
 0x169   : > { %4244 = vmatprep.subr.bf16.mxu0 %v5411_v43  ;;  %4416 = vmatprep.subr.bf16.mxu1 %v5413_v45  ;;  %v1374_v43 = vld [vmem:[%s6174_s28 + $0xa80] sm:$0xff] }
 0x16a   : > { %v1378_v45 = vld [vmem:[%s6174_s28 + $0xaa0] sm:$0xff] }
 0x16b   : > { %v5466_v56 = vcombine.low %v1374_v43, %v1378_v45 }
 0x16c   : > { %4245 = vmatpush1.bf16.msra.mxu0 %v5410_v50  ;;  %4417 = vmatpush1.bf16.msra.mxu1 %v5412_v51  ;;  %v5467_v50 = vcombine.high %v1374_v43, %v1378_v45  ;;  %v5469_v51 = vcombine.high %v1375_v46, %v1379_v47  ;;  %v5500_v46 = vcombine.low %v1407_v14, %v1411_v15 }
 0x16d   : > { %4246 = vmatprep.subr.bf16.mxu0 %v5419_v53  ;;  %4418 = vmatprep.subr.bf16.mxu1 %v5421_v54  ;;  %v1382_v53 = vld [vmem:[%s6174_s28 + $0xac0] sm:$0xff] }
 0x16e   : > { %v1386_v54 = vld [vmem:[%s6174_s28 + $0xae0] sm:$0xff] }
 0x16f   : > { %v5474_v63 = vcombine.low %v1382_v53, %v1386_v54 }
 0x170   : > { %4247 = vmatpush1.bf16.msra.mxu0 %v5418_v58  ;;  %4419 = vmatpush1.bf16.msra.mxu1 %v5420_v59  ;;  %v5475_v58 = vcombine.high %v1382_v53, %v1386_v54  ;;  %v5477_v59 = vcombine.high %v1383_v32, %v1387_v55  ;;  %v1423_v53 = vld [vmem:[%s6174_s28 + $0xc08] sm:$0xff]  ;;  %v1018_v55 = vld [vmem:[#allocation2 + $0x20] sm:$0xff] }
 0x171   : > { %4248 = vmatprep.subr.bf16.mxu0 %v5427_v28  ;;  %4420 = vmatprep.subr.bf16.mxu1 %v5429_v60  ;;  %v1390_v28 = vld [vmem:[%s6174_s28 + $0xb00] sm:$0xff]  ;;  %v1427_v54 = vld [vmem:[%s6174_s28 + $0xc28] sm:$0xff] }
 0x172   : > { %v1394_v60 = vld [vmem:[%s6174_s28 + $0xb20] sm:$0xff] }
 0x173   : > { %v5482_v7 = vcombine.low %v1390_v28, %v1394_v60 }
 0x174   : > { %4249 = vmatpush1.bf16.msra.mxu0 %v5426_v1  ;;  %4421 = vmatpush1.bf16.msra.mxu1 %v5428_v2  ;;  %v5483_v1 = vcombine.high %v1390_v28, %v1394_v60  ;;  %v5485_v2 = vcombine.high %v1391_v61, %v1395_v62  ;;  %v1430_v28 = vld [vmem:[%s6174_s28 + $0xc40] sm:$0xff]  ;;  %v1431_v61 = vld [vmem:[%s6174_s28 + $0xc48] sm:$0xff] }
 0x175   : > { %4250 = vmatprep.subr.bf16.mxu0 %v5435_v3  ;;  %4422 = vmatprep.subr.bf16.mxu1 %v5437_v4  ;;  %v1398_v3 = vld [vmem:[%s6174_s28 + $0xb40] sm:$0xff] }
 0x176   : > { %v1402_v4 = vld [vmem:[%s6174_s28 + $0xb60] sm:$0xff] }
 0x177   : > { %v5490_v16 = vcombine.low %v1398_v3, %v1402_v4  ;;  %v1434_v60 = vld [vmem:[%s6174_s28 + $0xc60] sm:$0xff] }
 0x178   : > { %4251 = vmatpush1.bf16.msra.mxu0 %v5434_v10  ;;  %4423 = vmatpush1.bf16.msra.mxu1 %v5436_v11  ;;  %v5491_v10 = vcombine.high %v1398_v3, %v1402_v4  ;;  %v5493_v11 = vcombine.high %v1399_v5, %v1403_v6  ;;  %v5516_v3 = vcombine.low %v1423_v53, %v1427_v54  ;;  %v1438_v6 = vld [vmem:[%s6174_s28 + $0xc80] sm:$0xff] }
 0x179   : > { %4252 = vmatprep.subr.bf16.mxu0 %v5443_v12  ;;  %4424 = vmatprep.subr.bf16.mxu1 %v5445_v13  ;;  %v1406_v12 = vld [vmem:[%s6174_s28 + $0xb80] sm:$0xff]  ;;  %v5523_v4 = vcombine.high %v1430_v28, %v1434_v60 }
 0x17a   : > { %v1410_v13 = vld [vmem:[%s6174_s28 + $0xba0] sm:$0xff] }
 0x17c   : > { %4253 = vmatpush1.bf16.msra.mxu0 %v5442_v19  ;;  %4425 = vmatpush1.bf16.msra.mxu1 %v5444_v20  ;;  %v5499_v19 = vcombine.high %v1406_v12, %v1410_v13 }
 0x17d   : > { %4254 = vmatprep.subr.bf16.mxu0 %v5451_v21  ;;  %4426 = vmatprep.subr.bf16.mxu1 %v5453_v23  ;;  %v5501_v21 = vcombine.high %v1407_v14, %v1411_v15  ;;  %v1414_v23 = vld [vmem:[%s6174_s28 + $0xbc0] sm:$0xff] }
 0x17e   : > { %v5507_v47 = vcombine.high %v1414_v23, %v1418_v24  ;;  %v5506_v32 = vcombine.low %v1414_v23, %v1418_v24 }
 0x180   : > { %4255 = vmatpush1.bf16.msra.mxu0 %v5450_v34  ;;  %4427 = vmatpush1.bf16.msra.mxu1 %v5452_v35  ;;  %v1419_v34 = vld [vmem:[%s6174_s28 + $0xbe8] sm:$0xff] }
 0x181   : > { %4256 = vmatprep.subr.bf16.mxu0 %v5459_v36  ;;  %4428 = vmatprep.subr.bf16.mxu1 %v5461_v37  ;;  %v5498_v37 = vcombine.low %v1406_v12, %v1410_v13  ;;  %v5522_v12 = vcombine.low %v1430_v28, %v1434_v60 }
 0x184   : > { %4257 = vmatpush1.bf16.msra.mxu0 %v5458_v48  ;;  %4429 = vmatpush1.bf16.msra.mxu1 %v5460_v49  ;;  %v5509_v49 = vcombine.high %v1415_v33, %v1419_v34 }
 0x185   : > { %4258 = vmatprep.subr.bf16.mxu0 %v5467_v50  ;;  %4430 = vmatprep.subr.bf16.mxu1 %v5469_v51  ;;  %v1422_v50 = vld [vmem:[%s6174_s28 + $0xc00] sm:$0xff] }
 0x186   : > { %v1426_v51 = vld [vmem:[%s6174_s28 + $0xc20] sm:$0xff] }
 0x188   : > { %4259 = vmatpush1.bf16.msra.mxu0 %v5466_v56  ;;  %4431 = vmatpush1.bf16.msra.mxu1 %v5468_v57  ;;  %v1026_v56 = vld [vmem:[#allocation2 + $0x60] sm:$0xff]  ;;  %v5508_v57 = vcombine.low %v1415_v33, %v1419_v34 }
 0x189   : > { %4260 = vmatprep.subr.bf16.mxu0 %v5475_v58  ;;  %4432 = vmatprep.subr.bf16.mxu1 %v5477_v59  ;;  %v5515_v58 = vcombine.high %v1422_v50, %v1426_v51  ;;  %v5517_v59 = vcombine.high %v1423_v53, %v1427_v54  ;;  %v6582_v62 = vpack.c.bf16 %v1026_v56, %v1018_v55  ;;  %v1466_v55 = vld [vmem:[%s6174_s28 + $0xd60] sm:$0xff]  ;;  %v1463_v56 = vld [vmem:[%s6174_s28 + $0xd48] sm:$0xff] }
 0x18c   : > { %4261 = vmatpush1.bf16.msra.mxu0 %v5474_v63  ;;  %4433 = vmatpush1.bf16.msra.mxu1 %v5476_v0  ;;  %v1435_v63 = vld [vmem:[%s6174_s28 + $0xc68] sm:$0xff] }
 0x18d   : > { %4262 = vmatprep.subr.bf16.mxu0 %v5483_v1  ;;  %4434 = vmatprep.subr.bf16.mxu1 %v5485_v2  ;;  %v1021_v0 = vld [vmem:[#allocation2 + $0x38] sm:$0xff]  ;;  %v5514_v2 = vcombine.low %v1422_v50, %v1426_v51  ;;  %v5525_v5 = vcombine.high %v1431_v61, %v1435_v63  ;;  %v5524_v13 = vcombine.low %v1431_v61, %v1435_v63  ;;  %v1470_v61 = vld [vmem:[%s6174_s28 + $0xd80] sm:$0xff] }
 0x18e   : > { %v1029_v1 = vld [vmem:[#allocation2 + $0x78] sm:$0xff]  ;;  %v1474_v63 = vld [vmem:[%s6174_s28 + $0xda0] sm:$0xff] }
 0x190   : > { %4263 = vmatpush1.bf16.msra.mxu0 %v5482_v7  ;;  %4435 = vmatpush1.bf16.msra.mxu1 %v5484_v9  ;;  %v1442_v7 = vld [vmem:[%s6174_s28 + $0xca0] sm:$0xff]  ;;  %v6587_v9 = vpack.c.bf16 %v1029_v1, %v1021_v0  ;;  %v1471_v0 = vld [vmem:[%s6174_s28 + $0xd88] sm:$0xff] }
 0x191   : > { %4264 = vmatprep.subr.bf16.mxu0 %v5491_v10  ;;  %4436 = vmatprep.subr.bf16.mxu1 %v5493_v11  ;;  %v1439_v10 = vld [vmem:[%s6174_s28 + $0xc88] sm:$0xff]  ;;  %v5531_v14 = vcombine.high %v1438_v6, %v1442_v7  ;;  %v5530_v23 = vcombine.low %v1438_v6, %v1442_v7  ;;  %v1478_v7 = vld [vmem:[%s6174_s28 + $0xdc0] sm:$0xff] }
 0x192   : > { %v6555_v20 = vpop.f32.mrb[0].mxu0  ;;  %v6559_v25 = vpop.f32.mrb[0].mxu1  ;;  %v1443_v11 = vld [vmem:[%s6174_s28 + $0xca8] sm:$0xff] }
 0x193   : > { %v6561_v31 = vpop.f32.mrb[1].mxu0  ;;  %v6565_v35 = vpop.f32.mrb[1].mxu1  ;;  %v5533_v15 = vcombine.high %v1439_v10, %v1443_v11  ;;  %v5532_v24 = vcombine.low %v1439_v10, %v1443_v11  ;;  %v1475_v1 = vld [vmem:[%s6174_s28 + $0xda8] sm:$0xff]  ;;  %v1482_v10 = vld [vmem:[%s6174_s28 + $0xde0] sm:$0xff] }
 0x194   : > { %v6567_v36 = vpop.f32.mrb[2].mxu0  ;;  %4265 = vmatpush1.bf16.msra.mxu0 %v5490_v16  ;;  %v6569_v43 = vpop.f32.mrb[2].mxu1  ;;  %4437 = vmatpush1.bf16.msra.mxu1 %v5492_v17  ;;  %v1446_v16 = vld [vmem:[%s6174_s28 + $0xcc0] sm:$0xff]  ;;  %v5565_v6 = vcombine.high %v1471_v0, %v1475_v1 }
 0x195   : > { %v6571_v45 = vpop.f32.mrb[3].mxu0  ;;  %4266 = vmatprep.subr.bf16.mxu0 %v5499_v19  ;;  %v6573_v48 = vpop.f32.mrb[3].mxu1  ;;  %4438 = vmatprep.subr.bf16.mxu1 %v5501_v21  ;;  %v1450_v17 = vld [vmem:[%s6174_s28 + $0xce0] sm:$0xff]  ;;  %v1447_v19 = vld [vmem:[%s6174_s28 + $0xcc8] sm:$0xff] }
 0x196   : > { %v1451_v21 = vld [vmem:[%s6174_s28 + $0xce8] sm:$0xff]  ;;  %v5539_v33 = vcombine.high %v1446_v16, %v1450_v17  ;;  %v5538_v50 = vcombine.low %v1446_v16, %v1450_v17 }
 0x197   : > { %v5541_v34 = vcombine.high %v1447_v19, %v1451_v21  ;;  %v5540_v51 = vcombine.low %v1447_v19, %v1451_v21 }
 0x198   : > { %4267 = vmatpush1.bf16.msra.mxu0 %v5498_v37  ;;  %4439 = vmatpush1.bf16.msra.mxu1 %v5500_v46  ;;  %v1454_v37 = vld [vmem:[%s6174_s28 + $0xd00] sm:$0xff] }
 0x199   : > { %4268 = vmatprep.subr.bf16.mxu0 %v5507_v47  ;;  %4440 = vmatprep.subr.bf16.mxu1 %v5509_v49  ;;  %v1458_v46 = vld [vmem:[%s6174_s28 + $0xd20] sm:$0xff]  ;;  %v1455_v47 = vld [vmem:[%s6174_s28 + $0xd08] sm:$0xff] }
 0x19a   : > { %v1459_v49 = vld [vmem:[%s6174_s28 + $0xd28] sm:$0xff]  ;;  %v5547_v53 = vcombine.high %v1454_v37, %v1458_v46 }
 0x19b   : > { %v5549_v54 = vcombine.high %v1455_v47, %v1459_v49 }
 0x19c   : > { %4269 = vmatpush1.bf16.msra.mxu0 %v5506_v32  ;;  %4441 = vmatpush1.bf16.msra.mxu1 %v5508_v57  ;;  %v1462_v32 = vld [vmem:[%s6174_s28 + $0xd40] sm:$0xff]  ;;  %v1467_v57 = vld [vmem:[%s6174_s28 + $0xd68] sm:$0xff] }
 0x19d   : > { %4281 = vmatprep.subr.bf16.mxu0 %v5515_v58  ;;  %4453 = vmatprep.subr.bf16.mxu1 %v5517_v59  ;;  %v5546_v58 = vcombine.low %v1454_v37, %v1458_v46  ;;  %v5548_v59 = vcombine.low %v1455_v47, %v1459_v49  ;;  %v5555_v28 = vcombine.high %v1462_v32, %v1466_v55 }
 0x19e   : > { %v5557_v60 = vcombine.high %v1463_v56, %v1467_v57  ;;  %v5571_v47 = vcombine.high %v1478_v7, %v1482_v10 }
 0x19f   : > { %4271 = vmatmul.mubr.bf16.vlgmr.msra.gmra.mrb[8].mxu0 %v6582_v62  ;;  %4443 = vmatmul.mubr.bf16.vlgmr.msra.gmra.mrb[8].mxu1 %v6582_v62 }
 0x1a0   : > { %4282 = vmatpush1.bf16.msra.mxu0 %v5514_v2  ;;  %4454 = vmatpush1.bf16.msra.mxu1 %v5516_v3  ;;  %v5554_v2 = vcombine.low %v1462_v32, %v1466_v55  ;;  %v5556_v3 = vcombine.low %v1463_v56, %v1467_v57  ;;  %v1487_v55 = vld [vmem:[%s6174_s28 + $0xe08] sm:$0xff] }
 0x1a1   : > { %4283 = vmatprep.subr.bf16.mxu0 %v5523_v4  ;;  %4455 = vmatprep.subr.bf16.mxu1 %v5525_v5  ;;  %v5563_v4 = vcombine.high %v1470_v61, %v1474_v63  ;;  %v1491_v56 = vld [vmem:[%s6174_s28 + $0xe28] sm:$0xff] }
 0x1a2   : > { %4313 = vmatprep.mubr.bf16.mxu0 %v6587_v9  ;;  %4485 = vmatprep.mubr.bf16.mxu1 %v6587_v9 }
 0x1a4   : > { %4284 = vmatpush1.bf16.msra.mxu0 %v5522_v12  ;;  %4456 = vmatpush1.bf16.msra.mxu1 %v5524_v13 }
 0x1a5   : > { %4285 = vmatprep.subr.bf16.mxu0 %v5531_v14  ;;  %4457 = vmatprep.subr.bf16.mxu1 %v5533_v15  ;;  %v1479_v14 = vld [vmem:[%s6174_s28 + $0xdc8] sm:$0xff] }
 0x1a6   : > { %v1483_v15 = vld [vmem:[%s6174_s28 + $0xde8] sm:$0xff] }
 0x1a8   : > { %4286 = vmatpush1.bf16.msra.mxu0 %v5530_v23  ;;  %4458 = vmatpush1.bf16.msra.mxu1 %v5532_v24  ;;  %v5562_v23 = vcombine.low %v1470_v61, %v1474_v63  ;;  %v5564_v24 = vcombine.low %v1471_v0, %v1475_v1  ;;  %v1499_v61 = vld [vmem:[%s6174_s28 + $0xe68] sm:$0xff]  ;;  %v5580_v63 = vcombine.low %v1487_v55, %v1491_v56 }
 0x1a9   : > { %4287 = vmatprep.subr.bf16.mxu0 %v5539_v33  ;;  %4459 = vmatprep.subr.bf16.mxu1 %v5541_v34 }
 0x1ac   : > { %4288 = vmatpush1.bf16.msra.mxu0 %v5538_v50  ;;  %4460 = vmatpush1.bf16.msra.mxu1 %v5540_v51 }
 0x1ad   : > { %4289 = vmatprep.subr.bf16.mxu0 %v5547_v53  ;;  %4461 = vmatprep.subr.bf16.mxu1 %v5549_v54  ;;  %v5573_v53 = vcombine.high %v1479_v14, %v1483_v15  ;;  %v1486_v54 = vld [vmem:[%s6174_s28 + $0xe00] sm:$0xff] }
 0x1b0   : > { %4290 = vmatpush1.bf16.msra.mxu0 %v5546_v58  ;;  %4462 = vmatpush1.bf16.msra.mxu1 %v5548_v59  ;;  %v5581_v58 = vcombine.high %v1487_v55, %v1491_v56  ;;  %v1494_v59 = vld [vmem:[%s6174_s28 + $0xe40] sm:$0xff] }
 0x1b1   : > { %4291 = vmatprep.subr.bf16.mxu0 %v5555_v28  ;;  %4463 = vmatprep.subr.bf16.mxu1 %v5557_v60  ;;  %v1498_v28 = vld [vmem:[%s6174_s28 + $0xe60] sm:$0xff]  ;;  %v1495_v60 = vld [vmem:[%s6174_s28 + $0xe48] sm:$0xff] }
 0x1b2   : > { %v962_v5 = vpop.f32.mrb[4].mxu0  ;;  %v1005_v12 = vpop.f32.mrb[4].mxu1  ;;  %v5587_v0 = vcombine.high %v1494_v59, %v1498_v28  ;;  %v5589_v1 = vcombine.high %v1495_v60, %v1499_v61 }
 0x1b3   : > { %v6614_v11 = vadd.f32 %v962_v5, %v6441_v38  ;;  %v964_v13 = vpop.f32.mrb[5].mxu0  ;;  %v6619_v16 = vadd.f32 %v1005_v12, %v6445_v39  ;;  %v1007_v19 = vpop.f32.mrb[5].mxu1  ;;  %v1507_v5 = vld [vmem:[%s6174_s28 + $0xea8] sm:$0xff] }
 0x1b4   : > { %v6622_v17 = vadd.f32 %v964_v13, %v6449_v40  ;;  %v966_v21 = vpop.f32.mrb[6].mxu0  ;;  %4292 = vmatpush1.bf16.msra.mxu0 %v5554_v2  ;;  %v6625_v33 = vadd.f32 %v1007_v19, %v6453_v42  ;;  %v1009_v37 = vpop.f32.mrb[6].mxu1  ;;  %4464 = vmatpush1.bf16.msra.mxu1 %v5556_v3  ;;  %v1502_v2 = vld [vmem:[%s6174_s28 + $0xe80] sm:$0xff]  ;;  %v1515_v19 = vld [vmem:[%s6174_s28 + $0xee8] sm:$0xff] }
 0x1b5   : > { %v6628_v34 = vadd.f32 %v966_v21, %v6441_v38  ;;  %v968_v46 = vpop.f32.mrb[7].mxu0  ;;  %4293 = vmatprep.subr.bf16.mxu0 %v5563_v4  ;;  %v6631_v49 = vadd.f32 %v1009_v37, %v6445_v39  ;;  %v1011_v51 = vpop.f32.mrb[7].mxu1  ;;  %4465 = vmatprep.subr.bf16.mxu1 %v5565_v6  ;;  %v1490_v38 = vld [vmem:[%s6174_s28 + $0xe20] sm:$0xff]  ;;  %v5570_v39 = vcombine.low %v1478_v7, %v1482_v10  ;;  %v1503_v4 = vld [vmem:[%s6174_s28 + $0xe88] sm:$0xff] }
 0x1b6   : > { %v6634_v50 = vadd.f32 %v968_v46, %v6449_v40  ;;  %v6639_v32 = vadd.f32 %v1011_v51, %v6453_v42  ;;  %v5572_v40 = vcombine.low %v1479_v14, %v1483_v15  ;;  %v5579_v57 = vcombine.high %v1486_v54, %v1490_v38  ;;  %v1506_v3 = vld [vmem:[%s6174_s28 + $0xea0] sm:$0xff]  ;;  %v1511_v15 = vld [vmem:[%s6174_s28 + $0xec8] sm:$0xff] }
 0x1b7   : > { %v5578_v42 = vcombine.low %v1486_v54, %v1490_v38  ;;  %v5586_v6 = vcombine.low %v1494_v59, %v1498_v28  ;;  %v5588_v7 = vcombine.low %v1495_v60, %v1499_v61  ;;  %v5595_v10 = vcombine.high %v1502_v2, %v1506_v3  ;;  %v1510_v13 = vld [vmem:[%s6174_s28 + $0xec0] sm:$0xff]  ;;  %v1519_v51 = vld [vmem:[%s6174_s28 + $0xf08] sm:$0xff] }
 0x1b8   : > { %4294 = vmatpush1.bf16.msra.mxu0 %v5562_v23  ;;  %4466 = vmatpush1.bf16.msra.mxu1 %v5564_v24  ;;  %v5597_v12 = vcombine.high %v1503_v4, %v1507_v5  ;;  %v1514_v14 = vld [vmem:[%s6174_s28 + $0xee0] sm:$0xff]  ;;  %v5594_v21 = vcombine.low %v1502_v2, %v1506_v3  ;;  %v5596_v23 = vcombine.low %v1503_v4, %v1507_v5 }
 0x1b9   : > { %4295 = vmatprep.subr.bf16.mxu0 %v5571_v47  ;;  %4467 = vmatprep.subr.bf16.mxu1 %v5573_v53  ;;  %v5603_v24 = vcombine.high %v1510_v13, %v1514_v14  ;;  %v5605_v37 = vcombine.high %v1511_v15, %v1515_v19  ;;  %v1518_v46 = vld [vmem:[%s6174_s28 + $0xf00] sm:$0xff]  ;;  %v1523_v53 = vld [vmem:[%s6174_s28 + $0xf28] sm:$0xff]  ;;  %v5602_v54 = vcombine.low %v1510_v13, %v1514_v14 }
 0x1ba   : > { %v1522_v47 = vld [vmem:[%s6174_s28 + $0xf20] sm:$0xff]  ;;  %v5604_v38 = vcombine.low %v1511_v15, %v1515_v19  ;;  %v5613_v56 = vcombine.high %v1519_v51, %v1523_v53  ;;  %v5612_v28 = vcombine.low %v1519_v51, %v1523_v53 }
 0x1bb   : > { %v5611_v55 = vcombine.high %v1518_v46, %v1522_v47  ;;  %v5610_v59 = vcombine.low %v1518_v46, %v1522_v47  ;;  %v1020_v47 = vld [vmem:[#allocation2 + $0x30] sm:$0xff] }
 0x1bc   : > { %4296 = vmatpush1.bf16.msra.mxu0 %v5570_v39  ;;  %4468 = vmatpush1.bf16.msra.mxu1 %v5572_v40  ;;  %v1526_v39 = vld [vmem:[%s6174_s28 + $0xf40] sm:$0xff] }
 0x1bd   : > { %4297 = vmatprep.subr.bf16.mxu0 %v5579_v57  ;;  %4469 = vmatprep.subr.bf16.mxu1 %v5581_v58  ;;  %v1530_v40 = vld [vmem:[%s6174_s28 + $0xf60] sm:$0xff]  ;;  %v1527_v57 = vld [vmem:[%s6174_s28 + $0xf48] sm:$0xff] }
 0x1be   : > { %v1531_v58 = vld [vmem:[%s6174_s28 + $0xf68] sm:$0xff]  ;;  %v5619_v60 = vcombine.high %v1526_v39, %v1530_v40  ;;  %v5618_v2 = vcombine.low %v1526_v39, %v1530_v40  ;;  %v1028_v51 = vld [vmem:[#allocation2 + $0x70] sm:$0xff]  ;;  %v1049_v40 = vld [vmem:[%s6174_s28 + $0x58] sm:$0xff] }
 0x1bf   : > { %v5621_v61 = vcombine.high %v1527_v57, %v1531_v58  ;;  %v5620_v3 = vcombine.low %v1527_v57, %v1531_v58  ;;  %v6677_v39 = vpack.c.bf16 %v1028_v51, %v1020_v47  ;;  %v1053_v57 = vld [vmem:[%s6174_s28 + $0x78] sm:$0xff]  ;;  %v1080_v51 = vld [vmem:[%s6174_s28 + $0x150] sm:$0xff] }
 0x1c0   : > { %4298 = vmatpush1.bf16.msra.mxu0 %v5578_v42  ;;  %4470 = vmatpush1.bf16.msra.mxu1 %v5580_v63  ;;  %v1534_v42 = vld [vmem:[%s6174_s28 + $0xf80] sm:$0xff] }
 0x1c1   : > { %4299 = vmatprep.subr.bf16.mxu0 %v5587_v0  ;;  %4471 = vmatprep.subr.bf16.mxu1 %v5589_v1  ;;  %v1538_v63 = vld [vmem:[%s6174_s28 + $0xfa0] sm:$0xff]  ;;  %v1535_v0 = vld [vmem:[%s6174_s28 + $0xf88] sm:$0xff] }
 0x1c2   : > { %v1539_v1 = vld [vmem:[%s6174_s28 + $0xfa8] sm:$0xff]  ;;  %v5627_v4 = vcombine.high %v1534_v42, %v1538_v63  ;;  %v5626_v13 = vcombine.low %v1534_v42, %v1538_v63  ;;  %v1060_v42 = vld [vmem:[%s6174_s28 + $0xb0] sm:$0xff]  ;;  %v1057_v63 = vld [vmem:[%s6174_s28 + $0x98] sm:$0xff] }
 0x1c3   : > { %v5629_v5 = vcombine.high %v1535_v0, %v1539_v1  ;;  %v5628_v14 = vcombine.low %v1535_v0, %v1539_v1  ;;  %v1061_v0 = vld [vmem:[%s6174_s28 + $0xb8] sm:$0xff] }
 0x1c4   : > { %4300 = vmatpush1.bf16.msra.mxu0 %v5586_v6  ;;  %4472 = vmatpush1.bf16.msra.mxu1 %v5588_v7  ;;  %v1542_v6 = vld [vmem:[%s6174_s28 + $0xfc0] sm:$0xff] }
 0x1c5   : > { %4301 = vmatprep.subr.bf16.mxu0 %v5595_v10  ;;  %4473 = vmatprep.subr.bf16.mxu1 %v5597_v12  ;;  %v1546_v7 = vld [vmem:[%s6174_s28 + $0xfe0] sm:$0xff]  ;;  %v1543_v10 = vld [vmem:[%s6174_s28 + $0xfc8] sm:$0xff] }
 0x1c6   : > { %v1547_v12 = vld [vmem:[%s6174_s28 + $0xfe8] sm:$0xff]  ;;  %v5635_v15 = vcombine.high %v1542_v6, %v1546_v7  ;;  %v5634_v46 = vcombine.low %v1542_v6, %v1546_v7  ;;  %v1068_v6 = vld [vmem:[%s6174_s28 + $0xf0] sm:$0xff]  ;;  %v1065_v7 = vld [vmem:[%s6174_s28 + $0xd8] sm:$0xff] }
 0x1c7   : > { %v5637_v19 = vcombine.high %v1543_v10, %v1547_v12  ;;  %v5636_v53 = vcombine.low %v1543_v10, %v1547_v12  ;;  %v1069_v10 = vld [vmem:[%s6174_s28 + $0xf8] sm:$0xff] }
 0x1c8   : > { %4302 = vmatpush1.bf16.msra.mxu0 %v5594_v21  ;;  %4474 = vmatpush1.bf16.msra.mxu1 %v5596_v23  ;;  %v1040_v21 = vld [vmem:[%s6174_s28 + $0x10] sm:$0xff] }
 0x1c9   : > { %4303 = vmatprep.subr.bf16.mxu0 %v5603_v24  ;;  %4475 = vmatprep.subr.bf16.mxu1 %v5605_v37  ;;  %v1044_v23 = vld [vmem:[%s6174_s28 + $0x30] sm:$0xff]  ;;  %v1041_v24 = vld [vmem:[%s6174_s28 + $0x18] sm:$0xff] }
 0x1ca   : > { %v1045_v37 = vld [vmem:[%s6174_s28 + $0x38] sm:$0xff]  ;;  %v5134_v58 = vcombine.low %v1040_v21, %v1044_v23 }
 0x1cc   : > { %4304 = vmatpush1.bf16.msra.mxu0 %v5602_v54  ;;  %4476 = vmatpush1.bf16.msra.mxu1 %v5604_v38  ;;  %v5135_v54 = vcombine.high %v1040_v21, %v1044_v23  ;;  %v5137_v38 = vcombine.high %v1041_v24, %v1045_v37  ;;  %v1076_v21 = vld [vmem:[%s6174_s28 + $0x130] sm:$0xff]  ;;  %v1073_v23 = vld [vmem:[%s6174_s28 + $0x118] sm:$0xff] }
 0x1cd   : > { %4305 = vmatprep.subr.bf16.mxu0 %v5611_v55  ;;  %4477 = vmatprep.subr.bf16.mxu1 %v5613_v56  ;;  %v1048_v55 = vld [vmem:[%s6174_s28 + $0x50] sm:$0xff] }
 0x1ce   : > { %v1052_v56 = vld [vmem:[%s6174_s28 + $0x70] sm:$0xff] }
 0x1cf   : > { %v5142_v1 = vcombine.low %v1048_v55, %v1052_v56 }
 0x1d0   : > { %4306 = vmatpush1.bf16.msra.mxu0 %v5610_v59  ;;  %4478 = vmatpush1.bf16.msra.mxu1 %v5612_v28  ;;  %v5136_v59 = vcombine.low %v1041_v24, %v1045_v37  ;;  %v5143_v28 = vcombine.high %v1048_v55, %v1052_v56  ;;  %v1077_v24 = vld [vmem:[%s6174_s28 + $0x138] sm:$0xff] }
 0x1d1   : > { %4307 = vmatprep.subr.bf16.mxu0 %v5619_v60  ;;  %4479 = vmatprep.subr.bf16.mxu1 %v5621_v61  ;;  %v5145_v60 = vcombine.high %v1049_v40, %v1053_v57  ;;  %v1056_v61 = vld [vmem:[%s6174_s28 + $0x90] sm:$0xff]  ;;  %v5169_v47 = vcombine.high %v1073_v23, %v1077_v24  ;;  %v5168_v56 = vcombine.low %v1073_v23, %v1077_v24 }
 0x1d2   : > { %v5150_v12 = vcombine.low %v1056_v61, %v1060_v42 }
 0x1d4   : > { %4308 = vmatpush1.bf16.msra.mxu0 %v5618_v2  ;;  %4480 = vmatpush1.bf16.msra.mxu1 %v5620_v3  ;;  %v5144_v2 = vcombine.low %v1049_v40, %v1053_v57  ;;  %v5151_v3 = vcombine.high %v1056_v61, %v1060_v42 }
 0x1d5   : > { %4309 = vmatprep.subr.bf16.mxu0 %v5627_v4  ;;  %4481 = vmatprep.subr.bf16.mxu1 %v5629_v5  ;;  %v5153_v4 = vcombine.high %v1057_v63, %v1061_v0  ;;  %v1064_v5 = vld [vmem:[%s6174_s28 + $0xd0] sm:$0xff] }
 0x1d6   : > { %v5158_v37 = vcombine.low %v1064_v5, %v1068_v6 }
 0x1d8   : > { %4310 = vmatpush1.bf16.msra.mxu0 %v5626_v13  ;;  %4482 = vmatpush1.bf16.msra.mxu1 %v5628_v14  ;;  %v5152_v13 = vcombine.low %v1057_v63, %v1061_v0  ;;  %v5159_v14 = vcombine.high %v1064_v5, %v1068_v6 }
 0x1d9   : > { %4311 = vmatprep.subr.bf16.mxu0 %v5635_v15  ;;  %4483 = vmatprep.subr.bf16.mxu1 %v5637_v19  ;;  %v5161_v15 = vcombine.high %v1065_v7, %v1069_v10  ;;  %v1072_v19 = vld [vmem:[%s6174_s28 + $0x110] sm:$0xff] }
 0x1da   : > { %v5166_v55 = vcombine.low %v1072_v19, %v1076_v21 }
 0x1dc   : > { %4312 = vmatpush1.bf16.msra.mxu0 %v5634_v46  ;;  %4484 = vmatpush1.bf16.msra.mxu1 %v5636_v53  ;;  %v5167_v46 = vcombine.high %v1072_v19, %v1076_v21  ;;  %v1084_v53 = vld [vmem:[%s6174_s28 + $0x170] sm:$0xff] }
 0x1dd   : > { %4496 = vmatprep.subr.bf16.mxu0 %v5135_v54  ;;  %4668 = vmatprep.subr.bf16.mxu1 %v5137_v38  ;;  %v1081_v54 = vld [vmem:[%s6174_s28 + $0x158] sm:$0xff]  ;;  %v5175_v40 = vcombine.high %v1080_v51, %v1084_v53  ;;  %v5174_v61 = vcombine.low %v1080_v51, %v1084_v53 }
 0x1de   : > { %v1085_v38 = vld [vmem:[%s6174_s28 + $0x178] sm:$0xff] }
 0x1df   : > { %4314 = vmatmul.mubr.bf16.vlgmr.msra.gmra.mrb[8].mxu0 %v6677_v39  ;;  %4486 = vmatmul.mubr.bf16.vlgmr.msra.gmra.mrb[8].mxu1 %v6677_v39  ;;  %v5177_v57 = vcombine.high %v1081_v54, %v1085_v38  ;;  %v5176_v42 = vcombine.low %v1081_v54, %v1085_v38 }
 0x1e0   : > { %4497 = vmatpush1.bf16.msra.mxu0 %v5134_v58  ;;  %4669 = vmatpush1.bf16.msra.mxu1 %v5136_v59  ;;  %v1088_v58 = vld [vmem:[%s6174_s28 + $0x190] sm:$0xff] }
 0x1e1   : > { %4498 = vmatprep.subr.bf16.mxu0 %v5143_v28  ;;  %4670 = vmatprep.subr.bf16.mxu1 %v5145_v60  ;;  %v1092_v59 = vld [vmem:[%s6174_s28 + $0x1b0] sm:$0xff]  ;;  %v1089_v28 = vld [vmem:[%s6174_s28 + $0x198] sm:$0xff] }
 0x1e2   : > { %4528 = vmatprep.mubr.bf16.mxu0 %v6332_v44  ;;  %4700 = vmatprep.mubr.bf16.mxu1 %v6332_v44  ;;  %v5160_v44 = vcombine.low %v1065_v7, %v1069_v10  ;;  %v1093_v60 = vld [vmem:[%s6174_s28 + $0x1b8] sm:$0xff]  ;;  %v5183_v63 = vcombine.high %v1088_v58, %v1092_v59  ;;  %v5182_v5 = vcombine.low %v1088_v58, %v1092_v59 }
 0x1e3   : > { %v5185_v0 = vcombine.high %v1089_v28, %v1093_v60  ;;  %v5184_v6 = vcombine.low %v1089_v28, %v1093_v60 }
 0x1e4   : > { %4499 = vmatpush1.bf16.msra.mxu0 %v5142_v1  ;;  %4671 = vmatpush1.bf16.msra.mxu1 %v5144_v2  ;;  %v1096_v1 = vld [vmem:[%s6174_s28 + $0x1d0] sm:$0xff] }
 0x1e5   : > { %4500 = vmatprep.subr.bf16.mxu0 %v5151_v3  ;;  %4672 = vmatprep.subr.bf16.mxu1 %v5153_v4  ;;  %v1100_v2 = vld [vmem:[%s6174_s28 + $0x1f0] sm:$0xff]  ;;  %v1097_v3 = vld [vmem:[%s6174_s28 + $0x1d8] sm:$0xff] }
 0x1e6   : > { %v1101_v4 = vld [vmem:[%s6174_s28 + $0x1f8] sm:$0xff]  ;;  %v5191_v7 = vcombine.high %v1096_v1, %v1100_v2  ;;  %v5190_v19 = vcombine.low %v1096_v1, %v1100_v2 }
 0x1e7   : > { %v5193_v10 = vcombine.high %v1097_v3, %v1101_v4  ;;  %v5192_v21 = vcombine.low %v1097_v3, %v1101_v4 }
 0x1e8   : > { %4501 = vmatpush1.bf16.msra.mxu0 %v5150_v12  ;;  %4673 = vmatpush1.bf16.msra.mxu1 %v5152_v13  ;;  %v1104_v12 = vld [vmem:[%s6174_s28 + $0x210] sm:$0xff] }
 0x1e9   : > { %4502 = vmatprep.subr.bf16.mxu0 %v5159_v14  ;;  %4674 = vmatprep.subr.bf16.mxu1 %v5161_v15  ;;  %v1108_v13 = vld [vmem:[%s6174_s28 + $0x230] sm:$0xff]  ;;  %v1105_v14 = vld [vmem:[%s6174_s28 + $0x218] sm:$0xff] }
 0x1ea   : > { %v1109_v15 = vld [vmem:[%s6174_s28 + $0x238] sm:$0xff]  ;;  %v5199_v23 = vcombine.high %v1104_v12, %v1108_v13  ;;  %v5198_v51 = vcombine.low %v1104_v12, %v1108_v13 }
 0x1eb   : > { %v5201_v24 = vcombine.high %v1105_v14, %v1109_v15  ;;  %v5200_v53 = vcombine.low %v1105_v14, %v1109_v15 }
 0x1ec   : > { %4503 = vmatpush1.bf16.msra.mxu0 %v5158_v37  ;;  %4675 = vmatpush1.bf16.msra.mxu1 %v5160_v44  ;;  %v1112_v37 = vld [vmem:[%s6174_s28 + $0x250] sm:$0xff] }
 0x1ed   : > { %4504 = vmatprep.subr.bf16.mxu0 %v5167_v46  ;;  %4676 = vmatprep.subr.bf16.mxu1 %v5169_v47  ;;  %v1116_v44 = vld [vmem:[%s6174_s28 + $0x270] sm:$0xff]  ;;  %v1113_v46 = vld [vmem:[%s6174_s28 + $0x258] sm:$0xff] }
 0x1ee   : > { %v1117_v47 = vld [vmem:[%s6174_s28 + $0x278] sm:$0xff]  ;;  %v5207_v54 = vcombine.high %v1112_v37, %v1116_v44  ;;  %v5206_v58 = vcombine.low %v1112_v37, %v1116_v44 }
 0x1ef   : > { %v5209_v38 = vcombine.high %v1113_v46, %v1117_v47  ;;  %v5208_v59 = vcombine.low %v1113_v46, %v1117_v47 }
 0x1f0   : > { %4505 = vmatpush1.bf16.msra.mxu0 %v5166_v55  ;;  %4677 = vmatpush1.bf16.msra.mxu1 %v5168_v56  ;;  %v1120_v55 = vld [vmem:[%s6174_s28 + $0x290] sm:$0xff] }
 0x1f1   : > { %4506 = vmatprep.subr.bf16.mxu0 %v5175_v40  ;;  %4678 = vmatprep.subr.bf16.mxu1 %v5177_v57  ;;  %v1124_v56 = vld [vmem:[%s6174_s28 + $0x2b0] sm:$0xff]  ;;  %v1121_v40 = vld [vmem:[%s6174_s28 + $0x298] sm:$0xff] }
 0x1f2   : > { %v1125_v57 = vld [vmem:[%s6174_s28 + $0x2b8] sm:$0xff]  ;;  %v5215_v28 = vcombine.high %v1120_v55, %v1124_v56  ;;  %v5214_v1 = vcombine.low %v1120_v55, %v1124_v56 }
 0x1f3   : > { %v5217_v60 = vcombine.high %v1121_v40, %v1125_v57  ;;  %v5216_v2 = vcombine.low %v1121_v40, %v1125_v57 }
 0x1f4   : > { %4507 = vmatpush1.bf16.msra.mxu0 %v5174_v61  ;;  %4679 = vmatpush1.bf16.msra.mxu1 %v5176_v42  ;;  %v1128_v61 = vld [vmem:[%s6174_s28 + $0x2d0] sm:$0xff] }
 0x1f5   : > { %4508 = vmatprep.subr.bf16.mxu0 %v5183_v63  ;;  %4680 = vmatprep.subr.bf16.mxu1 %v5185_v0  ;;  %v1132_v42 = vld [vmem:[%s6174_s28 + $0x2f0] sm:$0xff]  ;;  %v1129_v63 = vld [vmem:[%s6174_s28 + $0x2d8] sm:$0xff] }
 0x1f6   : > { %v1133_v0 = vld [vmem:[%s6174_s28 + $0x2f8] sm:$0xff]  ;;  %v5223_v3 = vcombine.high %v1128_v61, %v1132_v42  ;;  %v5222_v12 = vcombine.low %v1128_v61, %v1132_v42 }
 0x1f7   : > { %v5225_v4 = vcombine.high %v1129_v63, %v1133_v0  ;;  %v5224_v13 = vcombine.low %v1129_v63, %v1133_v0 }
 0x1f8   : > { %4509 = vmatpush1.bf16.msra.mxu0 %v5182_v5  ;;  %4681 = vmatpush1.bf16.msra.mxu1 %v5184_v6  ;;  %v1136_v5 = vld [vmem:[%s6174_s28 + $0x310] sm:$0xff] }
 0x1f9   : > { %4510 = vmatprep.subr.bf16.mxu0 %v5191_v7  ;;  %4682 = vmatprep.subr.bf16.mxu1 %v5193_v10  ;;  %v1140_v6 = vld [vmem:[%s6174_s28 + $0x330] sm:$0xff]  ;;  %v1137_v7 = vld [vmem:[%s6174_s28 + $0x318] sm:$0xff] }
 0x1fa   : > { %v1141_v10 = vld [vmem:[%s6174_s28 + $0x338] sm:$0xff]  ;;  %v5231_v14 = vcombine.high %v1136_v5, %v1140_v6  ;;  %v5230_v37 = vcombine.low %v1136_v5, %v1140_v6 }
 0x1fb   : > { %v5233_v15 = vcombine.high %v1137_v7, %v1141_v10  ;;  %v5232_v44 = vcombine.low %v1137_v7, %v1141_v10 }
 0x1fc   : > { %4511 = vmatpush1.bf16.msra.mxu0 %v5190_v19  ;;  %4683 = vmatpush1.bf16.msra.mxu1 %v5192_v21  ;;  %v1144_v19 = vld [vmem:[%s6174_s28 + $0x350] sm:$0xff] }
 0x1fd   : > { %4512 = vmatprep.subr.bf16.mxu0 %v5199_v23  ;;  %4684 = vmatprep.subr.bf16.mxu1 %v5201_v24  ;;  %v1148_v21 = vld [vmem:[%s6174_s28 + $0x370] sm:$0xff]  ;;  %v1145_v23 = vld [vmem:[%s6174_s28 + $0x358] sm:$0xff] }
 0x1fe   : > { %v1149_v24 = vld [vmem:[%s6174_s28 + $0x378] sm:$0xff]  ;;  %v5239_v46 = vcombine.high %v1144_v19, %v1148_v21  ;;  %v5238_v55 = vcombine.low %v1144_v19, %v1148_v21 }
 0x1ff   : > { %v5241_v47 = vcombine.high %v1145_v23, %v1149_v24  ;;  %v5240_v56 = vcombine.low %v1145_v23, %v1149_v24 }
 0x200   : > { %4513 = vmatpush1.bf16.msra.mxu0 %v5198_v51  ;;  %4685 = vmatpush1.bf16.msra.mxu1 %v5200_v53  ;;  %v1152_v51 = vld [vmem:[%s6174_s28 + $0x390] sm:$0xff] }
 0x201   : > { %4514 = vmatprep.subr.bf16.mxu0 %v5207_v54  ;;  %4686 = vmatprep.subr.bf16.mxu1 %v5209_v38  ;;  %v1156_v53 = vld [vmem:[%s6174_s28 + $0x3b0] sm:$0xff]  ;;  %v1153_v54 = vld [vmem:[%s6174_s28 + $0x398] sm:$0xff] }
 0x202   : > { %v1157_v38 = vld [vmem:[%s6174_s28 + $0x3b8] sm:$0xff]  ;;  %v5247_v40 = vcombine.high %v1152_v51, %v1156_v53  ;;  %v5246_v61 = vcombine.low %v1152_v51, %v1156_v53 }
 0x203   : > { %v5249_v57 = vcombine.high %v1153_v54, %v1157_v38  ;;  %v5248_v42 = vcombine.low %v1153_v54, %v1157_v38 }
 0x204   : > { %4515 = vmatpush1.bf16.msra.mxu0 %v5206_v58  ;;  %4687 = vmatpush1.bf16.msra.mxu1 %v5208_v59  ;;  %v1160_v58 = vld [vmem:[%s6174_s28 + $0x3d0] sm:$0xff] }
 0x205   : > { %4516 = vmatprep.subr.bf16.mxu0 %v5215_v28  ;;  %4688 = vmatprep.subr.bf16.mxu1 %v5217_v60  ;;  %v1164_v59 = vld [vmem:[%s6174_s28 + $0x3f0] sm:$0xff]  ;;  %v1161_v28 = vld [vmem:[%s6174_s28 + $0x3d8] sm:$0xff] }
 0x206   : > { %v1165_v60 = vld [vmem:[%s6174_s28 + $0x3f8] sm:$0xff]  ;;  %v5255_v63 = vcombine.high %v1160_v58, %v1164_v59  ;;  %v5254_v5 = vcombine.low %v1160_v58, %v1164_v59 }
 0x207   : > { %v5257_v0 = vcombine.high %v1161_v28, %v1165_v60  ;;  %v5256_v6 = vcombine.low %v1161_v28, %v1165_v60  ;;  %v1200_v60 = vld [vmem:[%s6174_s28 + $0x510] sm:$0xff] }
 0x208   : > { %4517 = vmatpush1.bf16.msra.mxu0 %v5214_v1  ;;  %4689 = vmatpush1.bf16.msra.mxu1 %v5216_v2  ;;  %v1168_v1 = vld [vmem:[%s6174_s28 + $0x410] sm:$0xff] }
 0x209   : > { %4518 = vmatprep.subr.bf16.mxu0 %v5223_v3  ;;  %4690 = vmatprep.subr.bf16.mxu1 %v5225_v4  ;;  %v1172_v2 = vld [vmem:[%s6174_s28 + $0x430] sm:$0xff]  ;;  %v1169_v3 = vld [vmem:[%s6174_s28 + $0x418] sm:$0xff] }
 0x20a   : > { %v1173_v4 = vld [vmem:[%s6174_s28 + $0x438] sm:$0xff]  ;;  %v5263_v7 = vcombine.high %v1168_v1, %v1172_v2  ;;  %v5262_v19 = vcombine.low %v1168_v1, %v1172_v2 }
 0x20b   : > { %v5265_v10 = vcombine.high %v1169_v3, %v1173_v4  ;;  %v5264_v21 = vcombine.low %v1169_v3, %v1173_v4  ;;  %v1208_v3 = vld [vmem:[%s6174_s28 + $0x550] sm:$0xff] }
 0x20c   : > { %4519 = vmatpush1.bf16.msra.mxu0 %v5222_v12  ;;  %4691 = vmatpush1.bf16.msra.mxu1 %v5224_v13  ;;  %v1176_v12 = vld [vmem:[%s6174_s28 + $0x450] sm:$0xff] }
 0x20d   : > { %4520 = vmatprep.subr.bf16.mxu0 %v5231_v14  ;;  %4692 = vmatprep.subr.bf16.mxu1 %v5233_v15  ;;  %v1180_v13 = vld [vmem:[%s6174_s28 + $0x470] sm:$0xff]  ;;  %v1177_v14 = vld [vmem:[%s6174_s28 + $0x458] sm:$0xff] }
 0x20e   : > { %v1181_v15 = vld [vmem:[%s6174_s28 + $0x478] sm:$0xff]  ;;  %v5271_v23 = vcombine.high %v1176_v12, %v1180_v13  ;;  %v5270_v51 = vcombine.low %v1176_v12, %v1180_v13  ;;  %v1212_v4 = vld [vmem:[%s6174_s28 + $0x570] sm:$0xff] }
 0x20f   : > { %v5273_v24 = vcombine.high %v1177_v14, %v1181_v15  ;;  %v5272_v53 = vcombine.low %v1177_v14, %v1181_v15  ;;  %v5303_v12 = vcombine.high %v1208_v3, %v1212_v4  ;;  %v1216_v14 = vld [vmem:[%s6174_s28 + $0x590] sm:$0xff] }
 0x210   : > { %4521 = vmatpush1.bf16.msra.mxu0 %v5230_v37  ;;  %4693 = vmatpush1.bf16.msra.mxu1 %v5232_v44  ;;  %v1184_v37 = vld [vmem:[%s6174_s28 + $0x490] sm:$0xff] }
 0x211   : > { %4522 = vmatprep.subr.bf16.mxu0 %v5239_v46  ;;  %4694 = vmatprep.subr.bf16.mxu1 %v5241_v47  ;;  %v1188_v44 = vld [vmem:[%s6174_s28 + $0x4b0] sm:$0xff]  ;;  %v1185_v46 = vld [vmem:[%s6174_s28 + $0x498] sm:$0xff] }
 0x212   : > { %v1189_v47 = vld [vmem:[%s6174_s28 + $0x4b8] sm:$0xff]  ;;  %v5279_v54 = vcombine.high %v1184_v37, %v1188_v44  ;;  %v1220_v15 = vld [vmem:[%s6174_s28 + $0x5b0] sm:$0xff] }
 0x213   : > { %v5281_v38 = vcombine.high %v1185_v46, %v1189_v47  ;;  %v5280_v58 = vcombine.low %v1185_v46, %v1189_v47  ;;  %v1224_v46 = vld [vmem:[%s6174_s28 + $0x5d0] sm:$0xff] }
 0x214   : > { %4523 = vmatpush1.bf16.msra.mxu0 %v5238_v55  ;;  %4695 = vmatpush1.bf16.msra.mxu1 %v5240_v56  ;;  %v1192_v55 = vld [vmem:[%s6174_s28 + $0x4d0] sm:$0xff] }
 0x215   : > { %4524 = vmatprep.subr.bf16.mxu0 %v5247_v40  ;;  %4696 = vmatprep.subr.bf16.mxu1 %v5249_v57  ;;  %v1196_v56 = vld [vmem:[%s6174_s28 + $0x4f0] sm:$0xff]  ;;  %v1193_v40 = vld [vmem:[%s6174_s28 + $0x4d8] sm:$0xff] }
 0x216   : > { %v1197_v57 = vld [vmem:[%s6174_s28 + $0x4f8] sm:$0xff]  ;;  %v5287_v59 = vcombine.high %v1192_v55, %v1196_v56  ;;  %v1228_v47 = vld [vmem:[%s6174_s28 + $0x5f0] sm:$0xff] }
 0x217   : > { %v5289_v28 = vcombine.high %v1193_v40, %v1197_v57 }
 0x218   : > { %4525 = vmatpush1.bf16.msra.mxu0 %v5246_v61  ;;  %4697 = vmatpush1.bf16.msra.mxu1 %v5248_v42  ;;  %v1204_v61 = vld [vmem:[%s6174_s28 + $0x530] sm:$0xff]  ;;  %v1201_v42 = vld [vmem:[%s6174_s28 + $0x518] sm:$0xff] }
 0x219   : > { %4526 = vmatprep.subr.bf16.mxu0 %v5255_v63  ;;  %4698 = vmatprep.subr.bf16.mxu1 %v5257_v0  ;;  %v1205_v63 = vld [vmem:[%s6174_s28 + $0x538] sm:$0xff]  ;;  %v5286_v0 = vcombine.low %v1192_v55, %v1196_v56  ;;  %v5295_v1 = vcombine.high %v1200_v60, %v1204_v61  ;;  %v5319_v55 = vcombine.high %v1224_v46, %v1228_v47 }
 0x21a   : > { %v5297_v2 = vcombine.high %v1201_v42, %v1205_v63 }
 0x21c   : > { %4527 = vmatpush1.bf16.msra.mxu0 %v5254_v5  ;;  %4699 = vmatpush1.bf16.msra.mxu1 %v5256_v6  ;;  %v1209_v5 = vld [vmem:[%s6174_s28 + $0x558] sm:$0xff] }
 0x21d   : > { %4539 = vmatprep.subr.bf16.mxu0 %v5263_v7  ;;  %4711 = vmatprep.subr.bf16.mxu1 %v5265_v10  ;;  %v1213_v6 = vld [vmem:[%s6174_s28 + $0x578] sm:$0xff]  ;;  %v5294_v7 = vcombine.low %v1200_v60, %v1204_v61  ;;  %v5296_v10 = vcombine.low %v1201_v42, %v1205_v63  ;;  %v1240_v42 = vld [vmem:[%s6174_s28 + $0x650] sm:$0xff] }
 0x21e   : > { %v5305_v13 = vcombine.high %v1209_v5, %v1213_v6  ;;  %v1244_v63 = vld [vmem:[%s6174_s28 + $0x670] sm:$0xff] }
 0x21f   : > { %4529 = vmatmul.mubr.bf16.vlgmr.msra.gmra.mrb[12].mxu0 %v6399_v41  ;;  %4701 = vmatmul.mubr.bf16.vlgmr.msra.gmra.mrb[12].mxu1 %v6399_v41  ;;  %v5278_v41 = vcombine.low %v1184_v37, %v1188_v44  ;;  %v5311_v37 = vcombine.high %v1216_v14, %v1220_v15 }
 0x220   : > { %4540 = vmatpush1.bf16.msra.mxu0 %v5262_v19  ;;  %4712 = vmatpush1.bf16.msra.mxu1 %v5264_v21  ;;  %v1217_v19 = vld [vmem:[%s6174_s28 + $0x598] sm:$0xff] }
 0x221   : > { %4541 = vmatprep.subr.bf16.mxu0 %v5271_v23  ;;  %4713 = vmatprep.subr.bf16.mxu1 %v5273_v24  ;;  %v1221_v21 = vld [vmem:[%s6174_s28 + $0x5b8] sm:$0xff]  ;;  %v5302_v23 = vcombine.low %v1208_v3, %v1212_v4  ;;  %v5304_v24 = vcombine.low %v1209_v5, %v1213_v6  ;;  %v5335_v3 = vcombine.high %v1240_v42, %v1244_v63  ;;  %v1248_v5 = vld [vmem:[%s6174_s28 + $0x690] sm:$0xff] }
 0x222   : > { %4571 = vmatprep.mubr.bf16.mxu0 %v6404_v52  ;;  %4743 = vmatprep.mubr.bf16.mxu1 %v6404_v52  ;;  %v5288_v52 = vcombine.low %v1193_v40, %v1197_v57  ;;  %v5313_v44 = vcombine.high %v1217_v19, %v1221_v21  ;;  %v1232_v40 = vld [vmem:[%s6174_s28 + $0x610] sm:$0xff] }
 0x223   : > { %v1236_v57 = vld [vmem:[%s6174_s28 + $0x630] sm:$0xff] }
 0x224   : > { %4542 = vmatpush1.bf16.msra.mxu0 %v5270_v51  ;;  %4714 = vmatpush1.bf16.msra.mxu1 %v5272_v53  ;;  %v1225_v51 = vld [vmem:[%s6174_s28 + $0x5d8] sm:$0xff]  ;;  %v5327_v60 = vcombine.high %v1232_v40, %v1236_v57  ;;  %v1252_v6 = vld [vmem:[%s6174_s28 + $0x6b0] sm:$0xff] }
 0x225   : > { %4543 = vmatprep.subr.bf16.mxu0 %v5279_v54  ;;  %4715 = vmatprep.subr.bf16.mxu1 %v5281_v38  ;;  %v1229_v53 = vld [vmem:[%s6174_s28 + $0x5f8] sm:$0xff]  ;;  %v5310_v54 = vcombine.low %v1216_v14, %v1220_v15  ;;  %v5312_v38 = vcombine.low %v1217_v19, %v1221_v21  ;;  %v5343_v14 = vcombine.high %v1248_v5, %v1252_v6  ;;  %v1256_v19 = vld [vmem:[%s6174_s28 + $0x6d0] sm:$0xff] }
 0x226   : > { %v5321_v56 = vcombine.high %v1225_v51, %v1229_v53  ;;  %v1260_v21 = vld [vmem:[%s6174_s28 + $0x6f0] sm:$0xff] }
 0x228   : > { %4544 = vmatpush1.bf16.msra.mxu0 %v5278_v41  ;;  %4716 = vmatpush1.bf16.msra.mxu1 %v5280_v58  ;;  %v1233_v41 = vld [vmem:[%s6174_s28 + $0x618] sm:$0xff] }
 0x229   : > { %4545 = vmatprep.subr.bf16.mxu0 %v5287_v59  ;;  %4717 = vmatprep.subr.bf16.mxu1 %v5289_v28  ;;  %v1237_v58 = vld [vmem:[%s6174_s28 + $0x638] sm:$0xff]  ;;  %v5318_v59 = vcombine.low %v1224_v46, %v1228_v47  ;;  %v5320_v28 = vcombine.low %v1225_v51, %v1229_v53  ;;  %v5351_v46 = vcombine.high %v1256_v19, %v1260_v21  ;;  %v1264_v51 = vld [vmem:[%s6174_s28 + $0x710] sm:$0xff] }
 0x22a   : > { %v5329_v61 = vcombine.high %v1233_v41, %v1237_v58  ;;  %v1268_v53 = vld [vmem:[%s6174_s28 + $0x730] sm:$0xff] }
 0x22c   : > { %4546 = vmatpush1.bf16.msra.mxu0 %v5286_v0  ;;  %4718 = vmatpush1.bf16.msra.mxu1 %v5288_v52  ;;  %v1241_v0 = vld [vmem:[%s6174_s28 + $0x658] sm:$0xff] }
 0x22d   : > { %4547 = vmatprep.subr.bf16.mxu0 %v5295_v1  ;;  %4719 = vmatprep.subr.bf16.mxu1 %v5297_v2  ;;  %v1245_v52 = vld [vmem:[%s6174_s28 + $0x678] sm:$0xff]  ;;  %v5326_v1 = vcombine.low %v1232_v40, %v1236_v57  ;;  %v5328_v2 = vcombine.low %v1233_v41, %v1237_v58  ;;  %v5359_v40 = vcombine.high %v1264_v51, %v1268_v53  ;;  %v1272_v41 = vld [vmem:[%s6174_s28 + $0x750] sm:$0xff] }
 0x22e   : > { %v5337_v4 = vcombine.high %v1241_v0, %v1245_v52  ;;  %v1276_v58 = vld [vmem:[%s6174_s28 + $0x770] sm:$0xff] }
 0x230   : > { %4548 = vmatpush1.bf16.msra.mxu0 %v5294_v7  ;;  %4720 = vmatpush1.bf16.msra.mxu1 %v5296_v10  ;;  %v1249_v7 = vld [vmem:[%s6174_s28 + $0x698] sm:$0xff] }
 0x231   : > { %4549 = vmatprep.subr.bf16.mxu0 %v5303_v12  ;;  %4721 = vmatprep.subr.bf16.mxu1 %v5305_v13  ;;  %v1253_v10 = vld [vmem:[%s6174_s28 + $0x6b8] sm:$0xff]  ;;  %v5334_v12 = vcombine.low %v1240_v42, %v1244_v63  ;;  %v5336_v13 = vcombine.low %v1241_v0, %v1245_v52  ;;  %v5367_v42 = vcombine.high %v1272_v41, %v1276_v58  ;;  %v1280_v0 = vld [vmem:[%s6174_s28 + $0x790] sm:$0xff] }
 0x232   : > { %v5345_v15 = vcombine.high %v1249_v7, %v1253_v10  ;;  %v1284_v52 = vld [vmem:[%s6174_s28 + $0x7b0] sm:$0xff] }
 0x234   : > { %4550 = vmatpush1.bf16.msra.mxu0 %v5302_v23  ;;  %4722 = vmatpush1.bf16.msra.mxu1 %v5304_v24  ;;  %v1257_v23 = vld [vmem:[%s6174_s28 + $0x6d8] sm:$0xff] }
 0x235   : > { %4551 = vmatprep.subr.bf16.mxu0 %v5311_v37  ;;  %4723 = vmatprep.subr.bf16.mxu1 %v5313_v44  ;;  %v1261_v24 = vld [vmem:[%s6174_s28 + $0x6f8] sm:$0xff]  ;;  %v5342_v37 = vcombine.low %v1248_v5, %v1252_v6  ;;  %v5344_v44 = vcombine.low %v1249_v7, %v1253_v10  ;;  %v5375_v5 = vcombine.high %v1280_v0, %v1284_v52  ;;  %v1288_v7 = vld [vmem:[%s6174_s28 + $0x7d0] sm:$0xff] }
 0x236   : > { %v5353_v47 = vcombine.high %v1257_v23, %v1261_v24  ;;  %v1292_v10 = vld [vmem:[%s6174_s28 + $0x7f0] sm:$0xff] }
 0x238   : > { %4552 = vmatpush1.bf16.msra.mxu0 %v5310_v54  ;;  %4724 = vmatpush1.bf16.msra.mxu1 %v5312_v38  ;;  %v1265_v54 = vld [vmem:[%s6174_s28 + $0x718] sm:$0xff] }
 0x239   : > { %4553 = vmatprep.subr.bf16.mxu0 %v5319_v55  ;;  %4725 = vmatprep.subr.bf16.mxu1 %v5321_v56  ;;  %v1269_v38 = vld [vmem:[%s6174_s28 + $0x738] sm:$0xff]  ;;  %v5350_v55 = vcombine.low %v1256_v19, %v1260_v21  ;;  %v5352_v56 = vcombine.low %v1257_v23, %v1261_v24  ;;  %v5383_v19 = vcombine.high %v1288_v7, %v1292_v10  ;;  %v1296_v23 = vld [vmem:[%s6174_s28 + $0x810] sm:$0xff] }
 0x23a   : > { %v5361_v57 = vcombine.high %v1265_v54, %v1269_v38  ;;  %v1300_v24 = vld [vmem:[%s6174_s28 + $0x830] sm:$0xff] }
 0x23c   : > { %4554 = vmatpush1.bf16.msra.mxu0 %v5318_v59  ;;  %4726 = vmatpush1.bf16.msra.mxu1 %v5320_v28  ;;  %v1273_v59 = vld [vmem:[%s6174_s28 + $0x758] sm:$0xff] }
 0x23d   : > { %4555 = vmatprep.subr.bf16.mxu0 %v5327_v60  ;;  %4727 = vmatprep.subr.bf16.mxu1 %v5329_v61  ;;  %v1277_v28 = vld [vmem:[%s6174_s28 + $0x778] sm:$0xff]  ;;  %v5358_v60 = vcombine.low %v1264_v51, %v1268_v53  ;;  %v5360_v61 = vcombine.low %v1265_v54, %v1269_v38  ;;  %v5391_v51 = vcombine.high %v1296_v23, %v1300_v24  ;;  %v1304_v54 = vld [vmem:[%s6174_s28 + $0x850] sm:$0xff] }
 0x23e   : > { %v5369_v63 = vcombine.high %v1273_v59, %v1277_v28  ;;  %v1308_v38 = vld [vmem:[%s6174_s28 + $0x870] sm:$0xff] }
 0x240   : > { %4556 = vmatpush1.bf16.msra.mxu0 %v5326_v1  ;;  %4728 = vmatpush1.bf16.msra.mxu1 %v5328_v2  ;;  %v1281_v1 = vld [vmem:[%s6174_s28 + $0x798] sm:$0xff] }
 0x241   : > { %4557 = vmatprep.subr.bf16.mxu0 %v5335_v3  ;;  %4729 = vmatprep.subr.bf16.mxu1 %v5337_v4  ;;  %v1285_v2 = vld [vmem:[%s6174_s28 + $0x7b8] sm:$0xff]  ;;  %v5366_v3 = vcombine.low %v1272_v41, %v1276_v58  ;;  %v5368_v4 = vcombine.low %v1273_v59, %v1277_v28  ;;  %v5399_v41 = vcombine.high %v1304_v54, %v1308_v38  ;;  %v1312_v59 = vld [vmem:[%s6174_s28 + $0x890] sm:$0xff] }
 0x242   : > { %v5377_v6 = vcombine.high %v1281_v1, %v1285_v2  ;;  %v1316_v28 = vld [vmem:[%s6174_s28 + $0x8b0] sm:$0xff] }
 0x244   : > { %4558 = vmatpush1.bf16.msra.mxu0 %v5334_v12  ;;  %4730 = vmatpush1.bf16.msra.mxu1 %v5336_v13  ;;  %v1289_v12 = vld [vmem:[%s6174_s28 + $0x7d8] sm:$0xff] }
 0x245   : > { %4559 = vmatprep.subr.bf16.mxu0 %v5343_v14  ;;  %4731 = vmatprep.subr.bf16.mxu1 %v5345_v15  ;;  %v1293_v13 = vld [vmem:[%s6174_s28 + $0x7f8] sm:$0xff]  ;;  %v5374_v14 = vcombine.low %v1280_v0, %v1284_v52  ;;  %v5376_v15 = vcombine.low %v1281_v1, %v1285_v2  ;;  %v5407_v0 = vcombine.high %v1312_v59, %v1316_v28  ;;  %v1320_v1 = vld [vmem:[%s6174_s28 + $0x8d0] sm:$0xff] }
 0x246   : > { %v5385_v21 = vcombine.high %v1289_v12, %v1293_v13  ;;  %v1324_v2 = vld [vmem:[%s6174_s28 + $0x8f0] sm:$0xff] }
 0x248   : > { %4560 = vmatpush1.bf16.msra.mxu0 %v5342_v37  ;;  %4732 = vmatpush1.bf16.msra.mxu1 %v5344_v44  ;;  %v1297_v37 = vld [vmem:[%s6174_s28 + $0x818] sm:$0xff] }
 0x249   : > { %4561 = vmatprep.subr.bf16.mxu0 %v5351_v46  ;;  %4733 = vmatprep.subr.bf16.mxu1 %v5353_v47  ;;  %v1301_v44 = vld [vmem:[%s6174_s28 + $0x838] sm:$0xff]  ;;  %v5382_v46 = vcombine.low %v1288_v7, %v1292_v10  ;;  %v5384_v47 = vcombine.low %v1289_v12, %v1293_v13  ;;  %v1328_v10 = vld [vmem:[%s6174_s28 + $0x910] sm:$0xff] }
 0x24a   : > { %v5393_v53 = vcombine.high %v1297_v37, %v1301_v44  ;;  %v1332_v12 = vld [vmem:[%s6174_s28 + $0x930] sm:$0xff]  ;;  %v1329_v13 = vld [vmem:[%s6174_s28 + $0x918] sm:$0xff] }
 0x24c   : > { %4562 = vmatpush1.bf16.msra.mxu0 %v5350_v55  ;;  %4734 = vmatpush1.bf16.msra.mxu1 %v5352_v56  ;;  %v1305_v55 = vld [vmem:[%s6174_s28 + $0x858] sm:$0xff] }
 0x24d   : > { %4563 = vmatprep.subr.bf16.mxu0 %v5359_v40  ;;  %4735 = vmatprep.subr.bf16.mxu1 %v5361_v57  ;;  %v1309_v56 = vld [vmem:[%s6174_s28 + $0x878] sm:$0xff]  ;;  %v5390_v40 = vcombine.low %v1296_v23, %v1300_v24  ;;  %v5392_v57 = vcombine.low %v1297_v37, %v1301_v44  ;;  %v1336_v23 = vld [vmem:[%s6174_s28 + $0x950] sm:$0xff] }
 0x24e   : > { %v5401_v58 = vcombine.high %v1305_v55, %v1309_v56  ;;  %v1340_v24 = vld [vmem:[%s6174_s28 + $0x970] sm:$0xff]  ;;  %v1337_v37 = vld [vmem:[%s6174_s28 + $0x958] sm:$0xff] }
 0x24f   : > { %v1341_v44 = vld [vmem:[%s6174_s28 + $0x978] sm:$0xff] }
 0x250   : > { %4564 = vmatpush1.bf16.msra.mxu0 %v5358_v60  ;;  %4736 = vmatpush1.bf16.msra.mxu1 %v5360_v61  ;;  %v1313_v60 = vld [vmem:[%s6174_s28 + $0x898] sm:$0xff] }
 0x251   : > { %4565 = vmatprep.subr.bf16.mxu0 %v5367_v42  ;;  %4737 = vmatprep.subr.bf16.mxu1 %v5369_v63  ;;  %v1317_v61 = vld [vmem:[%s6174_s28 + $0x8b8] sm:$0xff]  ;;  %v5398_v42 = vcombine.low %v1304_v54, %v1308_v38  ;;  %v5400_v63 = vcombine.low %v1305_v55, %v1309_v56  ;;  %v1344_v54 = vld [vmem:[%s6174_s28 + $0x990] sm:$0xff] }
 0x252   : > { %v5409_v52 = vcombine.high %v1313_v60, %v1317_v61  ;;  %v1348_v38 = vld [vmem:[%s6174_s28 + $0x9b0] sm:$0xff]  ;;  %v1345_v55 = vld [vmem:[%s6174_s28 + $0x998] sm:$0xff] }
 0x253   : > { %v1349_v56 = vld [vmem:[%s6174_s28 + $0x9b8] sm:$0xff] }
 0x254   : > { %4566 = vmatpush1.bf16.msra.mxu0 %v5366_v3  ;;  %4738 = vmatpush1.bf16.msra.mxu1 %v5368_v4  ;;  %v1321_v3 = vld [vmem:[%s6174_s28 + $0x8d8] sm:$0xff] }
 0x255   : > { %4567 = vmatprep.subr.bf16.mxu0 %v5375_v5  ;;  %4739 = vmatprep.subr.bf16.mxu1 %v5377_v6  ;;  %v1325_v4 = vld [vmem:[%s6174_s28 + $0x8f8] sm:$0xff]  ;;  %v5408_v5 = vcombine.low %v1313_v60, %v1317_v61  ;;  %v5415_v6 = vcombine.high %v1320_v1, %v1324_v2 }
 0x256   : > { %v5417_v7 = vcombine.high %v1321_v3, %v1325_v4  ;;  %v1353_v60 = vld [vmem:[%s6174_s28 + $0x9d8] sm:$0xff] }
 0x257   : > { %v1357_v61 = vld [vmem:[%s6174_s28 + $0x9f8] sm:$0xff] }
 0x258   : > { %4568 = vmatpush1.bf16.msra.mxu0 %v5374_v14  ;;  %4740 = vmatpush1.bf16.msra.mxu1 %v5376_v15  ;;  %v1333_v14 = vld [vmem:[%s6174_s28 + $0x938] sm:$0xff]  ;;  %v5414_v15 = vcombine.low %v1320_v1, %v1324_v2  ;;  %v1360_v1 = vld [vmem:[%s6174_s28 + $0xa10] sm:$0xff] }
 0x259   : > { %4569 = vmatprep.subr.bf16.mxu0 %v5383_v19  ;;  %4741 = vmatprep.subr.bf16.mxu1 %v5385_v21  ;;  %v5423_v19 = vcombine.high %v1328_v10, %v1332_v12  ;;  %v5425_v21 = vcombine.high %v1329_v13, %v1333_v14  ;;  %v1364_v2 = vld [vmem:[%s6174_s28 + $0xa30] sm:$0xff] }
 0x25c   : > { %4570 = vmatpush1.bf16.msra.mxu0 %v5382_v46  ;;  %4742 = vmatpush1.bf16.msra.mxu1 %v5384_v47  ;;  %v5422_v46 = vcombine.low %v1328_v10, %v1332_v12  ;;  %v5424_v47 = vcombine.low %v1329_v13, %v1333_v14  ;;  %v1368_v10 = vld [vmem:[%s6174_s28 + $0xa50] sm:$0xff]  ;;  %v1369_v13 = vld [vmem:[%s6174_s28 + $0xa58] sm:$0xff] }
 0x25d   : > { %4582 = vmatprep.subr.bf16.mxu0 %v5391_v51  ;;  %4754 = vmatprep.subr.bf16.mxu1 %v5393_v53  ;;  %v5431_v51 = vcombine.high %v1336_v23, %v1340_v24  ;;  %v5433_v53 = vcombine.high %v1337_v37, %v1341_v44  ;;  %v1372_v12 = vld [vmem:[%s6174_s28 + $0xa70] sm:$0xff]  ;;  %v1373_v14 = vld [vmem:[%s6174_s28 + $0xa78] sm:$0xff] }
 0x25f   : > { %4572 = vmatmul.mubr.bf16.vlgmr.msra.gmra.mrb[12].mxu0 %v6494_v8  ;;  %4744 = vmatmul.mubr.bf16.vlgmr.msra.gmra.mrb[12].mxu1 %v6494_v8  ;;  %v5406_v8 = vcombine.low %v1312_v59, %v1316_v28  ;;  %v1352_v59 = vld [vmem:[%s6174_s28 + $0x9d0] sm:$0xff] }
 0x260   : > { %4583 = vmatpush1.bf16.msra.mxu0 %v5390_v40  ;;  %4755 = vmatpush1.bf16.msra.mxu1 %v5392_v57  ;;  %v5430_v40 = vcombine.low %v1336_v23, %v1340_v24  ;;  %v5432_v57 = vcombine.low %v1337_v37, %v1341_v44  ;;  %v1356_v28 = vld [vmem:[%s6174_s28 + $0x9f0] sm:$0xff]  ;;  %v1377_v37 = vld [vmem:[%s6174_s28 + $0xa98] sm:$0xff] }
 0x261   : > { %4584 = vmatprep.subr.bf16.mxu0 %v5399_v41  ;;  %4756 = vmatprep.subr.bf16.mxu1 %v5401_v58  ;;  %v5439_v41 = vcombine.high %v1344_v54, %v1348_v38  ;;  %v5441_v58 = vcombine.high %v1345_v55, %v1349_v56  ;;  %v1376_v23 = vld [vmem:[%s6174_s28 + $0xa90] sm:$0xff]  ;;  %v1381_v44 = vld [vmem:[%s6174_s28 + $0xab8] sm:$0xff] }
 0x262   : > { %4614 = vmatprep.mubr.bf16.mxu0 %v6499_v18  ;;  %4786 = vmatprep.mubr.bf16.mxu1 %v6499_v18  ;;  %v5416_v18 = vcombine.low %v1321_v3, %v1325_v4  ;;  %v1361_v3 = vld [vmem:[%s6174_s28 + $0xa18] sm:$0xff]  ;;  %v1380_v24 = vld [vmem:[%s6174_s28 + $0xab0] sm:$0xff] }
 0x263   : > { %v1365_v4 = vld [vmem:[%s6174_s28 + $0xa38] sm:$0xff] }
 0x264   : > { %4585 = vmatpush1.bf16.msra.mxu0 %v5398_v42  ;;  %4757 = vmatpush1.bf16.msra.mxu1 %v5400_v63  ;;  %v5438_v42 = vcombine.low %v1344_v54, %v1348_v38  ;;  %v5440_v63 = vcombine.low %v1345_v55, %v1349_v56  ;;  %v1384_v54 = vld [vmem:[%s6174_s28 + $0xad0] sm:$0xff]  ;;  %v1385_v55 = vld [vmem:[%s6174_s28 + $0xad8] sm:$0xff] }
 0x265   : > { %4586 = vmatprep.subr.bf16.mxu0 %v5407_v0  ;;  %4758 = vmatprep.subr.bf16.mxu1 %v5409_v52  ;;  %v5447_v0 = vcombine.high %v1352_v59, %v1356_v28  ;;  %v5449_v52 = vcombine.high %v1353_v60, %v1357_v61  ;;  %v1388_v38 = vld [vmem:[%s6174_s28 + $0xaf0] sm:$0xff]  ;;  %v1389_v56 = vld [vmem:[%s6174_s28 + $0xaf8] sm:$0xff] }
 0x268   : > { %4587 = vmatpush1.bf16.msra.mxu0 %v5406_v8  ;;  %4759 = vmatpush1.bf16.msra.mxu1 %v5408_v5  ;;  %v5446_v8 = vcombine.low %v1352_v59, %v1356_v28  ;;  %v5448_v5 = vcombine.low %v1353_v60, %v1357_v61  ;;  %v1392_v59 = vld [vmem:[%s6174_s28 + $0xb10] sm:$0xff]  ;;  %v1393_v60 = vld [vmem:[%s6174_s28 + $0xb18] sm:$0xff] }
 0x269   : > { %4588 = vmatprep.subr.bf16.mxu0 %v5415_v6  ;;  %4760 = vmatprep.subr.bf16.mxu1 %v5417_v7  ;;  %v5455_v6 = vcombine.high %v1360_v1, %v1364_v2  ;;  %v5457_v7 = vcombine.high %v1361_v3, %v1365_v4  ;;  %v1396_v28 = vld [vmem:[%s6174_s28 + $0xb30] sm:$0xff]  ;;  %v1397_v61 = vld [vmem:[%s6174_s28 + $0xb38] sm:$0xff] }
 0x26c   : > { %4589 = vmatpush1.bf16.msra.mxu0 %v5414_v15  ;;  %4761 = vmatpush1.bf16.msra.mxu1 %v5416_v18  ;;  %v5454_v15 = vcombine.low %v1360_v1, %v1364_v2  ;;  %v5456_v18 = vcombine.low %v1361_v3, %v1365_v4  ;;  %v1400_v1 = vld [vmem:[%s6174_s28 + $0xb50] sm:$0xff]  ;;  %v1401_v3 = vld [vmem:[%s6174_s28 + $0xb58] sm:$0xff] }
 0x26d   : > { %4590 = vmatprep.subr.bf16.mxu0 %v5423_v19  ;;  %4762 = vmatprep.subr.bf16.mxu1 %v5425_v21  ;;  %v5463_v19 = vcombine.high %v1368_v10, %v1372_v12  ;;  %v5465_v21 = vcombine.high %v1369_v13, %v1373_v14  ;;  %v1404_v2 = vld [vmem:[%s6174_s28 + $0xb70] sm:$0xff]  ;;  %v1405_v4 = vld [vmem:[%s6174_s28 + $0xb78] sm:$0xff] }
 0x270   : > { %4591 = vmatpush1.bf16.msra.mxu0 %v5422_v46  ;;  %4763 = vmatpush1.bf16.msra.mxu1 %v5424_v47  ;;  %v5462_v46 = vcombine.low %v1368_v10, %v1372_v12  ;;  %v5464_v47 = vcombine.low %v1369_v13, %v1373_v14  ;;  %v1408_v10 = vld [vmem:[%s6174_s28 + $0xb90] sm:$0xff]  ;;  %v1409_v13 = vld [vmem:[%s6174_s28 + $0xb98] sm:$0xff] }
 0x271   : > { %4592 = vmatprep.subr.bf16.mxu0 %v5431_v51  ;;  %4764 = vmatprep.subr.bf16.mxu1 %v5433_v53  ;;  %v5471_v51 = vcombine.high %v1376_v23, %v1380_v24  ;;  %v5473_v53 = vcombine.high %v1377_v37, %v1381_v44  ;;  %v1412_v12 = vld [vmem:[%s6174_s28 + $0xbb0] sm:$0xff]  ;;  %v1413_v14 = vld [vmem:[%s6174_s28 + $0xbb8] sm:$0xff] }
 0x274   : > { %4593 = vmatpush1.bf16.msra.mxu0 %v5430_v40  ;;  %4765 = vmatpush1.bf16.msra.mxu1 %v5432_v57  ;;  %v5470_v40 = vcombine.low %v1376_v23, %v1380_v24  ;;  %v5472_v57 = vcombine.low %v1377_v37, %v1381_v44  ;;  %v1416_v23 = vld [vmem:[%s6174_s28 + $0xbd0] sm:$0xff]  ;;  %v1417_v37 = vld [vmem:[%s6174_s28 + $0xbd8] sm:$0xff] }
 0x275   : > { %4594 = vmatprep.subr.bf16.mxu0 %v5439_v41  ;;  %4766 = vmatprep.subr.bf16.mxu1 %v5441_v58  ;;  %v5479_v41 = vcombine.high %v1384_v54, %v1388_v38  ;;  %v5481_v58 = vcombine.high %v1385_v55, %v1389_v56  ;;  %v1420_v24 = vld [vmem:[%s6174_s28 + $0xbf0] sm:$0xff]  ;;  %v1421_v44 = vld [vmem:[%s6174_s28 + $0xbf8] sm:$0xff] }
 0x278   : > { %4595 = vmatpush1.bf16.msra.mxu0 %v5438_v42  ;;  %4767 = vmatpush1.bf16.msra.mxu1 %v5440_v63  ;;  %v5478_v42 = vcombine.low %v1384_v54, %v1388_v38  ;;  %v5480_v63 = vcombine.low %v1385_v55, %v1389_v56  ;;  %v1424_v54 = vld [vmem:[%s6174_s28 + $0xc10] sm:$0xff]  ;;  %v1425_v55 = vld [vmem:[%s6174_s28 + $0xc18] sm:$0xff] }
 0x279   : > { %4596 = vmatprep.subr.bf16.mxu0 %v5447_v0  ;;  %4768 = vmatprep.subr.bf16.mxu1 %v5449_v52  ;;  %v5487_v0 = vcombine.high %v1392_v59, %v1396_v28  ;;  %v5489_v52 = vcombine.high %v1393_v60, %v1397_v61  ;;  %v1428_v38 = vld [vmem:[%s6174_s28 + $0xc30] sm:$0xff]  ;;  %v1429_v56 = vld [vmem:[%s6174_s28 + $0xc38] sm:$0xff] }
 0x27c   : > { %4597 = vmatpush1.bf16.msra.mxu0 %v5446_v8  ;;  %4769 = vmatpush1.bf16.msra.mxu1 %v5448_v5  ;;  %v5486_v8 = vcombine.low %v1392_v59, %v1396_v28  ;;  %v5488_v5 = vcombine.low %v1393_v60, %v1397_v61  ;;  %v1432_v59 = vld [vmem:[%s6174_s28 + $0xc50] sm:$0xff]  ;;  %v1433_v60 = vld [vmem:[%s6174_s28 + $0xc58] sm:$0xff] }
 0x27d   : > { %4598 = vmatprep.subr.bf16.mxu0 %v5455_v6  ;;  %4770 = vmatprep.subr.bf16.mxu1 %v5457_v7  ;;  %v5495_v6 = vcombine.high %v1400_v1, %v1404_v2  ;;  %v5497_v7 = vcombine.high %v1401_v3, %v1405_v4  ;;  %v1436_v28 = vld [vmem:[%s6174_s28 + $0xc70] sm:$0xff]  ;;  %v1437_v61 = vld [vmem:[%s6174_s28 + $0xc78] sm:$0xff] }
 0x280   : > { %4599 = vmatpush1.bf16.msra.mxu0 %v5454_v15  ;;  %4771 = vmatpush1.bf16.msra.mxu1 %v5456_v18  ;;  %v5494_v15 = vcombine.low %v1400_v1, %v1404_v2  ;;  %v5496_v18 = vcombine.low %v1401_v3, %v1405_v4  ;;  %v1440_v1 = vld [vmem:[%s6174_s28 + $0xc90] sm:$0xff]  ;;  %v1441_v3 = vld [vmem:[%s6174_s28 + $0xc98] sm:$0xff] }
 0x281   : > { %4600 = vmatprep.subr.bf16.mxu0 %v5463_v19  ;;  %4772 = vmatprep.subr.bf16.mxu1 %v5465_v21  ;;  %v5503_v19 = vcombine.high %v1408_v10, %v1412_v12  ;;  %v5505_v21 = vcombine.high %v1409_v13, %v1413_v14  ;;  %v1444_v2 = vld [vmem:[%s6174_s28 + $0xcb0] sm:$0xff]  ;;  %v1445_v4 = vld [vmem:[%s6174_s28 + $0xcb8] sm:$0xff] }
 0x284   : > { %4601 = vmatpush1.bf16.msra.mxu0 %v5462_v46  ;;  %4773 = vmatpush1.bf16.msra.mxu1 %v5464_v47  ;;  %v5502_v46 = vcombine.low %v1408_v10, %v1412_v12  ;;  %v5504_v47 = vcombine.low %v1409_v13, %v1413_v14  ;;  %v5537_v10 = vcombine.high %v1441_v3, %v1445_v4  ;;  %v1448_v12 = vld [vmem:[%s6174_s28 + $0xcd0] sm:$0xff]  ;;  %v492_v14 = vsub.s32 2, %v6428_v22 }
 0x285   : > { %4602 = vmatprep.subr.bf16.mxu0 %v5471_v51  ;;  %4774 = vmatprep.subr.bf16.mxu1 %v5473_v53  ;;  %v5511_v51 = vcombine.high %v1416_v23, %v1420_v24  ;;  %v5513_v53 = vcombine.high %v1417_v37, %v1421_v44  ;;  %v1452_v13 = vld [vmem:[%s6174_s28 + $0xcf0] sm:$0xff] }
 0x288   : > { %4603 = vmatpush1.bf16.msra.mxu0 %v5470_v40  ;;  %4775 = vmatpush1.bf16.msra.mxu1 %v5472_v57  ;;  %v5510_v40 = vcombine.low %v1416_v23, %v1420_v24  ;;  %v5512_v57 = vcombine.low %v1417_v37, %v1421_v44  ;;  %v5536_v23 = vcombine.low %v1441_v3, %v1445_v4  ;;  %v5770_v37 = vld [vmem:[%s6189_s11] sm:$0xff] }
 0x289   : > { %4604 = vmatprep.subr.bf16.mxu0 %v5479_v41  ;;  %4776 = vmatprep.subr.bf16.mxu1 %v5481_v58  ;;  %v5519_v41 = vcombine.high %v1424_v54, %v1428_v38  ;;  %v5521_v58 = vcombine.high %v1425_v55, %v1429_v56  ;;  %v5543_v24 = vcombine.high %v1448_v12, %v1452_v13 }
 0x28c   : > { %4605 = vmatpush1.bf16.msra.mxu0 %v5478_v42  ;;  %4777 = vmatpush1.bf16.msra.mxu1 %v5480_v63  ;;  %v5518_v42 = vcombine.low %v1424_v54, %v1428_v38  ;;  %v5520_v63 = vcombine.low %v1425_v55, %v1429_v56  ;;  %v1457_v38 = vld [vmem:[%s6174_s28 + $0xd18] sm:$0xff]  ;;  %v5542_v56 = vcombine.low %v1448_v12, %v1452_v13 }
 0x28d   : > { %4606 = vmatprep.subr.bf16.mxu0 %v5487_v0  ;;  %4778 = vmatprep.subr.bf16.mxu1 %v5489_v52  ;;  %v5527_v0 = vcombine.high %v1432_v59, %v1436_v28  ;;  %v5529_v52 = vcombine.high %v1433_v60, %v1437_v61  ;;  %v1461_v55 = vld [vmem:[%s6174_s28 + $0xd38] sm:$0xff] }
 0x28e   : > { %v6934_v13 = vld [vmem:[%s6174_s28 + $0xd98] sm:$0xff] }
 0x290   : > { %4607 = vmatpush1.bf16.msra.mxu0 %v5486_v8  ;;  %4779 = vmatpush1.bf16.msra.mxu1 %v5488_v5  ;;  %v5526_v8 = vcombine.low %v1432_v59, %v1436_v28  ;;  %v5528_v5 = vcombine.low %v1433_v60, %v1437_v61  ;;  %v1464_v59 = vld [vmem:[%s6174_s28 + $0xd50] sm:$0xff] }
 0x291   : > { %4608 = vmatprep.subr.bf16.mxu0 %v5495_v6  ;;  %4780 = vmatprep.subr.bf16.mxu1 %v5497_v7  ;;  %v5535_v6 = vcombine.high %v1440_v1, %v1444_v2  ;;  %v484_v7 = vsub.s32 0, %v6428_v22  ;;  %v1468_v28 = vld [vmem:[%s6174_s28 + $0xd70] sm:$0xff] }
 0x293   : > { %v485_v44 = vrot.slane %v5770_v37, %v484_v7 }
 0x294   : > { %4609 = vmatpush1.bf16.msra.mxu0 %v5494_v15  ;;  %4781 = vmatpush1.bf16.msra.mxu1 %v5496_v18  ;;  %v496_v15 = vsub.s32 3, %v6428_v22  ;;  %v1449_v18 = vld [vmem:[%s6174_s28 + $0xcd8] sm:$0xff] }
 0x295   : > { %4610 = vmatprep.subr.bf16.mxu0 %v5503_v19  ;;  %4782 = vmatprep.subr.bf16.mxu1 %v5505_v21  ;;  %v1453_v19 = vld [vmem:[%s6174_s28 + $0xcf8] sm:$0xff]  ;;  %v5534_v21 = vcombine.low %v1440_v1, %v1444_v2  ;;  %v6919_v1 = vld [vmem:[%s6181_s14] sm:$0xff]  ;;  %v5552_v2 = vcombine.low %v1457_v38, %v1461_v55 }
 0x296   : > { %v497_v54 = vrot.slane %v5770_v37, %v496_v15  ;;  %v1555_v12 = vrot.slane %v6919_v1, %v484_v7  ;;  %v1567_v7 = vrot.slane %v6919_v1, %v496_v15 }
 0x298   : > { %4611 = vmatpush1.bf16.msra.mxu0 %v5502_v46  ;;  %4783 = vmatpush1.bf16.msra.mxu1 %v5504_v47  ;;  %v5545_v46 = vcombine.high %v1449_v18, %v1453_v19  ;;  %v1456_v47 = vld [vmem:[%s6174_s28 + $0xd10] sm:$0xff] }
 0x299   : > { %4612 = vmatprep.subr.bf16.mxu0 %v5511_v51  ;;  %4784 = vmatprep.subr.bf16.mxu1 %v5513_v53  ;;  %v1460_v51 = vld [vmem:[%s6174_s28 + $0xd30] sm:$0xff]  ;;  %v493_v53 = vrot.slane %v5770_v37, %v492_v14 }
 0x29b   : > { %v920_v60 = vadd.f32 %v6559_v25, %v493_v53  ;;  %v5559_v25 = vcombine.high %v1464_v59, %v1468_v28 }
 0x29c   : > { %4613 = vmatpush1.bf16.msra.mxu0 %v5510_v40  ;;  %4785 = vmatpush1.bf16.msra.mxu1 %v5512_v57  ;;  %v5544_v40 = vcombine.low %v1449_v18, %v1453_v19  ;;  %v5551_v57 = vcombine.high %v1456_v47, %v1460_v51  ;;  %v1563_v18 = vrot.slane %v6919_v1, %v492_v14  ;;  %v6957_v14 = vld [vmem:[%s6174_s28 + $0xdf8] sm:$0xff] }
 0x29d   : > { %4625 = vmatprep.subr.bf16.mxu0 %v5519_v41  ;;  %4797 = vmatprep.subr.bf16.mxu1 %v5521_v58  ;;  %v877_v41 = vadd.f32 %v6555_v20, %v485_v44  ;;  %v5553_v58 = vcombine.high %v1457_v38, %v1461_v55  ;;  %v881_v20 = vadd.f32 %v6567_v36, %v485_v44  ;;  %v4842_v36 = vadd.f32 1.0, %v920_v60 }
 0x29f   : > { %4615 = vmatmul.mubr.bf16.vlgmr.msra.gmra.mrb[12].mxu0 %v6582_v62  ;;  %4787 = vmatmul.mubr.bf16.vlgmr.msra.gmra.mrb[12].mxu1 %v6582_v62  ;;  %v488_v62 = vsub.s32 1, %v6428_v22  ;;  %v4840_v3 = vadd.f32 1.0, %v877_v41  ;;  %v4853_v22 = vadd.f32 1.0, %v6634_v50 }
 0x2a0   : > { %4626 = vmatpush1.bf16.msra.mxu0 %v5518_v42  ;;  %4798 = vmatpush1.bf16.msra.mxu1 %v5520_v63  ;;  %v922_v42 = vadd.f32 %v6565_v35, %v497_v54  ;;  %v1465_v63 = vld [vmem:[%s6174_s28 + $0xd58] sm:$0xff] }
 0x2a1   : > { %4627 = vmatprep.subr.bf16.mxu0 %v5527_v0  ;;  %4799 = vmatprep.subr.bf16.mxu1 %v5529_v52  ;;  %v1469_v0 = vld [vmem:[%s6174_s28 + $0xd78] sm:$0xff]  ;;  %v5550_v52 = vcombine.low %v1456_v47, %v1460_v51  ;;  %v1559_v19 = vrot.slane %v6919_v1, %v488_v62 }
 0x2a2   : > { %4657 = vmatprep.mubr.bf16.mxu0 %v6587_v9  ;;  %4829 = vmatprep.mubr.bf16.mxu1 %v6587_v9  ;;  %v489_v9 = vrot.slane %v5770_v37, %v488_v62  ;;  %v5561_v4 = vcombine.high %v1465_v63, %v1469_v0  ;;  %v4848_v37 = vadd.f32 1.0, %v881_v20  ;;  %v5560_v44 = vcombine.low %v1465_v63, %v1469_v0 }
 0x2a4   : > { %4628 = vmatpush1.bf16.msra.mxu0 %v5526_v8  ;;  %4800 = vmatpush1.bf16.msra.mxu1 %v5528_v5  ;;  %v879_v61 = vadd.f32 %v6561_v31, %v489_v9  ;;  %v924_v31 = vadd.f32 %v6569_v43, %v493_v53  ;;  %v883_v35 = vadd.f32 %v6571_v45, %v489_v9  ;;  %v6925_v8 = vld [vmem:[%s6174_s28 + $0xd90] sm:$0xff]  ;;  %v6937_v43 = vld [vmem:[%s6174_s28 + $0xdb8] sm:$0xff] }
 0x2a5   : > { %4629 = vmatprep.subr.bf16.mxu0 %v5535_v6  ;;  %4801 = vmatprep.subr.bf16.mxu1 %v5537_v10  ;;  %v6928_v5 = vld [vmem:[%s6174_s28 + $0xdb0] sm:$0xff]  ;;  %v4843_v10 = vadd.f32 1.0, %v922_v42  ;;  %v926_v45 = vadd.f32 %v6573_v48, %v497_v54  ;;  %v5569_v9 = vcombine.high %v6934_v13, %v6937_v43  ;;  %v5568_v55 = vcombine.low %v6934_v13, %v6937_v43 }
 0x2a6   : > { %v4841_v6 = vadd.f32 1.0, %v879_v61  ;;  %v5567_v48 = vcombine.high %v6925_v8, %v6928_v5  ;;  %v4850_v62 = vadd.f32 1.0, %v924_v31  ;;  %v4849_v47 = vadd.f32 1.0, %v883_v35 }
 0x2a7   : > { %v5566_v53 = vcombine.low %v6925_v8, %v6928_v5  ;;  %v4851_v61 = vadd.f32 1.0, %v926_v45  ;;  %v1488_v8 = vld [vmem:[%s6174_s28 + $0xe10] sm:$0xff] }
 0x2a8   : > { %4630 = vmatpush1.bf16.msra.mxu0 %v5534_v21  ;;  %4802 = vmatpush1.bf16.msra.mxu1 %v5536_v23  ;;  %v5558_v21 = vcombine.low %v1464_v59, %v1468_v28  ;;  %v6943_v23 = vld [vmem:[%s6174_s28 + $0xdd0] sm:$0xff] }
 0x2a9   : > { %4631 = vmatprep.subr.bf16.mxu0 %v5543_v24  ;;  %4803 = vmatprep.subr.bf16.mxu1 %v5545_v46  ;;  %v6946_v24 = vld [vmem:[%s6174_s28 + $0xdf0] sm:$0xff]  ;;  %v6954_v46 = vld [vmem:[%s6174_s28 + $0xdd8] sm:$0xff] }
 0x2aa   : > { %v5576_v28 = vcombine.low %v6954_v46, %v6957_v14  ;;  %v5577_v60 = vcombine.high %v6954_v46, %v6957_v14  ;;  %v1492_v5 = vld [vmem:[%s6174_s28 + $0xe30] sm:$0xff] }
 0x2ab   : > { %v1500_v14 = vld [vmem:[%s6174_s28 + $0xe70] sm:$0xff] }
 0x2ac   : > { %4632 = vmatpush1.bf16.msra.mxu0 %v5542_v56  ;;  %4804 = vmatpush1.bf16.msra.mxu1 %v5544_v40  ;;  %v5574_v56 = vcombine.low %v6943_v23, %v6946_v24  ;;  %v5575_v40 = vcombine.high %v6943_v23, %v6946_v24 }
 0x2ad   : > { %4633 = vmatprep.subr.bf16.mxu0 %v5551_v57  ;;  %4805 = vmatprep.subr.bf16.mxu1 %v5553_v58 }
 0x2b0   : > { %4634 = vmatpush1.bf16.msra.mxu0 %v5550_v52  ;;  %4806 = vmatpush1.bf16.msra.mxu1 %v5552_v2 }
 0x2b1   : > { %4635 = vmatprep.subr.bf16.mxu0 %v5559_v25  ;;  %4807 = vmatprep.subr.bf16.mxu1 %v5561_v4 }
 0x2b2   : > { %v4315_v51 = vpop.f32.mrb[8].mxu0  ;;  %v4487_v54 = vpop.f32.mrb[8].mxu1 }
 0x2b3   : > { %v5649_v15 = vadd.f32 %v4315_v51, %v1555_v12  ;;  %v4317_v38 = vpop.f32.mrb[9].mxu0  ;;  %v5653_v57 = vadd.f32 %v4487_v54, %v1563_v18  ;;  %v4489_v58 = vpop.f32.mrb[9].mxu1  ;;  %v1501_v51 = vld [vmem:[%s6174_s28 + $0xe78] sm:$0xff] }
 0x2b4   : > { %v5650_v41 = vadd.f32 %v4317_v38, %v1559_v19  ;;  %v4319_v59 = vpop.f32.mrb[10].mxu0  ;;  %4636 = vmatpush1.bf16.msra.mxu0 %v5558_v21  ;;  %v5654_v63 = vadd.f32 %v4489_v58, %v1567_v7  ;;  %v4491_v52 = vpop.f32.mrb[10].mxu1  ;;  %4808 = vmatpush1.bf16.msra.mxu1 %v5560_v44  ;;  %v1489_v21 = vld [vmem:[%s6174_s28 + $0xe18] sm:$0xff]  ;;  %v1504_v38 = vld [vmem:[%s6174_s28 + $0xe90] sm:$0xff] }
 0x2b5   : > { %v4856_v42 = vmul.f32 %v5649_v15, %v4840_v3  ;;  %v5651_v0 = vadd.f32 %v4319_v59, %v1555_v12  ;;  %v4321_v20 = vpop.f32.mrb[11].mxu0  ;;  %4637 = vmatprep.subr.bf16.mxu0 %v5567_v48  ;;  %v4858_v2 = vmul.f32 %v5653_v57, %v4842_v36  ;;  %v5655_v31 = vadd.f32 %v4491_v52, %v1563_v18  ;;  %v4493_v4 = vpop.f32.mrb[11].mxu1  ;;  %v1493_v12 = vld [vmem:[%s6174_s28 + $0xe38] sm:$0xff]  ;;  %v1496_v48 = vld [vmem:[%s6174_s28 + $0xe50] sm:$0xff] }
 0x2b6   : > { %v4857_v25 = vmul.f32 %v5650_v41, %v4841_v6  ;;  %v5652_v35 = vadd.f32 %v4321_v20, %v1559_v19  ;;  %4809 = vmatprep.subr.bf16.mxu1 %v5569_v9  ;;  %v4859_v43 = vmul.f32 %v5654_v63, %v4843_v10  ;;  %v5656_v3 = vadd.f32 %v4493_v4, %v1567_v7  ;;  %v1509_v57 = vld [vmem:[%s6174_s28 + $0xeb8] sm:$0xff] }
 0x2b7   : > { %v4872_v13 = vmax.f32 %v4856_v42, 0.0  ;;  %v4864_v45 = vmul.f32 %v5651_v0, %v4848_v37  ;;  %v4874_v23 = vmax.f32 %v4858_v2, 0.0  ;;  %v4866_v44 = vmul.f32 %v5655_v31, %v4850_v62  ;;  %v1517_v42 = vld [vmem:[%s6174_s28 + $0xef8] sm:$0xff]  ;;  %v1520_v2 = vld [vmem:[%s6174_s28 + $0xf10] sm:$0xff] }
 0x2b8   : > { %v4873_v24 = vmax.f32 %v4857_v25, 0.0  ;;  %v4865_v46 = vmul.f32 %v5652_v35, %v4849_v47  ;;  %4638 = vmatpush1.bf16.msra.mxu0 %v5566_v53  ;;  %v4875_v36 = vmax.f32 %v4859_v43, 0.0  ;;  %v4867_v18 = vmul.f32 %v5656_v3, %v4851_v61  ;;  %4810 = vmatpush1.bf16.msra.mxu1 %v5568_v55  ;;  %v1497_v47 = vld [vmem:[%s6174_s28 + $0xe58] sm:$0xff]  ;;  %v1508_v55 = vld [vmem:[%s6174_s28 + $0xeb0] sm:$0xff] }
 0x2b9   : > { %4888 = vst [vmem:[#allocation2] sm:$0xff] %v4872_v13  ;;  %v4880_v6 = vmax.f32 %v4864_v45, 0.0  ;;  %4639 = vmatprep.subr.bf16.mxu0 %v5575_v40  ;;  %v5583_v10 = vcombine.high %v1488_v8, %v1492_v5  ;;  %4890 = vst [vmem:[#allocation2 + $0x10] sm:$0xff] %v4874_v23  ;;  %v4882_v19 = vmax.f32 %v4866_v44, 0.0  ;;  %4811 = vmatprep.subr.bf16.mxu1 %v5577_v60  ;;  %v1505_v40 = vld [vmem:[%s6174_s28 + $0xe98] sm:$0xff]  ;;  %v1516_v60 = vld [vmem:[%s6174_s28 + $0xef0] sm:$0xff] }
 0x2ba   : > { %4889 = vst [vmem:[#allocation2 + $0x8] sm:$0xff] %v4873_v24  ;;  %v4881_v37 = vmax.f32 %v4865_v46, 0.0  ;;  %v5585_v7 = vcombine.high %v1489_v21, %v1493_v12  ;;  %4891 = vst [vmem:[#allocation2 + $0x18] sm:$0xff] %v4875_v36  ;;  %v4883_v62 = vmax.f32 %v4867_v18, 0.0  ;;  %v5582_v53 = vcombine.low %v1488_v8, %v1492_v5  ;;  %v1513_v61 = vld [vmem:[%s6174_s28 + $0xed8] sm:$0xff]  ;;  %v1524_v25 = vld [vmem:[%s6174_s28 + $0xf30] sm:$0xff] }
 0x2bb   : > { %4896 = vst [vmem:[#allocation2 + $0x40] sm:$0xff] %v4880_v6  ;;  %4898 = vst [vmem:[#allocation2 + $0x50] sm:$0xff] %v4882_v19  ;;  %v5584_v9 = vcombine.low %v1489_v21, %v1493_v12  ;;  %v5591_v15 = vcombine.high %v1496_v48, %v1500_v14  ;;  %v5593_v54 = vcombine.high %v1497_v47, %v1501_v51  ;;  %v1521_v31 = vld [vmem:[%s6174_s28 + $0xf18] sm:$0xff]  ;;  %v1528_v43 = vld [vmem:[%s6174_s28 + $0xf50] sm:$0xff] }
 0x2bc   : > { %4897 = vst [vmem:[#allocation2 + $0x48] sm:$0xff] %v4881_v37  ;;  %4640 = vmatpush1.bf16.msra.mxu0 %v5574_v56  ;;  %4899 = vst [vmem:[#allocation2 + $0x58] sm:$0xff] %v4883_v62  ;;  %4812 = vmatpush1.bf16.msra.mxu1 %v5576_v28  ;;  %v5590_v41 = vcombine.low %v1496_v48, %v1500_v14  ;;  %v5592_v56 = vcombine.low %v1497_v47, %v1501_v51  ;;  %v1512_v28 = vld [vmem:[%s6174_s28 + $0xed0] sm:$0xff]  ;;  %v1525_v35 = vld [vmem:[%s6174_s28 + $0xf38] sm:$0xff] }
 0x2bd   : > { %4641 = vmatprep.subr.bf16.mxu0 %v5583_v10  ;;  %4813 = vmatprep.subr.bf16.mxu1 %v5585_v7  ;;  %v5599_v58 = vcombine.high %v1504_v38, %v1508_v55  ;;  %v5601_v59 = vcombine.high %v1505_v40, %v1509_v57  ;;  %v5598_v63 = vcombine.low %v1504_v38, %v1508_v55  ;;  %v1532_v45 = vld [vmem:[%s6174_s28 + $0xf70] sm:$0xff]  ;;  %v1529_v3 = vld [vmem:[%s6174_s28 + $0xf58] sm:$0xff] }
 0x2be   : > { %v5600_v0 = vcombine.low %v1505_v40, %v1509_v57  ;;  %v5607_v52 = vcombine.high %v1512_v28, %v1516_v60  ;;  %v5609_v20 = vcombine.high %v1513_v61, %v1517_v42  ;;  %v5606_v4 = vcombine.low %v1512_v28, %v1516_v60  ;;  %v1533_v21 = vld [vmem:[%s6174_s28 + $0xf78] sm:$0xff]  ;;  %v1536_v46 = vld [vmem:[%s6174_s28 + $0xf90] sm:$0xff] }
 0x2bf   : > { %v5608_v8 = vcombine.low %v1513_v61, %v1517_v42  ;;  %v5615_v5 = vcombine.high %v1520_v2, %v1524_v25  ;;  %v5617_v13 = vcombine.high %v1521_v31, %v1525_v35  ;;  %v5614_v12 = vcombine.low %v1520_v2, %v1524_v25  ;;  %v1540_v36 = vld [vmem:[%s6174_s28 + $0xfb0] sm:$0xff]  ;;  %v1537_v6 = vld [vmem:[%s6174_s28 + $0xf98] sm:$0xff] }
 0x2c0   : > { %4642 = vmatpush1.bf16.msra.mxu0 %v5582_v53  ;;  %4814 = vmatpush1.bf16.msra.mxu1 %v5584_v9  ;;  %v5616_v23 = vcombine.low %v1521_v31, %v1525_v35  ;;  %v5623_v24 = vcombine.high %v1528_v43, %v1532_v45  ;;  %v5625_v44 = vcombine.high %v1529_v3, %v1533_v21  ;;  %v1541_v18 = vld [vmem:[%s6174_s28 + $0xfb8] sm:$0xff]  ;;  %v1544_v48 = vld [vmem:[%s6174_s28 + $0xfd0] sm:$0xff]  ;;  %v4852_v28 = vadd.f32 1.0, %v6628_v34 }
 0x2c1   : > { %4643 = vmatprep.subr.bf16.mxu0 %v5591_v15  ;;  %4815 = vmatprep.subr.bf16.mxu1 %v5593_v54  ;;  %v5622_v10 = vcombine.low %v1528_v43, %v1532_v45  ;;  %v5624_v19 = vcombine.low %v1529_v3, %v1533_v21  ;;  %v5631_v37 = vcombine.high %v1536_v46, %v1540_v36  ;;  %v1548_v14 = vld [vmem:[%s6174_s28 + $0xff0] sm:$0xff]  ;;  %v1545_v62 = vld [vmem:[%s6174_s28 + $0xfd8] sm:$0xff] }
 0x2c2   : > { %v5633_v7 = vcombine.high %v1537_v6, %v1541_v18  ;;  %v1549_v47 = vld [vmem:[%s6174_s28 + $0xff8] sm:$0xff]  ;;  %v5630_v51 = vcombine.low %v1536_v46, %v1540_v36  ;;  %v5632_v53 = vcombine.low %v1537_v6, %v1541_v18  ;;  %v5639_v9 = vcombine.high %v1544_v48, %v1548_v14  ;;  %v4910_v46 = vld [vmem:[#allocation2 + $0x10] sm:$0xff] (!%p5642_p3)  ;;  %v4911_v36 = vld [vmem:[#allocation2 + $0x18] sm:$0xff] (!%p5642_p3) }
 0x2c3   : > { %v5641_v15 = vcombine.high %v1545_v62, %v1549_v47  ;;  %v5638_v54 = vcombine.low %v1544_v48, %v1548_v14  ;;  %v5640_v38 = vcombine.low %v1545_v62, %v1549_v47  ;;  %v1571_v55 = vrot.slane %v6919_v1, %v500_v26  ;;  %4926 = vst [vmem:[%s7095_s6 + $0x10] sm:$0xff] (!%p5642_p3), %v4910_v46  ;;  %v4918_v48 = vld [vmem:[#allocation2 + $0x50] sm:$0xff] (!%p5642_p3)  ;;  %v4919_v14 = vld [vmem:[#allocation2 + $0x58] sm:$0xff] (!%p5642_p3) }
 0x2c4   : > { %4644 = vmatpush1.bf16.msra.mxu0 %v5590_v41  ;;  %4816 = vmatpush1.bf16.msra.mxu1 %v5592_v56  ;;  %v1579_v40 = vrot.slane %v6919_v1, %v508_v27  ;;  %v1575_v57 = vrot.slane %v6919_v1, %v504_v29  ;;  %v1583_v41 = vrot.slane %v6919_v1, %v512_v30  ;;  %v4844_v56 = vadd.f32 1.0, %v6614_v11 }
 0x2c5   : > { %4645 = vmatprep.subr.bf16.mxu0 %v5599_v58  ;;  %4817 = vmatprep.subr.bf16.mxu1 %v5601_v59  ;;  %v4845_v59 = vadd.f32 1.0, %v6622_v17  ;;  %v4847_v26 = vadd.f32 1.0, %v6625_v33  ;;  %v4854_v29 = vadd.f32 1.0, %v6631_v49  ;;  %4927 = vst [vmem:[%s7095_s6 + $0x18] sm:$0xff] (!%p5642_p3), %v4911_v36  ;;  %4934 = vst [vmem:[%s7095_s6 + $0x50] sm:$0xff] (!%p5642_p3), %v4918_v48 }
 0x2c6   : > { %4935 = vst [vmem:[%s7095_s6 + $0x58] sm:$0xff] (!%p5642_p3), %v4919_v14 }
 0x2c8   : > { %4646 = vmatpush1.bf16.msra.mxu0 %v5598_v63  ;;  %4818 = vmatpush1.bf16.msra.mxu1 %v5600_v0 }
 0x2c9   : > { %4647 = vmatprep.subr.bf16.mxu0 %v5607_v52  ;;  %4819 = vmatprep.subr.bf16.mxu1 %v5609_v20 }
 0x2cc   : > { %4648 = vmatpush1.bf16.msra.mxu0 %v5606_v4  ;;  %4820 = vmatpush1.bf16.msra.mxu1 %v5608_v8 }
 0x2cd   : > { %4649 = vmatprep.subr.bf16.mxu0 %v5615_v5  ;;  %4821 = vmatprep.subr.bf16.mxu1 %v5617_v13 }
 0x2d0   : > { %4650 = vmatpush1.bf16.msra.mxu0 %v5614_v12  ;;  %4822 = vmatpush1.bf16.msra.mxu1 %v5616_v23 }
 0x2d1   : > { %4651 = vmatprep.subr.bf16.mxu0 %v5623_v24  ;;  %4823 = vmatprep.subr.bf16.mxu1 %v5625_v44  ;;  %v4908_v24 = vld [vmem:[#allocation2] sm:$0xff] (!%p5642_p3)  ;;  %v4909_v44 = vld [vmem:[#allocation2 + $0x8] sm:$0xff] (!%p5642_p3) }
 0x2d2   : > { %4924 = vst [vmem:[%s7095_s6] sm:$0xff] (!%p5642_p3), %v4908_v24  ;;  %4925 = vst [vmem:[%s7095_s6 + $0x8] sm:$0xff] (!%p5642_p3), %v4909_v44 }
 0x2d4   : > { %4652 = vmatpush1.bf16.msra.mxu0 %v5622_v10  ;;  %4824 = vmatpush1.bf16.msra.mxu1 %v5624_v19 }
 0x2d5   : > { %4653 = vmatprep.subr.bf16.mxu0 %v5631_v37  ;;  %4825 = vmatprep.subr.bf16.mxu1 %v5633_v7  ;;  %v4916_v37 = vld [vmem:[#allocation2 + $0x40] sm:$0xff] (!%p5642_p3)  ;;  %v4917_v7 = vld [vmem:[#allocation2 + $0x48] sm:$0xff] (!%p5642_p3) }
 0x2d6   : > { %4932 = vst [vmem:[%s7095_s6 + $0x40] sm:$0xff] (!%p5642_p3), %v4916_v37  ;;  %4933 = vst [vmem:[%s7095_s6 + $0x48] sm:$0xff] (!%p5642_p3), %v4917_v7 }
 0x2d8   : > { %4654 = vmatpush1.bf16.msra.mxu0 %v5630_v51  ;;  %4826 = vmatpush1.bf16.msra.mxu1 %v5632_v53 }
 0x2d9   : > { %4655 = vmatprep.subr.bf16.mxu0 %v5639_v9  ;;  %4827 = vmatprep.subr.bf16.mxu1 %v5641_v15 }
 0x2dc   : > { %4656 = vmatpush1.bf16.msra.mxu0 %v5638_v54  ;;  %4828 = vmatpush1.bf16.msra.mxu1 %v5640_v38 }
 0x2df   : > { %4658 = vmatmul.mubr.bf16.vlgmr.msra.gmra.mrb[12].mxu0 %v6677_v39  ;;  %4830 = vmatmul.mubr.bf16.vlgmr.msra.gmra.mrb[12].mxu1 %v6677_v39  ;;  %v4846_v39 = vadd.f32 1.0, %v6619_v16  ;;  %v4855_v16 = vadd.f32 1.0, %v6639_v32 }
 0x3b2   : > { %v4659_v58 = vpop.f32.mrb[12].mxu0  ;;  %v4831_v60 = vpop.f32.mrb[12].mxu1 }
 0x3b3   : > { %v5657_v27 = vadd.f32 %v4659_v58, %v1571_v55  ;;  %v4661_v61 = vpop.f32.mrb[13].mxu0  ;;  %v5661_v42 = vadd.f32 %v4831_v60, %v1579_v40  ;;  %v4833_v1 = vpop.f32.mrb[13].mxu1 }
 0x3b4   : > { %v5658_v30 = vadd.f32 %v4661_v61, %v1575_v57  ;;  %v4663_v11 = vpop.f32.mrb[14].mxu0  ;;  %v5662_v0 = vadd.f32 %v4833_v1, %v1583_v41  ;;  %v4835_v52 = vpop.f32.mrb[14].mxu1 }
 0x3b5   : > { %v4860_v63 = vmul.f32 %v5657_v27, %v4844_v56  ;;  %v5659_v17 = vadd.f32 %v4663_v11, %v1571_v55  ;;  %v4665_v33 = vpop.f32.mrb[15].mxu0  ;;  %v4862_v20 = vmul.f32 %v5661_v42, %v4846_v39  ;;  %v5663_v2 = vadd.f32 %v4835_v52, %v1579_v40  ;;  %v4837_v31 = vpop.f32.mrb[15].mxu1 }
 0x3b6   : > { %v4861_v34 = vmul.f32 %v5658_v30, %v4845_v59  ;;  %v5660_v25 = vadd.f32 %v4665_v33, %v1575_v57  ;;  %v4863_v49 = vmul.f32 %v5662_v0, %v4847_v26  ;;  %v5664_v50 = vadd.f32 %v4837_v31, %v1583_v41  ;;  %4907 = sbr.rel (%p5642_p3) target bundleno = 965 (0x3c5), region = 68 }
 0x3b7   : > { %v4876_v35 = vmax.f32 %v4860_v63, 0.0  ;;  %v4868_v4 = vmul.f32 %v5659_v17, %v4852_v28  ;;  %v4878_v8 = vmax.f32 %v4862_v20, 0.0  ;;  %v4870_v13 = vmul.f32 %v5663_v2, %v4854_v29 }
 0x3b8   : > { %v4877_v5 = vmax.f32 %v4861_v34, 0.0  ;;  %v4869_v43 = vmul.f32 %v5660_v25, %v4853_v22  ;;  %v4879_v32 = vmax.f32 %v4863_v49, 0.0  ;;  %v4871_v3 = vmul.f32 %v5664_v50, %v4855_v16 }
 0x3b9   : > { %4892 = vst [vmem:[#allocation2 + $0x20] sm:$0xff] %v4876_v35  ;;  %v4884_v45 = vmax.f32 %v4868_v4, 0.0  ;;  %4894 = vst [vmem:[#allocation2 + $0x30] sm:$0xff] %v4878_v8  ;;  %v4886_v21 = vmax.f32 %v4870_v13, 0.0 }
 0x3ba   : > { %4893 = vst [vmem:[#allocation2 + $0x28] sm:$0xff] %v4877_v5  ;;  %v4885_v12 = vmax.f32 %v4869_v43, 0.0  ;;  %4895 = vst [vmem:[#allocation2 + $0x38] sm:$0xff] %v4879_v32  ;;  %v4887_v23 = vmax.f32 %v4871_v3, 0.0 }
 0x3bb   : > { %4900 = vst [vmem:[#allocation2 + $0x60] sm:$0xff] %v4884_v45  ;;  %4902 = vst [vmem:[#allocation2 + $0x70] sm:$0xff] %v4886_v21 }
 0x3bc   : > { %4901 = vst [vmem:[#allocation2 + $0x68] sm:$0xff] %v4885_v12  ;;  %4903 = vst [vmem:[#allocation2 + $0x78] sm:$0xff] %v4887_v23 }
 0x3c0   : > { %v4912_v6 = vld [vmem:[#allocation2 + $0x20] sm:$0xff]  ;;  %v4914_v10 = vld [vmem:[#allocation2 + $0x30] sm:$0xff] }
 0x3c1   : > { %v4913_v18 = vld [vmem:[#allocation2 + $0x28] sm:$0xff]  ;;  %4928 = vst [vmem:[%s7095_s6 + $0x20] sm:$0xff] %v4912_v6  ;;  %v4915_v19 = vld [vmem:[#allocation2 + $0x38] sm:$0xff]  ;;  %4930 = vst [vmem:[%s7095_s6 + $0x30] sm:$0xff] %v4914_v10 }
 0x3c2   : > { %4929 = vst [vmem:[%s7095_s6 + $0x28] sm:$0xff] %v4913_v18  ;;  %4931 = vst [vmem:[%s7095_s6 + $0x38] sm:$0xff] %v4915_v19  ;;  %v4920_v62 = vld [vmem:[#allocation2 + $0x60] sm:$0xff]  ;;  %v4922_v51 = vld [vmem:[#allocation2 + $0x70] sm:$0xff] }
 0x3c3   : > { %v4921_v47 = vld [vmem:[#allocation2 + $0x68] sm:$0xff]  ;;  %4936 = vst [vmem:[%s7095_s6 + $0x60] sm:$0xff] %v4920_v62  ;;  %4938 = vst [vmem:[%s7095_s6 + $0x70] sm:$0xff] %v4922_v51  ;;  %v4923_v53 = vld [vmem:[#allocation2 + $0x78] sm:$0xff] }
 0x3c4   : > { %4937 = vst [vmem:[%s7095_s6 + $0x68] sm:$0xff] %v4921_v47  ;;  %4939 = vst [vmem:[%s7095_s6 + $0x78] sm:$0xff] %v4923_v53 }
 0x3c5 PF: > { %p22_p5 = scmp.ge.s32.totalorder %s5999_s26, 5   ;;  %s7111_s21 = smov %s5925_s22 }
 0x3c6   : > { %s7112_s22 = smov %s5929_s23  ;;  %s7113_s23 = smov %s6009_s29 }
 0x3c7   : > { %s7114_s24 = smov %s5999_s26  ;;  %24 = sbr.rel (!%p22_p5) target bundleno = 9 (0x9), region = 125 }
 0x3ce   :  { %4951 = vsyncpa [#allocation5], 1 }
 0x3cf   :  { %4953 = vsyncpa [#allocation5 + $0x1], 1 }
 0x3d0   :  { %4954 = vsyncpa [#allocation7], 1 }
 0x3d1   :  { %4956 = vsyncpa [#allocation7 + $0x1], 1 }
 0x3d2   :  { %4957 = vsyncpa [#allocation10], 1 }
 0x3d3   :  { %4959 = vsyncpa [#allocation10 + $0x1], 1 }

</bundles_post_ra>
